<compile_context>
chip_gen: v6e
topology: v6e:2x2x1
jax: 0.10.0
libtpu: 0.0.40
codegen_flags: <defaults>
</compile_context>

<pallas_src>
import functools
import math

import jax
import jax.numpy as jnp
from jax.experimental import pallas as pl
from jax.experimental.pallas import tpu as pltpu


# -----------------------------------------------------------------------------
# Chip-adaptive VMEM budget / tile sizes
# -----------------------------------------------------------------------------
def _vmem_capacity():
    try:
        info = pltpu.get_tpu_info()
        cap = getattr(info, "vmem_capacity_bytes", None)
        if cap:
            return int(cap)
    except Exception:
        pass
    return 64 * 1024 * 1024   # conservative fallback (v7x-sized)


_VMEM_CAP = _vmem_capacity()
VMEM_LIMIT = min((_VMEM_CAP * 3) // 4, 100 * 1024 * 1024)
_BIG_VMEM = _VMEM_CAP >= 100 * 1024 * 1024          # v5e/v6e (128 MiB) vs v7x (64 MiB)
TM_POINT = 1024 if _BIG_VMEM else 512               # narrow-channel per-point kernels
TM_WIDE = 512 if _BIG_VMEM else 256                 # kernels with (tm, 1024/2048) f32 temps


def _pick_tile(dim, max_tile, quantum=8):
    """Largest t <= max_tile with t % quantum == 0 and dim % t == 0, else dim."""
    if dim <= max_tile:
        return dim
    for t in range(max_tile - (max_tile % quantum), 0, -quantum):
        if dim % t == 0:
            return t
    return dim


def _cparams(dims):
    return pltpu.CompilerParams(dimension_semantics=dims,
                                vmem_limit_bytes=VMEM_LIMIT)


# -----------------------------------------------------------------------------
# Kernel 1: STN conv1->conv2->conv3 (BN+ReLU each) fused with max over points
# -----------------------------------------------------------------------------
def _stn_feat_max_kernel(x_ref, w1_ref, s1_ref, b1_ref,
                         w2_ref, s2_ref, b2_ref,
                         w3_ref, s3_ref, b3_ref, mx_ref):
    h = jnp.dot(x_ref[0], w1_ref[...], preferred_element_type=jnp.float32)
    h = jnp.maximum(h * s1_ref[...] + b1_ref[...], 0.0)
    h = jnp.dot(h.astype(jnp.bfloat16), w2_ref[...],
                preferred_element_type=jnp.float32)
    h = jnp.maximum(h * s2_ref[...] + b2_ref[...], 0.0)
    h = jnp.dot(h.astype(jnp.bfloat16), w3_ref[...],
                preferred_element_type=jnp.float32)
    h = jnp.maximum(h * s3_ref[...] + b3_ref[...], 0.0)

    @pl.when(pl.program_id(1) == 0)
    def _():
        mx_ref[...] = jnp.full_like(mx_ref, -jnp.inf)

    mx_ref[...] = jnp.maximum(mx_ref[...],
                              jnp.max(h, axis=0, keepdims=True)[None])


def stn_feat_max(x_bnc, p):
    """x_bnc (B, N, C) bf16 -> (B, 1024) f32 (max-pooled STN features)."""
    B, N, C = x_bnc.shape
    tm = _pick_tile(N, TM_WIDE)
    out = pl.pallas_call(
        _stn_feat_max_kernel,
        out_shape=jax.ShapeDtypeStruct((B, 1, 1024), jnp.float32),
        grid_spec=pltpu.PrefetchScalarGridSpec(
            num_scalar_prefetch=0,
            grid=(B, N // tm),
            in_specs=[
                pl.BlockSpec((1, tm, C), lambda b, i: (b, i, 0)),
                pl.BlockSpec((C, 64), lambda b, i: (0, 0)),
                pl.BlockSpec((1, 64), lambda b, i: (0, 0)),
                pl.BlockSpec((1, 64), lambda b, i: (0, 0)),
                pl.BlockSpec((64, 128), lambda b, i: (0, 0)),
                pl.BlockSpec((1, 128), lambda b, i: (0, 0)),
                pl.BlockSpec((1, 128), lambda b, i: (0, 0)),
                pl.BlockSpec((128, 1024), lambda b, i: (0, 0)),
                pl.BlockSpec((1, 1024), lambda b, i: (0, 0)),
                pl.BlockSpec((1, 1024), lambda b, i: (0, 0)),
            ],
            out_specs=pl.BlockSpec((1, 1, 1024), lambda b, i: (b, 0, 0)),
        ),
        compiler_params=_cparams(("parallel", "arbitrary")),
    )(x_bnc, p["c1"]["w"], p["c1"]["scale"], p["c1"]["bias"],
      p["c2"]["w"], p["c2"]["scale"], p["c2"]["bias"],
      p["c3"]["w"], p["c3"]["scale"], p["c3"]["bias"])
    return out.reshape(B, 1024)


# -----------------------------------------------------------------------------
# Kernel 2: (transform-folded) conv1 + conv2 + conv3 chained, three outputs
# -----------------------------------------------------------------------------
def _conv123_kernel(x_ref, tw1_ref, s1_ref, b1_ref,
                    w2_ref, s2_ref, b2_ref,
                    w3_ref, s3_ref, b3_ref,
                    o1_ref, o2_ref, o3_ref):
    h1 = jnp.dot(x_ref[0], tw1_ref[0], preferred_element_type=jnp.float32)
    h1 = jnp.maximum(h1 * s1_ref[...] + b1_ref[...], 0.0)
    o1_ref[...] = h1[None].astype(o1_ref.dtype)

    h2 = jnp.dot(h1.astype(jnp.bfloat16), w2_ref[...],
                 preferred_element_type=jnp.float32)
    h2 = jnp.maximum(h2 * s2_ref[...] + b2_ref[...], 0.0)
    o2_ref[...] = h2[None].astype(o2_ref.dtype)

    h3 = jnp.dot(h2.astype(jnp.bfloat16), w3_ref[...],
                 preferred_element_type=jnp.float32)
    h3 = jnp.maximum(h3 * s3_ref[...] + b3_ref[...], 0.0)
    o3_ref[...] = h3[None].astype(o3_ref.dtype)


def conv123(pc8, tw1, pp):
    """pc8 (B, N, 8) bf16, tw1 (B, 8, 128) bf16 -> out1,out2,out3 (B,N,128) bf16."""
    B, N, C = pc8.shape
    tm = _pick_tile(N, TM_POINT)
    p1, p2, p3 = pp["conv1"], pp["conv2"], pp["conv3"]
    return pl.pallas_call(
        _conv123_kernel,
        out_shape=tuple(jax.ShapeDtypeStruct((B, N, 128), jnp.bfloat16)
                        for _ in range(3)),
        grid_spec=pltpu.PrefetchScalarGridSpec(
            num_scalar_prefetch=0,
            grid=(B, N // tm),
            in_specs=[
                pl.BlockSpec((1, tm, C), lambda b, i: (b, i, 0)),
                pl.BlockSpec((1, C, 128), lambda b, i: (b, 0, 0)),
                pl.BlockSpec((1, 128), lambda b, i: (0, 0)),
                pl.BlockSpec((1, 128), lambda b, i: (0, 0)),
                pl.BlockSpec((128, 128), lambda b, i: (0, 0)),
                pl.BlockSpec((1, 128), lambda b, i: (0, 0)),
                pl.BlockSpec((1, 128), lambda b, i: (0, 0)),
                pl.BlockSpec((128, 128), lambda b, i: (0, 0)),
                pl.BlockSpec((1, 128), lambda b, i: (0, 0)),
                pl.BlockSpec((1, 128), lambda b, i: (0, 0)),
            ],
            out_specs=tuple(pl.BlockSpec((1, tm, 128), lambda b, i: (b, i, 0))
                            for _ in range(3)),
        ),
        compiler_params=_cparams(("parallel", "parallel")),
    )(pc8, tw1, p1["scale"], p1["bias"],
      p2["w"], p2["scale"], p2["bias"],
      p3["w"], p3["scale"], p3["bias"])


# -----------------------------------------------------------------------------
# Kernel 3: (transform-folded) conv4 + conv5-BN + max over points
#           (out5 itself is never written to HBM — it is folded into convs1)
# -----------------------------------------------------------------------------
def _conv4_max_kernel(x_ref, tw4_ref, s4_ref, b4_ref,
                      w5_ref, s5_ref, b5_ref, o4_ref, mx_ref):
    h4 = jnp.dot(x_ref[0], tw4_ref[0], preferred_element_type=jnp.float32)
    h4 = jnp.maximum(h4 * s4_ref[...] + b4_ref[...], 0.0)
    o4_ref[...] = h4[None].astype(o4_ref.dtype)

    y5 = jnp.dot(h4.astype(jnp.bfloat16), w5_ref[...],
                 preferred_element_type=jnp.float32)
    y5 = y5 * s5_ref[...] + b5_ref[...]

    @pl.when(pl.program_id(1) == 0)
    def _():
        mx_ref[...] = jnp.full_like(mx_ref, -jnp.inf)

    mx_ref[...] = jnp.maximum(mx_ref[...],
                              jnp.max(y5, axis=0, keepdims=True)[None])


def conv4_conv5max(out3, tw4, pp):
    """out3 (B,N,128) bf16, tw4 (B,128,512) bf16 -> out4 (B,N,512) bf16, out_max (B,2048) f32."""
    B, N, _ = out3.shape
    tm = _pick_tile(N, TM_WIDE)
    p4, p5 = pp["conv4"], pp["conv5"]
    out4, omax = pl.pallas_call(
        _conv4_max_kernel,
        out_shape=(jax.ShapeDtypeStruct((B, N, 512), jnp.bfloat16),
                   jax.ShapeDtypeStruct((B, 1, 2048), jnp.float32)),
        grid_spec=pltpu.PrefetchScalarGridSpec(
            num_scalar_prefetch=0,
            grid=(B, N // tm),
            in_specs=[
                pl.BlockSpec((1, tm, 128), lambda b, i: (b, i, 0)),
                pl.BlockSpec((1, 128, 512), lambda b, i: (b, 0, 0)),
                pl.BlockSpec((1, 512), lambda b, i: (0, 0)),
                pl.BlockSpec((1, 512), lambda b, i: (0, 0)),
                pl.BlockSpec((512, 2048), lambda b, i: (0, 0)),
                pl.BlockSpec((1, 2048), lambda b, i: (0, 0)),
                pl.BlockSpec((1, 2048), lambda b, i: (0, 0)),
            ],
            out_specs=(pl.BlockSpec((1, tm, 512), lambda b, i: (b, i, 0)),
                       pl.BlockSpec((1, 1, 2048), lambda b, i: (b, 0, 0))),
        ),
        compiler_params=_cparams(("parallel", "arbitrary")),
    )(out3, tw4, p4["scale"], p4["bias"], p5["w"], p5["scale"], p5["bias"])
    return out4, omax.reshape(B, 2048)


# -----------------------------------------------------------------------------
# Kernel 4: convs1 fused — segment matmuls + per-batch expand row (conv5 folded)
# -----------------------------------------------------------------------------
def _convs1_kernel(e_ref, x1_ref, x2_ref, x3_ref, x4_ref,
                   w1_ref, w2_ref, w3_ref, w4_ref, s_ref, b_ref, o_ref):
    y = jnp.dot(x1_ref[0], w1_ref[...], preferred_element_type=jnp.float32)
    y = y + jnp.dot(x2_ref[0], w2_ref[...], preferred_element_type=jnp.float32)
    y = y + jnp.dot(x3_ref[0], w3_ref[...], preferred_element_type=jnp.float32)
    y = y + jnp.dot(x4_ref[0], w4_ref[...], preferred_element_type=jnp.float32)
    y = y + e_ref[0]                      # expand + folded-conv5-bias contribution
    y = jnp.maximum(y * s_ref[...] + b_ref[...], 0.0)
    o_ref[...] = y[None].astype(o_ref.dtype)


def convs1_fused(e, out1, out2, out3, out4, pp):
    B, N, _ = out1.shape
    tm = _pick_tile(N, TM_POINT)
    c = pp["convs1"]
    return pl.pallas_call(
        _convs1_kernel,
        out_shape=jax.ShapeDtypeStruct((B, N, 256), jnp.bfloat16),
        grid_spec=pltpu.PrefetchScalarGridSpec(
            num_scalar_prefetch=0,
            grid=(B, N // tm),
            in_specs=[
                pl.BlockSpec((1, 1, 256), lambda b, i: (b, 0, 0)),
                pl.BlockSpec((1, tm, 128), lambda b, i: (b, i, 0)),
                pl.BlockSpec((1, tm, 128), lambda b, i: (b, i, 0)),
                pl.BlockSpec((1, tm, 128), lambda b, i: (b, i, 0)),
                pl.BlockSpec((1, tm, 512), lambda b, i: (b, i, 0)),
                pl.BlockSpec((128, 256), lambda b, i: (0, 0)),
                pl.BlockSpec((128, 256), lambda b, i: (0, 0)),
                pl.BlockSpec((128, 256), lambda b, i: (0, 0)),
                pl.BlockSpec((512, 256), lambda b, i: (0, 0)),
                pl.BlockSpec((1, 256), lambda b, i: (0, 0)),
                pl.BlockSpec((1, 256), lambda b, i: (0, 0)),
            ],
            out_specs=pl.BlockSpec((1, tm, 256), lambda b, i: (b, i, 0)),
        ),
        compiler_params=_cparams(("parallel", "parallel")),
    )(e.reshape(B, 1, 256), out1, out2, out3, out4,
      c["w1"], c["w2"], c["w3"], c["w4"], c["scale"], c["bias"])


# -----------------------------------------------------------------------------
# Kernel 5: head — convs2 + convs3 + convs4 chained (output lane-padded to 128)
# -----------------------------------------------------------------------------
def _head_kernel(x_ref, w2_ref, s2_ref, b2_ref,
                 w3_ref, s3_ref, b3_ref, w4_ref, b4_ref, o_ref):
    h = jnp.dot(x_ref[...], w2_ref[...], preferred_element_type=jnp.float32)
    h = jnp.maximum(h * s2_ref[...] + b2_ref[...], 0.0)
    h = jnp.dot(h.astype(jnp.bfloat16), w3_ref[...],
                preferred_element_type=jnp.float32)
    h = jnp.maximum(h * s3_ref[...] + b3_ref[...], 0.0)
    h = jnp.dot(h.astype(jnp.bfloat16), w4_ref[...],
                preferred_element_type=jnp.float32)
    o_ref[...] = (h + b4_ref[...]).astype(o_ref.dtype)


def head_fused(x, pp):
    """x (M, 256) bf16 -> logits (M, 128) f32 (first part_num columns valid)."""
    M, _ = x.shape
    tm = _pick_tile(M, TM_POINT)
    c2, c3, c4 = pp["convs2"], pp["convs3"], pp["convs4"]
    return pl.pallas_call(
        _head_kernel,
        out_shape=jax.ShapeDtypeStruct((M, 128), jnp.float32),
        grid_spec=pltpu.PrefetchScalarGridSpec(
            num_scalar_prefetch=0,
            grid=(M // tm,),
            in_specs=[
                pl.BlockSpec((tm, 256), lambda i: (i, 0)),
                pl.BlockSpec((256, 256), lambda i: (0, 0)),
                pl.BlockSpec((1, 256), lambda i: (0, 0)),
                pl.BlockSpec((1, 256), lambda i: (0, 0)),
                pl.BlockSpec((256, 128), lambda i: (0, 0)),
                pl.BlockSpec((1, 128), lambda i: (0, 0)),
                pl.BlockSpec((1, 128), lambda i: (0, 0)),
                pl.BlockSpec((128, 128), lambda i: (0, 0)),
                pl.BlockSpec((1, 128), lambda i: (0, 0)),
            ],
            out_specs=pl.BlockSpec((tm, 128), lambda i: (i, 0)),
        ),
        compiler_params=_cparams(("parallel",)),
    )(x, c2["w"], c2["scale"], c2["bias"],
      c3["w"], c3["scale"], c3["bias"], c4["w"], c4["bias"])


# -----------------------------------------------------------------------------
# Parameters: deterministic synthetic init + one-time inference preparation
# -----------------------------------------------------------------------------
_EPS = 1e-5


def _layer(nxt, cin, cout, has_bias, has_bn):
    """Weight (cin, cout) + folded eval-mode BN (scale, bias) per output channel."""
    std = 1.0 / math.sqrt(cin)
    w = jax.random.normal(nxt(), (cin, cout), jnp.float32) * std
    cb = (jax.random.normal(nxt(), (cout,), jnp.float32) * 0.02
          if has_bias else jnp.zeros((cout,), jnp.float32))
    if has_bn:
        gamma = 1.0 + jax.random.normal(nxt(), (cout,), jnp.float32) * 0.02
        beta = jax.random.normal(nxt(), (cout,), jnp.float32) * 0.02
        s = gamma / jnp.sqrt(jnp.ones((cout,), jnp.float32) + _EPS)
        b = beta + s * cb                       # running_mean=0, running_var=1
    else:
        s = jnp.ones((cout,), jnp.float32)
        b = cb
    return {"w": w, "scale": s, "bias": b}


def init_params(key, part_num=50):
    keys = iter(jax.random.split(key, 128))
    nxt = lambda: next(keys)

    def stn(cin, k):
        return {"c1": _layer(nxt, cin, 64, True, True),
                "c2": _layer(nxt, 64, 128, True, True),
                "c3": _layer(nxt, 128, 1024, True, True),
                "fc1": _layer(nxt, 1024, 512, True, True),
                "fc2": _layer(nxt, 512, 256, True, True),
                "fc3": _layer(nxt, 256, k * k, True, False)}

    return {"stn": stn(3, 3), "fstn": stn(128, 128),
            "conv1": _layer(nxt, 3, 64, False, True),
            "conv2": _layer(nxt, 64, 128, False, True),
            "conv3": _layer(nxt, 128, 128, False, True),
            "conv4": _layer(nxt, 128, 512, False, True),
            "conv5": _layer(nxt, 512, 2048, False, True),
            "convs1": _layer(nxt, 4944, 256, False, True),
            "convs2": _layer(nxt, 256, 256, False, True),
            "convs3": _layer(nxt, 256, 128, False, True),
            "convs4": _layer(nxt, 128, part_num, True, False)}


def _prep_conv(layer, *, pad_in=0, pad_out=0):
    """bf16 weight (optionally zero-padded) + (1, cout) f32 scale/bias, done once."""
    w = layer["w"]
    if pad_in:
        w = jnp.pad(w, ((0, pad_in), (0, 0)))
    if pad_out:
        w = jnp.pad(w, ((0, 0), (0, pad_out)))
    s, b = layer["scale"], layer["bias"]
    if pad_out:
        s = jnp.pad(s, (0, pad_out), constant_values=1.0)
        b = jnp.pad(b, (0, pad_out))
    cout = w.shape[1]
    return {"w": w.astype(jnp.bfloat16),
            "scale": s.reshape(1, cout).astype(jnp.float32),
            "bias": b.reshape(1, cout).astype(jnp.float32)}


def prepare_params(raw):
    """All dtype casts / reshapes / algebraic folds hoisted out of the forward."""
    def prep_stack(s, pad_in_first=0):
        return {"c1": _prep_conv(s["c1"], pad_in=pad_in_first),
                "c2": _prep_conv(s["c2"]),
                "c3": _prep_conv(s["c3"]),
                "fc1": s["fc1"], "fc2": s["fc2"], "fc3": s["fc3"]}

    pp = {"stn": prep_stack(raw["stn"], pad_in_first=5),      # xyz padded 3 -> 8
          "fstn": prep_stack(raw["fstn"])}

    # conv1: f32 weight (prefolded per batch with the 3x3 transform), out 64 -> 128
    w1 = jnp.pad(raw["conv1"]["w"], ((0, 0), (0, 64)))
    pp["conv1"] = {
        "w": w1,
        "scale": jnp.pad(raw["conv1"]["scale"], (0, 64),
                         constant_values=1.0).reshape(1, 128),
        "bias": jnp.pad(raw["conv1"]["bias"], (0, 64)).reshape(1, 128)}
    pp["conv2"] = _prep_conv(raw["conv2"], pad_in=64)          # zero rows for padding
    pp["conv3"] = _prep_conv(raw["conv3"])
    # conv4: f32 weight kept for per-batch 128x128 transform prefold
    pp["conv4"] = {"w": raw["conv4"]["w"],
                   "scale": raw["conv4"]["scale"].reshape(1, 512),
                   "bias": raw["conv4"]["bias"].reshape(1, 512)}
    pp["conv5"] = _prep_conv(raw["conv5"])

    # convs1: split weight into segments, fold conv5 (BN, no ReLU) into w4 / bias.
    w = raw["convs1"]["w"]                                     # (4944, 256)
    w5_seg = w[2896:]
    w5_fold = (raw["conv5"]["w"] * raw["conv5"]["scale"][None, :]) @ w5_seg  # (512,256)
    b5_fold = raw["conv5"]["bias"] @ w5_seg                                   # (256,)
    pp["convs1"] = {
        "w_expand": w[:2064],                                  # f32: tiny (M=B) XLA matmul
        "w1": jnp.pad(w[2064:2128], ((0, 64), (0, 0))).astype(jnp.bfloat16),
        "w2": w[2128:2256].astype(jnp.bfloat16),
        "w3": w[2256:2384].astype(jnp.bfloat16),
        "w4": (w[2384:2896] + w5_fold).astype(jnp.bfloat16),
        "b5_fold": b5_fold.reshape(1, 256),
        "scale": raw["convs1"]["scale"].reshape(1, 256),
        "bias": raw["convs1"]["bias"].reshape(1, 256)}

    pp["convs2"] = _prep_conv(raw["convs2"])
    pp["convs3"] = _prep_conv(raw["convs3"])
    pp["convs4"] = _prep_conv(raw["convs4"],
                              pad_out=(-raw["convs4"]["w"].shape[1]) % 128)
    return pp


# -----------------------------------------------------------------------------
# Tiny B-row pieces kept in plain XLA (per perf review: launch overhead dominates)
# -----------------------------------------------------------------------------
def _stn_fc(p, feat, k):
    h = jnp.maximum(feat @ p["fc1"]["w"] * p["fc1"]["scale"] + p["fc1"]["bias"], 0.0)
    h = jnp.maximum(h @ p["fc2"]["w"] * p["fc2"]["scale"] + p["fc2"]["bias"], 0.0)
    h = h @ p["fc3"]["w"] + p["fc3"]["bias"]
    iden = jnp.eye(k, dtype=jnp.float32).reshape(1, k * k)
    return (h + iden).reshape(-1, k, k)


# -----------------------------------------------------------------------------
# Forward pass
# -----------------------------------------------------------------------------
def pointnet_partseg_forward(pp, point_cloud, label, *, part_num=50):
    """point_cloud (B, 3, N), label (B, 1, 16) -> logits (B, part_num, N)."""
    B, _, N = point_cloud.shape
    pc = jnp.transpose(point_cloud, (0, 2, 1)).astype(jnp.float32)   # (B, N, 3)

    # Pad points to a tiling-friendly count (duplicate last point: max-invariant,
    # per-point rows are sliced off at the end).
    quantum = 128 if N >= 128 else 8
    NP = ((N + quantum - 1) // quantum) * quantum
    if NP != N:
        pad = jnp.broadcast_to(pc[:, -1:, :], (B, NP - N, 3))
        pc = jnp.concatenate([pc, pad], axis=1)

    # Zero-pad xyz channel 3 -> 8 (MXU-friendly contraction).
    pc8 = jnp.pad(pc, ((0, 0), (0, 0), (0, 5))).astype(jnp.bfloat16)  # (B, NP, 8)

    # ---- input STN (3x3), fused conv chain + max ----
    stn_feat = stn_feat_max(pc8, pp["stn"])                    # (B, 1024)
    trans = _stn_fc(pp["stn"], stn_feat, 3)                    # (B, 3, 3)

    # Fold the 3x3 transform into conv1's weight: (pc @ T) @ W1 == pc @ (T @ W1).
    tw1 = jnp.einsum("bij,jc->bic", trans, pp["conv1"]["w"])   # (B, 3, 128) f32
    tw1 = jnp.pad(tw1, ((0, 0), (0, 5), (0, 0))).astype(jnp.bfloat16)  # (B, 8, 128)

    out1, out2, out3 = conv123(pc8, tw1, pp)                   # 3x (B, NP, 128) bf16

    # ---- feature STN (128x128) ----
    fstn_feat = stn_feat_max(out3, pp["fstn"])                 # (B, 1024)
    trans_feat = _stn_fc(pp["fstn"], fstn_feat, 128)           # (B, 128, 128)

    # Fold the 128x128 transform into conv4's weight; conv5 max fused in.
    tw4 = jnp.einsum("bij,jc->bic", trans_feat,
                     pp["conv4"]["w"]).astype(jnp.bfloat16)    # (B, 128, 512)
    out4, out_max = conv4_conv5max(out3, tw4, pp)              # (B,NP,512), (B,2048)

    out_max = jnp.concatenate(
        [out_max, label.reshape(B, 16).astype(jnp.float32)], axis=1)   # (B, 2064)
    # per-batch "expand" contribution + folded conv5 bias contribution
    e = out_max @ pp["convs1"]["w_expand"] + pp["convs1"]["b5_fold"]   # (B, 256)

    net = convs1_fused(e, out1, out2, out3, out4, pp)          # (B, NP, 256) bf16
    logits = head_fused(net.reshape(B * NP, 256), pp)          # (B*NP, 128) f32
    logits = logits.reshape(B, NP, -1)[:, :N, :part_num]       # (B, N, part_num)
    return jnp.transpose(logits, (0, 2, 1))                    # (B, part_num, N)


# -----------------------------------------------------------------------------
# Driver
# -----------------------------------------------------------------------------
if __name__ == "__main__":
    B, N = 2, 64
    PART_NUM = 50

    key = jax.random.PRNGKey(0)
    k_params, k_pc, k_lbl = jax.random.split(key, 3)

    raw_params = init_params(k_params, part_num=PART_NUM)
    params = prepare_params(raw_params)     # one-time casts / folds (review item #8)

    point_cloud = jax.random.normal(k_pc, (B, 3, N), jnp.float32)
    cls_idx = jax.random.randint(k_lbl, (B,), 0, 16)
    label = jax.nn.one_hot(cls_idx, 16, dtype=jnp.float32).reshape(B, 1, 16)

    fwd = jax.jit(functools.partial(pointnet_partseg_forward, part_num=PART_NUM))
    out = fwd(params, point_cloud, label)
    out = jax.block_until_ready(out)

    assert out.shape == (B, PART_NUM, N), out.shape
    assert bool(jnp.all(jnp.isfinite(out)))
    print("KERNEL_OK")
</pallas_src>

<mosaic_0001>
module attributes {stable_mosaic.version = 11 : i64} {
  func.func @_stn_feat_max_kernel(%arg0: i32, %arg1: i32, %arg2: memref<1x64x128xbf16, #tpu.memory_space<vmem>>, %arg3: memref<128x64xbf16, #tpu.memory_space<vmem>>, %arg4: memref<1x64xf32, #tpu.memory_space<vmem>>, %arg5: memref<1x64xf32, #tpu.memory_space<vmem>>, %arg6: memref<64x128xbf16, #tpu.memory_space<vmem>>, %arg7: memref<1x128xf32, #tpu.memory_space<vmem>>, %arg8: memref<1x128xf32, #tpu.memory_space<vmem>>, %arg9: memref<128x1024xbf16, #tpu.memory_space<vmem>>, %arg10: memref<1x1024xf32, #tpu.memory_space<vmem>>, %arg11: memref<1x1024xf32, #tpu.memory_space<vmem>>, %arg12: memref<1x1x1024xf32, #tpu.memory_space<vmem>>) attributes {dimension_semantics = [#tpu.dimension_semantics<parallel>, #tpu.dimension_semantics<arbitrary>], iteration_bounds = array<i64: 2, 1>, scalar_prefetch = 0 : i64, scratch_operands = 0 : i64, tpu.core_type = #tpu.core_type<tc>, window_params = [{transform_indices = @transform_0, window_bounds = array<i64: 1, 64, 128>}, {pipeline_mode = #tpu.pipeline_mode<synchronous>, transform_indices = @transform_1, window_bounds = array<i64: 128, 64>}, {pipeline_mode = #tpu.pipeline_mode<synchronous>, transform_indices = @transform_2, window_bounds = array<i64: 1, 64>}, {pipeline_mode = #tpu.pipeline_mode<synchronous>, transform_indices = @transform_3, window_bounds = array<i64: 1, 64>}, {pipeline_mode = #tpu.pipeline_mode<synchronous>, transform_indices = @transform_4, window_bounds = array<i64: 64, 128>}, {pipeline_mode = #tpu.pipeline_mode<synchronous>, transform_indices = @transform_5, window_bounds = array<i64: 1, 128>}, {pipeline_mode = #tpu.pipeline_mode<synchronous>, transform_indices = @transform_6, window_bounds = array<i64: 1, 128>}, {pipeline_mode = #tpu.pipeline_mode<synchronous>, transform_indices = @transform_7, window_bounds = array<i64: 128, 1024>}, {pipeline_mode = #tpu.pipeline_mode<synchronous>, transform_indices = @transform_8, window_bounds = array<i64: 1, 1024>}, {pipeline_mode = #tpu.pipeline_mode<synchronous>, transform_indices = @transform_9, window_bounds = array<i64: 1, 1024>}, {transform_indices = @transform_10, window_bounds = array<i64: 1, 1, 1024>}]} {
    %c0 = arith.constant 0 : index
    %c0_0 = arith.constant 0 : index
    %c0_1 = arith.constant 0 : index
    %0 = vector.load %arg2[%c0, %c0_0, %c0_1] : memref<1x64x128xbf16, #tpu.memory_space<vmem>>, vector<1x64x128xbf16>
    %1 = vector.shape_cast %0 : vector<1x64x128xbf16> to vector<64x128xbf16>
    %c0_2 = arith.constant 0 : index
    %c0_3 = arith.constant 0 : index
    %2 = vector.load %arg3[%c0_2, %c0_3] : memref<128x64xbf16, #tpu.memory_space<vmem>>, vector<128x64xbf16>
    %cst = arith.constant dense<0.000000e+00> : vector<64x64xf32>
    %3 = tpu.matmul %1, %2, %cst {dimension_numbers = #tpu.dot_dimension_numbers<[1], [0], [0], [1], [0, 0, 1, 1], [], []>} : vector<64x128xbf16>, vector<128x64xbf16>, vector<64x64xf32> -> vector<64x64xf32>
    %c0_4 = arith.constant 0 : index
    %c0_5 = arith.constant 0 : index
    %4 = vector.load %arg4[%c0_4, %c0_5] : memref<1x64xf32, #tpu.memory_space<vmem>>, vector<1x64xf32>
    %5 = vector.broadcast %4 : vector<1x64xf32> to vector<64x64xf32>
    %6 = arith.mulf %3, %5 : vector<64x64xf32>
    %c0_6 = arith.constant 0 : index
    %c0_7 = arith.constant 0 : index
    %7 = vector.load %arg5[%c0_6, %c0_7] : memref<1x64xf32, #tpu.memory_space<vmem>>, vector<1x64xf32>
    %8 = vector.broadcast %7 : vector<1x64xf32> to vector<64x64xf32>
    %9 = arith.addf %6, %8 : vector<64x64xf32>
    %cst_8 = arith.constant 0.000000e+00 : f32
    %10 = vector.broadcast %cst_8 : f32 to vector<64x64xf32>
    %11 = arith.maximumf %9, %10 : vector<64x64xf32>
    %12 = arith.truncf %11 : vector<64x64xf32> to vector<64x64xbf16>
    %c0_9 = arith.constant 0 : index
    %c0_10 = arith.constant 0 : index
    %13 = vector.load %arg6[%c0_9, %c0_10] : memref<64x128xbf16, #tpu.memory_space<vmem>>, vector<64x128xbf16>
    %cst_11 = arith.constant dense<0.000000e+00> : vector<64x128xf32>
    %14 = tpu.matmul %12, %13, %cst_11 {dimension_numbers = #tpu.dot_dimension_numbers<[1], [0], [0], [1], [0, 0, 1, 1], [], []>} : vector<64x64xbf16>, vector<64x128xbf16>, vector<64x128xf32> -> vector<64x128xf32>
    %c0_12 = arith.constant 0 : index
    %c0_13 = arith.constant 0 : index
    %15 = vector.load %arg7[%c0_12, %c0_13] : memref<1x128xf32, #tpu.memory_space<vmem>>, vector<1x128xf32>
    %16 = vector.broadcast %15 : vector<1x128xf32> to vector<64x128xf32>
    %17 = arith.mulf %14, %16 : vector<64x128xf32>
    %c0_14 = arith.constant 0 : index
    %c0_15 = arith.constant 0 : index
    %18 = vector.load %arg8[%c0_14, %c0_15] : memref<1x128xf32, #tpu.memory_space<vmem>>, vector<1x128xf32>
    %19 = vector.broadcast %18 : vector<1x128xf32> to vector<64x128xf32>
    %20 = arith.addf %17, %19 : vector<64x128xf32>
    %cst_16 = arith.constant 0.000000e+00 : f32
    %21 = vector.broadcast %cst_16 : f32 to vector<64x128xf32>
    %22 = arith.maximumf %20, %21 : vector<64x128xf32>
    %23 = arith.truncf %22 : vector<64x128xf32> to vector<64x128xbf16>
    %c0_17 = arith.constant 0 : index
    %c0_18 = arith.constant 0 : index
    %24 = vector.load %arg9[%c0_17, %c0_18] : memref<128x1024xbf16, #tpu.memory_space<vmem>>, vector<128x1024xbf16>
    %cst_19 = arith.constant dense<0.000000e+00> : vector<64x1024xf32>
    %25 = tpu.matmul %23, %24, %cst_19 {dimension_numbers = #tpu.dot_dimension_numbers<[1], [0], [0], [1], [0, 0, 1, 1], [], []>} : vector<64x128xbf16>, vector<128x1024xbf16>, vector<64x1024xf32> -> vector<64x1024xf32>
    %c0_20 = arith.constant 0 : index
    %c0_21 = arith.constant 0 : index
    %26 = vector.load %arg10[%c0_20, %c0_21] : memref<1x1024xf32, #tpu.memory_space<vmem>>, vector<1x1024xf32>
    %27 = vector.broadcast %26 : vector<1x1024xf32> to vector<64x1024xf32>
    %28 = arith.mulf %25, %27 : vector<64x1024xf32>
    %c0_22 = arith.constant 0 : index
    %c0_23 = arith.constant 0 : index
    %29 = vector.load %arg11[%c0_22, %c0_23] : memref<1x1024xf32, #tpu.memory_space<vmem>>, vector<1x1024xf32>
    %30 = vector.broadcast %29 : vector<1x1024xf32> to vector<64x1024xf32>
    %31 = arith.addf %28, %30 : vector<64x1024xf32>
    %cst_24 = arith.constant 0.000000e+00 : f32
    %32 = vector.broadcast %cst_24 : f32 to vector<64x1024xf32>
    %33 = arith.maximumf %31, %32 : vector<64x1024xf32>
    %c0_i32 = arith.constant 0 : i32
    %34 = arith.cmpi eq, %arg1, %c0_i32 : i32
    %35 = arith.extui %34 : i1 to i32
    %c0_i32_25 = arith.constant 0 : i32
    %36 = arith.cmpi ne, %35, %c0_i32_25 : i32
    scf.if %36 {
      %cst_33 = arith.constant 0xFF800000 : f32
      %43 = vector.broadcast %cst_33 : f32 to vector<1x1x1024xf32>
      %c0_34 = arith.constant 0 : index
      %c0_35 = arith.constant 0 : index
      %c0_36 = arith.constant 0 : index
      %44 = vector.load %arg12[%c0_34, %c0_35, %c0_36] : memref<1x1x1024xf32, #tpu.memory_space<vmem>>, vector<1x1x1024xf32>
      tpu.vector_store %arg12[%c0_34, %c0_35, %c0_36], %43 {strides = array<i32>} : memref<1x1x1024xf32, #tpu.memory_space<vmem>>, vector<1x1x1024xf32>,
    } else {
    }
    %c0_26 = arith.constant 0 : index
    %c0_27 = arith.constant 0 : index
    %c0_28 = arith.constant 0 : index
    %37 = vector.load %arg12[%c0_26, %c0_27, %c0_28] : memref<1x1x1024xf32, #tpu.memory_space<vmem>>, vector<1x1x1024xf32>
    %cst_29 = arith.constant dense<0xFF800000> : vector<1024xf32>
    %38 = vector.multi_reduction <maximumf>, %33, %cst_29 [0] : vector<64x1024xf32> to vector<1024xf32>
    %39 = vector.shape_cast %38 : vector<1024xf32> to vector<1x1024xf32>
    %40 = vector.shape_cast %39 : vector<1x1024xf32> to vector<1x1x1024xf32>
    %41 = arith.maximumf %37, %40 : vector<1x1x1024xf32>
    %c0_30 = arith.constant 0 : index
    %c0_31 = arith.constant 0 : index
    %c0_32 = arith.constant 0 : index
    %42 = vector.load %arg12[%c0_30, %c0_31, %c0_32] : memref<1x1x1024xf32, #tpu.memory_space<vmem>>, vector<1x1x1024xf32>
    tpu.vector_store %arg12[%c0_30, %c0_31, %c0_32], %41 {strides = array<i32>} : memref<1x1x1024xf32, #tpu.memory_space<vmem>>, vector<1x1x1024xf32>,
    return
  }
  func.func @transform_0(%arg0: i32, %arg1: i32) -> (i32, i32, i32) {
    %c0_i32 = arith.constant 0 : i32
    %c0_i32_0 = arith.constant 0 : i32
    return %arg0, %arg1, %c0_i32 : i32, i32, i32
  }
  func.func @transform_1(%arg0: i32, %arg1: i32) -> (i32, i32) {
    %c0_i32 = arith.constant 0 : i32
    %c0_i32_0 = arith.constant 0 : i32
    %c0_i32_1 = arith.constant 0 : i32
    return %c0_i32, %c0_i32_0 : i32, i32
  }
  func.func @transform_2(%arg0: i32, %arg1: i32) -> (i32, i32) {
    %c0_i32 = arith.constant 0 : i32
    %c0_i32_0 = arith.constant 0 : i32
    %c0_i32_1 = arith.constant 0 : i32
    return %c0_i32, %c0_i32_0 : i32, i32
  }
  func.func @transform_3(%arg0: i32, %arg1: i32) -> (i32, i32) {
    %c0_i32 = arith.constant 0 : i32
    %c0_i32_0 = arith.constant 0 : i32
    %c0_i32_1 = arith.constant 0 : i32
    return %c0_i32, %c0_i32_0 : i32, i32
  }
  func.func @transform_4(%arg0: i32, %arg1: i32) -> (i32, i32) {
    %c0_i32 = arith.constant 0 : i32
    %c0_i32_0 = arith.constant 0 : i32
    %c0_i32_1 = arith.constant 0 : i32
    return %c0_i32, %c0_i32_0 : i32, i32
  }
  func.func @transform_5(%arg0: i32, %arg1: i32) -> (i32, i32) {
    %c0_i32 = arith.constant 0 : i32
    %c0_i32_0 = arith.constant 0 : i32
    %c0_i32_1 = arith.constant 0 : i32
    return %c0_i32, %c0_i32_0 : i32, i32
  }
  func.func @transform_6(%arg0: i32, %arg1: i32) -> (i32, i32) {
    %c0_i32 = arith.constant 0 : i32
    %c0_i32_0 = arith.constant 0 : i32
    %c0_i32_1 = arith.constant 0 : i32
    return %c0_i32, %c0_i32_0 : i32, i32
  }
  func.func @transform_7(%arg0: i32, %arg1: i32) -> (i32, i32) {
    %c0_i32 = arith.constant 0 : i32
    %c0_i32_0 = arith.constant 0 : i32
    %c0_i32_1 = arith.constant 0 : i32
    return %c0_i32, %c0_i32_0 : i32, i32
  }
  func.func @transform_8(%arg0: i32, %arg1: i32) -> (i32, i32) {
    %c0_i32 = arith.constant 0 : i32
    %c0_i32_0 = arith.constant 0 : i32
    %c0_i32_1 = arith.constant 0 : i32
    return %c0_i32, %c0_i32_0 : i32, i32
  }
  func.func @transform_9(%arg0: i32, %arg1: i32) -> (i32, i32) {
    %c0_i32 = arith.constant 0 : i32
    %c0_i32_0 = arith.constant 0 : i32
    %c0_i32_1 = arith.constant 0 : i32
    return %c0_i32, %c0_i32_0 : i32, i32
  }
  func.func @transform_10(%arg0: i32, %arg1: i32) -> (i32, i32, i32) {
    %c0_i32 = arith.constant 0 : i32
    %c0_i32_0 = arith.constant 0 : i32
    %c0_i32_1 = arith.constant 0 : i32
    return %arg0, %c0_i32, %c0_i32_0 : i32, i32, i32
  }
}

module attributes {stable_mosaic.version = 11 : i64} {
  func.func @_stn_feat_max_kernel(%arg0: i32, %arg1: i32, %arg2: memref<1x64x8xbf16, #tpu.memory_space<vmem>>, %arg3: memref<8x64xbf16, #tpu.memory_space<vmem>>, %arg4: memref<1x64xf32, #tpu.memory_space<vmem>>, %arg5: memref<1x64xf32, #tpu.memory_space<vmem>>, %arg6: memref<64x128xbf16, #tpu.memory_space<vmem>>, %arg7: memref<1x128xf32, #tpu.memory_space<vmem>>, %arg8: memref<1x128xf32, #tpu.memory_space<vmem>>, %arg9: memref<128x1024xbf16, #tpu.memory_space<vmem>>, %arg10: memref<1x1024xf32, #tpu.memory_space<vmem>>, %arg11: memref<1x1024xf32, #tpu.memory_space<vmem>>, %arg12: memref<1x1x1024xf32, #tpu.memory_space<vmem>>) attributes {dimension_semantics = [#tpu.dimension_semantics<parallel>, #tpu.dimension_semantics<arbitrary>], iteration_bounds = array<i64: 2, 1>, scalar_prefetch = 0 : i64, scratch_operands = 0 : i64, tpu.core_type = #tpu.core_type<tc>, window_params = [{transform_indices = @transform_0, window_bounds = array<i64: 1, 64, 8>}, {pipeline_mode = #tpu.pipeline_mode<synchronous>, transform_indices = @transform_1, window_bounds = array<i64: 8, 64>}, {pipeline_mode = #tpu.pipeline_mode<synchronous>, transform_indices = @transform_2, window_bounds = array<i64: 1, 64>}, {pipeline_mode = #tpu.pipeline_mode<synchronous>, transform_indices = @transform_3, window_bounds = array<i64: 1, 64>}, {pipeline_mode = #tpu.pipeline_mode<synchronous>, transform_indices = @transform_4, window_bounds = array<i64: 64, 128>}, {pipeline_mode = #tpu.pipeline_mode<synchronous>, transform_indices = @transform_5, window_bounds = array<i64: 1, 128>}, {pipeline_mode = #tpu.pipeline_mode<synchronous>, transform_indices = @transform_6, window_bounds = array<i64: 1, 128>}, {pipeline_mode = #tpu.pipeline_mode<synchronous>, transform_indices = @transform_7, window_bounds = array<i64: 128, 1024>}, {pipeline_mode = #tpu.pipeline_mode<synchronous>, transform_indices = @transform_8, window_bounds = array<i64: 1, 1024>}, {pipeline_mode = #tpu.pipeline_mode<synchronous>, transform_indices = @transform_9, window_bounds = array<i64: 1, 1024>}, {transform_indices = @transform_10, window_bounds = array<i64: 1, 1, 1024>}]} {
    %c0 = arith.constant 0 : index
    %c0_0 = arith.constant 0 : index
    %c0_1 = arith.constant 0 : index
    %0 = vector.load %arg2[%c0, %c0_0, %c0_1] : memref<1x64x8xbf16, #tpu.memory_space<vmem>>, vector<1x64x8xbf16>
    %1 = vector.shape_cast %0 : vector<1x64x8xbf16> to vector<64x8xbf16>
    %c0_2 = arith.constant 0 : index
    %c0_3 = arith.constant 0 : index
    %2 = vector.load %arg3[%c0_2, %c0_3] : memref<8x64xbf16, #tpu.memory_space<vmem>>, vector<8x64xbf16>
    %cst = arith.constant dense<0.000000e+00> : vector<64x64xf32>
    %3 = tpu.matmul %1, %2, %cst {dimension_numbers = #tpu.dot_dimension_numbers<[1], [0], [0], [1], [0, 0, 1, 1], [], []>} : vector<64x8xbf16>, vector<8x64xbf16>, vector<64x64xf32> -> vector<64x64xf32>
    %c0_4 = arith.constant 0 : index
    %c0_5 = arith.constant 0 : index
    %4 = vector.load %arg4[%c0_4, %c0_5] : memref<1x64xf32, #tpu.memory_space<vmem>>, vector<1x64xf32>
    %5 = vector.broadcast %4 : vector<1x64xf32> to vector<64x64xf32>
    %6 = arith.mulf %3, %5 : vector<64x64xf32>
    %c0_6 = arith.constant 0 : index
    %c0_7 = arith.constant 0 : index
    %7 = vector.load %arg5[%c0_6, %c0_7] : memref<1x64xf32, #tpu.memory_space<vmem>>, vector<1x64xf32>
    %8 = vector.broadcast %7 : vector<1x64xf32> to vector<64x64xf32>
    %9 = arith.addf %6, %8 : vector<64x64xf32>
    %cst_8 = arith.constant 0.000000e+00 : f32
    %10 = vector.broadcast %cst_8 : f32 to vector<64x64xf32>
    %11 = arith.maximumf %9, %10 : vector<64x64xf32>
    %12 = arith.truncf %11 : vector<64x64xf32> to vector<64x64xbf16>
    %c0_9 = arith.constant 0 : index
    %c0_10 = arith.constant 0 : index
    %13 = vector.load %arg6[%c0_9, %c0_10] : memref<64x128xbf16, #tpu.memory_space<vmem>>, vector<64x128xbf16>
    %cst_11 = arith.constant dense<0.000000e+00> : vector<64x128xf32>
    %14 = tpu.matmul %12, %13, %cst_11 {dimension_numbers = #tpu.dot_dimension_numbers<[1], [0], [0], [1], [0, 0, 1, 1], [], []>} : vector<64x64xbf16>, vector<64x128xbf16>, vector<64x128xf32> -> vector<64x128xf32>
    %c0_12 = arith.constant 0 : index
    %c0_13 = arith.constant 0 : index
    %15 = vector.load %arg7[%c0_12, %c0_13] : memref<1x128xf32, #tpu.memory_space<vmem>>, vector<1x128xf32>
    %16 = vector.broadcast %15 : vector<1x128xf32> to vector<64x128xf32>
    %17 = arith.mulf %14, %16 : vector<64x128xf32>
    %c0_14 = arith.constant 0 : index
    %c0_15 = arith.constant 0 : index
    %18 = vector.load %arg8[%c0_14, %c0_15] : memref<1x128xf32, #tpu.memory_space<vmem>>, vector<1x128xf32>
    %19 = vector.broadcast %18 : vector<1x128xf32> to vector<64x128xf32>
    %20 = arith.addf %17, %19 : vector<64x128xf32>
    %cst_16 = arith.constant 0.000000e+00 : f32
    %21 = vector.broadcast %cst_16 : f32 to vector<64x128xf32>
    %22 = arith.maximumf %20, %21 : vector<64x128xf32>
    %23 = arith.truncf %22 : vector<64x128xf32> to vector<64x128xbf16>
    %c0_17 = arith.constant 0 : index
    %c0_18 = arith.constant 0 : index
    %24 = vector.load %arg9[%c0_17, %c0_18] : memref<128x1024xbf16, #tpu.memory_space<vmem>>, vector<128x1024xbf16>
    %cst_19 = arith.constant dense<0.000000e+00> : vector<64x1024xf32>
    %25 = tpu.matmul %23, %24, %cst_19 {dimension_numbers = #tpu.dot_dimension_numbers<[1], [0], [0], [1], [0, 0, 1, 1], [], []>} : vector<64x128xbf16>, vector<128x1024xbf16>, vector<64x1024xf32> -> vector<64x1024xf32>
    %c0_20 = arith.constant 0 : index
    %c0_21 = arith.constant 0 : index
    %26 = vector.load %arg10[%c0_20, %c0_21] : memref<1x1024xf32, #tpu.memory_space<vmem>>, vector<1x1024xf32>
    %27 = vector.broadcast %26 : vector<1x1024xf32> to vector<64x1024xf32>
    %28 = arith.mulf %25, %27 : vector<64x1024xf32>
    %c0_22 = arith.constant 0 : index
    %c0_23 = arith.constant 0 : index
    %29 = vector.load %arg11[%c0_22, %c0_23] : memref<1x1024xf32, #tpu.memory_space<vmem>>, vector<1x1024xf32>
    %30 = vector.broadcast %29 : vector<1x1024xf32> to vector<64x1024xf32>
    %31 = arith.addf %28, %30 : vector<64x1024xf32>
    %cst_24 = arith.constant 0.000000e+00 : f32
    %32 = vector.broadcast %cst_24 : f32 to vector<64x1024xf32>
    %33 = arith.maximumf %31, %32 : vector<64x1024xf32>
    %c0_i32 = arith.constant 0 : i32
    %34 = arith.cmpi eq, %arg1, %c0_i32 : i32
    %35 = arith.extui %34 : i1 to i32
    %c0_i32_25 = arith.constant 0 : i32
    %36 = arith.cmpi ne, %35, %c0_i32_25 : i32
    scf.if %36 {
      %cst_33 = arith.constant 0xFF800000 : f32
      %43 = vector.broadcast %cst_33 : f32 to vector<1x1x1024xf32>
      %c0_34 = arith.constant 0 : index
      %c0_35 = arith.constant 0 : index
      %c0_36 = arith.constant 0 : index
      %44 = vector.load %arg12[%c0_34, %c0_35, %c0_36] : memref<1x1x1024xf32, #tpu.memory_space<vmem>>, vector<1x1x1024xf32>
      tpu.vector_store %arg12[%c0_34, %c0_35, %c0_36], %43 {strides = array<i32>} : memref<1x1x1024xf32, #tpu.memory_space<vmem>>, vector<1x1x1024xf32>,
    } else {
    }
    %c0_26 = arith.constant 0 : index
    %c0_27 = arith.constant 0 : index
    %c0_28 = arith.constant 0 : index
    %37 = vector.load %arg12[%c0_26, %c0_27, %c0_28] : memref<1x1x1024xf32, #tpu.memory_space<vmem>>, vector<1x1x1024xf32>
    %cst_29 = arith.constant dense<0xFF800000> : vector<1024xf32>
    %38 = vector.multi_reduction <maximumf>, %33, %cst_29 [0] : vector<64x1024xf32> to vector<1024xf32>
    %39 = vector.shape_cast %38 : vector<1024xf32> to vector<1x1024xf32>
    %40 = vector.shape_cast %39 : vector<1x1024xf32> to vector<1x1x1024xf32>
    %41 = arith.maximumf %37, %40 : vector<1x1x1024xf32>
    %c0_30 = arith.constant 0 : index
    %c0_31 = arith.constant 0 : index
    %c0_32 = arith.constant 0 : index
    %42 = vector.load %arg12[%c0_30, %c0_31, %c0_32] : memref<1x1x1024xf32, #tpu.memory_space<vmem>>, vector<1x1x1024xf32>
    tpu.vector_store %arg12[%c0_30, %c0_31, %c0_32], %41 {strides = array<i32>} : memref<1x1x1024xf32, #tpu.memory_space<vmem>>, vector<1x1x1024xf32>,
    return
  }
  func.func @transform_0(%arg0: i32, %arg1: i32) -> (i32, i32, i32) {
    %c0_i32 = arith.constant 0 : i32
    %c0_i32_0 = arith.constant 0 : i32
    return %arg0, %arg1, %c0_i32 : i32, i32, i32
  }
  func.func @transform_1(%arg0: i32, %arg1: i32) -> (i32, i32) {
    %c0_i32 = arith.constant 0 : i32
    %c0_i32_0 = arith.constant 0 : i32
    %c0_i32_1 = arith.constant 0 : i32
    return %c0_i32, %c0_i32_0 : i32, i32
  }
  func.func @transform_2(%arg0: i32, %arg1: i32) -> (i32, i32) {
    %c0_i32 = arith.constant 0 : i32
    %c0_i32_0 = arith.constant 0 : i32
    %c0_i32_1 = arith.constant 0 : i32
    return %c0_i32, %c0_i32_0 : i32, i32
  }
  func.func @transform_3(%arg0: i32, %arg1: i32) -> (i32, i32) {
    %c0_i32 = arith.constant 0 : i32
    %c0_i32_0 = arith.constant 0 : i32
    %c0_i32_1 = arith.constant 0 : i32
    return %c0_i32, %c0_i32_0 : i32, i32
  }
  func.func @transform_4(%arg0: i32, %arg1: i32) -> (i32, i32) {
    %c0_i32 = arith.constant 0 : i32
    %c0_i32_0 = arith.constant 0 : i32
    %c0_i32_1 = arith.constant 0 : i32
    return %c0_i32, %c0_i32_0 : i32, i32
  }
  func.func @transform_5(%arg0: i32, %arg1: i32) -> (i32, i32) {
    %c0_i32 = arith.constant 0 : i32
    %c0_i32_0 = arith.constant 0 : i32
    %c0_i32_1 = arith.constant 0 : i32
    return %c0_i32, %c0_i32_0 : i32, i32
  }
  func.func @transform_6(%arg0: i32, %arg1: i32) -> (i32, i32) {
    %c0_i32 = arith.constant 0 : i32
    %c0_i32_0 = arith.constant 0 : i32
    %c0_i32_1 = arith.constant 0 : i32
    return %c0_i32, %c0_i32_0 : i32, i32
  }
  func.func @transform_7(%arg0: i32, %arg1: i32) -> (i32, i32) {
    %c0_i32 = arith.constant 0 : i32
    %c0_i32_0 = arith.constant 0 : i32
    %c0_i32_1 = arith.constant 0 : i32
    return %c0_i32, %c0_i32_0 : i32, i32
  }
  func.func @transform_8(%arg0: i32, %arg1: i32) -> (i32, i32) {
    %c0_i32 = arith.constant 0 : i32
    %c0_i32_0 = arith.constant 0 : i32
    %c0_i32_1 = arith.constant 0 : i32
    return %c0_i32, %c0_i32_0 : i32, i32
  }
  func.func @transform_9(%arg0: i32, %arg1: i32) -> (i32, i32) {
    %c0_i32 = arith.constant 0 : i32
    %c0_i32_0 = arith.constant 0 : i32
    %c0_i32_1 = arith.constant 0 : i32
    return %c0_i32, %c0_i32_0 : i32, i32
  }
  func.func @transform_10(%arg0: i32, %arg1: i32) -> (i32, i32, i32) {
    %c0_i32 = arith.constant 0 : i32
    %c0_i32_0 = arith.constant 0 : i32
    %c0_i32_1 = arith.constant 0 : i32
    return %arg0, %c0_i32, %c0_i32_0 : i32, i32, i32
  }
}

module attributes {stable_mosaic.version = 11 : i64} {
  func.func @_conv123_kernel(%arg0: i32, %arg1: i32, %arg2: memref<1x64x8xbf16, #tpu.memory_space<vmem>>, %arg3: memref<1x8x128xbf16, #tpu.memory_space<vmem>>, %arg4: memref<1x128xf32, #tpu.memory_space<vmem>>, %arg5: memref<1x128xf32, #tpu.memory_space<vmem>>, %arg6: memref<128x128xbf16, #tpu.memory_space<vmem>>, %arg7: memref<1x128xf32, #tpu.memory_space<vmem>>, %arg8: memref<1x128xf32, #tpu.memory_space<vmem>>, %arg9: memref<128x128xbf16, #tpu.memory_space<vmem>>, %arg10: memref<1x128xf32, #tpu.memory_space<vmem>>, %arg11: memref<1x128xf32, #tpu.memory_space<vmem>>, %arg12: memref<1x64x128xbf16, #tpu.memory_space<vmem>>, %arg13: memref<1x64x128xbf16, #tpu.memory_space<vmem>>, %arg14: memref<1x64x128xbf16, #tpu.memory_space<vmem>>) attributes {dimension_semantics = [#tpu.dimension_semantics<parallel>, #tpu.dimension_semantics<parallel>], iteration_bounds = array<i64: 2, 1>, scalar_prefetch = 0 : i64, scratch_operands = 0 : i64, tpu.core_type = #tpu.core_type<tc>, window_params = [{transform_indices = @transform_0, window_bounds = array<i64: 1, 64, 8>}, {transform_indices = @transform_1, window_bounds = array<i64: 1, 8, 128>}, {pipeline_mode = #tpu.pipeline_mode<synchronous>, transform_indices = @transform_2, window_bounds = array<i64: 1, 128>}, {pipeline_mode = #tpu.pipeline_mode<synchronous>, transform_indices = @transform_3, window_bounds = array<i64: 1, 128>}, {pipeline_mode = #tpu.pipeline_mode<synchronous>, transform_indices = @transform_4, window_bounds = array<i64: 128, 128>}, {pipeline_mode = #tpu.pipeline_mode<synchronous>, transform_indices = @transform_5, window_bounds = array<i64: 1, 128>}, {pipeline_mode = #tpu.pipeline_mode<synchronous>, transform_indices = @transform_6, window_bounds = array<i64: 1, 128>}, {pipeline_mode = #tpu.pipeline_mode<synchronous>, transform_indices = @transform_7, window_bounds = array<i64: 128, 128>}, {pipeline_mode = #tpu.pipeline_mode<synchronous>, transform_indices = @transform_8, window_bounds = array<i64: 1, 128>}, {pipeline_mode = #tpu.pipeline_mode<synchronous>, transform_indices = @transform_9, window_bounds = array<i64: 1, 128>}, {transform_indices = @transform_10, window_bounds = array<i64: 1, 64, 128>}, {transform_indices = @transform_11, window_bounds = array<i64: 1, 64, 128>}, {transform_indices = @transform_12, window_bounds = array<i64: 1, 64, 128>}]} {
    %c0 = arith.constant 0 : index
    %c0_0 = arith.constant 0 : index
    %c0_1 = arith.constant 0 : index
    %0 = vector.load %arg2[%c0, %c0_0, %c0_1] : memref<1x64x8xbf16, #tpu.memory_space<vmem>>, vector<1x64x8xbf16>
    %1 = vector.shape_cast %0 : vector<1x64x8xbf16> to vector<64x8xbf16>
    %c0_2 = arith.constant 0 : index
    %c0_3 = arith.constant 0 : index
    %c0_4 = arith.constant 0 : index
    %2 = vector.load %arg3[%c0_2, %c0_3, %c0_4] : memref<1x8x128xbf16, #tpu.memory_space<vmem>>, vector<1x8x128xbf16>
    %3 = vector.shape_cast %2 : vector<1x8x128xbf16> to vector<8x128xbf16>
    %cst = arith.constant dense<0.000000e+00> : vector<64x128xf32>
    %4 = tpu.matmul %1, %3, %cst {dimension_numbers = #tpu.dot_dimension_numbers<[1], [0], [0], [1], [0, 0, 1, 1], [], []>} : vector<64x8xbf16>, vector<8x128xbf16>, vector<64x128xf32> -> vector<64x128xf32>
    %c0_5 = arith.constant 0 : index
    %c0_6 = arith.constant 0 : index
    %5 = vector.load %arg4[%c0_5, %c0_6] : memref<1x128xf32, #tpu.memory_space<vmem>>, vector<1x128xf32>
    %6 = vector.broadcast %5 : vector<1x128xf32> to vector<64x128xf32>
    %7 = arith.mulf %4, %6 : vector<64x128xf32>
    %c0_7 = arith.constant 0 : index
    %c0_8 = arith.constant 0 : index
    %8 = vector.load %arg5[%c0_7, %c0_8] : memref<1x128xf32, #tpu.memory_space<vmem>>, vector<1x128xf32>
    %9 = vector.broadcast %8 : vector<1x128xf32> to vector<64x128xf32>
    %10 = arith.addf %7, %9 : vector<64x128xf32>
    %cst_9 = arith.constant 0.000000e+00 : f32
    %11 = vector.broadcast %cst_9 : f32 to vector<64x128xf32>
    %12 = arith.maximumf %10, %11 : vector<64x128xf32>
    %13 = vector.shape_cast %12 : vector<64x128xf32> to vector<1x64x128xf32>
    %14 = arith.truncf %13 : vector<1x64x128xf32> to vector<1x64x128xbf16>
    %c0_10 = arith.constant 0 : index
    %c0_11 = arith.constant 0 : index
    %c0_12 = arith.constant 0 : index
    %15 = vector.load %arg12[%c0_10, %c0_11, %c0_12] : memref<1x64x128xbf16, #tpu.memory_space<vmem>>, vector<1x64x128xbf16>
    tpu.vector_store %arg12[%c0_10, %c0_11, %c0_12], %14 {strides = array<i32>} : memref<1x64x128xbf16, #tpu.memory_space<vmem>>, vector<1x64x128xbf16>,
    %16 = arith.truncf %12 : vector<64x128xf32> to vector<64x128xbf16>
    %c0_13 = arith.constant 0 : index
    %c0_14 = arith.constant 0 : index
    %17 = vector.load %arg6[%c0_13, %c0_14] : memref<128x128xbf16, #tpu.memory_space<vmem>>, vector<128x128xbf16>
    %cst_15 = arith.constant dense<0.000000e+00> : vector<64x128xf32>
    %18 = tpu.matmul %16, %17, %cst_15 {dimension_numbers = #tpu.dot_dimension_numbers<[1], [0], [0], [1], [0, 0, 1, 1], [], []>} : vector<64x128xbf16>, vector<128x128xbf16>, vector<64x128xf32> -> vector<64x128xf32>
    %c0_16 = arith.constant 0 : index
    %c0_17 = arith.constant 0 : index
    %19 = vector.load %arg7[%c0_16, %c0_17] : memref<1x128xf32, #tpu.memory_space<vmem>>, vector<1x128xf32>
    %20 = vector.broadcast %19 : vector<1x128xf32> to vector<64x128xf32>
    %21 = arith.mulf %18, %20 : vector<64x128xf32>
    %c0_18 = arith.constant 0 : index
    %c0_19 = arith.constant 0 : index
    %22 = vector.load %arg8[%c0_18, %c0_19] : memref<1x128xf32, #tpu.memory_space<vmem>>, vector<1x128xf32>
    %23 = vector.broadcast %22 : vector<1x128xf32> to vector<64x128xf32>
    %24 = arith.addf %21, %23 : vector<64x128xf32>
    %cst_20 = arith.constant 0.000000e+00 : f32
    %25 = vector.broadcast %cst_20 : f32 to vector<64x128xf32>
    %26 = arith.maximumf %24, %25 : vector<64x128xf32>
    %27 = vector.shape_cast %26 : vector<64x128xf32> to vector<1x64x128xf32>
    %28 = arith.truncf %27 : vector<1x64x128xf32> to vector<1x64x128xbf16>
    %c0_21 = arith.constant 0 : index
    %c0_22 = arith.constant 0 : index
    %c0_23 = arith.constant 0 : index
    %29 = vector.load %arg13[%c0_21, %c0_22, %c0_23] : memref<1x64x128xbf16, #tpu.memory_space<vmem>>, vector<1x64x128xbf16>
    tpu.vector_store %arg13[%c0_21, %c0_22, %c0_23], %28 {strides = array<i32>} : memref<1x64x128xbf16, #tpu.memory_space<vmem>>, vector<1x64x128xbf16>,
    %30 = arith.truncf %26 : vector<64x128xf32> to vector<64x128xbf16>
    %c0_24 = arith.constant 0 : index
    %c0_25 = arith.constant 0 : index
    %31 = vector.load %arg9[%c0_24, %c0_25] : memref<128x128xbf16, #tpu.memory_space<vmem>>, vector<128x128xbf16>
    %cst_26 = arith.constant dense<0.000000e+00> : vector<64x128xf32>
    %32 = tpu.matmul %30, %31, %cst_26 {dimension_numbers = #tpu.dot_dimension_numbers<[1], [0], [0], [1], [0, 0, 1, 1], [], []>} : vector<64x128xbf16>, vector<128x128xbf16>, vector<64x128xf32> -> vector<64x128xf32>
    %c0_27 = arith.constant 0 : index
    %c0_28 = arith.constant 0 : index
    %33 = vector.load %arg10[%c0_27, %c0_28] : memref<1x128xf32, #tpu.memory_space<vmem>>, vector<1x128xf32>
    %34 = vector.broadcast %33 : vector<1x128xf32> to vector<64x128xf32>
    %35 = arith.mulf %32, %34 : vector<64x128xf32>
    %c0_29 = arith.constant 0 : index
    %c0_30 = arith.constant 0 : index
    %36 = vector.load %arg11[%c0_29, %c0_30] : memref<1x128xf32, #tpu.memory_space<vmem>>, vector<1x128xf32>
    %37 = vector.broadcast %36 : vector<1x128xf32> to vector<64x128xf32>
    %38 = arith.addf %35, %37 : vector<64x128xf32>
    %cst_31 = arith.constant 0.000000e+00 : f32
    %39 = vector.broadcast %cst_31 : f32 to vector<64x128xf32>
    %40 = arith.maximumf %38, %39 : vector<64x128xf32>
    %41 = vector.shape_cast %40 : vector<64x128xf32> to vector<1x64x128xf32>
    %42 = arith.truncf %41 : vector<1x64x128xf32> to vector<1x64x128xbf16>
    %c0_32 = arith.constant 0 : index
    %c0_33 = arith.constant 0 : index
    %c0_34 = arith.constant 0 : index
    %43 = vector.load %arg14[%c0_32, %c0_33, %c0_34] : memref<1x64x128xbf16, #tpu.memory_space<vmem>>, vector<1x64x128xbf16>
    tpu.vector_store %arg14[%c0_32, %c0_33, %c0_34], %42 {strides = array<i32>} : memref<1x64x128xbf16, #tpu.memory_space<vmem>>, vector<1x64x128xbf16>,
    return
  }
  func.func @transform_0(%arg0: i32, %arg1: i32) -> (i32, i32, i32) {
    %c0_i32 = arith.constant 0 : i32
    %c0_i32_0 = arith.constant 0 : i32
    return %arg0, %arg1, %c0_i32 : i32, i32, i32
  }
  func.func @transform_1(%arg0: i32, %arg1: i32) -> (i32, i32, i32) {
    %c0_i32 = arith.constant 0 : i32
    %c0_i32_0 = arith.constant 0 : i32
    %c0_i32_1 = arith.constant 0 : i32
    return %arg0, %c0_i32, %c0_i32_0 : i32, i32, i32
  }
  func.func @transform_2(%arg0: i32, %arg1: i32) -> (i32, i32) {
    %c0_i32 = arith.constant 0 : i32
    %c0_i32_0 = arith.constant 0 : i32
    %c0_i32_1 = arith.constant 0 : i32
    return %c0_i32, %c0_i32_0 : i32, i32
  }
  func.func @transform_3(%arg0: i32, %arg1: i32) -> (i32, i32) {
    %c0_i32 = arith.constant 0 : i32
    %c0_i32_0 = arith.constant 0 : i32
    %c0_i32_1 = arith.constant 0 : i32
    return %c0_i32, %c0_i32_0 : i32, i32
  }
  func.func @transform_4(%arg0: i32, %arg1: i32) -> (i32, i32) {
    %c0_i32 = arith.constant 0 : i32
    %c0_i32_0 = arith.constant 0 : i32
    %c0_i32_1 = arith.constant 0 : i32
    return %c0_i32, %c0_i32_0 : i32, i32
  }
  func.func @transform_5(%arg0: i32, %arg1: i32) -> (i32, i32) {
    %c0_i32 = arith.constant 0 : i32
    %c0_i32_0 = arith.constant 0 : i32
    %c0_i32_1 = arith.constant 0 : i32
    return %c0_i32, %c0_i32_0 : i32, i32
  }
  func.func @transform_6(%arg0: i32, %arg1: i32) -> (i32, i32) {
    %c0_i32 = arith.constant 0 : i32
    %c0_i32_0 = arith.constant 0 : i32
    %c0_i32_1 = arith.constant 0 : i32
    return %c0_i32, %c0_i32_0 : i32, i32
  }
  func.func @transform_7(%arg0: i32, %arg1: i32) -> (i32, i32) {
    %c0_i32 = arith.constant 0 : i32
    %c0_i32_0 = arith.constant 0 : i32
    %c0_i32_1 = arith.constant 0 : i32
    return %c0_i32, %c0_i32_0 : i32, i32
  }
  func.func @transform_8(%arg0: i32, %arg1: i32) -> (i32, i32) {
    %c0_i32 = arith.constant 0 : i32
    %c0_i32_0 = arith.constant 0 : i32
    %c0_i32_1 = arith.constant 0 : i32
    return %c0_i32, %c0_i32_0 : i32, i32
  }
  func.func @transform_9(%arg0: i32, %arg1: i32) -> (i32, i32) {
    %c0_i32 = arith.constant 0 : i32
    %c0_i32_0 = arith.constant 0 : i32
    %c0_i32_1 = arith.constant 0 : i32
    return %c0_i32, %c0_i32_0 : i32, i32
  }
  func.func @transform_10(%arg0: i32, %arg1: i32) -> (i32, i32, i32) {
    %c0_i32 = arith.constant 0 : i32
    %c0_i32_0 = arith.constant 0 : i32
    return %arg0, %arg1, %c0_i32 : i32, i32, i32
  }
  func.func @transform_11(%arg0: i32, %arg1: i32) -> (i32, i32, i32) {
    %c0_i32 = arith.constant 0 : i32
    %c0_i32_0 = arith.constant 0 : i32
    return %arg0, %arg1, %c0_i32 : i32, i32, i32
  }
  func.func @transform_12(%arg0: i32, %arg1: i32) -> (i32, i32, i32) {
    %c0_i32 = arith.constant 0 : i32
    %c0_i32_0 = arith.constant 0 : i32
    return %arg0, %arg1, %c0_i32 : i32, i32, i32
  }
}

module attributes {stable_mosaic.version = 11 : i64} {
  func.func @_conv4_max_kernel(%arg0: i32, %arg1: i32, %arg2: memref<1x64x128xbf16, #tpu.memory_space<vmem>>, %arg3: memref<1x128x512xbf16, #tpu.memory_space<vmem>>, %arg4: memref<1x512xf32, #tpu.memory_space<vmem>>, %arg5: memref<1x512xf32, #tpu.memory_space<vmem>>, %arg6: memref<512x2048xbf16, #tpu.memory_space<vmem>>, %arg7: memref<1x2048xf32, #tpu.memory_space<vmem>>, %arg8: memref<1x2048xf32, #tpu.memory_space<vmem>>, %arg9: memref<1x64x512xbf16, #tpu.memory_space<vmem>>, %arg10: memref<1x1x2048xf32, #tpu.memory_space<vmem>>) attributes {dimension_semantics = [#tpu.dimension_semantics<parallel>, #tpu.dimension_semantics<arbitrary>], iteration_bounds = array<i64: 2, 1>, scalar_prefetch = 0 : i64, scratch_operands = 0 : i64, tpu.core_type = #tpu.core_type<tc>, window_params = [{transform_indices = @transform_0, window_bounds = array<i64: 1, 64, 128>}, {transform_indices = @transform_1, window_bounds = array<i64: 1, 128, 512>}, {pipeline_mode = #tpu.pipeline_mode<synchronous>, transform_indices = @transform_2, window_bounds = array<i64: 1, 512>}, {pipeline_mode = #tpu.pipeline_mode<synchronous>, transform_indices = @transform_3, window_bounds = array<i64: 1, 512>}, {pipeline_mode = #tpu.pipeline_mode<synchronous>, transform_indices = @transform_4, window_bounds = array<i64: 512, 2048>}, {pipeline_mode = #tpu.pipeline_mode<synchronous>, transform_indices = @transform_5, window_bounds = array<i64: 1, 2048>}, {pipeline_mode = #tpu.pipeline_mode<synchronous>, transform_indices = @transform_6, window_bounds = array<i64: 1, 2048>}, {transform_indices = @transform_7, window_bounds = array<i64: 1, 64, 512>}, {transform_indices = @transform_8, window_bounds = array<i64: 1, 1, 2048>}]} {
    %c0 = arith.constant 0 : index
    %c0_0 = arith.constant 0 : index
    %c0_1 = arith.constant 0 : index
    %0 = vector.load %arg2[%c0, %c0_0, %c0_1] : memref<1x64x128xbf16, #tpu.memory_space<vmem>>, vector<1x64x128xbf16>
    %1 = vector.shape_cast %0 : vector<1x64x128xbf16> to vector<64x128xbf16>
    %c0_2 = arith.constant 0 : index
    %c0_3 = arith.constant 0 : index
    %c0_4 = arith.constant 0 : index
    %2 = vector.load %arg3[%c0_2, %c0_3, %c0_4] : memref<1x128x512xbf16, #tpu.memory_space<vmem>>, vector<1x128x512xbf16>
    %3 = vector.shape_cast %2 : vector<1x128x512xbf16> to vector<128x512xbf16>
    %cst = arith.constant dense<0.000000e+00> : vector<64x512xf32>
    %4 = tpu.matmul %1, %3, %cst {dimension_numbers = #tpu.dot_dimension_numbers<[1], [0], [0], [1], [0, 0, 1, 1], [], []>} : vector<64x128xbf16>, vector<128x512xbf16>, vector<64x512xf32> -> vector<64x512xf32>
    %c0_5 = arith.constant 0 : index
    %c0_6 = arith.constant 0 : index
    %5 = vector.load %arg4[%c0_5, %c0_6] : memref<1x512xf32, #tpu.memory_space<vmem>>, vector<1x512xf32>
    %6 = vector.broadcast %5 : vector<1x512xf32> to vector<64x512xf32>
    %7 = arith.mulf %4, %6 : vector<64x512xf32>
    %c0_7 = arith.constant 0 : index
    %c0_8 = arith.constant 0 : index
    %8 = vector.load %arg5[%c0_7, %c0_8] : memref<1x512xf32, #tpu.memory_space<vmem>>, vector<1x512xf32>
    %9 = vector.broadcast %8 : vector<1x512xf32> to vector<64x512xf32>
    %10 = arith.addf %7, %9 : vector<64x512xf32>
    %cst_9 = arith.constant 0.000000e+00 : f32
    %11 = vector.broadcast %cst_9 : f32 to vector<64x512xf32>
    %12 = arith.maximumf %10, %11 : vector<64x512xf32>
    %13 = vector.shape_cast %12 : vector<64x512xf32> to vector<1x64x512xf32>
    %14 = arith.truncf %13 : vector<1x64x512xf32> to vector<1x64x512xbf16>
    %c0_10 = arith.constant 0 : index
    %c0_11 = arith.constant 0 : index
    %c0_12 = arith.constant 0 : index
    %15 = vector.load %arg9[%c0_10, %c0_11, %c0_12] : memref<1x64x512xbf16, #tpu.memory_space<vmem>>, vector<1x64x512xbf16>
    tpu.vector_store %arg9[%c0_10, %c0_11, %c0_12], %14 {strides = array<i32>} : memref<1x64x512xbf16, #tpu.memory_space<vmem>>, vector<1x64x512xbf16>,
    %16 = arith.truncf %12 : vector<64x512xf32> to vector<64x512xbf16>
    %c0_13 = arith.constant 0 : index
    %c0_14 = arith.constant 0 : index
    %17 = vector.load %arg6[%c0_13, %c0_14] : memref<512x2048xbf16, #tpu.memory_space<vmem>>, vector<512x2048xbf16>
    %cst_15 = arith.constant dense<0.000000e+00> : vector<64x2048xf32>
    %18 = tpu.matmul %16, %17, %cst_15 {dimension_numbers = #tpu.dot_dimension_numbers<[1], [0], [0], [1], [0, 0, 1, 1], [], []>} : vector<64x512xbf16>, vector<512x2048xbf16>, vector<64x2048xf32> -> vector<64x2048xf32>
    %c0_16 = arith.constant 0 : index
    %c0_17 = arith.constant 0 : index
    %19 = vector.load %arg7[%c0_16, %c0_17] : memref<1x2048xf32, #tpu.memory_space<vmem>>, vector<1x2048xf32>
    %20 = vector.broadcast %19 : vector<1x2048xf32> to vector<64x2048xf32>
    %21 = arith.mulf %18, %20 : vector<64x2048xf32>
    %c0_18 = arith.constant 0 : index
    %c0_19 = arith.constant 0 : index
    %22 = vector.load %arg8[%c0_18, %c0_19] : memref<1x2048xf32, #tpu.memory_space<vmem>>, vector<1x2048xf32>
    %23 = vector.broadcast %22 : vector<1x2048xf32> to vector<64x2048xf32>
    %24 = arith.addf %21, %23 : vector<64x2048xf32>
    %c0_i32 = arith.constant 0 : i32
    %25 = arith.cmpi eq, %arg1, %c0_i32 : i32
    %26 = arith.extui %25 : i1 to i32
    %c0_i32_20 = arith.constant 0 : i32
    %27 = arith.cmpi ne, %26, %c0_i32_20 : i32
    scf.if %27 {
      %cst_28 = arith.constant 0xFF800000 : f32
      %34 = vector.broadcast %cst_28 : f32 to vector<1x1x2048xf32>
      %c0_29 = arith.constant 0 : index
      %c0_30 = arith.constant 0 : index
      %c0_31 = arith.constant 0 : index
      %35 = vector.load %arg10[%c0_29, %c0_30, %c0_31] : memref<1x1x2048xf32, #tpu.memory_space<vmem>>, vector<1x1x2048xf32>
      tpu.vector_store %arg10[%c0_29, %c0_30, %c0_31], %34 {strides = array<i32>} : memref<1x1x2048xf32, #tpu.memory_space<vmem>>, vector<1x1x2048xf32>,
    } else {
    }
    %c0_21 = arith.constant 0 : index
    %c0_22 = arith.constant 0 : index
    %c0_23 = arith.constant 0 : index
    %28 = vector.load %arg10[%c0_21, %c0_22, %c0_23] : memref<1x1x2048xf32, #tpu.memory_space<vmem>>, vector<1x1x2048xf32>
    %cst_24 = arith.constant dense<0xFF800000> : vector<2048xf32>
    %29 = vector.multi_reduction <maximumf>, %24, %cst_24 [0] : vector<64x2048xf32> to vector<2048xf32>
    %30 = vector.shape_cast %29 : vector<2048xf32> to vector<1x2048xf32>
    %31 = vector.shape_cast %30 : vector<1x2048xf32> to vector<1x1x2048xf32>
    %32 = arith.maximumf %28, %31 : vector<1x1x2048xf32>
    %c0_25 = arith.constant 0 : index
    %c0_26 = arith.constant 0 : index
    %c0_27 = arith.constant 0 : index
    %33 = vector.load %arg10[%c0_25, %c0_26, %c0_27] : memref<1x1x2048xf32, #tpu.memory_space<vmem>>, vector<1x1x2048xf32>
    tpu.vector_store %arg10[%c0_25, %c0_26, %c0_27], %32 {strides = array<i32>} : memref<1x1x2048xf32, #tpu.memory_space<vmem>>, vector<1x1x2048xf32>,
    return
  }
  func.func @transform_0(%arg0: i32, %arg1: i32) -> (i32, i32, i32) {
    %c0_i32 = arith.constant 0 : i32
    %c0_i32_0 = arith.constant 0 : i32
    return %arg0, %arg1, %c0_i32 : i32, i32, i32
  }
  func.func @transform_1(%arg0: i32, %arg1: i32) -> (i32, i32, i32) {
    %c0_i32 = arith.constant 0 : i32
    %c0_i32_0 = arith.constant 0 : i32
    %c0_i32_1 = arith.constant 0 : i32
    return %arg0, %c0_i32, %c0_i32_0 : i32, i32, i32
  }
  func.func @transform_2(%arg0: i32, %arg1: i32) -> (i32, i32) {
    %c0_i32 = arith.constant 0 : i32
    %c0_i32_0 = arith.constant 0 : i32
    %c0_i32_1 = arith.constant 0 : i32
    return %c0_i32, %c0_i32_0 : i32, i32
  }
  func.func @transform_3(%arg0: i32, %arg1: i32) -> (i32, i32) {
    %c0_i32 = arith.constant 0 : i32
    %c0_i32_0 = arith.constant 0 : i32
    %c0_i32_1 = arith.constant 0 : i32
    return %c0_i32, %c0_i32_0 : i32, i32
  }
  func.func @transform_4(%arg0: i32, %arg1: i32) -> (i32, i32) {
    %c0_i32 = arith.constant 0 : i32
    %c0_i32_0 = arith.constant 0 : i32
    %c0_i32_1 = arith.constant 0 : i32
    return %c0_i32, %c0_i32_0 : i32, i32
  }
  func.func @transform_5(%arg0: i32, %arg1: i32) -> (i32, i32) {
    %c0_i32 = arith.constant 0 : i32
    %c0_i32_0 = arith.constant 0 : i32
    %c0_i32_1 = arith.constant 0 : i32
    return %c0_i32, %c0_i32_0 : i32, i32
  }
  func.func @transform_6(%arg0: i32, %arg1: i32) -> (i32, i32) {
    %c0_i32 = arith.constant 0 : i32
    %c0_i32_0 = arith.constant 0 : i32
    %c0_i32_1 = arith.constant 0 : i32
    return %c0_i32, %c0_i32_0 : i32, i32
  }
  func.func @transform_7(%arg0: i32, %arg1: i32) -> (i32, i32, i32) {
    %c0_i32 = arith.constant 0 : i32
    %c0_i32_0 = arith.constant 0 : i32
    return %arg0, %arg1, %c0_i32 : i32, i32, i32
  }
  func.func @transform_8(%arg0: i32, %arg1: i32) -> (i32, i32, i32) {
    %c0_i32 = arith.constant 0 : i32
    %c0_i32_0 = arith.constant 0 : i32
    %c0_i32_1 = arith.constant 0 : i32
    return %arg0, %c0_i32, %c0_i32_0 : i32, i32, i32
  }
}

module attributes {stable_mosaic.version = 11 : i64} {
  func.func @_convs1_kernel(%arg0: i32, %arg1: i32, %arg2: memref<1x1x256xf32, #tpu.memory_space<vmem>>, %arg3: memref<1x64x128xbf16, #tpu.memory_space<vmem>>, %arg4: memref<1x64x128xbf16, #tpu.memory_space<vmem>>, %arg5: memref<1x64x128xbf16, #tpu.memory_space<vmem>>, %arg6: memref<1x64x512xbf16, #tpu.memory_space<vmem>>, %arg7: memref<128x256xbf16, #tpu.memory_space<vmem>>, %arg8: memref<128x256xbf16, #tpu.memory_space<vmem>>, %arg9: memref<128x256xbf16, #tpu.memory_space<vmem>>, %arg10: memref<512x256xbf16, #tpu.memory_space<vmem>>, %arg11: memref<1x256xf32, #tpu.memory_space<vmem>>, %arg12: memref<1x256xf32, #tpu.memory_space<vmem>>, %arg13: memref<1x64x256xbf16, #tpu.memory_space<vmem>>) attributes {dimension_semantics = [#tpu.dimension_semantics<parallel>, #tpu.dimension_semantics<parallel>], iteration_bounds = array<i64: 2, 1>, scalar_prefetch = 0 : i64, scratch_operands = 0 : i64, tpu.core_type = #tpu.core_type<tc>, window_params = [{transform_indices = @transform_0, window_bounds = array<i64: 1, 1, 256>}, {transform_indices = @transform_1, window_bounds = array<i64: 1, 64, 128>}, {transform_indices = @transform_2, window_bounds = array<i64: 1, 64, 128>}, {transform_indices = @transform_3, window_bounds = array<i64: 1, 64, 128>}, {transform_indices = @transform_4, window_bounds = array<i64: 1, 64, 512>}, {pipeline_mode = #tpu.pipeline_mode<synchronous>, transform_indices = @transform_5, window_bounds = array<i64: 128, 256>}, {pipeline_mode = #tpu.pipeline_mode<synchronous>, transform_indices = @transform_6, window_bounds = array<i64: 128, 256>}, {pipeline_mode = #tpu.pipeline_mode<synchronous>, transform_indices = @transform_7, window_bounds = array<i64: 128, 256>}, {pipeline_mode = #tpu.pipeline_mode<synchronous>, transform_indices = @transform_8, window_bounds = array<i64: 512, 256>}, {pipeline_mode = #tpu.pipeline_mode<synchronous>, transform_indices = @transform_9, window_bounds = array<i64: 1, 256>}, {pipeline_mode = #tpu.pipeline_mode<synchronous>, transform_indices = @transform_10, window_bounds = array<i64: 1, 256>}, {transform_indices = @transform_11, window_bounds = array<i64: 1, 64, 256>}]} {
    %c0 = arith.constant 0 : index
    %c0_0 = arith.constant 0 : index
    %c0_1 = arith.constant 0 : index
    %0 = vector.load %arg3[%c0, %c0_0, %c0_1] : memref<1x64x128xbf16, #tpu.memory_space<vmem>>, vector<1x64x128xbf16>
    %1 = vector.shape_cast %0 : vector<1x64x128xbf16> to vector<64x128xbf16>
    %c0_2 = arith.constant 0 : index
    %c0_3 = arith.constant 0 : index
    %2 = vector.load %arg7[%c0_2, %c0_3] : memref<128x256xbf16, #tpu.memory_space<vmem>>, vector<128x256xbf16>
    %cst = arith.constant dense<0.000000e+00> : vector<64x256xf32>
    %3 = tpu.matmul %1, %2, %cst {dimension_numbers = #tpu.dot_dimension_numbers<[1], [0], [0], [1], [0, 0, 1, 1], [], []>} : vector<64x128xbf16>, vector<128x256xbf16>, vector<64x256xf32> -> vector<64x256xf32>
    %c0_4 = arith.constant 0 : index
    %c0_5 = arith.constant 0 : index
    %c0_6 = arith.constant 0 : index
    %4 = vector.load %arg4[%c0_4, %c0_5, %c0_6] : memref<1x64x128xbf16, #tpu.memory_space<vmem>>, vector<1x64x128xbf16>
    %5 = vector.shape_cast %4 : vector<1x64x128xbf16> to vector<64x128xbf16>
    %c0_7 = arith.constant 0 : index
    %c0_8 = arith.constant 0 : index
    %6 = vector.load %arg8[%c0_7, %c0_8] : memref<128x256xbf16, #tpu.memory_space<vmem>>, vector<128x256xbf16>
    %cst_9 = arith.constant dense<0.000000e+00> : vector<64x256xf32>
    %7 = tpu.matmul %5, %6, %cst_9 {dimension_numbers = #tpu.dot_dimension_numbers<[1], [0], [0], [1], [0, 0, 1, 1], [], []>} : vector<64x128xbf16>, vector<128x256xbf16>, vector<64x256xf32> -> vector<64x256xf32>
    %8 = arith.addf %3, %7 : vector<64x256xf32>
    %c0_10 = arith.constant 0 : index
    %c0_11 = arith.constant 0 : index
    %c0_12 = arith.constant 0 : index
    %9 = vector.load %arg5[%c0_10, %c0_11, %c0_12] : memref<1x64x128xbf16, #tpu.memory_space<vmem>>, vector<1x64x128xbf16>
    %10 = vector.shape_cast %9 : vector<1x64x128xbf16> to vector<64x128xbf16>
    %c0_13 = arith.constant 0 : index
    %c0_14 = arith.constant 0 : index
    %11 = vector.load %arg9[%c0_13, %c0_14] : memref<128x256xbf16, #tpu.memory_space<vmem>>, vector<128x256xbf16>
    %cst_15 = arith.constant dense<0.000000e+00> : vector<64x256xf32>
    %12 = tpu.matmul %10, %11, %cst_15 {dimension_numbers = #tpu.dot_dimension_numbers<[1], [0], [0], [1], [0, 0, 1, 1], [], []>} : vector<64x128xbf16>, vector<128x256xbf16>, vector<64x256xf32> -> vector<64x256xf32>
    %13 = arith.addf %8, %12 : vector<64x256xf32>
    %c0_16 = arith.constant 0 : index
    %c0_17 = arith.constant 0 : index
    %c0_18 = arith.constant 0 : index
    %14 = vector.load %arg6[%c0_16, %c0_17, %c0_18] : memref<1x64x512xbf16, #tpu.memory_space<vmem>>, vector<1x64x512xbf16>
    %15 = vector.shape_cast %14 : vector<1x64x512xbf16> to vector<64x512xbf16>
    %c0_19 = arith.constant 0 : index
    %c0_20 = arith.constant 0 : index
    %16 = vector.load %arg10[%c0_19, %c0_20] : memref<512x256xbf16, #tpu.memory_space<vmem>>, vector<512x256xbf16>
    %cst_21 = arith.constant dense<0.000000e+00> : vector<64x256xf32>
    %17 = tpu.matmul %15, %16, %cst_21 {dimension_numbers = #tpu.dot_dimension_numbers<[1], [0], [0], [1], [0, 0, 1, 1], [], []>} : vector<64x512xbf16>, vector<512x256xbf16>, vector<64x256xf32> -> vector<64x256xf32>
    %18 = arith.addf %13, %17 : vector<64x256xf32>
    %c0_22 = arith.constant 0 : index
    %c0_23 = arith.constant 0 : index
    %c0_24 = arith.constant 0 : index
    %19 = vector.load %arg2[%c0_22, %c0_23, %c0_24] : memref<1x1x256xf32, #tpu.memory_space<vmem>>, vector<1x1x256xf32>
    %20 = vector.shape_cast %19 : vector<1x1x256xf32> to vector<1x256xf32>
    %21 = vector.broadcast %20 : vector<1x256xf32> to vector<64x256xf32>
    %22 = arith.addf %18, %21 : vector<64x256xf32>
    %c0_25 = arith.constant 0 : index
    %c0_26 = arith.constant 0 : index
    %23 = vector.load %arg11[%c0_25, %c0_26] : memref<1x256xf32, #tpu.memory_space<vmem>>, vector<1x256xf32>
    %24 = vector.broadcast %23 : vector<1x256xf32> to vector<64x256xf32>
    %25 = arith.mulf %22, %24 : vector<64x256xf32>
    %c0_27 = arith.constant 0 : index
    %c0_28 = arith.constant 0 : index
    %26 = vector.load %arg12[%c0_27, %c0_28] : memref<1x256xf32, #tpu.memory_space<vmem>>, vector<1x256xf32>
    %27 = vector.broadcast %26 : vector<1x256xf32> to vector<64x256xf32>
    %28 = arith.addf %25, %27 : vector<64x256xf32>
    %cst_29 = arith.constant 0.000000e+00 : f32
    %29 = vector.broadcast %cst_29 : f32 to vector<64x256xf32>
    %30 = arith.maximumf %28, %29 : vector<64x256xf32>
    %31 = vector.shape_cast %30 : vector<64x256xf32> to vector<1x64x256xf32>
    %32 = arith.truncf %31 : vector<1x64x256xf32> to vector<1x64x256xbf16>
    %c0_30 = arith.constant 0 : index
    %c0_31 = arith.constant 0 : index
    %c0_32 = arith.constant 0 : index
    %33 = vector.load %arg13[%c0_30, %c0_31, %c0_32] : memref<1x64x256xbf16, #tpu.memory_space<vmem>>, vector<1x64x256xbf16>
    tpu.vector_store %arg13[%c0_30, %c0_31, %c0_32], %32 {strides = array<i32>} : memref<1x64x256xbf16, #tpu.memory_space<vmem>>, vector<1x64x256xbf16>,
    return
  }
  func.func @transform_0(%arg0: i32, %arg1: i32) -> (i32, i32, i32) {
    %c0_i32 = arith.constant 0 : i32
    %c0_i32_0 = arith.constant 0 : i32
    %c0_i32_1 = arith.constant 0 : i32
    return %arg0, %c0_i32, %c0_i32_0 : i32, i32, i32
  }
  func.func @transform_1(%arg0: i32, %arg1: i32) -> (i32, i32, i32) {
    %c0_i32 = arith.constant 0 : i32
    %c0_i32_0 = arith.constant 0 : i32
    return %arg0, %arg1, %c0_i32 : i32, i32, i32
  }
  func.func @transform_2(%arg0: i32, %arg1: i32) -> (i32, i32, i32) {
    %c0_i32 = arith.constant 0 : i32
    %c0_i32_0 = arith.constant 0 : i32
    return %arg0, %arg1, %c0_i32 : i32, i32, i32
  }
  func.func @transform_3(%arg0: i32, %arg1: i32) -> (i32, i32, i32) {
    %c0_i32 = arith.constant 0 : i32
    %c0_i32_0 = arith.constant 0 : i32
    return %arg0, %arg1, %c0_i32 : i32, i32, i32
  }
  func.func @transform_4(%arg0: i32, %arg1: i32) -> (i32, i32, i32) {
    %c0_i32 = arith.constant 0 : i32
    %c0_i32_0 = arith.constant 0 : i32
    return %arg0, %arg1, %c0_i32 : i32, i32, i32
  }
  func.func @transform_5(%arg0: i32, %arg1: i32) -> (i32, i32) {
    %c0_i32 = arith.constant 0 : i32
    %c0_i32_0 = arith.constant 0 : i32
    %c0_i32_1 = arith.constant 0 : i32
    return %c0_i32, %c0_i32_0 : i32, i32
  }
  func.func @transform_6(%arg0: i32, %arg1: i32) -> (i32, i32) {
    %c0_i32 = arith.constant 0 : i32
    %c0_i32_0 = arith.constant 0 : i32
    %c0_i32_1 = arith.constant 0 : i32
    return %c0_i32, %c0_i32_0 : i32, i32
  }
  func.func @transform_7(%arg0: i32, %arg1: i32) -> (i32, i32) {
    %c0_i32 = arith.constant 0 : i32
    %c0_i32_0 = arith.constant 0 : i32
    %c0_i32_1 = arith.constant 0 : i32
    return %c0_i32, %c0_i32_0 : i32, i32
  }
  func.func @transform_8(%arg0: i32, %arg1: i32) -> (i32, i32) {
    %c0_i32 = arith.constant 0 : i32
    %c0_i32_0 = arith.constant 0 : i32
    %c0_i32_1 = arith.constant 0 : i32
    return %c0_i32, %c0_i32_0 : i32, i32
  }
  func.func @transform_9(%arg0: i32, %arg1: i32) -> (i32, i32) {
    %c0_i32 = arith.constant 0 : i32
    %c0_i32_0 = arith.constant 0 : i32
    %c0_i32_1 = arith.constant 0 : i32
    return %c0_i32, %c0_i32_0 : i32, i32
  }
  func.func @transform_10(%arg0: i32, %arg1: i32) -> (i32, i32) {
    %c0_i32 = arith.constant 0 : i32
    %c0_i32_0 = arith.constant 0 : i32
    %c0_i32_1 = arith.constant 0 : i32
    return %c0_i32, %c0_i32_0 : i32, i32
  }
  func.func @transform_11(%arg0: i32, %arg1: i32) -> (i32, i32, i32) {
    %c0_i32 = arith.constant 0 : i32
    %c0_i32_0 = arith.constant 0 : i32
    return %arg0, %arg1, %c0_i32 : i32, i32, i32
  }
}

module attributes {stable_mosaic.version = 11 : i64} {
  func.func @_head_kernel(%arg0: i32, %arg1: memref<128x256xbf16, #tpu.memory_space<vmem>>, %arg2: memref<256x256xbf16, #tpu.memory_space<vmem>>, %arg3: memref<1x256xf32, #tpu.memory_space<vmem>>, %arg4: memref<1x256xf32, #tpu.memory_space<vmem>>, %arg5: memref<256x128xbf16, #tpu.memory_space<vmem>>, %arg6: memref<1x128xf32, #tpu.memory_space<vmem>>, %arg7: memref<1x128xf32, #tpu.memory_space<vmem>>, %arg8: memref<128x128xbf16, #tpu.memory_space<vmem>>, %arg9: memref<1x128xf32, #tpu.memory_space<vmem>>, %arg10: memref<128x128xf32, #tpu.memory_space<vmem>>) attributes {dimension_semantics = [#tpu.dimension_semantics<parallel>], iteration_bounds = array<i64: 1>, scalar_prefetch = 0 : i64, scratch_operands = 0 : i64, tpu.core_type = #tpu.core_type<tc>, window_params = [{transform_indices = @transform_0, window_bounds = array<i64: 128, 256>}, {pipeline_mode = #tpu.pipeline_mode<synchronous>, transform_indices = @transform_1, window_bounds = array<i64: 256, 256>}, {pipeline_mode = #tpu.pipeline_mode<synchronous>, transform_indices = @transform_2, window_bounds = array<i64: 1, 256>}, {pipeline_mode = #tpu.pipeline_mode<synchronous>, transform_indices = @transform_3, window_bounds = array<i64: 1, 256>}, {pipeline_mode = #tpu.pipeline_mode<synchronous>, transform_indices = @transform_4, window_bounds = array<i64: 256, 128>}, {pipeline_mode = #tpu.pipeline_mode<synchronous>, transform_indices = @transform_5, window_bounds = array<i64: 1, 128>}, {pipeline_mode = #tpu.pipeline_mode<synchronous>, transform_indices = @transform_6, window_bounds = array<i64: 1, 128>}, {pipeline_mode = #tpu.pipeline_mode<synchronous>, transform_indices = @transform_7, window_bounds = array<i64: 128, 128>}, {pipeline_mode = #tpu.pipeline_mode<synchronous>, transform_indices = @transform_8, window_bounds = array<i64: 1, 128>}, {transform_indices = @transform_9, window_bounds = array<i64: 128, 128>}]} {
    %c0 = arith.constant 0 : index
    %c0_0 = arith.constant 0 : index
    %0 = vector.load %arg1[%c0, %c0_0] : memref<128x256xbf16, #tpu.memory_space<vmem>>, vector<128x256xbf16>
    %c0_1 = arith.constant 0 : index
    %c0_2 = arith.constant 0 : index
    %1 = vector.load %arg2[%c0_1, %c0_2] : memref<256x256xbf16, #tpu.memory_space<vmem>>, vector<256x256xbf16>
    %cst = arith.constant dense<0.000000e+00> : vector<128x256xf32>
    %2 = tpu.matmul %0, %1, %cst {dimension_numbers = #tpu.dot_dimension_numbers<[1], [0], [0], [1], [0, 0, 1, 1], [], []>} : vector<128x256xbf16>, vector<256x256xbf16>, vector<128x256xf32> -> vector<128x256xf32>
    %c0_3 = arith.constant 0 : index
    %c0_4 = arith.constant 0 : index
    %3 = vector.load %arg3[%c0_3, %c0_4] : memref<1x256xf32, #tpu.memory_space<vmem>>, vector<1x256xf32>
    %4 = vector.broadcast %3 : vector<1x256xf32> to vector<128x256xf32>
    %5 = arith.mulf %2, %4 : vector<128x256xf32>
    %c0_5 = arith.constant 0 : index
    %c0_6 = arith.constant 0 : index
    %6 = vector.load %arg4[%c0_5, %c0_6] : memref<1x256xf32, #tpu.memory_space<vmem>>, vector<1x256xf32>
    %7 = vector.broadcast %6 : vector<1x256xf32> to vector<128x256xf32>
    %8 = arith.addf %5, %7 : vector<128x256xf32>
    %cst_7 = arith.constant 0.000000e+00 : f32
    %9 = vector.broadcast %cst_7 : f32 to vector<128x256xf32>
    %10 = arith.maximumf %8, %9 : vector<128x256xf32>
    %11 = arith.truncf %10 : vector<128x256xf32> to vector<128x256xbf16>
    %c0_8 = arith.constant 0 : index
    %c0_9 = arith.constant 0 : index
    %12 = vector.load %arg5[%c0_8, %c0_9] : memref<256x128xbf16, #tpu.memory_space<vmem>>, vector<256x128xbf16>
    %cst_10 = arith.constant dense<0.000000e+00> : vector<128x128xf32>
    %13 = tpu.matmul %11, %12, %cst_10 {dimension_numbers = #tpu.dot_dimension_numbers<[1], [0], [0], [1], [0, 0, 1, 1], [], []>} : vector<128x256xbf16>, vector<256x128xbf16>, vector<128x128xf32> -> vector<128x128xf32>
    %c0_11 = arith.constant 0 : index
    %c0_12 = arith.constant 0 : index
    %14 = vector.load %arg6[%c0_11, %c0_12] : memref<1x128xf32, #tpu.memory_space<vmem>>, vector<1x128xf32>
    %15 = vector.broadcast %14 : vector<1x128xf32> to vector<128x128xf32>
    %16 = arith.mulf %13, %15 : vector<128x128xf32>
    %c0_13 = arith.constant 0 : index
    %c0_14 = arith.constant 0 : index
    %17 = vector.load %arg7[%c0_13, %c0_14] : memref<1x128xf32, #tpu.memory_space<vmem>>, vector<1x128xf32>
    %18 = vector.broadcast %17 : vector<1x128xf32> to vector<128x128xf32>
    %19 = arith.addf %16, %18 : vector<128x128xf32>
    %cst_15 = arith.constant 0.000000e+00 : f32
    %20 = vector.broadcast %cst_15 : f32 to vector<128x128xf32>
    %21 = arith.maximumf %19, %20 : vector<128x128xf32>
    %22 = arith.truncf %21 : vector<128x128xf32> to vector<128x128xbf16>
    %c0_16 = arith.constant 0 : index
    %c0_17 = arith.constant 0 : index
    %23 = vector.load %arg8[%c0_16, %c0_17] : memref<128x128xbf16, #tpu.memory_space<vmem>>, vector<128x128xbf16>
    %cst_18 = arith.constant dense<0.000000e+00> : vector<128x128xf32>
    %24 = tpu.matmul %22, %23, %cst_18 {dimension_numbers = #tpu.dot_dimension_numbers<[1], [0], [0], [1], [0, 0, 1, 1], [], []>} : vector<128x128xbf16>, vector<128x128xbf16>, vector<128x128xf32> -> vector<128x128xf32>
    %c0_19 = arith.constant 0 : index
    %c0_20 = arith.constant 0 : index
    %25 = vector.load %arg9[%c0_19, %c0_20] : memref<1x128xf32, #tpu.memory_space<vmem>>, vector<1x128xf32>
    %26 = vector.broadcast %25 : vector<1x128xf32> to vector<128x128xf32>
    %27 = arith.addf %24, %26 : vector<128x128xf32>
    %c0_21 = arith.constant 0 : index
    %c0_22 = arith.constant 0 : index
    %28 = vector.load %arg10[%c0_21, %c0_22] : memref<128x128xf32, #tpu.memory_space<vmem>>, vector<128x128xf32>
    tpu.vector_store %arg10[%c0_21, %c0_22], %27 {strides = array<i32>} : memref<128x128xf32, #tpu.memory_space<vmem>>, vector<128x128xf32>,
    return
  }
  func.func @transform_0(%arg0: i32) -> (i32, i32) {
    %c0_i32 = arith.constant 0 : i32
    %c0_i32_0 = arith.constant 0 : i32
    return %arg0, %c0_i32 : i32, i32
  }
  func.func @transform_1(%arg0: i32) -> (i32, i32) {
    %c0_i32 = arith.constant 0 : i32
    %c0_i32_0 = arith.constant 0 : i32
    %c0_i32_1 = arith.constant 0 : i32
    return %c0_i32, %c0_i32_0 : i32, i32
  }
  func.func @transform_2(%arg0: i32) -> (i32, i32) {
    %c0_i32 = arith.constant 0 : i32
    %c0_i32_0 = arith.constant 0 : i32
    %c0_i32_1 = arith.constant 0 : i32
    return %c0_i32, %c0_i32_0 : i32, i32
  }
  func.func @transform_3(%arg0: i32) -> (i32, i32) {
    %c0_i32 = arith.constant 0 : i32
    %c0_i32_0 = arith.constant 0 : i32
    %c0_i32_1 = arith.constant 0 : i32
    return %c0_i32, %c0_i32_0 : i32, i32
  }
  func.func @transform_4(%arg0: i32) -> (i32, i32) {
    %c0_i32 = arith.constant 0 : i32
    %c0_i32_0 = arith.constant 0 : i32
    %c0_i32_1 = arith.constant 0 : i32
    return %c0_i32, %c0_i32_0 : i32, i32
  }
  func.func @transform_5(%arg0: i32) -> (i32, i32) {
    %c0_i32 = arith.constant 0 : i32
    %c0_i32_0 = arith.constant 0 : i32
    %c0_i32_1 = arith.constant 0 : i32
    return %c0_i32, %c0_i32_0 : i32, i32
  }
  func.func @transform_6(%arg0: i32) -> (i32, i32) {
    %c0_i32 = arith.constant 0 : i32
    %c0_i32_0 = arith.constant 0 : i32
    %c0_i32_1 = arith.constant 0 : i32
    return %c0_i32, %c0_i32_0 : i32, i32
  }
  func.func @transform_7(%arg0: i32) -> (i32, i32) {
    %c0_i32 = arith.constant 0 : i32
    %c0_i32_0 = arith.constant 0 : i32
    %c0_i32_1 = arith.constant 0 : i32
    return %c0_i32, %c0_i32_0 : i32, i32
  }
  func.func @transform_8(%arg0: i32) -> (i32, i32) {
    %c0_i32 = arith.constant 0 : i32
    %c0_i32_0 = arith.constant 0 : i32
    %c0_i32_1 = arith.constant 0 : i32
    return %c0_i32, %c0_i32_0 : i32, i32
  }
  func.func @transform_9(%arg0: i32) -> (i32, i32) {
    %c0_i32 = arith.constant 0 : i32
    %c0_i32_0 = arith.constant 0 : i32
    return %arg0, %c0_i32 : i32, i32
  }
}

</mosaic_0001>

<bundles_post_ra>
// kernel: pointnet_partseg_forward.7
= control target key start
LH: loop header
LB: loop body
LE: loop exit
PB: predicated region body
PF: predicated region fallthrough
CT: control target
= control target key end

     0   :  { %s1708_s21 = smov 0   ;;  %s1710_s22 = smov 0   ;;  %s1826_s0 = inlined_call_operand.vmem [shape: bf16[2,64,8], index: 0, kind: input, shape index: {}]   ;;  %s1827_s1 = inlined_call_operand.vmem [shape: bf16[2,8,128], index: 1, kind: input, shape index: {}]   ;;  %s1828_s2 = inlined_call_operand.vmem [shape: f32[1,128], index: 2, kind: input, shape index: {}]   ;;  %s1829_s3 = inlined_call_operand.vmem [shape: f32[1,128], index: 3, kind: input, shape index: {}]   ;;  %s1830_s4 = inlined_call_operand.vmem [shape: bf16[128,128], index: 4, kind: input, shape index: {}]   ;;  %s1831_s5 = inlined_call_operand.vmem [shape: f32[1,128], index: 5, kind: input, shape index: {}]   ;;  %s1832_s6 = inlined_call_operand.vmem [shape: f32[1,128], index: 6, kind: input, shape index: {}]   ;;  %s1833_s7 = inlined_call_operand.vmem [shape: bf16[128,128], index: 7, kind: input, shape index: {}]   ;;  %s1834_s8 = inlined_call_operand.vmem [shape: f32[1,128], index: 8, kind: input, shape index: {}]   ;;  %s1835_s9 = inlined_call_operand.vmem [shape: f32[1,128], index: 9, kind: input, shape index: {}]   ;;  %s1836_s10 = inlined_call_operand.vmem [shape: bf16[2,64,128], index: 10, kind: output, shape index: {0}]   ;;  %s1837_s11 = inlined_call_operand.vmem [shape: bf16[2,64,128], index: 11, kind: output, shape index: {1}]   ;;  %s1838_s12 = inlined_call_operand.vmem [shape: bf16[2,64,128], index: 12, kind: output, shape index: {2}]  }
   0x1   :  { %s1712_s23 = smov 0  }
   0x2 LB: > { %s35_s24 = sadd.s32 1, %s1637_s22  ;;  %p1324_p0 = scmp.ge.s32.totalorder %s1641_s23, 1  ;;  %s1641_s23 = sphi %s1712_s23, %s23_s23   ;;  %s1637_s22 = sphi %s1710_s22, %s1840_s22   ;;  %s1633_s21 = sphi %s1708_s21, %s1839_s21  }
   0x3   : > { %p37_p1 = scmp.ge.s32.totalorder %s35_s24, 2  ;;  %p401_p2 = scmp.lt.s32.totalorder %s1641_s23, 3 }
   0x5   : > { %s1842_s24 = smov (%p37_p1, %s35_s24), 0  ;;  %p402_p3 = pnand %p1324_p0, %p401_p2 }
   0x6   : > { %p474_p4 = scmp.lt.s32.totalorder (!%p402_p3), %s1633_s21, 1 }
   0x7   : > { %405 = sbr.rel (%p402_p3) target bundleno = 652 (0x28c), region = 60 }
   0xc   : > { %v1603_v0 = vld [vmem:[%s1830_s4 + $0x38] sm:$0xff]   ;;  %s1844_s21 = smov (!%p474_p4, %s1633_s21), 1  ;;  %v1604_v1 = vld [vmem:[%s1830_s4 + $0x30] sm:$0xff]   ;;  %vm560_vm0 = vcmask 1043456   ;;  %vm547_vm1 = vcmask 64512   ;;  %v1605_v2 = vld [vmem:[%s1830_s4 + $0x28] sm:$0xff]  }
   0xd   : > { %1526 = vmatprep.subr.bf16.mxu1 %v1603_v0  ;;  %s1732_s29 = sshll.u32 %s1844_s21, 5  ;;  %s1327_s30 = sshll.u32 %s1844_s21, 2  ;;  %v1606_v4 = vld [vmem:[%s1830_s4 + $0x20] sm:$0xff]   ;;  %v1607_v10 = vld [vmem:[%s1830_s4 + $0x18] sm:$0xff]   ;;  %v1608_v11 = vld [vmem:[%s1830_s4 + $0x10] sm:$0xff]  }
   0xe   : > { %1527 = vmatpush3.bf16.msra.mxu1 %v1603_v0  ;;  %s481_s17 = scalar_lea.vmem %s1826_s0, %s1732_s29  ;;  %s486_s20 = scalar_lea.vmem %s1827_s1, %s1327_s30  ;;  %v1609_v12 = vld [vmem:[%s1830_s4 + $0x8] sm:$0xff]   ;;  %v1610_v13 = vld [vmem:[%s1830_s4] sm:$0xff]   ;;  %v1611_v14 = vld [vmem:[%s1833_s7 + $0x38] sm:$0xff]  }
   0xf   : > { %1528 = vmatprep.subr.bf16.mxu1 %v1604_v1  ;;  %v526_v3 = vld [vmem:[%s486_s20] sm:$0xf]  ;;  %v1600_v7 = vld [vmem:[%s481_s17 + $0x8] sm:$0xff]   ;;  %v1601_v8 = vld [vmem:[%s481_s17 + $0x10] sm:$0xff]   ;;  %s505_s18 = scalar_lea.vmem %s1837_s11, %s1732_s29  ;;  %s515_s28 = scalar_lea.vmem %s1838_s12, %s1732_s29 }
  0x10   : > { %1574 = vmatprep.subr.msk.bf16.mxu0 %vm560_vm0, %v526_v3  ;;  %v562_v5 = vsel %vm560_vm0, %v526_v3, 0  ;;  %v1599_v6 = vld [vmem:[%s481_s17] sm:$0xff]   ;;  %v1602_v9 = vld [vmem:[%s481_s17 + $0x18] sm:$0xff]   ;;  %v1612_v15 = vld [vmem:[%s1833_s7 + $0x30] sm:$0xff]   ;;  %s495_s17 = scalar_lea.vmem %s1836_s10, %s1732_s29 }
  0x11   : > { %1517 = vmatpush3.bf16.msra.mxu0 %v562_v5  ;;  %1518 = vmatprep.mubr.msk.bf16.mxu0 %vm547_vm1, %v1599_v6  ;;  %v1613_v16 = vld [vmem:[%s1833_s7 + $0x28] sm:$0xff]   ;;  %v1614_v17 = vld [vmem:[%s1833_s7 + $0x20] sm:$0xff]   ;;  %v1615_v56 = vld [vmem:[%s1833_s7 + $0x18] sm:$0xff]  }
  0x12   : > { %1529 = vmatpush3.bf16.msra.mxu1 %v1604_v1  ;;  %1550 = vmatprep.subr.bf16.mxu0 %v1611_v14  ;;  %v1342_v18 = vld [vmem:[%s1828_s2] ss:$0 sm:$0xff]  ;;  %v1616_v57 = vld [vmem:[%s1833_s7 + $0x10] sm:$0xff]   ;;  %v1617_v58 = vld [vmem:[%s1833_s7 + $0x8] sm:$0xff]  }
  0x13   : > { %1530 = vmatprep.subr.bf16.mxu1 %v1605_v2  ;;  %v1343_v21 = vld [vmem:[%s1829_s3] ss:$0 sm:$0xff] }
  0x14   : > { %1519 = vmatmul.mubr.msk.bf16.vlgmr.msra.gmra.mxu0 %vm547_vm1, %v1600_v7  ;;  %v1618_v59 = vld [vmem:[%s1833_s7] sm:$0xff]  }
  0x15   : > { %1522 = vmatprep.mubr.msk.bf16.mxu0 %vm547_vm1, %v1601_v8  ;;  %1551 = vmatpush3.bf16.msra.mxu0 %v1611_v14  ;;  %v1360_v60 = vld [vmem:[%s1831_s5] ss:$0 sm:$0xff] }
  0x16   : > { %1531 = vmatpush3.bf16.msra.mxu1 %v1605_v2  ;;  %1552 = vmatprep.subr.bf16.mxu0 %v1612_v15  ;;  %v1361_v63 = vld [vmem:[%s1832_s6] ss:$0 sm:$0xff] }
  0x17   : > { %1532 = vmatprep.subr.bf16.mxu1 %v1606_v4 }
  0x19   : > { %1553 = vmatpush3.bf16.msra.mxu0 %v1612_v15 }
  0x1a   : > { %1533 = vmatpush3.bf16.msra.mxu1 %v1606_v4  ;;  %1554 = vmatprep.subr.bf16.mxu0 %v1613_v16 }
  0x1b   : > { %1534 = vmatprep.subr.bf16.mxu1 %v1607_v10 }
  0x1c   : > { %1523 = vmatmul.mubr.msk.bf16.gmra.mxu0 %vm547_vm1, %v1602_v9 }
  0x1d   : > { %1555 = vmatpush3.bf16.msra.mxu0 %v1613_v16 }
  0x1e   : > { %1535 = vmatpush3.bf16.msra.mxu1 %v1607_v10  ;;  %1556 = vmatprep.subr.bf16.mxu0 %v1614_v17 }
  0x1f   : > { %1536 = vmatprep.subr.bf16.mxu1 %v1608_v11 }
  0x21   : > { %1557 = vmatpush3.bf16.msra.mxu0 %v1614_v17 }
  0x22   : > { %1537 = vmatpush3.bf16.msra.mxu1 %v1608_v11  ;;  %1558 = vmatprep.subr.bf16.mxu0 %v1615_v56 }
  0x23   : > { %1538 = vmatprep.subr.bf16.mxu1 %v1609_v12 }
  0x25   : > { %1559 = vmatpush3.bf16.msra.mxu0 %v1615_v56 }
  0x26   : > { %1539 = vmatpush3.bf16.msra.mxu1 %v1609_v12  ;;  %1560 = vmatprep.subr.bf16.mxu0 %v1616_v57 }
  0x27   : > { %1540 = vmatprep.subr.bf16.mxu1 %v1610_v13 }
  0x29   : > { %1561 = vmatpush3.bf16.msra.mxu0 %v1616_v57 }
  0x2a   : > { %1541 = vmatpush3.bf16.msra.mxu1 %v1610_v13  ;;  %1562 = vmatprep.subr.bf16.mxu0 %v1617_v58 }
  0x2d   : > { %1563 = vmatpush3.bf16.msra.mxu0 %v1617_v58 }
  0x2e   : > { %1564 = vmatprep.subr.bf16.mxu0 %v1618_v59 }
  0x31   : > { %1565 = vmatpush3.bf16.msra.mxu0 %v1618_v59 }
  0xd4   : > { %v1520_v19 = vpop.f32.mrf.mxu0 }
  0xd5   : > { %v638_v20 = vmul.f32 %v1520_v19, %v1342_v18 }
  0xd6   : > { %v598_v22 = vpop.f32.mrf.mxu0 }
  0xd7   : > { %v636_v23 = vmul.f32 %v1342_v18, %v598_v22  ;;  %v653_v25 = vadd.f32 %v1343_v21, %v638_v20 }
  0xd8   : > { %v1521_v24 = vpop.f32.mrf.mxu0 }
  0xd9   : > { %v639_v26 = vmul.f32 %v1521_v24, %v1342_v18  ;;  %v651_v28 = vadd.f32 %v1343_v21, %v636_v23  ;;  %v661_v32 = vmax.f32 %v653_v25, 0.0 }
  0xda   : > { %v601_v27 = vpop.f32.mrf.mxu0 }
  0xdb   : > { %v654_v29 = vadd.f32 %v1343_v21, %v639_v26  ;;  %v637_v30 = vmul.f32 %v1342_v18, %v601_v27  ;;  %v659_v37 = vmax.f32 %v651_v28, 0.0 }
  0xdc   : > { %v1524_v31 = vpop.f32.mrf.mxu0 }
  0xdd   : > { %v662_v33 = vmax.f32 %v654_v29, 0.0  ;;  %v652_v34 = vadd.f32 %v1343_v21, %v637_v30  ;;  %v642_v35 = vmul.f32 %v1524_v31, %v1342_v18 }
  0xde   : > { %v614_v36 = vpop.f32.mrf.mxu0 }
  0xdf   : > { %v660_v38 = vmax.f32 %v652_v34, 0.0  ;;  %v640_v39 = vmul.f32 %v1342_v18, %v614_v36  ;;  %v668_v40 = vpack.c.bf16 %v662_v33, %v661_v32  ;;  %v657_v42 = vadd.f32 %v1343_v21, %v642_v35  ;;  %v1378_v34 = vld [vmem:[%s1834_s8] ss:$0 sm:$0xff] }
  0xe0   : > { %v1525_v41 = vpop.f32.mrf.mxu0 }
  0xe1   : > { %v643_v43 = vmul.f32 %v1525_v41, %v1342_v18  ;;  %v667_v44 = vpack.c.bf16 %v660_v38, %v659_v37  ;;  %1478 = vst [vmem:[%s495_s17 + $0x8] sm:$0xff] %v668_v40   ;;  %v655_v46 = vadd.f32 %v1343_v21, %v640_v39  ;;  %v665_v49 = vmax.f32 %v657_v42, 0.0  ;;  %v1379_v37 = vld [vmem:[%s1835_s9] ss:$0 sm:$0xff] }
  0xe2   : > { %v617_v45 = vpop.f32.mrf.mxu0 }
  0xe3   : > { %v658_v47 = vadd.f32 %v1343_v21, %v643_v43  ;;  %v641_v48 = vmul.f32 %v1342_v18, %v617_v45  ;;  %1422 = vst [vmem:[%s495_s17] sm:$0xff] %v667_v44   ;;  %1542 = vmatprep.mubr.bf16.mxu1 %v667_v44  ;;  %v663_v52 = vmax.f32 %v655_v46, 0.0 }
  0xe4   : > { %1543 = vmatmul.mubr.bf16.vlgmr.msra.gmra.mxu1 %v668_v40 }
  0xe5   : > { %v666_v50 = vmax.f32 %v658_v47, 0.0  ;;  %v656_v51 = vadd.f32 %v1343_v21, %v641_v48 }
  0xe7   : > { %v664_v53 = vmax.f32 %v656_v51, 0.0  ;;  %v670_v54 = vpack.c.bf16 %v666_v50, %v665_v49 }
  0xe9   : > { %v669_v55 = vpack.c.bf16 %v664_v53, %v663_v52  ;;  %1480 = vst [vmem:[%s495_s17 + $0x18] sm:$0xff] %v670_v54  }
  0xeb   : > { %1479 = vst [vmem:[%s495_s17 + $0x10] sm:$0xff] %v669_v55   ;;  %1546 = vmatprep.mubr.bf16.mxu1 %v669_v55 }
  0xec   : > { %1547 = vmatmul.mubr.bf16.gmra.mxu1 %v670_v54 }
 0x1a4   : > { %v1544_v61 = vpop.f32.mrf.mxu1 }
 0x1a5   : > { %v845_v62 = vmul.f32 %v1544_v61, %v1360_v60 }
 0x1a6   : > { %v805_v0 = vpop.f32.mrf.mxu1 }
 0x1a7   : > { %v843_v1 = vmul.f32 %v1360_v60, %v805_v0  ;;  %v860_v3 = vadd.f32 %v1361_v63, %v845_v62 }
 0x1a8   : > { %v1545_v2 = vpop.f32.mrf.mxu1 }
 0x1a9   : > { %v846_v4 = vmul.f32 %v1545_v2, %v1360_v60  ;;  %v858_v6 = vadd.f32 %v1361_v63, %v843_v1  ;;  %v868_v10 = vmax.f32 %v860_v3, 0.0 }
 0x1aa   : > { %v808_v5 = vpop.f32.mrf.mxu1 }
 0x1ab   : > { %v861_v7 = vadd.f32 %v1361_v63, %v846_v4  ;;  %v844_v8 = vmul.f32 %v1360_v60, %v808_v5  ;;  %v866_v15 = vmax.f32 %v858_v6, 0.0 }
 0x1ac   : > { %v1548_v9 = vpop.f32.mrf.mxu1 }
 0x1ad   : > { %v869_v11 = vmax.f32 %v861_v7, 0.0  ;;  %v859_v12 = vadd.f32 %v1361_v63, %v844_v8  ;;  %v849_v13 = vmul.f32 %v1548_v9, %v1360_v60 }
 0x1ae   : > { %v821_v14 = vpop.f32.mrf.mxu1 }
 0x1af   : > { %v875_v16 = vpack.c.bf16 %v869_v11, %v868_v10  ;;  %v867_v17 = vmax.f32 %v859_v12, 0.0  ;;  %v847_v18 = vmul.f32 %v1360_v60, %v821_v14  ;;  %v864_v20 = vadd.f32 %v1361_v63, %v849_v13 }
 0x1b0   : > { %v1549_v19 = vpop.f32.mrf.mxu1 }
 0x1b1   : > { %1481 = vst [vmem:[%s505_s18 + $0x8] sm:$0xff] %v875_v16   ;;  %v850_v21 = vmul.f32 %v1549_v19, %v1360_v60  ;;  %v874_v22 = vpack.c.bf16 %v867_v17, %v866_v15  ;;  %v862_v24 = vadd.f32 %v1361_v63, %v847_v18  ;;  %v872_v27 = vmax.f32 %v864_v20, 0.0 }
 0x1b2   : > { %v824_v23 = vpop.f32.mrf.mxu1 }
 0x1b3   : > { %v865_v25 = vadd.f32 %v1361_v63, %v850_v21  ;;  %v848_v26 = vmul.f32 %v1360_v60, %v824_v23  ;;  %1442 = vst [vmem:[%s505_s18] sm:$0xff] %v874_v22   ;;  %1566 = vmatprep.mubr.bf16.mxu0 %v874_v22  ;;  %v870_v30 = vmax.f32 %v862_v24, 0.0 }
 0x1b4   : > { %1567 = vmatmul.mubr.bf16.vlgmr.msra.gmra.mxu0 %v875_v16 }
 0x1b5   : > { %v873_v28 = vmax.f32 %v865_v25, 0.0  ;;  %v863_v29 = vadd.f32 %v1361_v63, %v848_v26 }
 0x1b7   : > { %v871_v31 = vmax.f32 %v863_v29, 0.0  ;;  %v877_v32 = vpack.c.bf16 %v873_v28, %v872_v27 }
 0x1b9   : > { %v876_v33 = vpack.c.bf16 %v871_v31, %v870_v30  ;;  %1483 = vst [vmem:[%s505_s18 + $0x18] sm:$0xff] %v877_v32  }
 0x1bb   : > { %1482 = vst [vmem:[%s505_s18 + $0x10] sm:$0xff] %v876_v33   ;;  %1570 = vmatprep.mubr.bf16.mxu0 %v876_v33 }
 0x1bc   : > { %1571 = vmatmul.mubr.bf16.gmra.mxu0 %v877_v32 }
 0x274   : > { %v1568_v35 = vpop.f32.mrf.mxu0 }
 0x275   : > { %v1052_v36 = vmul.f32 %v1568_v35, %v1378_v34 }
 0x276   : > { %v1012_v38 = vpop.f32.mrf.mxu0 }
 0x277   : > { %v1050_v39 = vmul.f32 %v1378_v34, %v1012_v38  ;;  %v1067_v41 = vadd.f32 %v1379_v37, %v1052_v36 }
 0x278   : > { %v1569_v40 = vpop.f32.mrf.mxu0 }
 0x279   : > { %v1053_v42 = vmul.f32 %v1569_v40, %v1378_v34  ;;  %v1065_v44 = vadd.f32 %v1379_v37, %v1050_v39  ;;  %v1075_v48 = vmax.f32 %v1067_v41, 0.0 }
 0x27a   : > { %v1015_v43 = vpop.f32.mrf.mxu0 }
 0x27b   : > { %v1068_v45 = vadd.f32 %v1379_v37, %v1053_v42  ;;  %v1051_v46 = vmul.f32 %v1378_v34, %v1015_v43  ;;  %v1073_v53 = vmax.f32 %v1065_v44, 0.0 }
 0x27c   : > { %v1572_v47 = vpop.f32.mrf.mxu0 }
 0x27d   : > { %v1076_v49 = vmax.f32 %v1068_v45, 0.0  ;;  %v1066_v50 = vadd.f32 %v1379_v37, %v1051_v46  ;;  %v1056_v51 = vmul.f32 %v1572_v47, %v1378_v34 }
 0x27e   : > { %v1028_v52 = vpop.f32.mrf.mxu0 }
 0x27f   : > { %v1466_v54 = vpack.c.bf16 %v1076_v49, %v1075_v48  ;;  %v1074_v55 = vmax.f32 %v1066_v50, 0.0  ;;  %v1054_v56 = vmul.f32 %v1378_v34, %v1028_v52  ;;  %v1071_v59 = vadd.f32 %v1379_v37, %v1056_v51 }
 0x280   : > { %v1573_v57 = vpop.f32.mrf.mxu0 }
 0x281   : > { %1484 = vst [vmem:[%s515_s28 + $0x8] sm:$0xff] %v1466_v54   ;;  %v1461_v58 = vpack.c.bf16 %v1074_v55, %v1073_v53  ;;  %v1057_v60 = vmul.f32 %v1573_v57, %v1378_v34  ;;  %v1069_v62 = vadd.f32 %v1379_v37, %v1054_v56  ;;  %v1079_v1 = vmax.f32 %v1071_v59, 0.0 }
 0x282   : > { %v1031_v61 = vpop.f32.mrf.mxu0 }
 0x283   : > { %1462 = vst [vmem:[%s515_s28] sm:$0xff] %v1461_v58   ;;  %v1072_v63 = vadd.f32 %v1379_v37, %v1057_v60  ;;  %v1055_v0 = vmul.f32 %v1378_v34, %v1031_v61  ;;  %v1077_v4 = vmax.f32 %v1069_v62, 0.0 }
 0x285   : > { %v1080_v2 = vmax.f32 %v1072_v63, 0.0  ;;  %v1070_v3 = vadd.f32 %v1379_v37, %v1055_v0 }
 0x287   : > { %v1476_v5 = vpack.c.bf16 %v1080_v2, %v1079_v1  ;;  %v1078_v6 = vmax.f32 %v1070_v3, 0.0 }
 0x289   : > { %1486 = vst [vmem:[%s515_s28 + $0x18] sm:$0xff] %v1476_v5   ;;  %v1471_v7 = vpack.c.bf16 %v1078_v6, %v1077_v4 }
 0x28b   : > { %1485 = vst [vmem:[%s515_s28 + $0x10] sm:$0xff] %v1471_v7  }
 0x28c PF: > { %s23_s23 = sadd.s32 1, %s1641_s23   ;;  %s1839_s21 = smov %s1637_s22 }
 0x28d   : > { %p20_p5 = scmp.ge.s32.totalorder %s23_s23, 4   ;;  %s1840_s22 = smov %s1842_s24 }
 0x28f   :  { %22 = sbr.rel (!%p20_p5) target bundleno = 2 (0x2), region = 117 }

// kernel: pointnet_partseg_forward.8
= control target key start
LH: loop header
LB: loop body
LE: loop exit
PB: predicated region body
PF: predicated region fallthrough
CT: control target
= control target key end

     0   :  { %s2230_s13 = smov 0   ;;  %s2232_s14 = smov 0   ;;  %s2862_s0 = inlined_call_operand.vmem [shape: bf16[2,64,128], index: 0, kind: input, shape index: {}]   ;;  %s2863_s1 = inlined_call_operand.vmem [shape: bf16[128,64], index: 1, kind: input, shape index: {}]   ;;  %s2864_s2 = inlined_call_operand.vmem [shape: f32[1,64], index: 2, kind: input, shape index: {}]   ;;  %s2865_s3 = inlined_call_operand.vmem [shape: f32[1,64], index: 3, kind: input, shape index: {}]   ;;  %s2866_s4 = inlined_call_operand.vmem [shape: bf16[64,128], index: 4, kind: input, shape index: {}]   ;;  %s2867_s5 = inlined_call_operand.vmem [shape: f32[1,128], index: 5, kind: input, shape index: {}]   ;;  %s2868_s6 = inlined_call_operand.vmem [shape: f32[1,128], index: 6, kind: input, shape index: {}]   ;;  %s2869_s7 = inlined_call_operand.vmem [shape: bf16[128,1024], index: 7, kind: input, shape index: {}]   ;;  %s2870_s8 = inlined_call_operand.vmem [shape: f32[1,1024], index: 8, kind: input, shape index: {}]   ;;  %s2871_s9 = inlined_call_operand.vmem [shape: f32[1,1024], index: 9, kind: input, shape index: {}]   ;;  %s2872_s10 = inlined_call_operand.vmem [shape: f32[2,1,1024], index: 10, kind: output, shape index: {}]  }
   0x1   :  { %s2234_s15 = smov 0  }
   0x2 LB: > { %s32_s16 = sadd.s32 1, %s2167_s14  ;;  %p1935_p0 = scmp.ge.s32.totalorder %s2171_s15, 1  ;;  %s2171_s15 = sphi %s2234_s15, %s20_s15   ;;  %s2167_s14 = sphi %s2232_s14, %s2874_s14   ;;  %s2163_s13 = sphi %s2230_s13, %s2873_s13  }
   0x3   : > { %p34_p1 = scmp.ge.s32.totalorder %s32_s16, 2  ;;  %p331_p2 = scmp.lt.s32.totalorder %s2171_s15, 3 }
   0x5   : > { %s2876_s16 = smov (%p34_p1, %s32_s16), 0  ;;  %p332_p3 = pnand %p1935_p0, %p331_p2 }
   0x6   : > { %p373_p4 = scmp.lt.s32.totalorder (!%p332_p3), %s2163_s13, 1 }
   0x7   : > { %335 = sbr.rel (%p332_p3) target bundleno = 754 (0x2f2), region = 60 }
   0xc   : > { %v2133_v0 = vld [vmem:[%s2863_s1 + $0x38] sm:$0xff]   ;;  %v2134_v1 = vld [vmem:[%s2863_s1 + $0x30] sm:$0xff]   ;;  %s2878_s13 = smov (!%p373_p4, %s2163_s13), 1  ;;  %v2135_v2 = vld [vmem:[%s2863_s1 + $0x28] sm:$0xff]   ;;  %vm622_vm0 = vcmask 523264  }
   0xd   : > { %2050 = vmatprep.subr.bf16.mxu0 %v2133_v0  ;;  %s2029_s23 = sshll.u32 %s2878_s13, 5  ;;  %v2136_v3 = vld [vmem:[%s2863_s1 + $0x20] sm:$0xff]   ;;  %v2137_v5 = vld [vmem:[%s2863_s1 + $0x18] sm:$0xff]   ;;  %v2138_v6 = vld [vmem:[%s2863_s1 + $0x10] sm:$0xff]   ;;  %s1938_s25 = sshll.u32 %s2878_s13, 3 }
   0xe   : > { %2051 = vmatpush3.bf16.msra.mxu0 %v2133_v0  ;;  %s380_s26 = scalar_lea.vmem %s2862_s0, %s2029_s23  ;;  %v2139_v7 = vld [vmem:[%s2863_s1 + $0x8] sm:$0xff]   ;;  %v2140_v8 = vld [vmem:[%s2863_s1] sm:$0xff]   ;;  %v2145_v12 = vld [vmem:[%s2866_s4 + $0x18] sm:$0xff]   ;;  %s385_s28 = scalar_lea.vmem %s2872_s10, %s1938_s25 }
   0xf   : > { %2052 = vmatprep.subr.bf16.mxu0 %v2134_v1  ;;  %v2141_v4 = vld [vmem:[%s380_s26] sm:$0xff]   ;;  %v2142_v9 = vld [vmem:[%s380_s26 + $0x8] sm:$0xff]   ;;  %v2143_v10 = vld [vmem:[%s380_s26 + $0x10] sm:$0xff]   ;;  %2074 = vmatprep.subr.bf16.mxu1 %v2145_v12 }
  0x10   : > { %2066 = vmatprep.mubr.bf16.mxu0 %v2141_v4  ;;  %v2144_v11 = vld [vmem:[%s380_s26 + $0x18] sm:$0xff]   ;;  %2075 = vmatpush3.bf16.msra.mxu1 %v2145_v12  ;;  %v2146_v13 = vld [vmem:[%s2866_s4 + $0x10] sm:$0xff]   ;;  %v2147_v14 = vld [vmem:[%s2866_s4 + $0x8] sm:$0xff]  }
  0x11   : > { %2076 = vmatprep.subr.bf16.mxu1 %v2146_v13  ;;  %v2148_v15 = vld [vmem:[%s2866_s4] sm:$0xff]   ;;  %v799_v18 = vld [vmem:[%s2869_s7 + $0x1c8] sm:$0xff] }
  0x12   : > { %2053 = vmatpush3.bf16.msra.mxu0 %v2134_v1  ;;  %v2293_v16 = vld [vmem:[%s2869_s7 + $0x1c0] sm:$0xff]  ;;  %v803_v21 = vld [vmem:[%s2869_s7 + $0x1e8] sm:$0xff] }
  0x13   : > { %2054 = vmatprep.subr.bf16.mxu0 %v2135_v2  ;;  %v2298_v17 = vld [vmem:[%s2869_s7 + $0x1e0] sm:$0xff]  ;;  %v2021_v22 = vcombine.low %v799_v18, %v803_v21  ;;  %v2022_v23 = vcombine.high %v799_v18, %v803_v21  ;;  %v791_v24 = vld [vmem:[%s2869_s7 + $0x188] sm:$0xff] }
  0x14   : > { %2077 = vmatpush3.bf16.msra.mxu1 %v2146_v13  ;;  %v2019_v19 = vcombine.low %v2293_v16, %v2298_v17  ;;  %v2020_v20 = vcombine.high %v2293_v16, %v2298_v17  ;;  %v795_v25 = vld [vmem:[%s2869_s7 + $0x1a8] sm:$0xff]  ;;  %v1951_v41 = vld [vmem:[%s2864_s2] ss:$0 sm:$0xff] }
  0x15   : > { %2078 = vmatprep.subr.bf16.mxu1 %v2147_v14  ;;  %v2014_v26 = vcombine.high %v791_v24, %v795_v25  ;;  %v783_v27 = vld [vmem:[%s2869_s7 + $0x148] sm:$0xff]  ;;  %v2013_v29 = vcombine.low %v791_v24, %v795_v25  ;;  %v1952_v46 = vld [vmem:[%s2865_s3] ss:$0 sm:$0xff] }
  0x16   : > { %2055 = vmatpush3.bf16.msra.mxu0 %v2135_v2  ;;  %v787_v28 = vld [vmem:[%s2869_s7 + $0x168] sm:$0xff]  ;;  %v790_v61 = vld [vmem:[%s2869_s7 + $0x180] sm:$0xff] }
  0x17   : > { %2056 = vmatprep.subr.bf16.mxu0 %v2136_v3  ;;  %v2006_v30 = vcombine.high %v783_v27, %v787_v28  ;;  %v775_v31 = vld [vmem:[%s2869_s7 + $0x108] sm:$0xff]  ;;  %v2005_v33 = vcombine.low %v783_v27, %v787_v28  ;;  %v794_v62 = vld [vmem:[%s2869_s7 + $0x1a0] sm:$0xff] }
  0x18   : > { %2079 = vmatpush3.bf16.msra.mxu1 %v2147_v14  ;;  %v779_v32 = vld [vmem:[%s2869_s7 + $0x128] sm:$0xff]  ;;  %v2011_v18 = vcombine.low %v790_v61, %v794_v62  ;;  %v766_v16 = vld [vmem:[%s2869_s7 + $0xc0] sm:$0xff] }
  0x19   : > { %2080 = vmatprep.subr.bf16.mxu1 %v2148_v15  ;;  %v1998_v34 = vcombine.high %v775_v31, %v779_v32  ;;  %v767_v35 = vld [vmem:[%s2869_s7 + $0xc8] sm:$0xff]  ;;  %v1997_v37 = vcombine.low %v775_v31, %v779_v32  ;;  %v770_v17 = vld [vmem:[%s2869_s7 + $0xe0] sm:$0xff] }
  0x1a   : > { %2057 = vmatpush3.bf16.msra.mxu0 %v2136_v3  ;;  %v771_v36 = vld [vmem:[%s2869_s7 + $0xe8] sm:$0xff]  ;;  %v1988_v28 = vcombine.high %v766_v16, %v770_v17  ;;  %v762_v31 = vld [vmem:[%s2869_s7 + $0xa0] sm:$0xff] }
  0x1b   : > { %2058 = vmatprep.subr.bf16.mxu0 %v2137_v5  ;;  %v1990_v38 = vcombine.high %v767_v35, %v771_v36  ;;  %v1989_v39 = vcombine.low %v767_v35, %v771_v36 }
  0x1c   : > { %2081 = vmatpush3.bf16.msra.mxu1 %v2148_v15 }
  0x1d   : > { %1126 = vmatprep.subr.bf16.mxu1 %v2020_v20 }
  0x1e   : > { %2059 = vmatpush3.bf16.msra.mxu0 %v2137_v5 }
  0x1f   : > { %2060 = vmatprep.subr.bf16.mxu0 %v2138_v6 }
  0x22   : > { %2061 = vmatpush3.bf16.msra.mxu0 %v2138_v6 }
  0x23   : > { %2062 = vmatprep.subr.bf16.mxu0 %v2139_v7 }
  0x26   : > { %2063 = vmatpush3.bf16.msra.mxu0 %v2139_v7  ;;  %v2012_v7 = vcombine.high %v790_v61, %v794_v62 }
  0x27   : > { %2064 = vmatprep.subr.bf16.mxu0 %v2140_v8 }
  0x2a   : > { %2065 = vmatpush3.bf16.msra.mxu0 %v2140_v8 }
  0x2b   : > { %1199 = vmatprep.subr.bf16.mxu0 %v2022_v23  ;;  %v778_v23 = vld [vmem:[%s2869_s7 + $0x120] sm:$0xff] }
  0x2d   : > { %2067 = vmatmul.mubr.bf16.vlgmr.msra.gmra.mxu0 %v2142_v9 }
  0x2e   : > { %2070 = vmatprep.mubr.bf16.mxu0 %v2143_v10  ;;  %1200 = vmatpush1.bf16.msra.mxu0 %v2021_v22  ;;  %v782_v10 = vld [vmem:[%s2869_s7 + $0x140] sm:$0xff] }
  0x2f   : > { %1201 = vmatprep.subr.bf16.mxu0 %v2014_v26  ;;  %v774_v22 = vld [vmem:[%s2869_s7 + $0x100] sm:$0xff] }
  0x30   : > { %v1996_v27 = vcombine.high %v774_v22, %v778_v23 }
  0x32   : > { %1202 = vmatpush1.bf16.msra.mxu0 %v2013_v29  ;;  %v1987_v29 = vcombine.low %v766_v16, %v770_v17  ;;  %v788_v17 = vld [vmem:[%s2869_s7 + $0x170] sm:$0xff] }
  0x33   : > { %1203 = vmatprep.subr.bf16.mxu0 %v2006_v30  ;;  %v758_v30 = vld [vmem:[%s2869_s7 + $0x80] sm:$0xff] }
  0x34   : > { %v1980_v32 = vcombine.high %v758_v30, %v762_v31  ;;  %v1979_v35 = vcombine.low %v758_v30, %v762_v31 }
  0x35   : > { %2071 = vmatmul.mubr.bf16.gmra.mxu0 %v2144_v11  ;;  %v786_v11 = vld [vmem:[%s2869_s7 + $0x160] sm:$0xff] }
  0x36   : > { %1204 = vmatpush1.bf16.msra.mxu0 %v2005_v33  ;;  %v2004_v20 = vcombine.high %v782_v10, %v786_v11  ;;  %v2003_v26 = vcombine.low %v782_v10, %v786_v11  ;;  %v759_v33 = vld [vmem:[%s2869_s7 + $0x88] sm:$0xff]  ;;  %v792_v11 = vld [vmem:[%s2869_s7 + $0x190] sm:$0xff] }
  0x37   : > { %1205 = vmatprep.subr.bf16.mxu0 %v1998_v34  ;;  %v763_v34 = vld [vmem:[%s2869_s7 + $0xa8] sm:$0xff] }
  0x38   : > { %v1981_v36 = vcombine.low %v759_v33, %v763_v34 }
  0x3a   : > { %1206 = vmatpush1.bf16.msra.mxu0 %v1997_v37  ;;  %v1982_v37 = vcombine.high %v759_v33, %v763_v34 }
  0x3b   : > { %1207 = vmatprep.subr.bf16.mxu0 %v1990_v38  ;;  %v750_v38 = vld [vmem:[%s2869_s7 + $0x40] sm:$0xff] }
  0x3e   : > { %1208 = vmatpush1.bf16.msra.mxu0 %v1989_v39  ;;  %v754_v39 = vld [vmem:[%s2869_s7 + $0x60] sm:$0xff] }
  0x3f   : > { %1209 = vmatprep.subr.bf16.mxu0 %v1982_v37  ;;  %v780_v37 = vld [vmem:[%s2869_s7 + $0x130] sm:$0xff] }
  0x42   : > { %1210 = vmatpush1.bf16.msra.mxu0 %v1981_v36  ;;  %v776_v36 = vld [vmem:[%s2869_s7 + $0x110] sm:$0xff] }
  0xed   : > { %v2068_v40 = vpop.f32.mrf.mxu0 }
  0xee   : > { %v557_v44 = vmul.f32 %v2068_v40, %v1951_v41  ;;  %v751_v40 = vld [vmem:[%s2869_s7 + $0x48] sm:$0xff] }
  0xef   : > { %v517_v42 = vpop.f32.mrf.mxu0 }
  0xf0   : > { %v555_v43 = vmul.f32 %v1951_v41, %v517_v42  ;;  %v572_v52 = vadd.f32 %v1952_v46, %v557_v44  ;;  %v755_v42 = vld [vmem:[%s2869_s7 + $0x68] sm:$0xff] }
  0xf1   : > { %v2069_v45 = vpop.f32.mrf.mxu0  ;;  %v1973_v44 = vcombine.low %v751_v40, %v755_v42 }
  0xf2   : > { %v558_v47 = vmul.f32 %v2069_v45, %v1951_v41  ;;  %v570_v49 = vadd.f32 %v1952_v46, %v555_v43  ;;  %v580_v63 = vmax.f32 %v572_v52, 0.0  ;;  %v1971_v43 = vcombine.low %v750_v38, %v754_v39 }
  0xf3   : > { %v520_v48 = vpop.f32.mrf.mxu0  ;;  %v1974_v45 = vcombine.high %v751_v40, %v755_v42 }
  0xf4   : > { %v573_v50 = vadd.f32 %v1952_v46, %v558_v47  ;;  %v556_v51 = vmul.f32 %v1951_v41, %v520_v48  ;;  %v578_v58 = vmax.f32 %v570_v49, 0.0  ;;  %v746_v47 = vld [vmem:[%s2869_s7 + $0x20] sm:$0xff]  ;;  %v743_v48 = vld [vmem:[%s2869_s7 + $0x8] sm:$0xff] }
  0xf5   : > { %v2072_v53 = vpop.f32.mrf.mxu0  ;;  %1211 = vmatprep.subr.bf16.mxu0 %v1974_v45 }
  0xf6   : > { %v571_v54 = vadd.f32 %v1952_v46, %v556_v51  ;;  %v561_v55 = vmul.f32 %v2072_v53, %v1951_v41  ;;  %v581_v56 = vmax.f32 %v573_v50, 0.0  ;;  %1212 = vmatpush1.bf16.msra.mxu0 %v1973_v44  ;;  %v747_v50 = vld [vmem:[%s2869_s7 + $0x28] sm:$0xff]  ;;  %v2000_v44 = vcombine.high %v776_v36, %v780_v37 }
  0xf7   : > { %v533_v57 = vpop.f32.mrf.mxu0  ;;  %v1965_v52 = vcombine.low %v743_v48, %v747_v50  ;;  %v1966_v53 = vcombine.high %v743_v48, %v747_v50  ;;  %v768_v48 = vld [vmem:[%s2869_s7 + $0xd0] sm:$0xff]  ;;  %v769_v50 = vld [vmem:[%s2869_s7 + $0xd8] sm:$0xff] }
  0xf8   : > { %v579_v59 = vmax.f32 %v571_v54, 0.0  ;;  %v559_v60 = vmul.f32 %v1951_v41, %v533_v57  ;;  %v576_v0 = vadd.f32 %v1952_v46, %v561_v55  ;;  %v587_v5 = vpack.c.bf16 %v581_v56, %v580_v63  ;;  %v800_v54 = vld [vmem:[%s2869_s7 + $0x1d0] sm:$0xff]  ;;  %v801_v56 = vld [vmem:[%s2869_s7 + $0x1d8] sm:$0xff] }
  0xf9   : > { %v2073_v1 = vpop.f32.mrf.mxu0  ;;  %1213 = vmatprep.subr.bf16.mxu0 %v1966_v53  ;;  %v804_v55 = vld [vmem:[%s2869_s7 + $0x1f0] sm:$0xff]  ;;  %v1999_v53 = vcombine.low %v776_v36, %v780_v37 }
  0xfa   : > { %v574_v2 = vadd.f32 %v1952_v46, %v559_v60  ;;  %v562_v3 = vmul.f32 %v2073_v1, %v1951_v41  ;;  %v586_v4 = vpack.c.bf16 %v579_v59, %v578_v58  ;;  %v584_v12 = vmax.f32 %v576_v0, 0.0  ;;  %1214 = vmatpush1.bf16.msra.mxu0 %v1965_v52  ;;  %v805_v58 = vld [vmem:[%s2869_s7 + $0x1f8] sm:$0xff]  ;;  %v2429_v0 = vld [vmem:[%s2867_s5] ss:$0 sm:$0xff] }
  0xfb   : > { %v536_v6 = vpop.f32.mrf.mxu0  ;;  %v2024_v57 = vcombine.high %v800_v54, %v804_v55  ;;  %v2173_v59 = vmov 0   ;;  %v2023_v60 = vcombine.low %v800_v54, %v804_v55  ;;  %v2421_v61 = vcombine.low %v801_v56, %v805_v58 }
  0xfc   : > { %v577_v8 = vadd.f32 %v1952_v46, %v562_v3  ;;  %v560_v9 = vmul.f32 %v1951_v41, %v536_v6  ;;  %2082 = vmatprep.mubr.msk.bf16.mxu1 %vm622_vm0, %v586_v4  ;;  %v582_v13 = vmax.f32 %v574_v2, 0.0  ;;  %v1972_v41 = vcombine.high %v750_v38, %v754_v39  ;;  %1231 = vmatprep.mubr.bf16.mxu0 %v2173_v59  ;;  %v2435_v4 = vld [vmem:[%s2868_s6] ss:$0 sm:$0xff]  ;;  %v777_v38 = vld [vmem:[%s2869_s7 + $0x118] sm:$0xff] }
  0xfd   : > { %2083 = vmatmul.mubr.msk.bf16.vlgmr.msra.gmra.mxu1 %vm622_vm0, %v587_v5  ;;  %v2423_v62 = vcombine.high %v801_v56, %v805_v58  ;;  %v781_v39 = vld [vmem:[%s2869_s7 + $0x138] sm:$0xff] }
  0xfe   : > { %v585_v14 = vmax.f32 %v577_v8, 0.0  ;;  %v575_v15 = vadd.f32 %v1952_v46, %v560_v9  ;;  %1127 = vmatpush1.bf16.msra.mxu1 %v2019_v19  ;;  %v1995_v19 = vcombine.low %v774_v22, %v778_v23  ;;  %v742_v46 = vld [vmem:[%s2869_s7] sm:$0xff]  ;;  %v2523_v54 = vcombine.low %v777_v38, %v781_v39 }
  0xff   : > { %1128 = vmatprep.subr.bf16.mxu1 %v2012_v7  ;;  %v1964_v49 = vcombine.high %v742_v46, %v746_v47  ;;  %v1963_v51 = vcombine.low %v742_v46, %v746_v47  ;;  %1345 = vmatprep.subr.bf16.mxu0 %v2423_v62  ;;  %v2505_v47 = vcombine.high %v777_v38, %v781_v39  ;;  %v2630_v39 = vld [vmem:[%s2871_s9] sm:$0xff] }
 0x100   : > { %v583_v21 = vmax.f32 %v575_v15, 0.0  ;;  %v589_v24 = vpack.c.bf16 %v585_v14, %v584_v12  ;;  %v793_v14 = vld [vmem:[%s2869_s7 + $0x198] sm:$0xff] }
 0x101   : > { %v797_v15 = vld [vmem:[%s2869_s7 + $0x1b8] sm:$0xff] }
 0x102   : > { %v588_v25 = vpack.c.bf16 %v583_v21, %v582_v13  ;;  %1129 = vmatpush1.bf16.msra.mxu1 %v2011_v18  ;;  %v796_v13 = vld [vmem:[%s2869_s7 + $0x1b0] sm:$0xff]  ;;  %v2477_v31 = vcombine.low %v793_v14, %v797_v15 }
 0x103   : > { %1130 = vmatprep.subr.bf16.mxu1 %v2004_v20  ;;  %v2015_v30 = vcombine.low %v792_v11, %v796_v13 }
 0x104   : > { %2086 = vmatprep.mubr.msk.bf16.mxu1 %vm622_vm0, %v588_v25  ;;  %v2016_v25 = vcombine.high %v792_v11, %v796_v13  ;;  %v753_v13 = vld [vmem:[%s2869_s7 + $0x58] sm:$0xff] }
 0x105   : > { %2087 = vmatmul.mubr.msk.bf16.gmra.mxu1 %vm622_vm0, %v589_v24 }
 0x106   : > { %1131 = vmatpush1.bf16.msra.mxu1 %v2003_v26  ;;  %1158 = vmatprep.mubr.bf16.mxu1 %v2173_v59  ;;  %v2459_v26 = vcombine.high %v793_v14, %v797_v15  ;;  %v757_v14 = vld [vmem:[%s2869_s7 + $0x78] sm:$0xff] }
 0x107   : > { %1132 = vmatprep.subr.bf16.mxu1 %v1996_v27  ;;  %v784_v27 = vld [vmem:[%s2869_s7 + $0x150] sm:$0xff] }
 0x108   : > { %v2008_v34 = vcombine.high %v784_v27, %v788_v17  ;;  %v2007_v42 = vcombine.low %v784_v27, %v788_v17  ;;  %v745_v27 = vld [vmem:[%s2869_s7 + $0x18] sm:$0xff] }
 0x10a   : > { %1133 = vmatpush1.bf16.msra.mxu1 %v1995_v19  ;;  %v785_v19 = vld [vmem:[%s2869_s7 + $0x158] sm:$0xff] }
 0x10b   : > { %1134 = vmatprep.subr.bf16.mxu1 %v1988_v28  ;;  %v789_v28 = vld [vmem:[%s2869_s7 + $0x178] sm:$0xff] }
 0x10e   : > { %1135 = vmatpush1.bf16.msra.mxu1 %v1987_v29 }
 0x10f   : > { %1136 = vmatprep.subr.bf16.mxu1 %v1980_v32 }
 0x112   : > { %1137 = vmatpush1.bf16.msra.mxu1 %v1979_v35  ;;  %v2481_v35 = vcombine.high %v785_v19, %v789_v28 }
 0x113   : > { %1138 = vmatprep.subr.bf16.mxu1 %v1972_v41 }
 0x116   : > { %1139 = vmatpush1.bf16.msra.mxu1 %v1971_v43  ;;  %v2499_v43 = vcombine.low %v785_v19, %v789_v28  ;;  %v1977_v28 = vcombine.low %v753_v13, %v757_v14 }
 0x117   : > { %1140 = vmatprep.subr.bf16.mxu1 %v1964_v49  ;;  %v772_v49 = vld [vmem:[%s2869_s7 + $0xf0] sm:$0xff] }
 0x11a   : > { %1141 = vmatpush1.bf16.msra.mxu1 %v1963_v51  ;;  %v773_v51 = vld [vmem:[%s2869_s7 + $0xf8] sm:$0xff] }
 0x11b   : > { %1272 = vmatprep.subr.bf16.mxu1 %v2024_v57  ;;  %v1992_v57 = vcombine.high %v768_v48, %v772_v49  ;;  %v2527_v58 = vcombine.high %v769_v50, %v773_v51 }
 0x1bd   : > { %v2084_v63 = vpop.f32.mrf.mxu1 }
 0x1be   : > { %v709_v18 = vmul.f32 %v2084_v63, %v2429_v0  ;;  %v764_v63 = vld [vmem:[%s2869_s7 + $0xb0] sm:$0xff] }
 0x1bf   : > { %v669_v1 = vpop.f32.mrf.mxu1 }
 0x1c0   : > { %v707_v2 = vmul.f32 %v2429_v0, %v669_v1  ;;  %v724_v29 = vadd.f32 %v2435_v4, %v709_v18  ;;  %v761_v1 = vld [vmem:[%s2869_s7 + $0x98] sm:$0xff] }
 0x1c1   : > { %v2085_v3 = vpop.f32.mrf.mxu1 }
 0x1c2   : > { %v722_v6 = vadd.f32 %v2435_v4, %v707_v2  ;;  %v710_v9 = vmul.f32 %v2085_v3, %v2429_v0  ;;  %v732_v40 = vmax.f32 %v724_v29, 0.0  ;;  %v765_v2 = vld [vmem:[%s2869_s7 + $0xb8] sm:$0xff] }
 0x1c3   : > { %v672_v5 = vpop.f32.mrf.mxu1 }
 0x1c4   : > { %v708_v7 = vmul.f32 %v2429_v0, %v672_v5  ;;  %v730_v20 = vmax.f32 %v722_v6, 0.0  ;;  %v725_v23 = vadd.f32 %v2435_v4, %v710_v9  ;;  %v1991_v6 = vcombine.low %v768_v48, %v772_v49 }
 0x1c5   : > { %v2439_v8 = vpop.f32.mrf.mxu1 }
 0x1c6   : > { %v723_v10 = vadd.f32 %v2435_v4, %v708_v7  ;;  %v733_v32 = vmax.f32 %v725_v23, 0.0  ;;  %v713_v3 = vmul.f32 %v2439_v8, %v2429_v0  ;;  %v2546_v7 = vcombine.low %v769_v50, %v773_v51  ;;  %v756_v8 = vld [vmem:[%s2869_s7 + $0x70] sm:$0xff] }
 0x1c7   : > { %v685_v12 = vpop.f32.mrf.mxu1  ;;  %v1978_v23 = vcombine.high %v753_v13, %v757_v14 }
 0x1c8   : > { %v731_v21 = vmax.f32 %v723_v10, 0.0  ;;  %v711_v41 = vmul.f32 %v2429_v0, %v685_v12  ;;  %v2501_v45 = vpack.c.bf16 %v733_v32, %v732_v40  ;;  %v2552_v12 = vcombine.high %v761_v1, %v765_v2 }
 0x1c9   : > { %v2089_v22 = vpop.f32.mrf.mxu1  ;;  %v728_v15 = vadd.f32 %v2435_v4, %v713_v3 }
 0x1ca   : > { %v2457_v24 = vpack.c.bf16 %v731_v21, %v730_v20  ;;  %v726_v52 = vadd.f32 %v2435_v4, %v711_v41  ;;  %v714_v55 = vmul.f32 %v2089_v22, %v2429_v0  ;;  %v1985_v20 = vcombine.low %v761_v1, %v765_v2 }
 0x1cb   : > { %v688_v16 = vpop.f32.mrf.mxu1  ;;  %v736_v17 = vmax.f32 %v728_v15, 0.0 }
 0x1cc   : > { %1159 = vmatmul.mubr.bf16.vlgmr.msra.gmra.mxu1 %v2457_v24  ;;  %1232 = vmatmul.mubr.bf16.vlgmr.msra.gmra.mxu0 %v2457_v24  ;;  %v712_v33 = vmul.f32 %v2429_v0, %v688_v16  ;;  %v734_v5 = vmax.f32 %v726_v52, 0.0  ;;  %v729_v10 = vadd.f32 %v2435_v4, %v714_v55  ;;  %v752_v0 = vld [vmem:[%s2869_s7 + $0x50] sm:$0xff]  ;;  %v749_v16 = vld [vmem:[%s2869_s7 + $0x38] sm:$0xff] }
 0x1cd   : > { %1273 = vmatpush1.bf16.msra.mxu1 %v2023_v60  ;;  %1346 = vmatpush1.bf16.msra.mxu0 %v2421_v61  ;;  %v760_v60 = vld [vmem:[%s2869_s7 + $0x90] sm:$0xff]  ;;  %v1976_v22 = vcombine.high %v752_v0, %v756_v8  ;;  %v1975_v19 = vcombine.low %v752_v0, %v756_v8  ;;  %v1970_v32 = vcombine.high %v745_v27, %v749_v16 }
 0x1ce   : > { %1274 = vmatprep.subr.bf16.mxu1 %v2016_v25  ;;  %1347 = vmatprep.subr.bf16.mxu0 %v2459_v26  ;;  %v727_v46 = vadd.f32 %v2435_v4, %v712_v33  ;;  %v1984_v9 = vcombine.high %v760_v60, %v764_v63  ;;  %v1983_v18 = vcombine.low %v760_v60, %v764_v63  ;;  %v737_v21 = vmax.f32 %v729_v10, 0.0  ;;  %v744_v25 = vld [vmem:[%s2869_s7 + $0x10] sm:$0xff] }
 0x1cf   : > { %1168 = vmatprep.mubr.bf16.mxu1 %v2173_v59  ;;  %1241 = vmatprep.mubr.bf16.mxu0 %v2173_v59  ;;  %v748_v4 = vld [vmem:[%s2869_s7 + $0x30] sm:$0xff] }
 0x1d0   : > { %v735_v56 = vmax.f32 %v727_v46, 0.0  ;;  %v741_v29 = vpack.c.bf16 %v737_v21, %v736_v17  ;;  %v1967_v33 = vcombine.low %v744_v25, %v748_v4 }
 0x1d1   : > { %1275 = vmatpush1.bf16.msra.mxu1 %v2015_v30  ;;  %1348 = vmatpush1.bf16.msra.mxu0 %v2477_v31  ;;  %v1968_v30 = vcombine.high %v744_v25, %v748_v4 }
 0x1d2   : > { %1276 = vmatprep.subr.bf16.mxu1 %v2008_v34  ;;  %1349 = vmatprep.subr.bf16.mxu0 %v2481_v35  ;;  %v2549_v11 = vpack.c.bf16 %v735_v56, %v734_v5  ;;  %v1969_v34 = vcombine.low %v745_v27, %v749_v16 }
 0x1d4   : > { %1169 = vmatmul.mubr.bf16.gmra.mxu1 %v2501_v45  ;;  %1242 = vmatmul.mubr.bf16.gmra.mxu0 %v2501_v45 }
 0x1d5   : > { %1277 = vmatpush1.bf16.msra.mxu1 %v2007_v42  ;;  %1350 = vmatpush1.bf16.msra.mxu0 %v2499_v43 }
 0x1d6   : > { %1278 = vmatprep.subr.bf16.mxu1 %v2000_v44  ;;  %1351 = vmatprep.subr.bf16.mxu0 %v2505_v47 }
 0x1d7   : > { %1178 = vmatprep.mubr.bf16.mxu1 %v2173_v59  ;;  %1251 = vmatprep.mubr.bf16.mxu0 %v2173_v59 }
 0x1d9   : > { %1279 = vmatpush1.bf16.msra.mxu1 %v1999_v53  ;;  %1352 = vmatpush1.bf16.msra.mxu0 %v2523_v54 }
 0x1da   : > { %1280 = vmatprep.subr.bf16.mxu1 %v1992_v57  ;;  %1353 = vmatprep.subr.bf16.mxu0 %v2527_v58 }
 0x1dc   : > { %1179 = vmatmul.mubr.bf16.gmra.mxu1 %v2549_v11  ;;  %1252 = vmatmul.mubr.bf16.gmra.mxu0 %v2549_v11 }
 0x1dd   : > { %1281 = vmatpush1.bf16.msra.mxu1 %v1991_v6  ;;  %1354 = vmatpush1.bf16.msra.mxu0 %v2546_v7 }
 0x1de   : > { %1282 = vmatprep.subr.bf16.mxu1 %v1984_v9  ;;  %1355 = vmatprep.subr.bf16.mxu0 %v2552_v12 }
 0x1df   : > { %1188 = vmatprep.mubr.bf16.mxu1 %v2173_v59  ;;  %1261 = vmatprep.mubr.bf16.mxu0 %v2173_v59 }
 0x1e1   : > { %1283 = vmatpush1.bf16.msra.mxu1 %v1983_v18  ;;  %1356 = vmatpush1.bf16.msra.mxu0 %v1985_v20 }
 0x1e2   : > { %1284 = vmatprep.subr.bf16.mxu1 %v1976_v22  ;;  %1357 = vmatprep.subr.bf16.mxu0 %v1978_v23 }
 0x1e4   : > { %1189 = vmatmul.mubr.bf16.gmra.mxu1 %v741_v29  ;;  %1262 = vmatmul.mubr.bf16.gmra.mxu0 %v741_v29 }
 0x1e5   : > { %1285 = vmatpush1.bf16.msra.mxu1 %v1975_v19  ;;  %1358 = vmatpush1.bf16.msra.mxu0 %v1977_v28 }
 0x1e6   : > { %1286 = vmatprep.subr.bf16.mxu1 %v1968_v30  ;;  %1359 = vmatprep.subr.bf16.mxu0 %v1970_v32 }
 0x1e7   : > { %1304 = vmatprep.mubr.bf16.mxu1 %v2173_v59  ;;  %1377 = vmatprep.mubr.bf16.mxu0 %v2173_v59 }
 0x1e9   : > { %1287 = vmatpush1.bf16.msra.mxu1 %v1967_v33  ;;  %1360 = vmatpush1.bf16.msra.mxu0 %v1969_v34 }
 0x1ea   : > { %2090 = vmatprep.subr.bf16.mxu1 %v2423_v62 }
 0x1ec   : > { %1305 = vmatmul.mubr.bf16.vlgmr.msra.gmra.mxu1 %v2457_v24  ;;  %1378 = vmatmul.mubr.bf16.vlgmr.msra.gmra.mxu0 %v2457_v24 }
 0x1ed   : > { %2098 = vmatpush1.bf16.msra.mxu1 %v2421_v61  ;;  %1314 = vmatprep.mubr.bf16.mxu1 %v2173_v59  ;;  %v1420_v61 = vlaneseq }
 0x1ee   : > { %2091 = vmatprep.subr.bf16.mxu1 %v2459_v26  ;;  %1387 = vmatprep.mubr.bf16.mxu0 %v2173_v59 }
 0x1ef   : > { %v2610_v62 = vshrl.u32 %v1420_v61, 7 }
 0x1f1   : > { %2099 = vmatpush1.bf16.msra.mxu1 %v2477_v31  ;;  %v1422_v24 = vsub.s32 0, %v2610_v62  ;;  %v1430_v26 = vsub.s32 2, %v2610_v62  ;;  %v2617_v31 = vld [vmem:[%s2870_s8] sm:$0xff]  ;;  %v1434_v36 = vsub.s32 3, %v2610_v62  ;;  %v1446_v21 = vsub.s32 6, %v2610_v62 }
 0x1f2   : > { %2092 = vmatprep.subr.bf16.mxu1 %v2481_v35  ;;  %v1426_v35 = vsub.s32 1, %v2610_v62 }
 0x1f3   : > { %v2625_v37 = vrot.slane %v2617_v31, %v1430_v26  ;;  %v2636_v42 = vrot.slane %v2617_v31, %v1434_v36  ;;  %v2640_v46 = vrot.slane %v2630_v39, %v1422_v24  ;;  %v2644_v48 = vrot.slane %v2630_v39, %v1430_v26 }
 0x1f4   : > { %1315 = vmatmul.mubr.bf16.gmra.mxu1 %v2501_v45  ;;  %1388 = vmatmul.mubr.bf16.gmra.mxu0 %v2501_v45  ;;  %v2633_v41 = vrot.slane %v2617_v31, %v1426_v35  ;;  %v2648_v50 = vrot.slane %v2630_v39, %v1426_v35  ;;  %v2652_v52 = vrot.slane %v2630_v39, %v1434_v36 }
 0x1f5   : > { %2100 = vmatpush1.bf16.msra.mxu1 %v2499_v43  ;;  %1324 = vmatprep.mubr.bf16.mxu1 %v2173_v59 }
 0x1f6   : > { %2093 = vmatprep.subr.bf16.mxu1 %v2505_v47  ;;  %1397 = vmatprep.mubr.bf16.mxu0 %v2173_v59 }
 0x1f9   : > { %2101 = vmatpush1.bf16.msra.mxu1 %v2523_v54 }
 0x1fa   : > { %2094 = vmatprep.subr.bf16.mxu1 %v2527_v58 }
 0x1fc   : > { %1325 = vmatmul.mubr.bf16.gmra.mxu1 %v2549_v11  ;;  %1398 = vmatmul.mubr.bf16.gmra.mxu0 %v2549_v11 }
 0x1fd   : > { %2102 = vmatpush1.bf16.msra.mxu1 %v2546_v7  ;;  %1334 = vmatprep.mubr.bf16.mxu1 %v2173_v59 }
 0x1fe   : > { %2095 = vmatprep.subr.bf16.mxu1 %v2552_v12 }
 0x201   : > { %2103 = vmatpush1.bf16.msra.mxu1 %v1985_v20  ;;  %v1438_v20 = vsub.s32 4, %v2610_v62 }
 0x202   : > { %2096 = vmatprep.subr.bf16.mxu1 %v1978_v23 }
 0x204   : > { %1335 = vmatmul.mubr.bf16.gmra.mxu1 %v741_v29 }
 0x205   : > { %2104 = vmatpush1.bf16.msra.mxu1 %v1977_v28  ;;  %1407 = vmatprep.mubr.bf16.mxu1 %v2173_v59  ;;  %v2622_v59 = vrot.slane %v2617_v31, %v1422_v24 }
 0x206   : > { %2097 = vmatprep.subr.bf16.mxu1 %v1970_v32 }
 0x209   : > { %2105 = vmatpush1.bf16.msra.mxu1 %v1969_v34 }
 0x20c   : > { %1408 = vmatmul.mubr.bf16.vlgmr.msra.gmra.mxu1 %v741_v29 }
 0x28c   : > { %v1160_v38 = vpop.f32.mrf.mxu1  ;;  %v1233_v40 = vpop.f32.mrf.mxu0 }
 0x28d   : > { %v1460_v45 = vmul.f32 %v2622_v59, %v1160_v38  ;;  %v1462_v47 = vmul.f32 %v2625_v37, %v1233_v40 }
 0x28e   : > { %v1162_v43 = vpop.f32.mrf.mxu1  ;;  %v1235_v44 = vpop.f32.mrf.mxu0 }
 0x28f   : > { %v1461_v49 = vmul.f32 %v2633_v41, %v1162_v43  ;;  %v1463_v51 = vmul.f32 %v2636_v42, %v1235_v44  ;;  %v1566_v60 = vadd.f32 %v2640_v46, %v1460_v45  ;;  %v1568_v63 = vadd.f32 %v2644_v48, %v1462_v47 }
 0x290   : > { %v1164_v53 = vpop.f32.mrf.mxu1  ;;  %v1237_v54 = vpop.f32.mrf.mxu0 }
 0x291   : > { %v1468_v55 = vmul.f32 %v2622_v59, %v1164_v53  ;;  %v1470_v56 = vmul.f32 %v2625_v37, %v1237_v54  ;;  %v1567_v3 = vadd.f32 %v2648_v50, %v1461_v49  ;;  %v1569_v5 = vadd.f32 %v2652_v52, %v1463_v51 }
 0x292   : > { %v1166_v57 = vpop.f32.mrf.mxu1  ;;  %v1239_v58 = vpop.f32.mrf.mxu0  ;;  %v1630_v22 = vmax.f32 %v1566_v60, 0.0  ;;  %v1632_v23 = vmax.f32 %v1568_v63, 0.0 }
 0x293   : > { %v1469_v1 = vmul.f32 %v2633_v41, %v1166_v57  ;;  %v1471_v2 = vmul.f32 %v2636_v42, %v1239_v58  ;;  %v1574_v6 = vadd.f32 %v2640_v46, %v1468_v55  ;;  %v1576_v7 = vadd.f32 %v2644_v48, %v1470_v56 }
 0x294   : > { %v1170_v9 = vpop.f32.mrf.mxu1  ;;  %v1243_v10 = vpop.f32.mrf.mxu0  ;;  %v1631_v27 = vmax.f32 %v1567_v3, 0.0  ;;  %v1633_v16 = vmax.f32 %v1569_v5, 0.0  ;;  %v2689_v5 = vrot.slane %v2617_v31, %v1438_v20 }
 0x295   : > { %v1575_v11 = vadd.f32 %v2648_v50, %v1469_v1  ;;  %v1577_v12 = vadd.f32 %v2652_v52, %v1471_v2  ;;  %v1476_v0 = vmul.f32 %v2622_v59, %v1170_v9  ;;  %v1478_v8 = vmul.f32 %v2625_v37, %v1243_v10 }
 0x296   : > { %v1638_v13 = vmax.f32 %v1574_v6, 0.0  ;;  %v1640_v14 = vmax.f32 %v1576_v7, 0.0  ;;  %v1172_v15 = vpop.f32.mrf.mxu1  ;;  %v1245_v18 = vpop.f32.mrf.mxu0  ;;  %v2694_v6 = vrot.slane %v2617_v31, %v1446_v21 }
 0x297   : > { %v1582_v25 = vadd.f32 %v2640_v46, %v1476_v0  ;;  %v1584_v4 = vadd.f32 %v2644_v48, %v1478_v8  ;;  %v1477_v17 = vmul.f32 %v2633_v41, %v1172_v15  ;;  %v1479_v19 = vmul.f32 %v2636_v42, %v1245_v18 }
 0x298   : > { %v1174_v28 = vpop.f32.mrf.mxu1  ;;  %v1247_v29 = vpop.f32.mrf.mxu0  ;;  %v1700_v30 = vmax.f32 %v1630_v22, %v1638_v13  ;;  %v1726_v32 = vmax.f32 %v1632_v23, %v1640_v14  ;;  %v1639_v33 = vmax.f32 %v1575_v11, 0.0  ;;  %v1641_v34 = vmax.f32 %v1577_v12, 0.0 }
 0x299   : > { %v1583_v61 = vadd.f32 %v2648_v50, %v1477_v17  ;;  %v1585_v24 = vadd.f32 %v2652_v52, %v1479_v19  ;;  %v1484_v26 = vmul.f32 %v2622_v59, %v1174_v28  ;;  %v1486_v35 = vmul.f32 %v2625_v37, %v1247_v29 }
 0x29a   : > { %v1176_v36 = vpop.f32.mrf.mxu1  ;;  %v1249_v38 = vpop.f32.mrf.mxu0  ;;  %v1646_v40 = vmax.f32 %v1582_v25, 0.0  ;;  %v1648_v43 = vmax.f32 %v1584_v4, 0.0  ;;  %v1713_v63 = vmax.f32 %v1631_v27, %v1639_v33  ;;  %v1739_v1 = vmax.f32 %v1633_v16, %v1641_v34 }
 0x29b   : > { %v1485_v44 = vmul.f32 %v2633_v41, %v1176_v36  ;;  %v1487_v45 = vmul.f32 %v2636_v42, %v1249_v38  ;;  %v1647_v47 = vmax.f32 %v1583_v61, 0.0  ;;  %v1649_v49 = vmax.f32 %v1585_v24, 0.0 }
 0x29c   : > { %v1590_v51 = vadd.f32 %v2640_v46, %v1484_v26  ;;  %v1592_v53 = vadd.f32 %v2644_v48, %v1486_v35  ;;  %v1180_v54 = vpop.f32.mrf.mxu1  ;;  %v1253_v55 = vpop.f32.mrf.mxu0  ;;  %v1701_v7 = vmax.f32 %v1700_v30, %v1646_v40  ;;  %v1727_v9 = vmax.f32 %v1726_v32, %v1648_v43 }
 0x29d   : > { %v1591_v56 = vadd.f32 %v2648_v50, %v1485_v44  ;;  %v1593_v57 = vadd.f32 %v2652_v52, %v1487_v45  ;;  %v1492_v58 = vmul.f32 %v2622_v59, %v1180_v54  ;;  %v1494_v60 = vmul.f32 %v2625_v37, %v1253_v55 }
 0x29e   : > { %v1182_v2 = vpop.f32.mrf.mxu1  ;;  %v1255_v3 = vpop.f32.mrf.mxu0  ;;  %v1654_v12 = vmax.f32 %v1590_v51, 0.0  ;;  %v1656_v0 = vmax.f32 %v1592_v53, 0.0  ;;  %v1714_v18 = vmax.f32 %v1713_v63, %v1647_v47  ;;  %v1740_v22 = vmax.f32 %v1739_v1, %v1649_v49 }
 0x29f   : > { %v1598_v10 = vadd.f32 %v2640_v46, %v1492_v58  ;;  %v1600_v11 = vadd.f32 %v2644_v48, %v1494_v60  ;;  %v1493_v8 = vmul.f32 %v2633_v41, %v1182_v2  ;;  %v1495_v13 = vmul.f32 %v2636_v42, %v1255_v3 }
 0x2a0   : > { %v1184_v14 = vpop.f32.mrf.mxu1  ;;  %v1257_v15 = vpop.f32.mrf.mxu0  ;;  %v1655_v23 = vmax.f32 %v1591_v56, 0.0  ;;  %v1657_v25 = vmax.f32 %v1593_v57, 0.0  ;;  %v1702_v34 = vmax.f32 %v1701_v7, %v1654_v12  ;;  %v1728_v61 = vmax.f32 %v1727_v9, %v1656_v0 }
 0x2a1   : > { %v1599_v4 = vadd.f32 %v2648_v50, %v1493_v8  ;;  %v1601_v27 = vadd.f32 %v2652_v52, %v1495_v13  ;;  %v1500_v16 = vmul.f32 %v2622_v59, %v1184_v14  ;;  %v1502_v17 = vmul.f32 %v2625_v37, %v1257_v15 }
 0x2a2   : > { %v1186_v19 = vpop.f32.mrf.mxu1  ;;  %v1259_v28 = vpop.f32.mrf.mxu0  ;;  %v1662_v29 = vmax.f32 %v1598_v10, 0.0  ;;  %v1664_v30 = vmax.f32 %v1600_v11, 0.0  ;;  %v1715_v45 = vmax.f32 %v1714_v18, %v1655_v23  ;;  %v1741_v47 = vmax.f32 %v1740_v22, %v1657_v25 }
 0x2a3   : > { %v1501_v32 = vmul.f32 %v2633_v41, %v1186_v19  ;;  %v1503_v33 = vmul.f32 %v2636_v42, %v1259_v28  ;;  %v1663_v24 = vmax.f32 %v1599_v4, 0.0  ;;  %v1665_v26 = vmax.f32 %v1601_v27, 0.0 }
 0x2a4   : > { %v1190_v35 = vpop.f32.mrf.mxu1  ;;  %v1263_v36 = vpop.f32.mrf.mxu0  ;;  %v1606_v38 = vadd.f32 %v2640_v46, %v1500_v16  ;;  %v1608_v40 = vadd.f32 %v2644_v48, %v1502_v17  ;;  %v1442_v53 = vsub.s32 5, %v2610_v62  ;;  %v1450_v54 = vsub.s32 7, %v2610_v62 }
 0x2a5   : > { %v1508_v43 = vmul.f32 %v2622_v59, %v1190_v35  ;;  %v1510_v44 = vmul.f32 %v2625_v37, %v1263_v36  ;;  %v1703_v55 = vmax.f32 %v1702_v34, %v1662_v29  ;;  %v1729_v56 = vmax.f32 %v1728_v61, %v1664_v30 }
 0x2a6   : > { %v1192_v49 = vpop.f32.mrf.mxu1  ;;  %v1265_v51 = vpop.f32.mrf.mxu0  ;;  %v1607_v57 = vadd.f32 %v2648_v50, %v1501_v32  ;;  %v1609_v58 = vadd.f32 %v2652_v52, %v1503_v33  ;;  %v1716_v9 = vmax.f32 %v1715_v45, %v1663_v24  ;;  %v1742_v10 = vmax.f32 %v1741_v47, %v1665_v26 }
 0x2a7   : > { %v1614_v60 = vadd.f32 %v2640_v46, %v1508_v43  ;;  %v1616_v63 = vadd.f32 %v2644_v48, %v1510_v44  ;;  %v1509_v1 = vmul.f32 %v2633_v41, %v1192_v49  ;;  %v1511_v2 = vmul.f32 %v2636_v42, %v1265_v51 }
 0x2a8   : > { %v1194_v3 = vpop.f32.mrf.mxu1  ;;  %v1267_v7 = vpop.f32.mrf.mxu0  ;;  %v1670_v11 = vmax.f32 %v1606_v38, 0.0  ;;  %v1672_v12 = vmax.f32 %v1608_v40, 0.0  ;;  %v1671_v22 = vmax.f32 %v1607_v57, 0.0  ;;  %v1673_v23 = vmax.f32 %v1609_v58, 0.0 }
 0x2a9   : > { %v1615_v0 = vadd.f32 %v2648_v50, %v1509_v1  ;;  %v1617_v8 = vadd.f32 %v2652_v52, %v1511_v2  ;;  %v1516_v13 = vmul.f32 %v2622_v59, %v1194_v3  ;;  %v1518_v14 = vmul.f32 %v2625_v37, %v1267_v7 }
 0x2aa   : > { %v1196_v15 = vpop.f32.mrf.mxu1  ;;  %v1269_v18 = vpop.f32.mrf.mxu0  ;;  %v1678_v27 = vmax.f32 %v1614_v60, 0.0  ;;  %v1680_v16 = vmax.f32 %v1616_v63, 0.0  ;;  %v1704_v30 = vmax.f32 %v1703_v55, %v1670_v11  ;;  %v1730_v59 = vmax.f32 %v1729_v56, %v1672_v12 }
 0x2ab   : > { %v1517_v25 = vmul.f32 %v2633_v41, %v1196_v15  ;;  %v1519_v4 = vmul.f32 %v2636_v42, %v1269_v18  ;;  %v1622_v17 = vadd.f32 %v2640_v46, %v1516_v13  ;;  %v1624_v19 = vadd.f32 %v2644_v48, %v1518_v14 }
 0x2ac   : > { %v1306_v28 = vpop.f32.mrf.mxu1  ;;  %v1379_v29 = vpop.f32.mrf.mxu0  ;;  %v1679_v33 = vmax.f32 %v1615_v0, 0.0  ;;  %v1681_v34 = vmax.f32 %v1617_v8, 0.0  ;;  %v1717_v26 = vmax.f32 %v1716_v9, %v1671_v22  ;;  %v1743_v35 = vmax.f32 %v1742_v10, %v1673_v23 }
 0x2ad   : > { %v1623_v37 = vadd.f32 %v2648_v50, %v1517_v25  ;;  %v1625_v32 = vadd.f32 %v2652_v52, %v1519_v4  ;;  %v1686_v61 = vmax.f32 %v1622_v17, 0.0  ;;  %v1688_v41 = vmax.f32 %v1624_v19, 0.0 }
 0x2ae   : > { %v1308_v24 = vpop.f32.mrf.mxu1  ;;  %v1381_v42 = vpop.f32.mrf.mxu0  ;;  %v2731_v46 = vrot.slane %v2617_v31, %v1442_v53  ;;  %v2736_v48 = vrot.slane %v2617_v31, %v1450_v54  ;;  %v1705_v50 = vmax.f32 %v1704_v30, %v1678_v27  ;;  %v1731_v52 = vmax.f32 %v1730_v59, %v1680_v16 }
 0x2af   : > { %v1687_v36 = vmax.f32 %v1623_v37, 0.0  ;;  %v1689_v38 = vmax.f32 %v1625_v32, 0.0  ;;  %v1464_v44 = vmul.f32 %v2689_v5, %v1306_v28  ;;  %v2742_v45 = vrot.slane %v2630_v39, %v1438_v20 }
 0x2b0   : > { %v1310_v40 = vpop.f32.mrf.mxu1  ;;  %v1383_v43 = vpop.f32.mrf.mxu0  ;;  %v1466_v47 = vmul.f32 %v2694_v6, %v1379_v29  ;;  %v2748_v31 = vrot.slane %v2630_v39, %v1446_v21  ;;  %v1718_v49 = vmax.f32 %v1717_v26, %v1679_v33  ;;  %v1744_v51 = vmax.f32 %v1743_v35, %v1681_v34 }
 0x2b1   : > { %v1706_v55 = vmax.f32 %v1705_v50, %v1686_v61  ;;  %v1732_v56 = vmax.f32 %v1731_v52, %v1688_v41  ;;  %v1465_v60 = vmul.f32 %v2731_v46, %v1308_v24  ;;  %v2754_v20 = vrot.slane %v2630_v39, %v1442_v53 }
 0x2b2   : > { %v1312_v57 = vpop.f32.mrf.mxu1  ;;  %v1385_v58 = vpop.f32.mrf.mxu0  ;;  %v1467_v63 = vmul.f32 %v2736_v48, %v1381_v42  ;;  %v2760_v21 = vrot.slane %v2630_v39, %v1450_v54  ;;  %v1719_v1 = vmax.f32 %v1718_v49, %v1687_v36  ;;  %v1745_v2 = vmax.f32 %v1744_v51, %v1689_v38 }
 0x2b3   : > { %v1472_v3 = vmul.f32 %v2689_v5, %v1310_v40  ;;  %v1474_v7 = vmul.f32 %v2694_v6, %v1383_v43  ;;  %v1570_v11 = vadd.f32 %v2742_v45, %v1464_v44  ;;  %v1572_v53 = vadd.f32 %v2748_v31, %v1466_v47 }
 0x2b4   : > { %v1316_v9 = vpop.f32.mrf.mxu1  ;;  %v1389_v10 = vpop.f32.mrf.mxu0  ;;  %v1707_v12 = vrot.slane %v1706_v55, 4  ;;  %v1733_v0 = vrot.slane %v1732_v56, 4  ;;  %v1473_v8 = vmul.f32 %v2731_v46, %v1312_v57  ;;  %v1475_v13 = vmul.f32 %v2736_v48, %v1385_v58 }
 0x2b5   : > { %v1571_v14 = vadd.f32 %v2754_v20, %v1465_v60  ;;  %v1573_v15 = vadd.f32 %v2760_v21, %v1467_v63  ;;  %v1720_v18 = vrot.slane %v1719_v1, 4  ;;  %v1746_v22 = vrot.slane %v1745_v2, 4 }
 0x2b6   : > { %v1318_v39 = vpop.f32.mrf.mxu1  ;;  %v1391_v54 = vpop.f32.mrf.mxu0  ;;  %v1578_v23 = vadd.f32 %v2742_v45, %v1472_v3  ;;  %v1580_v25 = vadd.f32 %v2748_v31, %v1474_v7  ;;  %v1579_v16 = vadd.f32 %v2754_v20, %v1473_v8  ;;  %v1581_v17 = vadd.f32 %v2760_v21, %v1475_v13 }
 0x2b7   : > { %v2774_v19 = vmax.f32 %v1706_v55, %v1707_v12  ;;  %v2776_v28 = vmax.f32 %v1732_v56, %v1733_v0  ;;  %v1634_v29 = vmax.f32 %v1570_v11, 0.0  ;;  %v1636_v30 = vmax.f32 %v1572_v53, 0.0 }
 0x2b8   : > { %v1320_v4 = vpop.f32.mrf.mxu1  ;;  %v1393_v27 = vpop.f32.mrf.mxu0  ;;  %v1635_v32 = vmax.f32 %v1571_v14, 0.0  ;;  %v1637_v33 = vmax.f32 %v1573_v15, 0.0  ;;  %v1480_v34 = vmul.f32 %v2689_v5, %v1316_v9  ;;  %v1482_v61 = vmul.f32 %v2694_v6, %v1389_v10 }
 0x2b9   : > { %v2780_v41 = vmax.f32 %v1719_v1, %v1720_v18  ;;  %v2782_v24 = vmax.f32 %v1745_v2, %v1746_v22  ;;  %v1642_v42 = vmax.f32 %v1578_v23, 0.0  ;;  %v1644_v26 = vmax.f32 %v1580_v25, 0.0 }
 0x2ba   : > { %v1322_v59 = vpop.f32.mrf.mxu1  ;;  %v1395_v37 = vpop.f32.mrf.mxu0  ;;  %v1643_v52 = vmax.f32 %v1579_v16, 0.0  ;;  %v1645_v36 = vmax.f32 %v1581_v17, 0.0  ;;  %v1586_v38 = vadd.f32 %v2742_v45, %v1480_v34  ;;  %v1588_v40 = vadd.f32 %v2748_v31, %v1482_v61 }
 0x2bb   : > { %v1481_v43 = vmul.f32 %v2731_v46, %v1318_v39  ;;  %v1483_v44 = vmul.f32 %v2736_v48, %v1391_v54  ;;  %v1488_v47 = vmul.f32 %v2689_v5, %v1320_v4  ;;  %v1490_v49 = vmul.f32 %v2694_v6, %v1393_v27 }
 0x2bc   : > { %v1326_v35 = vpop.f32.mrf.mxu1  ;;  %v1399_v50 = vpop.f32.mrf.mxu0  ;;  %v1709_v55 = vrot.slane %v2774_v19, 2  ;;  %v1735_v56 = vrot.slane %v2776_v28, 2  ;;  %v1650_v57 = vmax.f32 %v1586_v38, 0.0  ;;  %v1652_v58 = vmax.f32 %v1588_v40, 0.0 }
 0x2bd   : > { %v1587_v60 = vadd.f32 %v2754_v20, %v1481_v43  ;;  %v1589_v63 = vadd.f32 %v2760_v21, %v1483_v44  ;;  %v1594_v1 = vadd.f32 %v2742_v45, %v1488_v47  ;;  %v1596_v2 = vadd.f32 %v2748_v31, %v1490_v49 }
 0x2be   : > { %v1328_v51 = vpop.f32.mrf.mxu1  ;;  %v1401_v3 = vpop.f32.mrf.mxu0  ;;  %v1722_v9 = vrot.slane %v2780_v41, 2  ;;  %v1748_v10 = vrot.slane %v2782_v24, 2  ;;  %v1752_v11 = vmax.f32 %v1634_v29, %v1642_v42  ;;  %v1778_v53 = vmax.f32 %v1636_v30, %v1644_v26 }
 0x2bf   : > { %v1765_v12 = vmax.f32 %v1635_v32, %v1643_v52  ;;  %v1791_v0 = vmax.f32 %v1637_v33, %v1645_v36  ;;  %v1651_v8 = vmax.f32 %v1587_v60, 0.0  ;;  %v1653_v13 = vmax.f32 %v1589_v63, 0.0 }
 0x2c0   : > { %v1330_v7 = vpop.f32.mrf.mxu1  ;;  %v1753_v54 = vmax.f32 %v1752_v11, %v1650_v57  ;;  %v1489_v14 = vmul.f32 %v2731_v46, %v1322_v59  ;;  %v1491_v15 = vmul.f32 %v2736_v48, %v1395_v37  ;;  %v1496_v18 = vmul.f32 %v2689_v5, %v1326_v35  ;;  %v1403_v27 = vpop.f32.mrf.mxu0 }
 0x2c1   : > { %v1779_v22 = vmax.f32 %v1778_v53, %v1652_v58  ;;  %v1766_v23 = vmax.f32 %v1765_v12, %v1651_v8  ;;  %v1658_v25 = vmax.f32 %v1594_v1, 0.0  ;;  %v1660_v4 = vmax.f32 %v1596_v2, 0.0 }
 0x2c2   : > { %v1332_v39 = vpop.f32.mrf.mxu1  ;;  %v1792_v17 = vmax.f32 %v1791_v0, %v1653_v13  ;;  %v1595_v29 = vadd.f32 %v2754_v20, %v1489_v14  ;;  %v1597_v30 = vadd.f32 %v2760_v21, %v1491_v15  ;;  %v1602_v32 = vadd.f32 %v2742_v45, %v1496_v18  ;;  %v1405_v43 = vpop.f32.mrf.mxu0 }
 0x2c3   : > { %v1498_v33 = vmul.f32 %v2694_v6, %v1399_v50  ;;  %v1497_v59 = vmul.f32 %v2731_v46, %v1328_v51  ;;  %v1499_v37 = vmul.f32 %v2736_v48, %v1401_v3  ;;  %v1504_v34 = vmul.f32 %v2689_v5, %v1330_v7 }
 0x2c4   : > { %v1336_v16 = vpop.f32.mrf.mxu1  ;;  %v1659_v42 = vmax.f32 %v1595_v29, 0.0  ;;  %v1661_v26 = vmax.f32 %v1597_v30, 0.0  ;;  %v1666_v35 = vmax.f32 %v1602_v32, 0.0  ;;  %v1506_v52 = vmul.f32 %v2694_v6, %v1403_v27 }
 0x2c5   : > { %v1604_v36 = vadd.f32 %v2748_v31, %v1498_v33  ;;  %v1603_v38 = vadd.f32 %v2754_v20, %v1497_v59  ;;  %v1605_v40 = vadd.f32 %v2760_v21, %v1499_v37  ;;  %v1610_v50 = vadd.f32 %v2742_v45, %v1504_v34 }
 0x2c6   : > { %v1338_v61 = vpop.f32.mrf.mxu1  ;;  %v2814_v47 = vmax.f32 %v2780_v41, %v1722_v9  ;;  %v1754_v49 = vmax.f32 %v1753_v54, %v1658_v25  ;;  %v1780_v51 = vmax.f32 %v1779_v22, %v1660_v4  ;;  %v1612_v57 = vadd.f32 %v2748_v31, %v1506_v52 }
 0x2c7   : > { %v1767_v58 = vmax.f32 %v1766_v23, %v1659_v42  ;;  %v1793_v60 = vmax.f32 %v1792_v17, %v1661_v26  ;;  %v1668_v63 = vmax.f32 %v1604_v36, 0.0  ;;  %v1667_v1 = vmax.f32 %v1603_v38, 0.0 }
 0x2c8   : > { %v1340_v44 = vpop.f32.mrf.mxu1  ;;  %v1674_v3 = vmax.f32 %v1610_v50, 0.0  ;;  %v1505_v7 = vmul.f32 %v2731_v46, %v1332_v39  ;;  %v1507_v11 = vmul.f32 %v2736_v48, %v1405_v43  ;;  %v1512_v53 = vmul.f32 %v2689_v5, %v1336_v16 }
 0x2c9   : > { %v1755_v12 = vmax.f32 %v1754_v49, %v1666_v35  ;;  %v1781_v0 = vmax.f32 %v1780_v51, %v1668_v63  ;;  %v1669_v41 = vmax.f32 %v1605_v40, 0.0  ;;  %v1676_v9 = vmax.f32 %v1612_v57, 0.0 }
 0x2ca   : > { %v1342_v2 = vpop.f32.mrf.mxu1  ;;  %v1611_v13 = vadd.f32 %v2754_v20, %v1505_v7  ;;  %v1613_v54 = vadd.f32 %v2760_v21, %v1507_v11  ;;  %v1618_v14 = vadd.f32 %v2742_v45, %v1512_v53  ;;  %v1513_v15 = vmul.f32 %v2731_v46, %v1338_v61 }
 0x2cb   : > { %v1768_v18 = vmax.f32 %v1767_v58, %v1667_v1  ;;  %v1520_v39 = vmul.f32 %v2689_v5, %v1340_v44  ;;  %v1521_v22 = vmul.f32 %v2731_v46, %v1342_v2  ;;  %v1756_v4 = vmax.f32 %v1755_v12, %v1674_v3 }
 0x2cc   : > { %v1409_v8 = vpop.f32.mrf.mxu1  ;;  %v1675_v27 = vmax.f32 %v1611_v13, 0.0  ;;  %v1682_v16 = vmax.f32 %v1618_v14, 0.0  ;;  %v1619_v17 = vadd.f32 %v2754_v20, %v1513_v15  ;;  %v1677_v37 = vmax.f32 %v1613_v54, 0.0 }
 0x2cd   : > { %v1514_v23 = vmul.f32 %v2694_v6, %v1409_v8  ;;  %v1626_v29 = vadd.f32 %v2742_v45, %v1520_v39  ;;  %v1627_v30 = vadd.f32 %v2754_v20, %v1521_v22  ;;  %v1794_v36 = vmax.f32 %v1793_v60, %v1669_v41 }
 0x2ce   : > { %v1411_v25 = vpop.f32.mrf.mxu1  ;;  %v1769_v5 = vmax.f32 %v1768_v18, %v1675_v27  ;;  %v1757_v46 = vmax.f32 %v1756_v4, %v1682_v16  ;;  %v1683_v34 = vmax.f32 %v1619_v17, 0.0  ;;  %v1749_v40 = vmax.f32 %v2782_v24, %v1748_v10 }
 0x2cf   : > { %v1620_v32 = vadd.f32 %v2748_v31, %v1514_v23  ;;  %v1515_v33 = vmul.f32 %v2736_v48, %v1411_v25  ;;  %v1690_v61 = vmax.f32 %v1626_v29, 0.0  ;;  %v1691_v42 = vmax.f32 %v1627_v30, 0.0 }
 0x2d0   : > { %v1413_v59 = vpop.f32.mrf.mxu1  ;;  %v1770_v38 = vmax.f32 %v1769_v5, %v1683_v34  ;;  %v1782_v50 = vmax.f32 %v1781_v0, %v1676_v9  ;;  %v1795_v49 = vmax.f32 %v1794_v36, %v1677_v37  ;;  %v1710_v60 = vmax.f32 %v2774_v19, %v1709_v55 }
 0x2d1   : > { %v1684_v26 = vmax.f32 %v1620_v32, 0.0  ;;  %v1621_v35 = vadd.f32 %v2760_v21, %v1515_v33  ;;  %v1522_v45 = vmul.f32 %v2694_v6, %v1413_v59  ;;  %v1758_v43 = vmax.f32 %v1757_v46, %v1690_v61 }
 0x2d2   : > { %v1415_v52 = vpop.f32.mrf.mxu1  ;;  %v1771_v51 = vmax.f32 %v1770_v38, %v1691_v42  ;;  %v1736_v6 = vmax.f32 %v2776_v28, %v1735_v56  ;;  %v1724_v3 = vrot.slane %v2814_v47, 1  ;;  %v2174_v7 = vmov 1966171168  }
 0x2d3   : > { %v1523_v20 = vmul.f32 %v2736_v48, %v1415_v52  ;;  %v1685_v44 = vmax.f32 %v1621_v35, 0.0  ;;  %v1628_v57 = vadd.f32 %v2748_v31, %v1522_v45  ;;  %v1759_v48 = vrot.slane %v1758_v43, 4 }
 0x2d4   : > { %v1783_v63 = vmax.f32 %v1782_v50, %v1684_v26  ;;  %v1772_v24 = vrot.slane %v1771_v51, 4  ;;  %v1817_v31 = vunpack.c.l.s4 %v2174_v7  ;;  %v1711_v19 = vrot.slane %v1710_v60, 1 }
 0x2d5   : > { %v1629_v58 = vadd.f32 %v2760_v21, %v1523_v20  ;;  %v1796_v10 = vmax.f32 %v1795_v49, %v1685_v44  ;;  %v1692_v1 = vmax.f32 %v1628_v57, 0.0  ;;  %v1760_v11 = vmax.f32 %v1758_v43, %v1759_v48 }
 0x2d6   : > { %v1750_v21 = vrot.slane %v1749_v40, 1  ;;  %v1773_v53 = vmax.f32 %v1771_v51, %v1772_v24  ;;  %v1737_v55 = vrot.slane %v1736_v6, 1  ;;  %v1725_v8 = vmax.f32 %v2814_v47, %v1724_v3 }
 0x2d7   : > { %v1693_v2 = vmax.f32 %v1629_v58, 0.0  ;;  %v1784_v12 = vmax.f32 %v1783_v63, %v1692_v1  ;;  %v1761_v41 = vrot.slane %v1760_v11, 2  ;;  %v1818_v13 = vunpack.c.0.s8 %v1817_v31 }
 0x2d8   : > { %v1774_v9 = vrot.slane %v1773_v53, 2  ;;  %v1751_v14 = vmax.f32 %v1749_v40, %v1750_v21  ;;  %v1712_v22 = vmax.f32 %v1710_v60, %v1711_v19  ;;  %v1738_v23 = vmax.f32 %v1736_v6, %v1737_v55 }
 0x2d9   : > { %v1797_v0 = vmax.f32 %v1796_v10, %v1693_v2  ;;  %v1785_v28 = vrot.slane %v1784_v12, 4  ;;  %v1762_v54 = vmax.f32 %v1760_v11, %v1761_v41  ;;  %v1821_v29 = vsub.s32 %v1818_v13, %v2610_v62 }
 0x2da   : > { %v1775_v15 = vmax.f32 %v1773_v53, %v1774_v9  ;;  %v1812_v17 = vcombine.low %v1712_v22, %v1725_v8  ;;  %v1813_v30 = vcombine.low %v1738_v23, %v1751_v14 }
 0x2db   : > { %v1798_v56 = vrot.slane %v1797_v0, 4  ;;  %v1786_v18 = vmax.f32 %v1784_v12, %v1785_v28  ;;  %v1763_v25 = vrot.slane %v1762_v54, 1 }
 0x2dc   : > { %v1776_v4 = vrot.slane %v1775_v15, 1  ;;  %v1822_v46 = vrot.slane %v1812_v17, %v1821_v29  ;;  %v1829_v34 = vrot.slane %v1813_v30, %v1821_v29 }
 0x2dd   : > { %v1799_v39 = vmax.f32 %v1797_v0, %v1798_v56  ;;  %v1787_v27 = vrot.slane %v1786_v18, 2  ;;  %v1764_v59 = vmax.f32 %v1762_v54, %v1763_v25 }
 0x2de   : > { %v1777_v32 = vmax.f32 %v1775_v15, %v1776_v4  ;;  %v1844_v52 = vcombine.low %v1822_v46, %v1829_v34 }
 0x2df   : > { %v1800_v16 = vrot.slane %v1799_v39, 2  ;;  %v1788_v33 = vmax.f32 %v1786_v18, %v1787_v27 }
 0x2e0   : > { %v1814_v61 = vcombine.low %v1764_v59, %v1777_v32  ;;  %v1852_v62 = vrot.slane %v1844_v52, %v1821_v29 }
 0x2e1   : > { %v1801_v47 = vmax.f32 %v1799_v39, %v1800_v16  ;;  %v1789_v5 = vrot.slane %v1788_v33, 1 }
 0x2e2   : > { %v1836_v36 = vrot.slane %v1814_v61, %v1821_v29 }
 0x2e3   : > { %v1802_v37 = vrot.slane %v1801_v47, 1  ;;  %v1790_v42 = vmax.f32 %v1788_v33, %v1789_v5 }
 0x2e5   : > { %v1803_v26 = vmax.f32 %v1801_v47, %v1802_v37 }
 0x2e7   : > { %v1815_v35 = vcombine.low %v1790_v42, %v1803_v26 }
 0x2e9   : > { %v1843_v38 = vrot.slane %v1815_v35, %v1821_v29 }
 0x2eb   : > { %v1845_v45 = vcombine.low %v1836_v36, %v1843_v38 }
 0x2ed   : > { %v1859_v20 = vrot.slane %v1845_v45, %v1821_v29 }
 0x2ef   : > { %v1860_v40 = vcombine.low %v1852_v62, %v1859_v20 }
 0x2f1   : > { %1863 = vst [vmem:[%s385_s28] sm:$0xff] %v1860_v40 }
 0x2f2 PF: > { %s20_s15 = sadd.s32 1, %s2171_s15   ;;  %s2873_s13 = smov %s2167_s14 }
 0x2f3   : > { %p17_p5 = scmp.ge.s32.totalorder %s20_s15, 4   ;;  %s2874_s14 = smov %s2876_s16 }
 0x2f5   :  { %19 = sbr.rel (!%p17_p5) target bundleno = 2 (0x2), region = 94 }

// kernel: pointnet_partseg_forward.6
= control target key start
LH: loop header
LB: loop body
LE: loop exit
PB: predicated region body
PF: predicated region fallthrough
CT: control target
= control target key end

     0   :  { %15 = vsyncpa [#allocation3], 0  ;;  %s3187_s0 = inlined_call_operand.vmem [shape: bf16[2,64,8], index: 0, kind: input, shape index: {}]   ;;  %s3188_s1 = inlined_call_operand.hbm [shape: bf16[8,64], index: 1, kind: input, shape index: {}]   ;;  %s3189_s2 = inlined_call_operand.hbm [shape: f32[1,64], index: 2, kind: input, shape index: {}]   ;;  %s3190_s3 = inlined_call_operand.hbm [shape: f32[1,64], index: 3, kind: input, shape index: {}]   ;;  %s3191_s4 = inlined_call_operand.hbm [shape: bf16[64,128], index: 4, kind: input, shape index: {}]   ;;  %s3192_s5 = inlined_call_operand.hbm [shape: f32[1,128], index: 5, kind: input, shape index: {}]   ;;  %s3193_s6 = inlined_call_operand.hbm [shape: f32[1,128], index: 6, kind: input, shape index: {}]   ;;  %s3194_s7 = inlined_call_operand.hbm [shape: bf16[128,1024], index: 7, kind: input, shape index: {}]   ;;  %s3195_s8 = inlined_call_operand.hbm [shape: f32[1,1024], index: 8, kind: input, shape index: {}]   ;;  %s3196_s9 = inlined_call_operand.hbm [shape: f32[1,1024], index: 9, kind: input, shape index: {}]   ;;  %s3197_s10 = inlined_call_operand.vmem [shape: f32[2,1,1024], index: 10, kind: output, shape index: {}]  }
   0x1   :  { %16 = vsyncpa [#allocation5], 0 }
   0x2   :  { %17 = vsyncpa [#allocation8], 0 }
   0x3   :  { %18 = vsyncpa [#allocation11], 0 }
   0x4   :  { %19 = vsyncpa [#allocation14], 0  ;;  %s2718_s13 = smov 0   ;;  %s2720_s14 = smov 0  }
   0x5   :  { %s2722_s15 = smov 0  }
   0x6 LB: > { %s2648_s16 = smov [#allocation4]   ;;  %s2087_s18 = sadd.s32 4294967295, %s2646_s15   ;;  %s2646_s15 = sphi %s2722_s15, %s25_s15   ;;  %s2642_s14 = sphi %s2720_s14, %s3208_s14   ;;  %s2638_s13 = sphi %s2718_s13, %s3207_s13  }
   0x7   : > { %s309_s17 = sshll.u32 %s2648_s16, 4  ;;  %p2089_p0 = scmp.ge.s32.totalorder %s2646_s15, 1  ;;  %s310_s17 = int_to_ptr.vmem [resolvable:$true] %s309_s17 }
   0x8   : > { %p285_p1 = scmp.lt.s32.totalorder %s2646_s15, 3  ;;  %p2736_p2 = scmp.eq.s32.totalorder %s2087_s18, 0 }
   0x9   : > { %s2649_s21 = smov [#allocation7]   ;;  %s2650_s24 = smov [#allocation10]  }
   0xa   : > { %s3201_s19 = scalar_select %p2736_p2, 1, 0 }
   0xb   : > { %p2740_p3 = pnand %p2089_p0, %p285_p1  ;;  %s330_s22 = sshll.u32 %s2649_s21, 4  ;;  %s2746_s22 = int_to_ptr.vmem [resolvable:$true] %s330_s22 }
   0xc   : > { %s355_s25 = sshll.u32 %s2650_s24, 4  ;;  %s2651_s26 = smov [#allocation13]   ;;  %s2754_s25 = int_to_ptr.vmem [resolvable:$true] %s355_s25 }
   0xd   : > { %s3202_s20 = scalar_select %p2740_p3, 1, 0 }
   0xe   : > { %p2276_p4 = pneg %p2740_p3  ;;  %s2756_s27 = sshll.u32 %s2651_s26, 4  ;;  %s380_s27 = int_to_ptr.vmem [resolvable:$true] %s2756_s27 }
   0xf   : > { %s2381_s29 = scalar_lea.vmem %s310_s17, 16  ;;  %s2388_s30 = scalar_lea.vmem %s310_s17, 32 }
  0x10   : > { %p2750_p5 = pnand %p2736_p2, %p2276_p4  ;;  %p2382_p7 = scmp.ne.s32.totalorder %s310_s17, %s2381_s29 }
  0x11   : > { %p2389_p10 = scmp.lt.s32.totalorder %s310_s17, %s310_s17  ;;  %p2390_p11 = scmp.lt.s32.totalorder %s2388_s30, %s2381_s29 }
  0x12   : > { %p2760_p6 = pneg %p2750_p5 }
  0x13   : > { %p2391_p12 = por %p2390_p11, %p2389_p10 }
  0x14   : > { %p2384_p8 = pnand %p2382_p7, %p2760_p6 }
  0x16   : > { %p2385_p9 = pneg %p2384_p8 }
  0x18   : > { %p2392_p13 = pnand %p2391_p12, %p2385_p9 }
  0x1a   : > { %2395 = shalt.err (!%p2392_p13)
}
  0x1b   : > { %2282 = dma.hbm_to_vmem [thread:$0]  (!%p2750_p5), %s3189_s2, 16, %s310_s17, [#allocation5]  }
  0x1c   : > { %s2407_s16 = scalar_lea.vmem %s2746_s22, 512  ;;  %p2415_p7 = scmp.lt.s32.totalorder %s2746_s22, %s2746_s22 }
  0x1d   : > { %p2408_p0 = scmp.ne.s32.totalorder %s2746_s22, %s2407_s16  ;;  %p2416_p8 = scmp.lt.s32.totalorder %s2407_s16, %s2407_s16 }
  0x1f   : > { %p2410_p1 = pnand %p2408_p0, %p2760_p6  ;;  %p2417_p9 = por %p2416_p8, %p2415_p7 }
  0x21   : > { %p2411_p4 = pneg %p2410_p1 }
  0x23   : > { %p2418_p10 = pnand %p2417_p9, %p2411_p4 }
  0x25   : > { %2421 = shalt.err (!%p2418_p10)
}
  0x26   : > { %s2652_s18 = smov 64   ;;  %s2653_s17 = smov 4  }
  0x27   : > { %2288 = dma.hbm_to_vmem [thread:$0]  (!%p2750_p5), %s3191_s4, 512, %s2746_s22, [#allocation8], %s2652_s18, %s2652_s18, %s2653_s17  }
  0x28   : > { %s2433_s26 = scalar_lea.vmem %s2754_s25, 16  ;;  %s2440_s29 = scalar_lea.vmem %s2754_s25, 32 }
  0x29   : > { %p2434_p11 = scmp.ne.s32.totalorder %s2754_s25, %s2433_s26  ;;  %p2441_p0 = scmp.lt.s32.totalorder %s2754_s25, %s2754_s25 }
  0x2a   : > { %p2442_p1 = scmp.lt.s32.totalorder %s2440_s29, %s2433_s26 }
  0x2b   : > { %p2436_p12 = pnand %p2434_p11, %p2760_p6 }
  0x2c   : > { %p2443_p4 = por %p2442_p1, %p2441_p0 }
  0x2d   : > { %p2437_p13 = pneg %p2436_p12 }
  0x2f   : > { %p2444_p7 = pnand %p2443_p4, %p2437_p13 }
  0x31   : > { %2447 = shalt.err (!%p2444_p7)
}
  0x32   : > { %2294 = dma.hbm_to_vmem [thread:$0]  (!%p2750_p5), %s3193_s6, 16, %s2754_s25, [#allocation11]  }
  0x33   : > { %s2459_s22 = scalar_lea.vmem %s380_s27, 128  ;;  %p2467_p11 = scmp.lt.s32.totalorder %s380_s27, %s380_s27 }
  0x34   : > { %p2460_p8 = scmp.ne.s32.totalorder %s380_s27, %s2459_s22  ;;  %p2468_p12 = scmp.lt.s32.totalorder %s2459_s22, %s2459_s22 }
  0x36   : > { %p2462_p9 = pnand %p2460_p8, %p2760_p6  ;;  %p2469_p0 = por %p2468_p12, %p2467_p11 }
  0x38   : > { %p2463_p10 = pneg %p2462_p9 }
  0x3a   : > { %p2470_p13 = pnand %p2469_p0, %p2463_p10 }
  0x3c   : > { %2473 = shalt.err (!%p2470_p13)
}
  0x3d   : > { %2300 = dma.hbm_to_vmem [thread:$0]  (!%p2750_p5), %s3195_s8, 128, %s380_s27, [#allocation14]  }
  0x3e   : > { %s37_s25 = sadd.s32 1, %s2642_s14  ;;  %s2654_s18 = smov [#allocation2]  }
  0x3f   : > { %s298_s17 = sshll.u32 %s2654_s18, 4  ;;  %p39_p1 = scmp.ge.s32.totalorder %s37_s25, 2  ;;  %s299_s17 = int_to_ptr.vmem [resolvable:$true] %s298_s17 }
  0x40   : > { %s2485_s21 = scalar_lea.vmem %s299_s17, 64  ;;  %p2493_p9 = scmp.lt.s32.totalorder %s299_s17, %s299_s17 }
  0x41   : > { %p2486_p4 = scmp.ne.s32.totalorder %s299_s17, %s2485_s21  ;;  %p2494_p10 = scmp.lt.s32.totalorder %s2485_s21, %s2485_s21 }
  0x43   : > { %p2488_p7 = pnand %p2486_p4, %p2760_p6  ;;  %p2495_p11 = por %p2494_p10, %p2493_p9 }
  0x45   : > { %p2489_p8 = pneg %p2488_p7 }
  0x47   : > { %p2496_p12 = pnand %p2495_p11, %p2489_p8 }
  0x49   : > { %2499 = shalt.err (!%p2496_p12)
}
  0x4a   : > { %2279 = dma.hbm_to_vmem [thread:$0]  (!%p2750_p5), %s3188_s1, 64, %s299_s17, [#allocation3]  }
  0x4b   : > { %s3210_s25 = smov (%p39_p1, %s37_s25), 0  ;;  %s2655_s27 = smov [#allocation6]  }
  0x4c   : > { %s320_s29 = sshll.u32 %s2655_s27, 4  ;;  %s2656_s30 = smov [#allocation9]   ;;  %s321_s29 = int_to_ptr.vmem [resolvable:$true] %s320_s29 }
  0x4d   : > { %s344_s11 = sshll.u32 %s2656_s30, 4  ;;  %s2511_s22 = scalar_lea.vmem %s321_s29, 16  ;;  %s345_s11 = int_to_ptr.vmem [resolvable:$true] %s344_s11 }
  0x4e   : > { %p2512_p0 = scmp.ne.s32.totalorder %s321_s29, %s2511_s22  ;;  %s2518_s12 = scalar_lea.vmem %s321_s29, 32 }
  0x4f   : > { %p2519_p7 = scmp.lt.s32.totalorder %s321_s29, %s321_s29  ;;  %p2520_p8 = scmp.lt.s32.totalorder %s2518_s12, %s2511_s22 }
  0x50   : > { %p2514_p13 = pnand %p2512_p0, %p2760_p6 }
  0x51   : > { %p2521_p9 = por %p2520_p8, %p2519_p7 }
  0x52   : > { %p2515_p4 = pneg %p2514_p13 }
  0x54   : > { %p2522_p10 = pnand %p2521_p9, %p2515_p4 }
  0x56   : > { %2525 = shalt.err (!%p2522_p10)
}
  0x57   : > { %2285 = dma.hbm_to_vmem [thread:$0]  (!%p2750_p5), %s3190_s3, 16, %s321_s29, [#allocation5]  }
  0x58   : > { %s2537_s17 = scalar_lea.vmem %s345_s11, 16  ;;  %s2544_s21 = scalar_lea.vmem %s345_s11, 32 }
  0x59   : > { %p2538_p1 = scmp.ne.s32.totalorder %s345_s11, %s2537_s17  ;;  %p2545_p0 = scmp.lt.s32.totalorder %s345_s11, %s345_s11 }
  0x5a   : > { %p2546_p13 = scmp.lt.s32.totalorder %s2544_s21, %s2537_s17 }
  0x5b   : > { %p2540_p11 = pnand %p2538_p1, %p2760_p6 }
  0x5c   : > { %p2547_p2 = por %p2546_p13, %p2545_p0 }
  0x5d   : > { %p2541_p12 = pneg %p2540_p11 }
  0x5f   : > { %p2548_p3 = pnand %p2547_p2, %p2541_p12 }
  0x61   : > { %2551 = shalt.err (!%p2548_p3)
}
  0x62   : > { %2291 = dma.hbm_to_vmem [thread:$0]  (!%p2750_p5), %s3192_s5, 16, %s345_s11, [#allocation8]  }
  0x63   : > { %s2657_s27 = smov [#allocation12]  }
  0x64   : > { %s365_s29 = sshll.u32 %s2657_s27, 4  ;;  %s366_s29 = int_to_ptr.vmem [resolvable:$true] %s365_s29 }
  0x65   : > { %s2563_s30 = scalar_lea.vmem %s366_s29, 8192  ;;  %p2571_p9 = scmp.lt.s32.totalorder %s366_s29, %s366_s29 }
  0x66   : > { %p2564_p4 = scmp.ne.s32.totalorder %s366_s29, %s2563_s30  ;;  %p2572_p10 = scmp.lt.s32.totalorder %s2563_s30, %s2563_s30 }
  0x68   : > { %p2566_p7 = pnand %p2564_p4, %p2760_p6  ;;  %p2573_p1 = por %p2572_p10, %p2571_p9 }
  0x6a   : > { %p2567_p8 = pneg %p2566_p7 }
  0x6c   : > { %p2574_p2 = pnand %p2573_p1, %p2567_p8 }
  0x6e   : > { %2577 = shalt.err (!%p2574_p2)
}
  0x6f   : > { %s2658_s22 = smov 512   ;;  %s2659_s12 = smov 32  }
  0x70   : > { %2297 = dma.hbm_to_vmem [thread:$0]  (!%p2750_p5), %s3194_s7, 8192, %s366_s29, [#allocation11], %s2658_s22, %s2658_s22, %s2659_s12  }
  0x71   : > { %s2660_s18 = smov [#allocation15]  }
  0x72   : > { %s390_s17 = sshll.u32 %s2660_s18, 4  ;;  %s391_s17 = int_to_ptr.vmem [resolvable:$true] %s390_s17 }
  0x73   : > { %s2589_s21 = scalar_lea.vmem %s391_s17, 128  ;;  %p2597_p0 = scmp.lt.s32.totalorder %s391_s17, %s391_s17 }
  0x74   : > { %p2590_p3 = scmp.ne.s32.totalorder %s391_s17, %s2589_s21  ;;  %p2598_p13 = scmp.lt.s32.totalorder %s2589_s21, %s2589_s21 }
  0x76   : > { %p2592_p11 = pnand %p2590_p3, %p2760_p6  ;;  %p2599_p4 = por %p2598_p13, %p2597_p0 }
  0x78   : > { %p2593_p12 = pneg %p2592_p11 }
  0x7a   : > { %p2600_p7 = pnand %p2599_p4, %p2593_p12 }
  0x7c   : > { %2603 = shalt.err (!%p2600_p7)
}
  0x7d   : > { %2303 = dma.hbm_to_vmem [thread:$0]  (!%p2750_p5), %s3196_s9, 128, %s391_s17, [#allocation14]  }
  0x7e   : > { %p3205_p8 = scmp.ne.s32.totalorder %s3202_s20, 0 }
  0x7f   : > { %p3206_p9 = scmp.ne.s32.totalorder (!%p3205_p8), %s3201_s19, 0 }
  0x80   : > { %416 = sbr.rel (%p3205_p8) target bundleno = 855 (0x357), region = 60 }
  0x85   : > { %2617 = dma.done.wait (%p3206_p9), [#allocation3], 64  }
  0x86   : > { %2619 = vsyncadd (%p3206_p9), [#allocation3], 4294967232 }
  0x87   : > { %2621 = dma.done.wait (%p3206_p9), [#allocation5], 32  }
  0x88   : > { %2623 = vsyncadd (%p3206_p9), [#allocation5], 4294967264 }
  0x89   : > { %2625 = dma.done.wait (%p3206_p9), [#allocation8], 528  }
  0x8a   : > { %2627 = vsyncadd (%p3206_p9), [#allocation8], 4294966768 }
  0x8b   : > { %2629 = dma.done.wait (%p3206_p9), [#allocation11], 8208  }
  0x8c   : > { %2631 = vsyncadd (%p3206_p9), [#allocation11], 4294959088 }
  0x8d   : > { %2633 = dma.done.wait (%p3206_p9), [#allocation14], 256  }
  0x8e   : > { %2635 = vsyncadd (%p3206_p9), [#allocation14], 4294967040  ;;  %p490_p5 = scmp.lt.s32.totalorder %s2638_s13, 1  ;;  %vm546_vm0 = vcmask 1043456   ;;  %vm533_vm1 = vcmask 64512   ;;  %v2366_v6 = vld [vmem:[#allocation7 + $0x18] sm:$0xff]  }
  0x8f   : > { %v512_v0 = vld [vmem:[#allocation2] sm:$0xf]  ;;  %2223 = vmatprep.subr.bf16.mxu1 %v2366_v6  ;;  %v2367_v7 = vld [vmem:[#allocation7 + $0x10] sm:$0xff]   ;;  %v2368_v8 = vld [vmem:[#allocation7 + $0x8] sm:$0xff]   ;;  %vm689_vm2 = vcmask 523264  }
  0x90   : > { %s3212_s13 = smov (!%p490_p5, %s2638_s13), 1  ;;  %2239 = vmatprep.subr.msk.bf16.mxu0 %vm546_vm0, %v512_v0  ;;  %v548_v1 = vsel %vm546_vm0, %v512_v0, 0  ;;  %2224 = vmatpush3.bf16.msra.mxu1 %v2366_v6  ;;  %v2369_v9 = vld [vmem:[#allocation7] sm:$0xff]   ;;  %v2872_v12 = vld [vmem:[#allocation12 + $0x1c8] sm:$0xff]  ;;  %v2121_v35 = vld [vmem:[#allocation4] ss:$0 sm:$0xff] }
  0x91   : > { %s2199_s20 = sshll.u32 %s3212_s13, 5  ;;  %2214 = vmatpush3.bf16.msra.mxu0 %v548_v1  ;;  %2225 = vmatprep.subr.bf16.mxu1 %v2367_v7  ;;  %v865_v10 = vld [vmem:[#allocation12 + $0x1c0] sm:$0xff]  ;;  %v2874_v15 = vld [vmem:[#allocation12 + $0x1e8] sm:$0xff]  ;;  %v2122_v40 = vld [vmem:[#allocation6] ss:$0 sm:$0xff]  ;;  %s2112_s19 = sshll.u32 %s3212_s13, 3 }
  0x92   : > { %s497_s27 = scalar_lea.vmem %s3187_s0, %s2199_s20  ;;  %v869_v11 = vld [vmem:[#allocation12 + $0x1e0] sm:$0xff]  ;;  %v2191_v18 = vcombine.low %v2872_v12, %v2874_v15  ;;  %v2192_v19 = vcombine.high %v2872_v12, %v2874_v15  ;;  %v858_v55 = vld [vmem:[#allocation12 + $0x188] sm:$0xff]  ;;  %s502_s22 = scalar_lea.vmem %s3197_s10, %s2112_s19 }
  0x93   : > { %v2362_v2 = vld [vmem:[%s497_s27] sm:$0xff]   ;;  %v2363_v3 = vld [vmem:[%s497_s27 + $0x8] sm:$0xff]   ;;  %v2364_v4 = vld [vmem:[%s497_s27 + $0x10] sm:$0xff]   ;;  %v2189_v13 = vcombine.low %v865_v10, %v869_v11  ;;  %v2190_v14 = vcombine.high %v865_v10, %v869_v11 }
  0x94   : > { %2215 = vmatprep.mubr.msk.bf16.mxu0 %vm533_vm1, %v2362_v2  ;;  %v2365_v5 = vld [vmem:[%s497_s27 + $0x18] sm:$0xff]   ;;  %2226 = vmatpush3.bf16.msra.mxu1 %v2367_v7  ;;  %v857_v16 = vld [vmem:[#allocation12 + $0x180] sm:$0xff] }
  0x95   : > { %2216 = vmatmul.mubr.msk.bf16.vlgmr.msra.gmra.mxu0 %vm533_vm1, %v2363_v3  ;;  %2227 = vmatprep.subr.bf16.mxu1 %v2368_v8  ;;  %v861_v17 = vld [vmem:[#allocation12 + $0x1a0] sm:$0xff]  ;;  %v862_v56 = vld [vmem:[#allocation12 + $0x1a8] sm:$0xff] }
  0x96   : > { %2219 = vmatprep.mubr.msk.bf16.mxu0 %vm533_vm1, %v2364_v4  ;;  %v2182_v20 = vcombine.high %v857_v16, %v861_v17  ;;  %v849_v21 = vld [vmem:[#allocation12 + $0x140] sm:$0xff]  ;;  %1193 = vmatprep.subr.bf16.mxu0 %v2190_v14  ;;  %v2181_v23 = vcombine.low %v857_v16, %v861_v17  ;;  %v2184_v1 = vcombine.high %v858_v55, %v862_v56  ;;  %v850_v4 = vld [vmem:[#allocation12 + $0x148] sm:$0xff] }
  0x97   : > { %v853_v22 = vld [vmem:[#allocation12 + $0x160] sm:$0xff]  ;;  %1194 = vmatpush1.bf16.msra.mxu0 %v2189_v13  ;;  %v2183_v10 = vcombine.low %v858_v55, %v862_v56  ;;  %v842_v14 = vld [vmem:[#allocation12 + $0x108] sm:$0xff] }
  0x98   : > { %2228 = vmatpush3.bf16.msra.mxu1 %v2368_v8  ;;  %1195 = vmatprep.subr.bf16.mxu0 %v2182_v20  ;;  %v2174_v24 = vcombine.high %v849_v21, %v853_v22  ;;  %v841_v25 = vld [vmem:[#allocation12 + $0x100] sm:$0xff]  ;;  %v2173_v27 = vcombine.low %v849_v21, %v853_v22  ;;  %v846_v16 = vld [vmem:[#allocation12 + $0x128] sm:$0xff] }
  0x99   : > { %2229 = vmatprep.subr.bf16.mxu1 %v2369_v9  ;;  %v845_v26 = vld [vmem:[#allocation12 + $0x120] sm:$0xff]  ;;  %v2168_v21 = vcombine.high %v842_v14, %v846_v16  ;;  %v834_v22 = vld [vmem:[#allocation12 + $0xc8] sm:$0xff]  ;;  %v2167_v12 = vcombine.low %v842_v14, %v846_v16 }
  0x9a   : > { %v2166_v28 = vcombine.high %v841_v25, %v845_v26  ;;  %v833_v29 = vld [vmem:[#allocation12 + $0xc0] sm:$0xff]  ;;  %v2165_v31 = vcombine.low %v841_v25, %v845_v26 }
  0x9b   : > { %1196 = vmatpush1.bf16.msra.mxu0 %v2181_v23  ;;  %v837_v30 = vld [vmem:[#allocation12 + $0xe0] sm:$0xff]  ;;  %v838_v23 = vld [vmem:[#allocation12 + $0xe8] sm:$0xff] }
  0x9c   : > { %2230 = vmatpush3.bf16.msra.mxu1 %v2369_v9  ;;  %1197 = vmatprep.subr.bf16.mxu0 %v2174_v24  ;;  %v2158_v32 = vcombine.high %v833_v29, %v837_v30  ;;  %v2157_v33 = vcombine.low %v833_v29, %v837_v30  ;;  %v2160_v15 = vcombine.high %v834_v22, %v838_v23  ;;  %v825_v24 = vld [vmem:[#allocation12 + $0x80] sm:$0xff] }
  0x9d   : > { %2220 = vmatmul.mubr.msk.bf16.gmra.mxu0 %vm533_vm1, %v2365_v5  ;;  %1266 = vmatprep.subr.bf16.mxu1 %v2192_v19  ;;  %v854_v5 = vld [vmem:[#allocation12 + $0x168] sm:$0xff]  ;;  %v829_v25 = vld [vmem:[#allocation12 + $0xa0] sm:$0xff] }
  0x9e   : > { %v2176_v11 = vcombine.high %v850_v4, %v854_v5  ;;  %v2175_v20 = vcombine.low %v850_v4, %v854_v5  ;;  %v2150_v26 = vcombine.high %v825_v24, %v829_v25  ;;  %v2149_v29 = vcombine.low %v825_v24, %v829_v25  ;;  %v859_v5 = vld [vmem:[#allocation12 + $0x190] sm:$0xff] }
  0x9f   : > { %1198 = vmatpush1.bf16.msra.mxu0 %v2173_v27  ;;  %v826_v27 = vld [vmem:[#allocation12 + $0x88] sm:$0xff] }
  0xa0   : > { %1199 = vmatprep.subr.bf16.mxu0 %v2166_v28  ;;  %v830_v28 = vld [vmem:[#allocation12 + $0xa8] sm:$0xff] }
  0xa1   : > { %v2151_v30 = vcombine.low %v826_v27, %v830_v28 }
  0xa3   : > { %1200 = vmatpush1.bf16.msra.mxu0 %v2165_v31  ;;  %v2152_v31 = vcombine.high %v826_v27, %v830_v28 }
  0xa4   : > { %1201 = vmatprep.subr.bf16.mxu0 %v2158_v32  ;;  %v817_v32 = vld [vmem:[#allocation12 + $0x40] sm:$0xff] }
  0xa7   : > { %1202 = vmatpush1.bf16.msra.mxu0 %v2157_v33  ;;  %v821_v33 = vld [vmem:[#allocation12 + $0x60] sm:$0xff] }
  0xa8   : > { %1203 = vmatprep.subr.bf16.mxu0 %v2150_v26 }
  0xab   : > { %1204 = vmatpush1.bf16.msra.mxu0 %v2149_v29 }
 0x155   : > { %v2217_v34 = vpop.f32.mrf.mxu0 }
 0x156   : > { %v624_v38 = vmul.f32 %v2217_v34, %v2121_v35  ;;  %v818_v34 = vld [vmem:[#allocation12 + $0x48] sm:$0xff] }
 0x157   : > { %v584_v36 = vpop.f32.mrf.mxu0 }
 0x158   : > { %v622_v37 = vmul.f32 %v2121_v35, %v584_v36  ;;  %v639_v46 = vadd.f32 %v2122_v40, %v624_v38  ;;  %v822_v36 = vld [vmem:[#allocation12 + $0x68] sm:$0xff] }
 0x159   : > { %v2218_v39 = vpop.f32.mrf.mxu0  ;;  %v2143_v38 = vcombine.low %v818_v34, %v822_v36 }
 0x15a   : > { %v625_v41 = vmul.f32 %v2218_v39, %v2121_v35  ;;  %v637_v43 = vadd.f32 %v2122_v40, %v622_v37  ;;  %v647_v57 = vmax.f32 %v639_v46, 0.0  ;;  %v2141_v37 = vcombine.low %v817_v32, %v821_v33 }
 0x15b   : > { %v587_v42 = vpop.f32.mrf.mxu0  ;;  %v2144_v39 = vcombine.high %v818_v34, %v822_v36 }
 0x15c   : > { %v640_v44 = vadd.f32 %v2122_v40, %v625_v41  ;;  %v623_v45 = vmul.f32 %v2121_v35, %v587_v42  ;;  %v645_v52 = vmax.f32 %v637_v43, 0.0  ;;  %v813_v41 = vld [vmem:[#allocation12 + $0x20] sm:$0xff]  ;;  %v810_v42 = vld [vmem:[#allocation12 + $0x8] sm:$0xff] }
 0x15d   : > { %v2221_v47 = vpop.f32.mrf.mxu0 }
 0x15e   : > { %v638_v48 = vadd.f32 %v2122_v40, %v623_v45  ;;  %v628_v49 = vmul.f32 %v2221_v47, %v2121_v35  ;;  %v648_v50 = vmax.f32 %v640_v44, 0.0  ;;  %v814_v44 = vld [vmem:[#allocation12 + $0x28] sm:$0xff] }
 0x15f   : > { %v600_v51 = vpop.f32.mrf.mxu0  ;;  %v2135_v46 = vcombine.low %v810_v42, %v814_v44  ;;  %v2136_v47 = vcombine.high %v810_v42, %v814_v44  ;;  %v835_v42 = vld [vmem:[#allocation12 + $0xd0] sm:$0xff]  ;;  %v836_v44 = vld [vmem:[#allocation12 + $0xd8] sm:$0xff] }
 0x160   : > { %v646_v53 = vmax.f32 %v638_v48, 0.0  ;;  %v626_v54 = vmul.f32 %v2121_v35, %v600_v51  ;;  %v643_v58 = vadd.f32 %v2122_v40, %v628_v49  ;;  %v654_v63 = vpack.c.bf16 %v648_v50, %v647_v57  ;;  %v867_v48 = vld [vmem:[#allocation12 + $0x1d0] sm:$0xff]  ;;  %v868_v50 = vld [vmem:[#allocation12 + $0x1d8] sm:$0xff] }
 0x161   : > { %v2222_v59 = vpop.f32.mrf.mxu0  ;;  %v871_v49 = vld [vmem:[#allocation12 + $0x1f0] sm:$0xff] }
 0x162   : > { %v641_v60 = vadd.f32 %v2122_v40, %v626_v54  ;;  %v629_v61 = vmul.f32 %v2222_v59, %v2121_v35  ;;  %v653_v62 = vpack.c.bf16 %v646_v53, %v645_v52  ;;  %v651_v6 = vmax.f32 %v643_v58, 0.0  ;;  %v872_v52 = vld [vmem:[#allocation12 + $0x1f8] sm:$0xff] }
 0x163   : > { %v603_v0 = vpop.f32.mrf.mxu0  ;;  %v2194_v51 = vcombine.high %v867_v48, %v871_v49  ;;  %v2661_v53 = vmov 0   ;;  %v2193_v54 = vcombine.low %v867_v48, %v871_v49  ;;  %v2195_v55 = vcombine.low %v868_v50, %v872_v52  ;;  %v2889_v58 = vld [vmem:[#allocation9] ss:$0 sm:$0xff] }
 0x164   : > { %v644_v2 = vadd.f32 %v2122_v40, %v629_v61  ;;  %v627_v3 = vmul.f32 %v2121_v35, %v603_v0  ;;  %2231 = vmatprep.mubr.msk.bf16.mxu1 %vm689_vm2, %v653_v62  ;;  %v649_v7 = vmax.f32 %v641_v60, 0.0  ;;  %v2142_v35 = vcombine.high %v817_v32, %v821_v33  ;;  %1225 = vmatprep.mubr.bf16.mxu0 %v2661_v53  ;;  %v2892_v62 = vld [vmem:[#allocation10] ss:$0 sm:$0xff] }
 0x165   : > { %2232 = vmatmul.mubr.msk.bf16.vlgmr.msra.gmra.mxu1 %vm689_vm2, %v654_v63  ;;  %v2196_v56 = vcombine.high %v868_v50, %v872_v52  ;;  %v844_v32 = vld [vmem:[#allocation12 + $0x118] sm:$0xff] }
 0x166   : > { %v652_v8 = vmax.f32 %v644_v2, 0.0  ;;  %v642_v9 = vadd.f32 %v2122_v40, %v627_v3  ;;  %1267 = vmatpush1.bf16.msra.mxu1 %v2191_v18  ;;  %v2159_v18 = vcombine.low %v834_v22, %v838_v23  ;;  %1205 = vmatprep.subr.bf16.mxu0 %v2142_v35  ;;  %v809_v40 = vld [vmem:[#allocation12] sm:$0xff]  ;;  %v855_v23 = vld [vmem:[#allocation12 + $0x170] sm:$0xff]  ;;  %v848_v33 = vld [vmem:[#allocation12 + $0x138] sm:$0xff] }
 0x167   : > { %1268 = vmatprep.subr.bf16.mxu1 %v2184_v1  ;;  %1206 = vmatpush1.bf16.msra.mxu0 %v2141_v37  ;;  %v2134_v43 = vcombine.high %v809_v40, %v813_v41  ;;  %v2133_v45 = vcombine.low %v809_v40, %v813_v41  ;;  %v2172_v41 = vcombine.high %v844_v32, %v848_v33 }
 0x168   : > { %v650_v13 = vmax.f32 %v642_v9, 0.0  ;;  %v656_v17 = vpack.c.bf16 %v652_v8, %v651_v6  ;;  %v860_v8 = vld [vmem:[#allocation12 + $0x198] sm:$0xff]  ;;  %v2171_v48 = vcombine.low %v844_v32, %v848_v33  ;;  %v2952_v33 = vld [vmem:[#allocation15] sm:$0xff] }
 0x169   : > { %1207 = vmatprep.subr.bf16.mxu0 %v2134_v43  ;;  %v864_v9 = vld [vmem:[#allocation12 + $0x1b8] sm:$0xff]  ;;  %v839_v43 = vld [vmem:[#allocation12 + $0xf0] sm:$0xff] }
 0x16a   : > { %v655_v19 = vpack.c.bf16 %v650_v13, %v649_v7  ;;  %1269 = vmatpush1.bf16.msra.mxu1 %v2183_v10  ;;  %v863_v7 = vld [vmem:[#allocation12 + $0x1b0] sm:$0xff]  ;;  %v2187_v25 = vcombine.low %v860_v8, %v864_v9 }
 0x16b   : > { %1270 = vmatprep.subr.bf16.mxu1 %v2176_v11  ;;  %1208 = vmatpush1.bf16.msra.mxu0 %v2133_v45  ;;  %v2185_v24 = vcombine.low %v859_v5, %v863_v7  ;;  %v840_v45 = vld [vmem:[#allocation12 + $0xf8] sm:$0xff] }
 0x16c   : > { %2235 = vmatprep.mubr.msk.bf16.mxu1 %vm689_vm2, %v655_v19  ;;  %1339 = vmatprep.subr.bf16.mxu0 %v2194_v51  ;;  %v2186_v19 = vcombine.high %v859_v5, %v863_v7  ;;  %v2162_v51 = vcombine.high %v835_v42, %v839_v43  ;;  %v2164_v52 = vcombine.high %v836_v44, %v840_v45  ;;  %v819_v5 = vld [vmem:[#allocation12 + $0x50] sm:$0xff]  ;;  %v820_v7 = vld [vmem:[#allocation12 + $0x58] sm:$0xff] }
 0x16d   : > { %2236 = vmatmul.mubr.msk.bf16.gmra.mxu1 %vm689_vm2, %v656_v17 }
 0x16e   : > { %1271 = vmatpush1.bf16.msra.mxu1 %v2175_v20  ;;  %1298 = vmatprep.mubr.bf16.mxu1 %v2661_v53  ;;  %v2188_v20 = vcombine.high %v860_v8, %v864_v9  ;;  %v824_v8 = vld [vmem:[#allocation12 + $0x78] sm:$0xff] }
 0x16f   : > { %1272 = vmatprep.subr.bf16.mxu1 %v2168_v21  ;;  %v851_v21 = vld [vmem:[#allocation12 + $0x150] sm:$0xff] }
 0x170   : > { %v2178_v28 = vcombine.high %v851_v21, %v855_v23  ;;  %v2177_v36 = vcombine.low %v851_v21, %v855_v23 }
 0x172   : > { %1273 = vmatpush1.bf16.msra.mxu1 %v2167_v12  ;;  %v852_v12 = vld [vmem:[#allocation12 + $0x158] sm:$0xff] }
 0x173   : > { %1274 = vmatprep.subr.bf16.mxu1 %v2160_v15  ;;  %v856_v15 = vld [vmem:[#allocation12 + $0x178] sm:$0xff] }
 0x174   : > { %v2180_v29 = vcombine.high %v852_v12, %v856_v15  ;;  %v2179_v37 = vcombine.low %v852_v12, %v856_v15 }
 0x176   : > { %1275 = vmatpush1.bf16.msra.mxu1 %v2159_v18 }
 0x177   : > { %1276 = vmatprep.subr.bf16.mxu1 %v2152_v31  ;;  %v847_v31 = vld [vmem:[#allocation12 + $0x130] sm:$0xff] }
 0x17a   : > { %1277 = vmatpush1.bf16.msra.mxu1 %v2151_v30  ;;  %v843_v30 = vld [vmem:[#allocation12 + $0x110] sm:$0xff] }
 0x17b   : > { %1278 = vmatprep.subr.bf16.mxu1 %v2144_v39 }
 0x17e   : > { %1279 = vmatpush1.bf16.msra.mxu1 %v2143_v38  ;;  %v2170_v38 = vcombine.high %v843_v30, %v847_v31 }
 0x17f   : > { %1280 = vmatprep.subr.bf16.mxu1 %v2136_v47  ;;  %v2169_v47 = vcombine.low %v843_v30, %v847_v31 }
 0x182   : > { %1281 = vmatpush1.bf16.msra.mxu1 %v2135_v46 }
 0x183   : > { %1412 = vmatprep.subr.bf16.mxu1 %v2196_v56  ;;  %v828_v56 = vld [vmem:[#allocation12 + $0x98] sm:$0xff] }
 0x225   : > { %v2233_v57 = vpop.f32.mrf.mxu1 }
 0x226   : > { %v776_v10 = vmul.f32 %v2233_v57, %v2889_v58  ;;  %v832_v57 = vld [vmem:[#allocation12 + $0xb8] sm:$0xff] }
 0x227   : > { %v736_v59 = vpop.f32.mrf.mxu1 }
 0x228   : > { %v774_v60 = vmul.f32 %v2889_v58, %v736_v59  ;;  %v791_v18 = vadd.f32 %v2892_v62, %v776_v10 }
 0x229   : > { %v2234_v61 = vpop.f32.mrf.mxu1 }
 0x22a   : > { %v789_v0 = vadd.f32 %v2892_v62, %v774_v60  ;;  %v777_v3 = vmul.f32 %v2234_v61, %v2889_v58  ;;  %v799_v34 = vmax.f32 %v791_v18, 0.0  ;;  %v2161_v61 = vcombine.low %v835_v42, %v839_v43 }
 0x22b   : > { %v739_v63 = vpop.f32.mrf.mxu1 }
 0x22c   : > { %v775_v1 = vmul.f32 %v2889_v58, %v739_v63  ;;  %v797_v11 = vmax.f32 %v789_v0, 0.0  ;;  %v792_v16 = vadd.f32 %v2892_v62, %v777_v3  ;;  %v2163_v63 = vcombine.low %v836_v44, %v840_v45 }
 0x22d   : > { %v2896_v2 = vpop.f32.mrf.mxu1 }
 0x22e   : > { %v790_v4 = vadd.f32 %v2892_v62, %v775_v1  ;;  %v800_v26 = vmax.f32 %v792_v16, 0.0  ;;  %v780_v59 = vmul.f32 %v2896_v2, %v2889_v58  ;;  %v2155_v2 = vcombine.low %v828_v56, %v832_v57  ;;  %v815_v16 = vld [vmem:[#allocation12 + $0x30] sm:$0xff] }
 0x22f   : > { %v752_v6 = vpop.f32.mrf.mxu1 }
 0x230   : > { %v798_v13 = vmax.f32 %v790_v4, 0.0  ;;  %v778_v35 = vmul.f32 %v2889_v58, %v752_v6  ;;  %v2911_v39 = vpack.c.bf16 %v800_v26, %v799_v34  ;;  %v2156_v4 = vcombine.high %v828_v56, %v832_v57  ;;  %v823_v6 = vld [vmem:[#allocation12 + $0x70] sm:$0xff] }
 0x231   : > { %v2238_v14 = vpop.f32.mrf.mxu1  ;;  %v795_v9 = vadd.f32 %v2892_v62, %v780_v59  ;;  %v2145_v21 = vcombine.low %v819_v5, %v823_v6 }
 0x232   : > { %v2902_v17 = vpack.c.bf16 %v798_v13, %v797_v11  ;;  %v793_v46 = vadd.f32 %v2892_v62, %v778_v35  ;;  %v781_v49 = vmul.f32 %v2238_v14, %v2889_v58  ;;  %v2146_v11 = vcombine.high %v819_v5, %v823_v6  ;;  %v811_v14 = vld [vmem:[#allocation12 + $0x10] sm:$0xff] }
 0x233   : > { %v755_v22 = vpop.f32.mrf.mxu1  ;;  %v2148_v13 = vcombine.high %v820_v7, %v824_v8  ;;  %v2138_v12 = vcombine.high %v811_v14, %v815_v16  ;;  %v2137_v18 = vcombine.low %v811_v14, %v815_v16 }
 0x234   : > { %1226 = vmatmul.mubr.bf16.vlgmr.msra.gmra.mxu0 %v2902_v17  ;;  %1299 = vmatmul.mubr.bf16.vlgmr.msra.gmra.mxu1 %v2902_v17  ;;  %v779_v27 = vmul.f32 %v2889_v58, %v755_v22  ;;  %v801_v60 = vmax.f32 %v793_v46, 0.0  ;;  %v796_v1 = vadd.f32 %v2892_v62, %v781_v49  ;;  %v2147_v22 = vcombine.low %v820_v7, %v824_v8 }
 0x235   : > { %1340 = vmatpush1.bf16.msra.mxu0 %v2193_v54  ;;  %1413 = vmatpush1.bf16.msra.mxu1 %v2195_v55  ;;  %v827_v54 = vld [vmem:[#allocation12 + $0x90] sm:$0xff] }
 0x236   : > { %1341 = vmatprep.subr.bf16.mxu0 %v2186_v19  ;;  %1414 = vmatprep.subr.bf16.mxu1 %v2188_v20  ;;  %v794_v40 = vadd.f32 %v2892_v62, %v779_v27  ;;  %v831_v55 = vld [vmem:[#allocation12 + $0xb0] sm:$0xff]  ;;  %v804_v10 = vmax.f32 %v796_v1, 0.0  ;;  %v812_v19 = vld [vmem:[#allocation12 + $0x18] sm:$0xff]  ;;  %v803_v62 = vmax.f32 %v795_v9, 0.0 }
 0x237   : > { %1235 = vmatprep.mubr.bf16.mxu0 %v2661_v53  ;;  %1308 = vmatprep.mubr.bf16.mxu1 %v2661_v53  ;;  %v2154_v0 = vcombine.high %v827_v54, %v831_v55  ;;  %v2153_v58 = vcombine.low %v827_v54, %v831_v55  ;;  %v816_v20 = vld [vmem:[#allocation12 + $0x38] sm:$0xff] }
 0x238   : > { %v802_v50 = vmax.f32 %v794_v40, 0.0  ;;  %v808_v23 = vpack.c.bf16 %v804_v10, %v803_v62  ;;  %v2140_v15 = vcombine.high %v812_v19, %v816_v20 }
 0x239   : > { %1342 = vmatpush1.bf16.msra.mxu0 %v2185_v24  ;;  %1415 = vmatpush1.bf16.msra.mxu1 %v2187_v25  ;;  %v2139_v24 = vcombine.low %v812_v19, %v816_v20 }
 0x23a   : > { %1343 = vmatprep.subr.bf16.mxu0 %v2178_v28  ;;  %1416 = vmatprep.subr.bf16.mxu1 %v2180_v29  ;;  %v807_v3 = vpack.c.bf16 %v802_v50, %v801_v60  ;;  %v2942_v28 = vld [vmem:[#allocation13] sm:$0xff] }
 0x23c   : > { %1236 = vmatmul.mubr.bf16.gmra.mxu0 %v2911_v39  ;;  %1309 = vmatmul.mubr.bf16.gmra.mxu1 %v2911_v39 }
 0x23d   : > { %1344 = vmatpush1.bf16.msra.mxu0 %v2177_v36  ;;  %1417 = vmatpush1.bf16.msra.mxu1 %v2179_v37 }
 0x23e   : > { %1345 = vmatprep.subr.bf16.mxu0 %v2170_v38  ;;  %1418 = vmatprep.subr.bf16.mxu1 %v2172_v41 }
 0x23f   : > { %1245 = vmatprep.mubr.bf16.mxu0 %v2661_v53  ;;  %1318 = vmatprep.mubr.bf16.mxu1 %v2661_v53 }
 0x241   : > { %1346 = vmatpush1.bf16.msra.mxu0 %v2169_v47  ;;  %1419 = vmatpush1.bf16.msra.mxu1 %v2171_v48 }
 0x242   : > { %1347 = vmatprep.subr.bf16.mxu0 %v2162_v51  ;;  %1420 = vmatprep.subr.bf16.mxu1 %v2164_v52 }
 0x244   : > { %1246 = vmatmul.mubr.bf16.gmra.mxu0 %v807_v3  ;;  %1319 = vmatmul.mubr.bf16.gmra.mxu1 %v807_v3 }
 0x245   : > { %1348 = vmatpush1.bf16.msra.mxu0 %v2161_v61  ;;  %1421 = vmatpush1.bf16.msra.mxu1 %v2163_v63 }
 0x246   : > { %1349 = vmatprep.subr.bf16.mxu0 %v2154_v0  ;;  %1422 = vmatprep.subr.bf16.mxu1 %v2156_v4 }
 0x247   : > { %1255 = vmatprep.mubr.bf16.mxu0 %v2661_v53  ;;  %1328 = vmatprep.mubr.bf16.mxu1 %v2661_v53 }
 0x249   : > { %1350 = vmatpush1.bf16.msra.mxu0 %v2153_v58  ;;  %1423 = vmatpush1.bf16.msra.mxu1 %v2155_v2 }
 0x24a   : > { %1351 = vmatprep.subr.bf16.mxu0 %v2146_v11  ;;  %1424 = vmatprep.subr.bf16.mxu1 %v2148_v13 }
 0x24c   : > { %1256 = vmatmul.mubr.bf16.gmra.mxu0 %v808_v23  ;;  %1329 = vmatmul.mubr.bf16.gmra.mxu1 %v808_v23 }
 0x24d   : > { %1352 = vmatpush1.bf16.msra.mxu0 %v2145_v21  ;;  %1425 = vmatpush1.bf16.msra.mxu1 %v2147_v22 }
 0x24e   : > { %1353 = vmatprep.subr.bf16.mxu0 %v2138_v12  ;;  %1426 = vmatprep.subr.bf16.mxu1 %v2140_v15 }
 0x24f   : > { %1371 = vmatprep.mubr.bf16.mxu0 %v2661_v53  ;;  %1444 = vmatprep.mubr.bf16.mxu1 %v2661_v53 }
 0x251   : > { %1354 = vmatpush1.bf16.msra.mxu0 %v2137_v18  ;;  %1427 = vmatpush1.bf16.msra.mxu1 %v2139_v24 }
 0x254   : > { %1372 = vmatmul.mubr.bf16.vlgmr.msra.gmra.mxu0 %v2902_v17  ;;  %1445 = vmatmul.mubr.bf16.vlgmr.msra.gmra.mxu1 %v2902_v17  ;;  %v1487_v17 = vlaneseq }
 0x255   : > { %1381 = vmatprep.mubr.bf16.mxu0 %v2661_v53  ;;  %1454 = vmatprep.mubr.bf16.mxu1 %v2661_v53 }
 0x256   : > { %v2938_v25 = vshrl.u32 %v1487_v17, 7 }
 0x258   : > { %v1489_v26 = vsub.s32 0, %v2938_v25  ;;  %v1497_v27 = vsub.s32 2, %v2938_v25  ;;  %v1493_v29 = vsub.s32 1, %v2938_v25  ;;  %v1501_v30 = vsub.s32 3, %v2938_v25 }
 0x259   : > { %v1505_v54 = vsub.s32 4, %v2938_v25  ;;  %v1513_v55 = vsub.s32 6, %v2938_v25  ;;  %v1509_v2 = vsub.s32 5, %v2938_v25 }
 0x25a   : > { %v2947_v31 = vrot.slane %v2942_v28, %v1489_v26  ;;  %v2955_v35 = vrot.slane %v2942_v28, %v1493_v29  ;;  %v2958_v36 = vrot.slane %v2942_v28, %v1501_v30  ;;  %v2962_v40 = vrot.slane %v2952_v33, %v1489_v26 }
 0x25b   : > { %v2966_v42 = vrot.slane %v2952_v33, %v1497_v27  ;;  %v2970_v44 = vrot.slane %v2952_v33, %v1493_v29  ;;  %v2974_v46 = vrot.slane %v2952_v33, %v1501_v30  ;;  %v2993_v9 = vrot.slane %v2942_v28, %v1505_v54 }
 0x25c   : > { %1382 = vmatmul.mubr.bf16.gmra.mxu0 %v2911_v39  ;;  %1455 = vmatmul.mubr.bf16.gmra.mxu1 %v2911_v39  ;;  %v2998_v58 = vrot.slane %v2942_v28, %v1513_v55 }
 0x25d   : > { %1391 = vmatprep.mubr.bf16.mxu0 %v2661_v53  ;;  %1464 = vmatprep.mubr.bf16.mxu1 %v2661_v53 }
 0x264   : > { %1392 = vmatmul.mubr.bf16.gmra.mxu0 %v807_v3  ;;  %1465 = vmatmul.mubr.bf16.gmra.mxu1 %v807_v3 }
 0x265   : > { %1401 = vmatprep.mubr.bf16.mxu0 %v2661_v53  ;;  %1474 = vmatprep.mubr.bf16.mxu1 %v2661_v53  ;;  %v2950_v53 = vrot.slane %v2942_v28, %v1497_v27 }
 0x26c   : > { %1402 = vmatmul.mubr.bf16.gmra.mxu0 %v808_v23  ;;  %1475 = vmatmul.mubr.bf16.gmra.mxu1 %v808_v23 }
 0x2f4   : > { %v1227_v32 = vpop.f32.mrf.mxu0  ;;  %v1300_v34 = vpop.f32.mrf.mxu1 }
 0x2f5   : > { %v1527_v39 = vmul.f32 %v2947_v31, %v1227_v32  ;;  %v1529_v41 = vmul.f32 %v2950_v53, %v1300_v34 }
 0x2f6   : > { %v1229_v37 = vpop.f32.mrf.mxu0  ;;  %v1302_v38 = vpop.f32.mrf.mxu1 }
 0x2f7   : > { %v1528_v43 = vmul.f32 %v2955_v35, %v1229_v37  ;;  %v1530_v45 = vmul.f32 %v2958_v36, %v1302_v38  ;;  %v1633_v56 = vadd.f32 %v2962_v40, %v1527_v39  ;;  %v1635_v57 = vadd.f32 %v2966_v42, %v1529_v41 }
 0x2f8   : > { %v1231_v47 = vpop.f32.mrf.mxu0  ;;  %v1304_v48 = vpop.f32.mrf.mxu1 }
 0x2f9   : > { %v1535_v49 = vmul.f32 %v2947_v31, %v1231_v47  ;;  %v1537_v50 = vmul.f32 %v2950_v53, %v1304_v48  ;;  %v1634_v61 = vadd.f32 %v2970_v44, %v1528_v43  ;;  %v1636_v63 = vadd.f32 %v2974_v46, %v1530_v45 }
 0x2fa   : > { %v1233_v51 = vpop.f32.mrf.mxu0  ;;  %v1306_v52 = vpop.f32.mrf.mxu1  ;;  %v1697_v10 = vmax.f32 %v1633_v56, 0.0  ;;  %v1699_v11 = vmax.f32 %v1635_v57, 0.0 }
 0x2fb   : > { %v1536_v59 = vmul.f32 %v2955_v35, %v1233_v51  ;;  %v1538_v60 = vmul.f32 %v2958_v36, %v1306_v52  ;;  %v1641_v3 = vadd.f32 %v2962_v40, %v1535_v49  ;;  %v1643_v4 = vadd.f32 %v2966_v42, %v1537_v50 }
 0x2fc   : > { %v1237_v0 = vpop.f32.mrf.mxu0  ;;  %v1310_v1 = vpop.f32.mrf.mxu1  ;;  %v1698_v23 = vmax.f32 %v1634_v61, 0.0  ;;  %v1700_v12 = vmax.f32 %v1636_v63, 0.0 }
 0x2fd   : > { %v1543_v5 = vmul.f32 %v2947_v31, %v1237_v0  ;;  %v1545_v6 = vmul.f32 %v2950_v53, %v1310_v1  ;;  %v1642_v13 = vadd.f32 %v2970_v44, %v1536_v59  ;;  %v1644_v14 = vadd.f32 %v2974_v46, %v1538_v60 }
 0x2fe   : > { %v1239_v7 = vpop.f32.mrf.mxu0  ;;  %v1312_v8 = vpop.f32.mrf.mxu1  ;;  %v1705_v15 = vmax.f32 %v1641_v3, 0.0  ;;  %v1707_v18 = vmax.f32 %v1643_v4, 0.0 }
 0x2ff   : > { %v1649_v16 = vadd.f32 %v2962_v40, %v1543_v5  ;;  %v1651_v19 = vadd.f32 %v2966_v42, %v1545_v6  ;;  %v1544_v20 = vmul.f32 %v2955_v35, %v1239_v7  ;;  %v1546_v62 = vmul.f32 %v2958_v36, %v1312_v8 }
 0x300   : > { %v1241_v21 = vpop.f32.mrf.mxu0  ;;  %v1314_v22 = vpop.f32.mrf.mxu1  ;;  %v1706_v32 = vmax.f32 %v1642_v13, 0.0  ;;  %v1708_v34 = vmax.f32 %v1644_v14, 0.0  ;;  %v1767_v56 = vmax.f32 %v1697_v10, %v1705_v15  ;;  %v1793_v57 = vmax.f32 %v1699_v11, %v1707_v18 }
 0x301   : > { %v1650_v24 = vadd.f32 %v2970_v44, %v1544_v20  ;;  %v1652_v17 = vadd.f32 %v2974_v46, %v1546_v62  ;;  %v1551_v26 = vmul.f32 %v2947_v31, %v1241_v21  ;;  %v1553_v27 = vmul.f32 %v2950_v53, %v1314_v22 }
 0x302   : > { %v1243_v29 = vpop.f32.mrf.mxu0  ;;  %v1316_v30 = vpop.f32.mrf.mxu1  ;;  %v1713_v39 = vmax.f32 %v1649_v16, 0.0  ;;  %v1715_v41 = vmax.f32 %v1651_v19, 0.0  ;;  %v1780_v0 = vmax.f32 %v1698_v23, %v1706_v32  ;;  %v1806_v1 = vmax.f32 %v1700_v12, %v1708_v34 }
 0x303   : > { %v1552_v37 = vmul.f32 %v2955_v35, %v1243_v29  ;;  %v1554_v38 = vmul.f32 %v2958_v36, %v1316_v30  ;;  %v1657_v43 = vadd.f32 %v2962_v40, %v1551_v26  ;;  %v1659_v45 = vadd.f32 %v2966_v42, %v1553_v27 }
 0x304   : > { %v1247_v47 = vpop.f32.mrf.mxu0  ;;  %v1320_v48 = vpop.f32.mrf.mxu1  ;;  %v1714_v49 = vmax.f32 %v1650_v24, 0.0  ;;  %v1716_v50 = vmax.f32 %v1652_v17, 0.0  ;;  %v1768_v13 = vmax.f32 %v1767_v56, %v1713_v39  ;;  %v1794_v14 = vmax.f32 %v1793_v57, %v1715_v41 }
 0x305   : > { %v1559_v51 = vmul.f32 %v2947_v31, %v1247_v47  ;;  %v1561_v52 = vmul.f32 %v2950_v53, %v1320_v48  ;;  %v1658_v59 = vadd.f32 %v2970_v44, %v1552_v37  ;;  %v1660_v60 = vadd.f32 %v2974_v46, %v1554_v38 }
 0x306   : > { %v1249_v61 = vpop.f32.mrf.mxu0  ;;  %v1322_v63 = vpop.f32.mrf.mxu1  ;;  %v1721_v5 = vmax.f32 %v1657_v43, 0.0  ;;  %v1723_v6 = vmax.f32 %v1659_v45, 0.0  ;;  %v1781_v16 = vmax.f32 %v1780_v0, %v1714_v49  ;;  %v1807_v19 = vmax.f32 %v1806_v1, %v1716_v50 }
 0x307   : > { %v1665_v3 = vadd.f32 %v2962_v40, %v1559_v51  ;;  %v1667_v4 = vadd.f32 %v2966_v42, %v1561_v52  ;;  %v1560_v7 = vmul.f32 %v2955_v35, %v1249_v61  ;;  %v1562_v8 = vmul.f32 %v2958_v36, %v1322_v63 }
 0x308   : > { %v1251_v10 = vpop.f32.mrf.mxu0  ;;  %v1324_v11 = vpop.f32.mrf.mxu1  ;;  %v1722_v20 = vmax.f32 %v1658_v59, 0.0  ;;  %v1724_v62 = vmax.f32 %v1660_v60, 0.0  ;;  %v1769_v26 = vmax.f32 %v1768_v13, %v1721_v5  ;;  %v1795_v27 = vmax.f32 %v1794_v14, %v1723_v6 }
 0x309   : > { %v1666_v21 = vadd.f32 %v2970_v44, %v1560_v7  ;;  %v1567_v22 = vmul.f32 %v2947_v31, %v1251_v10  ;;  %v1729_v15 = vmax.f32 %v1665_v3, 0.0  ;;  %v1731_v18 = vmax.f32 %v1667_v4, 0.0 }
 0x30a   : > { %v1253_v23 = vpop.f32.mrf.mxu0  ;;  %v1326_v12 = vpop.f32.mrf.mxu1  ;;  %v1569_v24 = vmul.f32 %v2950_v53, %v1324_v11  ;;  %v1668_v29 = vadd.f32 %v2974_v46, %v1562_v8  ;;  %v1782_v43 = vmax.f32 %v1781_v16, %v1722_v20  ;;  %v1808_v45 = vmax.f32 %v1807_v19, %v1724_v62 }
 0x30b   : > { %v1568_v17 = vmul.f32 %v2955_v35, %v1253_v23  ;;  %v1570_v30 = vmul.f32 %v2958_v36, %v1326_v12  ;;  %v1730_v37 = vmax.f32 %v1666_v21, 0.0  ;;  %v1673_v38 = vadd.f32 %v2962_v40, %v1567_v22 }
 0x30c   : > { %v1257_v32 = vpop.f32.mrf.mxu0  ;;  %v1330_v34 = vpop.f32.mrf.mxu1  ;;  %v3035_v49 = vrot.slane %v2952_v33, %v1505_v54  ;;  %v1517_v50 = vsub.s32 7, %v2938_v25  ;;  %v1770_v51 = vmax.f32 %v1769_v26, %v1729_v15  ;;  %v1796_v52 = vmax.f32 %v1795_v27, %v1731_v18 }
 0x30d   : > { %v1575_v39 = vmul.f32 %v2947_v31, %v1257_v32  ;;  %v1577_v41 = vmul.f32 %v2950_v53, %v1330_v34  ;;  %v1675_v56 = vadd.f32 %v2966_v42, %v1569_v24  ;;  %v1674_v57 = vadd.f32 %v2970_v44, %v1568_v17 }
 0x30e   : > { %v1259_v47 = vpop.f32.mrf.mxu0  ;;  %v1332_v48 = vpop.f32.mrf.mxu1  ;;  %v1676_v59 = vadd.f32 %v2974_v46, %v1570_v30  ;;  %v1783_v54 = vmax.f32 %v1782_v43, %v1730_v37  ;;  %v1732_v3 = vmax.f32 %v1668_v29, 0.0  ;;  %v1737_v4 = vmax.f32 %v1673_v38, 0.0 }
 0x30f   : > { %v1681_v60 = vadd.f32 %v2962_v40, %v1575_v39  ;;  %v1576_v61 = vmul.f32 %v2955_v35, %v1259_v47  ;;  %v1578_v63 = vmul.f32 %v2958_v36, %v1332_v48  ;;  %v1683_v5 = vadd.f32 %v2966_v42, %v1577_v41 }
 0x310   : > { %v1261_v0 = vpop.f32.mrf.mxu0  ;;  %v1334_v1 = vpop.f32.mrf.mxu1  ;;  %v1739_v14 = vmax.f32 %v1675_v56, 0.0  ;;  %v1738_v16 = vmax.f32 %v1674_v57, 0.0  ;;  %v1740_v62 = vmax.f32 %v1676_v59, 0.0  ;;  %v1809_v18 = vmax.f32 %v1808_v45, %v1732_v3 }
 0x311   : > { %v1682_v6 = vadd.f32 %v2970_v44, %v1576_v61  ;;  %v1684_v7 = vadd.f32 %v2974_v46, %v1578_v63  ;;  %v1583_v8 = vmul.f32 %v2947_v31, %v1261_v0  ;;  %v1585_v10 = vmul.f32 %v2950_v53, %v1334_v1 }
 0x312   : > { %v1263_v11 = vpop.f32.mrf.mxu0  ;;  %v1336_v13 = vpop.f32.mrf.mxu1  ;;  %v1745_v21 = vmax.f32 %v1681_v60, 0.0  ;;  %v1747_v31 = vmax.f32 %v1683_v5, 0.0  ;;  %v1771_v17 = vmax.f32 %v1770_v51, %v1737_v4  ;;  %v1797_v30 = vmax.f32 %v1796_v52, %v1739_v14 }
 0x313   : > { %v1584_v19 = vmul.f32 %v2955_v35, %v1263_v11  ;;  %v1586_v20 = vmul.f32 %v2958_v36, %v1336_v13  ;;  %v1689_v22 = vadd.f32 %v2962_v40, %v1583_v8  ;;  %v1691_v23 = vadd.f32 %v2966_v42, %v1585_v10 }
 0x314   : > { %v1373_v12 = vpop.f32.mrf.mxu0  ;;  %v1446_v15 = vpop.f32.mrf.mxu1  ;;  %v1746_v26 = vmax.f32 %v1682_v6, 0.0  ;;  %v1748_v27 = vmax.f32 %v1684_v7, 0.0  ;;  %v1784_v32 = vmax.f32 %v1783_v54, %v1738_v16  ;;  %v3058_v40 = vrot.slane %v2942_v28, %v1509_v2 }
 0x315   : > { %v1690_v53 = vadd.f32 %v2970_v44, %v1584_v19  ;;  %v1692_v24 = vadd.f32 %v2974_v46, %v1586_v20  ;;  %v1753_v35 = vmax.f32 %v1689_v22, 0.0  ;;  %v1755_v34 = vmax.f32 %v1691_v23, 0.0 }
 0x316   : > { %v1375_v29 = vpop.f32.mrf.mxu0  ;;  %v1448_v36 = vpop.f32.mrf.mxu1  ;;  %v1810_v42 = vmax.f32 %v1809_v18, %v1740_v62  ;;  %v1772_v37 = vmax.f32 %v1771_v17, %v1745_v21  ;;  %v1798_v41 = vmax.f32 %v1797_v30, %v1747_v31  ;;  %v1531_v43 = vmul.f32 %v2993_v9, %v1373_v12 }
 0x317   : > { %v1754_v38 = vmax.f32 %v1690_v53, 0.0  ;;  %v1756_v44 = vmax.f32 %v1692_v24, 0.0  ;;  %v1533_v45 = vmul.f32 %v2998_v58, %v1446_v15  ;;  %v3065_v47 = vrot.slane %v2952_v33, %v1513_v55 }
 0x318   : > { %v1377_v39 = vpop.f32.mrf.mxu0  ;;  %v1450_v46 = vpop.f32.mrf.mxu1  ;;  %v1785_v48 = vmax.f32 %v1784_v32, %v1746_v26  ;;  %v1811_v51 = vmax.f32 %v1810_v42, %v1748_v27  ;;  %v1773_v52 = vmax.f32 %v1772_v37, %v1753_v35  ;;  %v3070_v56 = vrot.slane %v2942_v28, %v1517_v50 }
 0x319   : > { %v1799_v60 = vmax.f32 %v1798_v41, %v1755_v34  ;;  %v1532_v61 = vmul.f32 %v3058_v40, %v1375_v29  ;;  %v3076_v63 = vrot.slane %v2952_v33, %v1509_v2  ;;  %v1539_v1 = vmul.f32 %v2993_v9, %v1377_v39 }
 0x31a   : > { %v1379_v57 = vpop.f32.mrf.mxu0  ;;  %v1452_v59 = vpop.f32.mrf.mxu1  ;;  %v1786_v55 = vmax.f32 %v1785_v48, %v1754_v38  ;;  %v1812_v0 = vmax.f32 %v1811_v51, %v1756_v44  ;;  %v1541_v54 = vmul.f32 %v2998_v58, %v1450_v46  ;;  %v1637_v28 = vadd.f32 %v3035_v49, %v1531_v43 }
 0x31b   : > { %v1639_v5 = vadd.f32 %v3065_v47, %v1533_v45  ;;  %v3085_v6 = vrot.slane %v2952_v33, %v1517_v50  ;;  %v1774_v7 = vrot.slane %v1773_v52, 4  ;;  %v1534_v2 = vmul.f32 %v3070_v56, %v1448_v36 }
 0x31c   : > { %v1383_v3 = vpop.f32.mrf.mxu0  ;;  %v1456_v4 = vpop.f32.mrf.mxu1  ;;  %v1540_v8 = vmul.f32 %v3058_v40, %v1379_v57  ;;  %v1542_v10 = vmul.f32 %v3070_v56, %v1452_v59  ;;  %v1800_v14 = vrot.slane %v1799_v60, 4  ;;  %v1638_v16 = vadd.f32 %v3076_v63, %v1532_v61 }
 0x31d   : > { %v1787_v19 = vrot.slane %v1786_v55, 4  ;;  %v1813_v20 = vrot.slane %v1812_v0, 4  ;;  %v1645_v62 = vadd.f32 %v3035_v49, %v1539_v1  ;;  %v1647_v21 = vadd.f32 %v3065_v47, %v1541_v54 }
 0x31e   : > { %v1385_v11 = vpop.f32.mrf.mxu0  ;;  %v1458_v13 = vpop.f32.mrf.mxu1  ;;  %v2662_v22 = vmov 1966171168   ;;  %v1646_v12 = vadd.f32 %v3076_v63, %v1540_v8  ;;  %v1648_v15 = vadd.f32 %v3085_v6, %v1542_v10  ;;  %v3097_v18 = vmax.f32 %v1773_v52, %v1774_v7 }
 0x31f   : > { %v3093_v23 = vunpack.c.l.s4 %v2662_v22  ;;  %v1701_v31 = vmax.f32 %v1637_v28, 0.0  ;;  %v1703_v53 = vmax.f32 %v1639_v5, 0.0  ;;  %v1640_v24 = vadd.f32 %v3085_v6, %v1534_v2 }
 0x320   : > { %v1387_v33 = vpop.f32.mrf.mxu0  ;;  %v1460_v50 = vpop.f32.mrf.mxu1  ;;  %v3100_v27 = vmax.f32 %v1799_v60, %v1800_v14  ;;  %v1702_v35 = vmax.f32 %v1638_v16, 0.0  ;;  %v1547_v29 = vmul.f32 %v2993_v9, %v1383_v3  ;;  %v1549_v36 = vmul.f32 %v2998_v58, %v1456_v4 }
 0x321   : > { %v3104_v30 = vmax.f32 %v1786_v55, %v1787_v19  ;;  %v3106_v32 = vmax.f32 %v1812_v0, %v1813_v20  ;;  %v1709_v34 = vmax.f32 %v1645_v62, 0.0  ;;  %v1711_v42 = vmax.f32 %v1647_v21, 0.0 }
 0x322   : > { %v1389_v17 = vpop.f32.mrf.mxu0  ;;  %v1462_v26 = vpop.f32.mrf.mxu1  ;;  %v1710_v44 = vmax.f32 %v1646_v12, 0.0  ;;  %v1712_v39 = vmax.f32 %v1648_v15, 0.0  ;;  %v1653_v46 = vadd.f32 %v3035_v49, %v1547_v29  ;;  %v1655_v41 = vadd.f32 %v3065_v47, %v1549_v36 }
 0x323   : > { %v1548_v43 = vmul.f32 %v3058_v40, %v1385_v11  ;;  %v1550_v45 = vmul.f32 %v3070_v56, %v1458_v13  ;;  %v1555_v48 = vmul.f32 %v2993_v9, %v1387_v33  ;;  %v1557_v51 = vmul.f32 %v2998_v58, %v1460_v50 }
 0x324   : > { %v1393_v37 = vpop.f32.mrf.mxu0  ;;  %v1466_v38 = vpop.f32.mrf.mxu1  ;;  %v1776_v59 = vrot.slane %v3097_v18, 2  ;;  %v1704_v60 = vmax.f32 %v1640_v24, 0.0  ;;  %v1717_v61 = vmax.f32 %v1653_v46, 0.0  ;;  %v1719_v55 = vmax.f32 %v1655_v41, 0.0 }
 0x325   : > { %v1654_v0 = vadd.f32 %v3076_v63, %v1548_v43  ;;  %v1656_v1 = vadd.f32 %v3085_v6, %v1550_v45  ;;  %v1661_v54 = vadd.f32 %v3035_v49, %v1555_v48  ;;  %v1663_v3 = vadd.f32 %v3065_v47, %v1557_v51 }
 0x326   : > { %v1395_v52 = vpop.f32.mrf.mxu0  ;;  %v1468_v57 = vpop.f32.mrf.mxu1  ;;  %v1802_v5 = vrot.slane %v3100_v27, 2  ;;  %v1789_v7 = vrot.slane %v3104_v30, 2  ;;  %v1815_v2 = vrot.slane %v3106_v32, 2  ;;  %v1819_v8 = vmax.f32 %v1701_v31, %v1709_v34 }
 0x327   : > { %v1845_v10 = vmax.f32 %v1703_v53, %v1711_v42  ;;  %v1832_v11 = vmax.f32 %v1702_v35, %v1710_v44  ;;  %v1858_v13 = vmax.f32 %v1704_v60, %v1712_v39  ;;  %v1718_v14 = vmax.f32 %v1654_v0, 0.0 }
 0x328   : > { %v1397_v4 = vpop.f32.mrf.mxu0  ;;  %v1470_v28 = vpop.f32.mrf.mxu1  ;;  %v1820_v20 = vmax.f32 %v1819_v8, %v1717_v61  ;;  %v1556_v62 = vmul.f32 %v3058_v40, %v1389_v17  ;;  %v1558_v21 = vmul.f32 %v3070_v56, %v1462_v26  ;;  %v1563_v33 = vmul.f32 %v2993_v9, %v1393_v37 }
 0x329   : > { %v1846_v50 = vmax.f32 %v1845_v10, %v1719_v55  ;;  %v1720_v22 = vmax.f32 %v1656_v1, 0.0  ;;  %v1725_v12 = vmax.f32 %v1661_v54, 0.0  ;;  %v1727_v15 = vmax.f32 %v1663_v3, 0.0 }
 0x32a   : > { %v1399_v16 = vpop.f32.mrf.mxu0  ;;  %v1472_v19 = vpop.f32.mrf.mxu1  ;;  %v1833_v31 = vmax.f32 %v1832_v11, %v1718_v14  ;;  %v1662_v53 = vadd.f32 %v3076_v63, %v1556_v62  ;;  %v1664_v35 = vadd.f32 %v3085_v6, %v1558_v21  ;;  %v1669_v36 = vadd.f32 %v3035_v49, %v1563_v33 }
 0x32b   : > { %v1565_v34 = vmul.f32 %v2998_v58, %v1466_v38  ;;  %v1564_v17 = vmul.f32 %v3058_v40, %v1395_v52  ;;  %v1566_v26 = vmul.f32 %v3070_v56, %v1468_v57  ;;  %v1571_v42 = vmul.f32 %v2993_v9, %v1397_v4 }
 0x32c   : > { %v1403_v24 = vpop.f32.mrf.mxu0  ;;  %v1476_v29 = vpop.f32.mrf.mxu1  ;;  %v1726_v37 = vmax.f32 %v1662_v53, 0.0  ;;  %v1728_v44 = vmax.f32 %v1664_v35, 0.0  ;;  %v1733_v39 = vmax.f32 %v1669_v36, 0.0  ;;  %v1573_v46 = vmul.f32 %v2998_v58, %v1470_v28 }
 0x32d   : > { %v1671_v43 = vadd.f32 %v3065_v47, %v1565_v34  ;;  %v1670_v45 = vadd.f32 %v3076_v63, %v1564_v17  ;;  %v1672_v48 = vadd.f32 %v3085_v6, %v1566_v26  ;;  %v1677_v38 = vadd.f32 %v3035_v49, %v1571_v42 }
 0x32e   : > { %v1405_v41 = vpop.f32.mrf.mxu0  ;;  %v1478_v51 = vpop.f32.mrf.mxu1  ;;  %v3138_v52 = vmax.f32 %v3104_v30, %v1789_v7  ;;  %v1859_v57 = vmax.f32 %v1858_v13, %v1720_v22  ;;  %v1821_v60 = vmax.f32 %v1820_v20, %v1725_v12  ;;  %v1679_v61 = vadd.f32 %v3065_v47, %v1573_v46 }
 0x32f   : > { %v1847_v55 = vmax.f32 %v1846_v50, %v1727_v15  ;;  %v1834_v0 = vmax.f32 %v1833_v31, %v1726_v37  ;;  %v1735_v1 = vmax.f32 %v1671_v43, 0.0  ;;  %v1734_v54 = vmax.f32 %v1670_v45, 0.0 }
 0x330   : > { %v1741_v3 = vmax.f32 %v1677_v38, 0.0  ;;  %v1572_v4 = vmul.f32 %v3058_v40, %v1399_v16  ;;  %v1574_v28 = vmul.f32 %v3070_v56, %v1472_v19  ;;  %v1579_v8 = vmul.f32 %v2993_v9, %v1403_v24  ;;  %v1407_v10 = vpop.f32.mrf.mxu0  ;;  %v1480_v13 = vpop.f32.mrf.mxu1 }
 0x331   : > { %v1860_v11 = vmax.f32 %v1859_v57, %v1728_v44  ;;  %v1822_v14 = vmax.f32 %v1821_v60, %v1733_v39  ;;  %v1736_v30 = vmax.f32 %v1672_v48, 0.0  ;;  %v1743_v7 = vmax.f32 %v1679_v61, 0.0 }
 0x332   : > { %v1678_v20 = vadd.f32 %v3076_v63, %v1572_v4  ;;  %v1680_v62 = vadd.f32 %v3085_v6, %v1574_v28  ;;  %v1685_v21 = vadd.f32 %v3035_v49, %v1579_v8  ;;  %v1581_v33 = vmul.f32 %v2998_v58, %v1476_v29  ;;  %v1409_v34 = vpop.f32.mrf.mxu0  ;;  %v1482_v17 = vpop.f32.mrf.mxu1 }
 0x333   : > { %v1848_v50 = vmax.f32 %v1847_v55, %v1735_v1  ;;  %v1580_v16 = vmul.f32 %v3058_v40, %v1405_v41  ;;  %v1582_v19 = vmul.f32 %v3070_v56, %v1478_v51  ;;  %v1587_v22 = vmul.f32 %v2993_v9, %v1407_v10 }
 0x334   : > { %v1835_v12 = vmax.f32 %v1834_v0, %v1734_v54  ;;  %v1823_v15 = vmax.f32 %v1822_v14, %v1741_v3  ;;  %v1749_v24 = vmax.f32 %v1685_v21, 0.0  ;;  %v1687_v31 = vadd.f32 %v3065_v47, %v1581_v33 }
 0x335   : > { %v1686_v53 = vadd.f32 %v3076_v63, %v1580_v16  ;;  %v1688_v35 = vadd.f32 %v3085_v6, %v1582_v19  ;;  %v1693_v36 = vadd.f32 %v3035_v49, %v1587_v22  ;;  %v1589_v29 = vmul.f32 %v2998_v58, %v1480_v13 }
 0x336   : > { %v1861_v26 = vmax.f32 %v1860_v11, %v1736_v30  ;;  %v1742_v42 = vmax.f32 %v1678_v20, 0.0  ;;  %v1744_v37 = vmax.f32 %v1680_v62, 0.0  ;;  %v1751_v44 = vmax.f32 %v1687_v31, 0.0 }
 0x337   : > { %v1849_v9 = vmax.f32 %v1848_v50, %v1743_v7  ;;  %v1824_v39 = vmax.f32 %v1823_v15, %v1749_v24  ;;  %v1757_v46 = vmax.f32 %v1693_v36, 0.0  ;;  %v1695_v41 = vadd.f32 %v3065_v47, %v1589_v29 }
 0x338   : > { %v1750_v43 = vmax.f32 %v1686_v53, 0.0  ;;  %v1752_v45 = vmax.f32 %v1688_v35, 0.0  ;;  %v1588_v48 = vmul.f32 %v3058_v40, %v1409_v34  ;;  %v1590_v38 = vmul.f32 %v3070_v56, %v1482_v17 }
 0x339   : > { %v1816_v58 = vmax.f32 %v3106_v32, %v1815_v2  ;;  %v1850_v49 = vmax.f32 %v1849_v9, %v1751_v44  ;;  %v1825_v51 = vmax.f32 %v1824_v39, %v1757_v46  ;;  %v1759_v57 = vmax.f32 %v1695_v41, 0.0 }
 0x33a   : > { %v1836_v60 = vmax.f32 %v1835_v12, %v1742_v42  ;;  %v1862_v61 = vmax.f32 %v1861_v26, %v1744_v37  ;;  %v1694_v55 = vadd.f32 %v3076_v63, %v1588_v48  ;;  %v1696_v0 = vadd.f32 %v3085_v6, %v1590_v38 }
 0x33b   : > { %v1777_v47 = vmax.f32 %v3097_v18, %v1776_v59  ;;  %v1803_v40 = vmax.f32 %v3100_v27, %v1802_v5  ;;  %v1826_v56 = vrot.slane %v1825_v51, 4  ;;  %v1851_v1 = vmax.f32 %v1850_v49, %v1759_v57 }
 0x33c   : > { %v1837_v32 = vmax.f32 %v1836_v60, %v1750_v43  ;;  %v1863_v2 = vmax.f32 %v1862_v61, %v1752_v45  ;;  %v1758_v54 = vmax.f32 %v1694_v55, 0.0  ;;  %v1760_v3 = vmax.f32 %v1696_v0, 0.0 }
 0x33d   : > { %v1791_v4 = vrot.slane %v3138_v52, 1  ;;  %v1817_v28 = vrot.slane %v1816_v58, 1  ;;  %v1827_v63 = vmax.f32 %v1825_v51, %v1826_v56  ;;  %v1852_v8 = vrot.slane %v1851_v1, 4 }
 0x33e   : > { %v1838_v6 = vmax.f32 %v1837_v32, %v1758_v54  ;;  %v1864_v10 = vmax.f32 %v1863_v2, %v1760_v3  ;;  %v1778_v11 = vrot.slane %v1777_v47, 1  ;;  %v1804_v14 = vrot.slane %v1803_v40, 1 }
 0x33f   : > { %v1828_v18 = vrot.slane %v1827_v63, 2  ;;  %v1853_v59 = vmax.f32 %v1851_v1, %v1852_v8  ;;  %v1792_v27 = vmax.f32 %v3138_v52, %v1791_v4  ;;  %v1885_v5 = vunpack.c.0.s8 %v3093_v23 }
 0x340   : > { %v1839_v30 = vrot.slane %v1838_v6, 4  ;;  %v1865_v7 = vrot.slane %v1864_v10, 4  ;;  %v1818_v13 = vmax.f32 %v1816_v58, %v1817_v28  ;;  %v1779_v50 = vmax.f32 %v1777_v47, %v1778_v11 }
 0x341   : > { %v1854_v20 = vrot.slane %v1853_v59, 2  ;;  %v1829_v62 = vmax.f32 %v1827_v63, %v1828_v18  ;;  %v1805_v16 = vmax.f32 %v1803_v40, %v1804_v14  ;;  %v1888_v24 = vsub.s32 %v1885_v5, %v2938_v25 }
 0x342   : > { %v1840_v21 = vmax.f32 %v1838_v6, %v1839_v30  ;;  %v1866_v33 = vmax.f32 %v1864_v10, %v1865_v7  ;;  %v1879_v15 = vcombine.low %v1779_v50, %v1792_v27 }
 0x343   : > { %v1855_v19 = vmax.f32 %v1853_v59, %v1854_v20  ;;  %v1880_v31 = vcombine.low %v1805_v16, %v1818_v13  ;;  %v1830_v53 = vrot.slane %v1829_v62, 1 }
 0x344   : > { %v1841_v22 = vrot.slane %v1840_v21, 2  ;;  %v1867_v12 = vrot.slane %v1866_v33, 2  ;;  %v1889_v34 = vrot.slane %v1879_v15, %v1888_v24 }
 0x345   : > { %v1856_v35 = vrot.slane %v1855_v19, 1  ;;  %v1896_v17 = vrot.slane %v1880_v31, %v1888_v24  ;;  %v1831_v26 = vmax.f32 %v1829_v62, %v1830_v53 }
 0x346   : > { %v1842_v36 = vmax.f32 %v1840_v21, %v1841_v22  ;;  %v1868_v52 = vmax.f32 %v1866_v33, %v1867_v12 }
 0x347   : > { %v1857_v42 = vmax.f32 %v1855_v19, %v1856_v35  ;;  %v1911_v46 = vcombine.low %v1889_v34, %v1896_v17 }
 0x348   : > { %v1843_v23 = vrot.slane %v1842_v36, 1  ;;  %v1869_v29 = vrot.slane %v1868_v52, 1 }
 0x349   : > { %v1919_v45 = vrot.slane %v1911_v46, %v1888_v24 }
 0x34a   : > { %v1844_v37 = vmax.f32 %v1842_v36, %v1843_v23  ;;  %v1870_v44 = vmax.f32 %v1868_v52, %v1869_v29 }
 0x34c   : > { %v1881_v9 = vcombine.low %v1831_v26, %v1844_v37  ;;  %v1882_v39 = vcombine.low %v1857_v42, %v1870_v44 }
 0x34e   : > { %v1903_v41 = vrot.slane %v1881_v9, %v1888_v24  ;;  %v1910_v43 = vrot.slane %v1882_v39, %v1888_v24 }
 0x350   : > { %v1912_v25 = vcombine.low %v1903_v41, %v1910_v43 }
 0x352   : > { %v1926_v48 = vrot.slane %v1912_v25, %v1888_v24 }
 0x354   : > { %v1927_v38 = vcombine.low %v1919_v45, %v1926_v48 }
 0x356   : > { %1930 = vst [vmem:[%s502_s22] sm:$0xff] %v1927_v38 }
 0x357 PF: > { %s25_s15 = sadd.s32 1, %s2646_s15   ;;  %s3207_s13 = smov %s2642_s14 }
 0x358   : > { %p22_p6 = scmp.ge.s32.totalorder %s25_s15, 4   ;;  %s3208_s14 = smov %s3210_s25 }
 0x35a   :  { %24 = sbr.rel (!%p22_p6) target bundleno = 6 (0x6), region = 131 }
 0x35f   :  { %1950 = vsyncpa [#allocation3], 1 }
 0x360   :  { %1952 = vsyncpa [#allocation3 + $0x1], 1 }
 0x361   :  { %1953 = vsyncpa [#allocation5], 1 }
 0x362   :  { %1954 = vsyncpa [#allocation8], 1 }
 0x363   :  { %1955 = vsyncpa [#allocation11], 1 }
 0x364   :  { %1956 = vsyncpa [#allocation14], 1 }

// kernel: pointnet_partseg_forward.10
= control target key start
LH: loop header
LB: loop body
LE: loop exit
PB: predicated region body
PF: predicated region fallthrough
CT: control target
= control target key end

     0   :  { %s2629_s17 = smov 0   ;;  %s2631_s18 = smov 0   ;;  %s3281_s0 = inlined_call_operand.vmem [shape: f32[2,1,256], index: 0, kind: input, shape index: {}]   ;;  %s3282_s1 = inlined_call_operand.vmem [shape: bf16[2,64,128], index: 1, kind: input, shape index: {}]   ;;  %s3283_s2 = inlined_call_operand.vmem [shape: bf16[2,64,128], index: 2, kind: input, shape index: {}]   ;;  %s3284_s3 = inlined_call_operand.vmem [shape: bf16[2,64,128], index: 3, kind: input, shape index: {}]   ;;  %s3285_s4 = inlined_call_operand.vmem [shape: bf16[2,64,512], index: 4, kind: input, shape index: {}]   ;;  %s3286_s5 = inlined_call_operand.vmem [shape: bf16[128,256], index: 5, kind: input, shape index: {}]   ;;  %s3287_s6 = inlined_call_operand.vmem [shape: bf16[128,256], index: 6, kind: input, shape index: {}]   ;;  %s3288_s7 = inlined_call_operand.vmem [shape: bf16[128,256], index: 7, kind: input, shape index: {}]   ;;  %s3289_s8 = inlined_call_operand.vmem [shape: bf16[512,256], index: 8, kind: input, shape index: {}]   ;;  %s3290_s9 = inlined_call_operand.vmem [shape: f32[1,256], index: 9, kind: input, shape index: {}]   ;;  %s3291_s10 = inlined_call_operand.vmem [shape: f32[1,256], index: 10, kind: input, shape index: {}]   ;;  %s3292_s11 = inlined_call_operand.vmem [shape: bf16[2,64,256], index: 11, kind: output, shape index: {}]  }
   0x1   :  { %s2633_s19 = smov 0  }
   0x2 LB: > { %s33_s20 = sadd.s32 1, %s2562_s18  ;;  %p2140_p0 = scmp.ge.s32.totalorder %s2566_s19, 1  ;;  %s2566_s19 = sphi %s2633_s19, %s21_s19   ;;  %s2562_s18 = sphi %s2631_s18, %s3314_s18   ;;  %s2558_s17 = sphi %s2629_s17, %s3313_s17  }
   0x3   : > { %p35_p1 = scmp.ge.s32.totalorder %s33_s20, 2  ;;  %p419_p2 = scmp.lt.s32.totalorder %s2566_s19, 3 }
   0x5   : > { %s3316_s20 = smov (%p35_p1, %s33_s20), 0  ;;  %p420_p3 = pnand %p2140_p0, %p419_p2 }
   0x7   : > { %423 = sbr.rel (%p420_p3) target bundleno = 380 (0x17c), region = 64 }
   0xc   : > { %v2340_v0 = vld [vmem:[%s3287_s6 + $0x74] ss:$8 sps:$4 sm:$0xff]   ;;  %v2568_v2 = vmov 0   ;;  %v2344_v3 = vld [vmem:[%s3287_s6 + $0x70] ss:$8 sps:$4 sm:$0xff]   ;;  %p500_p4 = scmp.lt.s32.totalorder %s2558_s17, 1 }
   0xd   : > { %v2342_v1 = vld [vmem:[%s3286_s5 + $0x74] ss:$8 sps:$4 sm:$0xff]   ;;  %741 = vmatprep.mubr.bf16.mxu0 %v2568_v2  ;;  %918 = vmatprep.mubr.bf16.mxu1 %v2568_v2  ;;  %v2345_v4 = vld [vmem:[%s3286_s5 + $0x70] ss:$8 sps:$4 sm:$0xff]   ;;  %v2346_v5 = vld [vmem:[%s3287_s6 + $0x64] ss:$8 sps:$4 sm:$0xff]  }
   0xe   : > { %709 = vmatprep.subr.bf16.mxu0 %v2340_v0  ;;  %886 = vmatprep.subr.bf16.mxu1 %v2342_v1  ;;  %v2348_v6 = vld [vmem:[%s3286_s5 + $0x64] ss:$8 sps:$4 sm:$0xff]   ;;  %v2350_v7 = vld [vmem:[%s3287_s6 + $0x60] ss:$8 sps:$4 sm:$0xff]   ;;  %v2352_v9 = vld [vmem:[%s3287_s6 + $0x54] ss:$8 sps:$4 sm:$0xff]  }
   0xf   : > { %710 = vmatpush1.bf16.msra.mxu0 %v2344_v3  ;;  %887 = vmatpush1.bf16.msra.mxu1 %v2345_v4  ;;  %v2351_v8 = vld [vmem:[%s3286_s5 + $0x60] ss:$8 sps:$4 sm:$0xff]   ;;  %v2354_v10 = vld [vmem:[%s3286_s5 + $0x54] ss:$8 sps:$4 sm:$0xff]   ;;  %v2356_v11 = vld [vmem:[%s3287_s6 + $0x50] ss:$8 sps:$4 sm:$0xff]  }
  0x10   : > { %711 = vmatprep.subr.bf16.mxu0 %v2346_v5  ;;  %888 = vmatprep.subr.bf16.mxu1 %v2348_v6  ;;  %v2357_v12 = vld [vmem:[%s3286_s5 + $0x50] ss:$8 sps:$4 sm:$0xff]   ;;  %v2358_v13 = vld [vmem:[%s3287_s6 + $0x44] ss:$8 sps:$4 sm:$0xff]   ;;  %v2362_v15 = vld [vmem:[%s3287_s6 + $0x40] ss:$8 sps:$4 sm:$0xff]  }
  0x11   : > { %v2360_v14 = vld [vmem:[%s3286_s5 + $0x44] ss:$8 sps:$4 sm:$0xff]   ;;  %v2363_v16 = vld [vmem:[%s3286_s5 + $0x40] ss:$8 sps:$4 sm:$0xff]   ;;  %v2364_v17 = vld [vmem:[%s3287_s6 + $0x34] ss:$8 sps:$4 sm:$0xff]  }
  0x12   : > { %v2366_v18 = vld [vmem:[%s3286_s5 + $0x34] ss:$8 sps:$4 sm:$0xff]   ;;  %s3318_s17 = smov (!%p500_p4, %s2558_s17), 1  ;;  %v2368_v19 = vld [vmem:[%s3287_s6 + $0x30] ss:$8 sps:$4 sm:$0xff]  }
  0x13   : > { %712 = vmatpush1.bf16.msra.mxu0 %v2350_v7  ;;  %889 = vmatpush1.bf16.msra.mxu1 %v2351_v8  ;;  %v2369_v20 = vld [vmem:[%s3286_s5 + $0x30] ss:$8 sps:$4 sm:$0xff]   ;;  %v2370_v21 = vld [vmem:[%s3287_s6 + $0x24] ss:$8 sps:$4 sm:$0xff]   ;;  %s2722_s16 = sshll.u32 %s3318_s17, 5  ;;  %s2306_s14 = sshll.u32 %s3318_s17, 6 }
  0x14   : > { %713 = vmatprep.subr.bf16.mxu0 %v2352_v9  ;;  %890 = vmatprep.subr.bf16.mxu1 %v2354_v10  ;;  %v2372_v22 = vld [vmem:[%s3286_s5 + $0x24] ss:$8 sps:$4 sm:$0xff]   ;;  %v2374_v23 = vld [vmem:[%s3287_s6 + $0x20] ss:$8 sps:$4 sm:$0xff]   ;;  %v2376_v25 = vld [vmem:[%s3287_s6 + $0x14] ss:$8 sps:$4 sm:$0xff]   ;;  %s2737_s29 = scalar_lea.vmem %s3283_s2, %s2722_s16  ;;  %s2746_s15 = scalar_lea.vmem %s3282_s1, %s2722_s16 }
  0x15   : > { %v2375_v24 = vld [vmem:[%s3286_s5 + $0x20] ss:$8 sps:$4 sm:$0xff]   ;;  %v2378_v26 = vld [vmem:[%s3286_s5 + $0x14] ss:$8 sps:$4 sm:$0xff]   ;;  %v2380_v27 = vld [vmem:[%s3287_s6 + $0x10] ss:$8 sps:$4 sm:$0xff]   ;;  %s2800_s27 = scalar_lea.vmem %s3284_s3, %s2722_s16  ;;  %s3208_s16 = scalar_lea.vmem %s3292_s11, %s2306_s14 }
  0x16   : > { %v2381_v28 = vld [vmem:[%s3286_s5 + $0x10] ss:$8 sps:$4 sm:$0xff]   ;;  %v2382_v29 = vld [vmem:[%s3287_s6 + $0x4] ss:$8 sps:$4 sm:$0xff]   ;;  %v2386_v31 = vld [vmem:[%s3287_s6] ss:$8 sps:$4 sm:$0xff]  }
  0x17   : > { %714 = vmatpush1.bf16.msra.mxu0 %v2356_v11  ;;  %891 = vmatpush1.bf16.msra.mxu1 %v2357_v12  ;;  %v2384_v30 = vld [vmem:[%s3286_s5 + $0x4] ss:$8 sps:$4 sm:$0xff]   ;;  %v2387_v32 = vld [vmem:[%s3286_s5] ss:$8 sps:$4 sm:$0xff]   ;;  %v2392_v33 = vld [vmem:[%s3288_s7 + $0x74] ss:$8 sps:$4 sm:$0xff]  }
  0x18   : > { %715 = vmatprep.subr.bf16.mxu0 %v2358_v13  ;;  %892 = vmatprep.subr.bf16.mxu1 %v2360_v14  ;;  %v2388_v34 = vld [vmem:[%s2737_s29] sm:$0xff]   ;;  %v2390_v36 = vld [vmem:[%s3288_s7 + $0x70] ss:$8 sps:$4 sm:$0xff]   ;;  %v2400_v39 = vld [vmem:[%s3288_s7 + $0x54] ss:$8 sps:$4 sm:$0xff]  }
  0x19   : > { %v2389_v35 = vld [vmem:[%s2746_s15] sm:$0xff]   ;;  %v2396_v40 = vld [vmem:[%s2737_s29 + $0x8] sm:$0xff]   ;;  %v2417_v42 = vld [vmem:[%s3289_s8 + $0x70] ss:$8 sps:$4 sm:$0xff]  }
  0x1a   : > { %v2395_v37 = vld [vmem:[%s3288_s7 + $0x64] ss:$8 sps:$4 sm:$0xff]   ;;  %v2393_v38 = vld [vmem:[%s3288_s7 + $0x60] ss:$8 sps:$4 sm:$0xff]   ;;  %v2419_v43 = vld [vmem:[%s3289_s8 + $0x74] ss:$8 sps:$4 sm:$0xff]  }
  0x1b   : > { %716 = vmatpush1.bf16.msra.mxu0 %v2362_v15  ;;  %893 = vmatpush1.bf16.msra.mxu1 %v2363_v16  ;;  %v2397_v41 = vld [vmem:[%s2746_s15 + $0x8] sm:$0xff]   ;;  %v2398_v44 = vld [vmem:[%s3288_s7 + $0x50] ss:$8 sps:$4 sm:$0xff]   ;;  %v2408_v49 = vld [vmem:[%s3288_s7 + $0x34] ss:$8 sps:$4 sm:$0xff]  }
  0x1c   : > { %717 = vmatprep.subr.bf16.mxu0 %v2364_v17  ;;  %894 = vmatprep.subr.bf16.mxu1 %v2366_v18  ;;  %v2403_v45 = vld [vmem:[%s3288_s7 + $0x44] ss:$8 sps:$4 sm:$0xff]   ;;  %v2423_v47 = vld [vmem:[%s3289_s8 + $0x60] ss:$8 sps:$4 sm:$0xff]   ;;  %v2432_v50 = vld [vmem:[%s3289_s8 + $0x54] ss:$8 sps:$4 sm:$0xff]  }
  0x1d   : > { %v2425_v46 = vld [vmem:[%s3289_s8 + $0x64] ss:$8 sps:$4 sm:$0xff]   ;;  %v2401_v48 = vld [vmem:[%s3288_s7 + $0x40] ss:$8 sps:$4 sm:$0xff]   ;;  %v2404_v51 = vld [vmem:[%s2737_s29 + $0x10] sm:$0xff]  }
  0x1e   : > { %v2405_v52 = vld [vmem:[%s2746_s15 + $0x10] sm:$0xff]   ;;  %v2411_v54 = vld [vmem:[%s3288_s7 + $0x24] ss:$8 sps:$4 sm:$0xff]   ;;  %v2409_v57 = vld [vmem:[%s3288_s7 + $0x20] ss:$8 sps:$4 sm:$0xff]  }
  0x1f   : > { %718 = vmatpush1.bf16.msra.mxu0 %v2368_v19  ;;  %895 = vmatpush1.bf16.msra.mxu1 %v2369_v20  ;;  %v2406_v53 = vld [vmem:[%s3288_s7 + $0x30] ss:$8 sps:$4 sm:$0xff]   ;;  %v2438_v56 = vld [vmem:[%s3289_s8 + $0x44] ss:$8 sps:$4 sm:$0xff]   ;;  %v2416_v59 = vld [vmem:[%s3288_s7 + $0x14] ss:$8 sps:$4 sm:$0xff]  }
  0x20   : > { %719 = vmatprep.subr.bf16.mxu0 %v2370_v21  ;;  %896 = vmatprep.subr.bf16.mxu1 %v2372_v22  ;;  %v2430_v55 = vld [vmem:[%s3289_s8 + $0x50] ss:$8 sps:$4 sm:$0xff]   ;;  %v2436_v60 = vld [vmem:[%s3289_s8 + $0x40] ss:$8 sps:$4 sm:$0xff]   ;;  %v2422_v63 = vld [vmem:[%s3288_s7 + $0x4] ss:$8 sps:$4 sm:$0xff]  }
  0x21   : > { %v2412_v58 = vld [vmem:[%s2737_s29 + $0x18] sm:$0xff]   ;;  %v2451_v3 = vld [vmem:[%s3289_s8 + $0x24] ss:$8 sps:$4 sm:$0xff]   ;;  %v2420_v4 = vld [vmem:[%s3288_s7] ss:$8 sps:$4 sm:$0xff]  }
  0x22   : > { %v2413_v61 = vld [vmem:[%s2746_s15 + $0x18] sm:$0xff]   ;;  %v2449_v6 = vld [vmem:[%s3289_s8 + $0x20] ss:$8 sps:$4 sm:$0xff]   ;;  %v2435_v10 = vld [vmem:[%s3289_s8 + $0x164] ss:$8 sps:$4 sm:$0xff]   ;;  %s2305_s15 = sshll.u32 %s3318_s17, 7 }
  0x23   : > { %720 = vmatpush1.bf16.msra.mxu0 %v2374_v23  ;;  %897 = vmatpush1.bf16.msra.mxu1 %v2375_v24  ;;  %v2414_v62 = vld [vmem:[%s3288_s7 + $0x10] ss:$8 sps:$4 sm:$0xff]   ;;  %v2445_v0 = vld [vmem:[%s3289_s8 + $0x34] ss:$8 sps:$4 sm:$0xff]   ;;  %v2426_v7 = vld [vmem:[%s2800_s27] sm:$0xff]   ;;  %s2943_s21 = scalar_lea.vmem %s3285_s4, %s2305_s15 }
  0x24   : > { %721 = vmatprep.subr.bf16.mxu0 %v2376_v25  ;;  %898 = vmatprep.subr.bf16.mxu1 %v2378_v26  ;;  %v2443_v1 = vld [vmem:[%s3289_s8 + $0x30] ss:$8 sps:$4 sm:$0xff]   ;;  %v2429_v5 = vld [vmem:[%s3289_s8 + $0x174] ss:$8 sps:$4 sm:$0xff]   ;;  %v2464_v12 = vld [vmem:[%s3289_s8 + $0x4] ss:$8 sps:$4 sm:$0xff]  }
  0x25   : > { %v2458_v8 = vld [vmem:[%s3289_s8 + $0x14] ss:$8 sps:$4 sm:$0xff]   ;;  %v2427_v9 = vld [vmem:[%s3289_s8 + $0x170] ss:$8 sps:$4 sm:$0xff]   ;;  %v2433_v13 = vld [vmem:[%s3289_s8 + $0x160] ss:$8 sps:$4 sm:$0xff]  }
  0x26   : > { %v2456_v11 = vld [vmem:[%s3289_s8 + $0x10] ss:$8 sps:$4 sm:$0xff]   ;;  %v2442_v14 = vld [vmem:[%s3289_s8 + $0x154] ss:$8 sps:$4 sm:$0xff]   ;;  %v2462_v15 = vld [vmem:[%s3289_s8] ss:$8 sps:$4 sm:$0xff]  }
  0x27   : > { %722 = vmatpush1.bf16.msra.mxu0 %v2380_v27  ;;  %899 = vmatpush1.bf16.msra.mxu1 %v2381_v28  ;;  %v2439_v16 = vld [vmem:[%s2800_s27 + $0x8] sm:$0xff]   ;;  %v2471_v17 = vld [vmem:[%s3289_s8 + $0xf4] ss:$8 sps:$4 sm:$0xff]   ;;  %v2440_v18 = vld [vmem:[%s3289_s8 + $0x150] ss:$8 sps:$4 sm:$0xff]  }
  0x28   : > { %723 = vmatprep.subr.bf16.mxu0 %v2382_v29  ;;  %900 = vmatprep.subr.bf16.mxu1 %v2384_v30  ;;  %v2448_v19 = vld [vmem:[%s3289_s8 + $0x144] ss:$8 sps:$4 sm:$0xff]   ;;  %v2469_v20 = vld [vmem:[%s3289_s8 + $0xf0] ss:$8 sps:$4 sm:$0xff]   ;;  %v2446_v22 = vld [vmem:[%s3289_s8 + $0x140] ss:$8 sps:$4 sm:$0xff]  }
  0x29   : > { %v2477_v21 = vld [vmem:[%s3289_s8 + $0xe4] ss:$8 sps:$4 sm:$0xff]   ;;  %v2455_v23 = vld [vmem:[%s3289_s8 + $0x134] ss:$8 sps:$4 sm:$0xff]   ;;  %v2475_v24 = vld [vmem:[%s3289_s8 + $0xe0] ss:$8 sps:$4 sm:$0xff]  }
  0x2a   : > { %v2452_v25 = vld [vmem:[%s2800_s27 + $0x10] sm:$0xff]   ;;  %v2461_v28 = vld [vmem:[%s3289_s8 + $0x124] ss:$8 sps:$4 sm:$0xff]  }
  0x2b   : > { %724 = vmatpush1.bf16.msra.mxu0 %v2386_v31  ;;  %901 = vmatpush1.bf16.msra.mxu1 %v2387_v32  ;;  %v2483_v26 = vld [vmem:[%s3289_s8 + $0xd4] ss:$8 sps:$4 sm:$0xff]   ;;  %v2453_v27 = vld [vmem:[%s3289_s8 + $0x130] ss:$8 sps:$4 sm:$0xff]   ;;  %v2489_v30 = vld [vmem:[%s3289_s8 + $0xc4] ss:$8 sps:$4 sm:$0xff]  }
  0x2c   : > { %1087 = vmatprep.subr.bf16.mxu0 %v2392_v33  ;;  %1656 = vmatprep.subr.bf16.mxu1 %v2419_v43  ;;  %v2481_v29 = vld [vmem:[%s3289_s8 + $0xd0] ss:$8 sps:$4 sm:$0xff]   ;;  %v2459_v31 = vld [vmem:[%s3289_s8 + $0x120] ss:$8 sps:$4 sm:$0xff]   ;;  %v2468_v33 = vld [vmem:[%s3289_s8 + $0x114] ss:$8 sps:$4 sm:$0xff]  }
  0x2d   : > { %v2465_v32 = vld [vmem:[%s2800_s27 + $0x18] sm:$0xff]   ;;  %v2499_v43 = vld [vmem:[%s3289_s8 + $0xa0] ss:$8 sps:$4 sm:$0xff]  }
  0x2e   : > { %742 = vmatmul.mubr.bf16.vlgmr.msra.gmra.mxu0 %v2388_v34  ;;  %919 = vmatmul.mubr.bf16.vlgmr.msra.gmra.mxu1 %v2389_v35  ;;  %v2487_v34 = vld [vmem:[%s3289_s8 + $0xc0] ss:$8 sps:$4 sm:$0xff]   ;;  %v2519_v35 = vld [vmem:[%s2943_s21 + $0x4] ss:$16 sps:$4 sm:$0xff]  }
  0x2f   : > { %1088 = vmatpush1.bf16.msra.mxu0 %v2390_v36  ;;  %751 = vmatprep.mubr.bf16.mxu0 %v2568_v2  ;;  %v2466_v36 = vld [vmem:[%s3289_s8 + $0x110] ss:$8 sps:$4 sm:$0xff]  }
  0x30   : > { %1089 = vmatprep.subr.bf16.mxu0 %v2395_v37  ;;  %928 = vmatprep.mubr.bf16.mxu1 %v2568_v2  ;;  %v2474_v37 = vld [vmem:[%s3289_s8 + $0x104] ss:$8 sps:$4 sm:$0xff]  }
  0x31   : > { %1657 = vmatpush1.bf16.msra.mxu1 %v2417_v42  ;;  %v2480_v42 = vld [vmem:[%s3289_s8 + $0x1f4] ss:$8 sps:$4 sm:$0xff]  }
  0x32   : > { %1658 = vmatprep.subr.bf16.mxu1 %v2425_v46  ;;  %v2486_v46 = vld [vmem:[%s3289_s8 + $0x1e4] ss:$8 sps:$4 sm:$0xff]  }
  0x33   : > { %1090 = vmatpush1.bf16.msra.mxu0 %v2393_v38  ;;  %v2525_v38 = vld [vmem:[%s2943_s21 + $0xc] ss:$16 sps:$4 sm:$0xff]  }
  0x34   : > { %1091 = vmatprep.subr.bf16.mxu0 %v2400_v39  ;;  %v2493_v39 = vld [vmem:[%s3289_s8 + $0xb0] ss:$8 sps:$4 sm:$0xff]  }
  0x35   : > { %1659 = vmatpush1.bf16.msra.mxu1 %v2423_v47  ;;  %v2505_v47 = vld [vmem:[%s3289_s8 + $0x90] ss:$8 sps:$4 sm:$0xff]  }
  0x36   : > { %752 = vmatmul.mubr.bf16.gmra.mxu0 %v2396_v40  ;;  %929 = vmatmul.mubr.bf16.gmra.mxu1 %v2397_v41  ;;  %v2501_v40 = vld [vmem:[%s3289_s8 + $0xa4] ss:$8 sps:$4 sm:$0xff]   ;;  %v2472_v41 = vld [vmem:[%s3289_s8 + $0x100] ss:$8 sps:$4 sm:$0xff]  }
  0x37   : > { %1092 = vmatpush1.bf16.msra.mxu0 %v2398_v44  ;;  %761 = vmatprep.mubr.bf16.mxu0 %v2568_v2  ;;  %v2507_v44 = vld [vmem:[%s3289_s8 + $0x94] ss:$8 sps:$4 sm:$0xff]  }
  0x38   : > { %1093 = vmatprep.subr.bf16.mxu0 %v2403_v45  ;;  %938 = vmatprep.mubr.bf16.mxu1 %v2568_v2  ;;  %v2478_v45 = vld [vmem:[%s3289_s8 + $0x1f0] ss:$8 sps:$4 sm:$0xff]  }
  0x39   : > { %1660 = vmatprep.subr.bf16.mxu1 %v2432_v50  ;;  %v2492_v50 = vld [vmem:[%s3289_s8 + $0x1d4] ss:$8 sps:$4 sm:$0xff]  }
  0x3a   : > { %1661 = vmatpush1.bf16.msra.mxu1 %v2430_v55  ;;  %v2526_v55 = vld [vmem:[%s2943_s21 + $0x24] ss:$16 sps:$4 sm:$0xff]  }
  0x3b   : > { %1094 = vmatpush1.bf16.msra.mxu0 %v2401_v48  ;;  %1662 = vmatprep.subr.bf16.mxu1 %v2438_v56  ;;  %v2513_v48 = vld [vmem:[%s3289_s8 + $0x84] ss:$8 sps:$4 sm:$0xff]   ;;  %v2496_v56 = vld [vmem:[%s3289_s8 + $0x1c0] ss:$8 sps:$4 sm:$0xff]  }
  0x3c   : > { %1095 = vmatprep.subr.bf16.mxu0 %v2408_v49  ;;  %v2484_v49 = vld [vmem:[%s3289_s8 + $0x1e0] ss:$8 sps:$4 sm:$0xff]  }
  0x3e   : > { %762 = vmatmul.mubr.bf16.gmra.mxu0 %v2404_v51  ;;  %939 = vmatmul.mubr.bf16.gmra.mxu1 %v2405_v52  ;;  %v2511_v51 = vld [vmem:[%s3289_s8 + $0x80] ss:$8 sps:$4 sm:$0xff]   ;;  %v2490_v52 = vld [vmem:[%s3289_s8 + $0x1d0] ss:$8 sps:$4 sm:$0xff]  }
  0x3f   : > { %1096 = vmatpush1.bf16.msra.mxu0 %v2406_v53  ;;  %771 = vmatprep.mubr.bf16.mxu0 %v2568_v2  ;;  %v2498_v53 = vld [vmem:[%s3289_s8 + $0x1c4] ss:$8 sps:$4 sm:$0xff]  }
  0x40   : > { %1097 = vmatprep.subr.bf16.mxu0 %v2411_v54  ;;  %948 = vmatprep.mubr.bf16.mxu1 %v2568_v2  ;;  %v2517_v54 = vld [vmem:[%s2943_s21] ss:$16 sps:$4 sm:$0xff]  }
  0x41   : > { %1663 = vmatpush1.bf16.msra.mxu1 %v2436_v60  ;;  %v2528_v60 = vld [vmem:[%s2943_s21 + $0x20] ss:$16 sps:$4 sm:$0xff]  }
  0x42   : > { %1664 = vmatprep.subr.bf16.mxu1 %v2445_v0  ;;  %v2514_v0 = vld [vmem:[%s3289_s8 + $0x190] ss:$8 sps:$4 sm:$0xff]  }
  0x43   : > { %1098 = vmatpush1.bf16.msra.mxu0 %v2409_v57  ;;  %v2504_v57 = vld [vmem:[%s3289_s8 + $0x1b4] ss:$8 sps:$4 sm:$0xff]  }
  0x44   : > { %1099 = vmatprep.subr.bf16.mxu0 %v2416_v59  ;;  %v2510_v59 = vld [vmem:[%s3289_s8 + $0x1a4] ss:$8 sps:$4 sm:$0xff]  }
  0x45   : > { %1665 = vmatpush1.bf16.msra.mxu1 %v2443_v1  ;;  %v2522_v1 = vld [vmem:[%s3289_s8 + $0x184] ss:$8 sps:$4 sm:$0xff]  }
  0x46   : > { %772 = vmatmul.mubr.bf16.gmra.mxu0 %v2412_v58  ;;  %949 = vmatmul.mubr.bf16.gmra.mxu1 %v2413_v61  ;;  %v2502_v58 = vld [vmem:[%s3289_s8 + $0x1b0] ss:$8 sps:$4 sm:$0xff]   ;;  %v2532_v61 = vld [vmem:[%s2943_s21 + $0x44] ss:$16 sps:$4 sm:$0xff]  }
  0x47   : > { %1100 = vmatpush1.bf16.msra.mxu0 %v2414_v62  ;;  %1119 = vmatprep.mubr.bf16.mxu0 %v2568_v2  ;;  %v2508_v62 = vld [vmem:[%s3289_s8 + $0x1a0] ss:$8 sps:$4 sm:$0xff]  }
  0x48   : > { %1101 = vmatprep.subr.bf16.mxu0 %v2422_v63  ;;  %1666 = vmatprep.subr.bf16.mxu1 %v2451_v3  ;;  %v2516_v63 = vld [vmem:[%s3289_s8 + $0x194] ss:$8 sps:$4 sm:$0xff]   ;;  %v2534_v3 = vld [vmem:[%s2943_s21 + $0x40] ss:$16 sps:$4 sm:$0xff]  }
  0x49   : > { %1667 = vmatpush1.bf16.msra.mxu1 %v2449_v6  ;;  %1688 = vmatprep.mubr.bf16.mxu1 %v2519_v35  ;;  %v2523_v6 = vld [vmem:[%s2943_s21 + $0x8] ss:$16 sps:$4 sm:$0xff]  }
  0x4a   : > { %1668 = vmatprep.subr.bf16.mxu1 %v2458_v8  ;;  %v2540_v8 = vld [vmem:[%s2943_s21 + $0x60] ss:$16 sps:$4 sm:$0xff]  }
  0x4b   : > { %1102 = vmatpush1.bf16.msra.mxu0 %v2420_v4  ;;  %v2538_v4 = vld [vmem:[%s2943_s21 + $0x64] ss:$16 sps:$4 sm:$0xff]  }
  0x4c   : > { %1729 = vmatprep.subr.bf16.mxu0 %v2429_v5  ;;  %v2520_v5 = vld [vmem:[%s3289_s8 + $0x180] ss:$8 sps:$4 sm:$0xff]  }
  0x4d   : > { %1669 = vmatpush1.bf16.msra.mxu1 %v2456_v11  ;;  %v2537_v11 = vld [vmem:[%s2943_s21 + $0x48] ss:$16 sps:$4 sm:$0xff]  }
  0x4e   : > { %1120 = vmatmul.mubr.bf16.vlgmr.msra.gmra.mxu0 %v2426_v7  ;;  %1670 = vmatprep.subr.bf16.mxu1 %v2464_v12  ;;  %v2529_v7 = vld [vmem:[%s2943_s21 + $0x2c] ss:$16 sps:$4 sm:$0xff]  }
  0x4f   : > { %1730 = vmatpush1.bf16.msra.mxu0 %v2427_v9  ;;  %1129 = vmatprep.mubr.bf16.mxu0 %v2568_v2  ;;  %v2531_v9 = vld [vmem:[%s2943_s21 + $0x28] ss:$16 sps:$4 sm:$0xff]   ;;  %v2541_v12 = vld [vmem:[%s2943_s21 + $0x6c] ss:$16 sps:$4 sm:$0xff]  }
  0x50   : > { %1731 = vmatprep.subr.bf16.mxu0 %v2435_v10  ;;  %v2535_v10 = vld [vmem:[%s2943_s21 + $0x4c] ss:$16 sps:$4 sm:$0xff]  }
  0x51   : > { %1671 = vmatpush1.bf16.msra.mxu1 %v2462_v15 }
  0x52   : > { %1672 = vmatprep.subr.bf16.mxu1 %v2471_v17 }
  0x53   : > { %1732 = vmatpush1.bf16.msra.mxu0 %v2433_v13  ;;  %v2543_v13 = vld [vmem:[%s2943_s21 + $0x68] ss:$16 sps:$4 sm:$0xff]   ;;  %s2141_s21 = sshll.u32 %s3318_s17, 1 }
  0x54   : > { %1733 = vmatprep.subr.bf16.mxu0 %v2442_v14  ;;  %s503_s28 = scalar_lea.vmem %s3281_s0, %s2141_s21 }
  0x55   : > { %1673 = vmatpush2.bf16.msra.mxu1 %v2469_v20 }
  0x56   : > { %1130 = vmatmul.mubr.bf16.gmra.mxu0 %v2439_v16  ;;  %1674 = vmatprep.subr.bf16.mxu1 %v2477_v21 }
  0x57   : > { %1734 = vmatpush1.bf16.msra.mxu0 %v2440_v18  ;;  %1139 = vmatprep.mubr.bf16.mxu0 %v2568_v2 }
  0x58   : > { %1735 = vmatprep.subr.bf16.mxu0 %v2448_v19 }
  0x59   : > { %1675 = vmatpush2.bf16.msra.mxu1 %v2475_v24 }
  0x5a   : > { %1676 = vmatprep.subr.bf16.mxu1 %v2483_v26 }
  0x5b   : > { %1736 = vmatpush1.bf16.msra.mxu0 %v2446_v22 }
  0x5c   : > { %1737 = vmatprep.subr.bf16.mxu0 %v2455_v23 }
  0x5d   : > { %1677 = vmatpush2.bf16.msra.mxu1 %v2481_v29 }
  0x5e   : > { %1140 = vmatmul.mubr.bf16.gmra.mxu0 %v2452_v25  ;;  %1678 = vmatprep.subr.bf16.mxu1 %v2489_v30 }
  0x5f   : > { %1738 = vmatpush1.bf16.msra.mxu0 %v2453_v27  ;;  %1149 = vmatprep.mubr.bf16.mxu0 %v2568_v2  ;;  %v2495_v2 = vld [vmem:[%s3289_s8 + $0xb4] ss:$8 sps:$4 sm:$0xff]  }
  0x60   : > { %1739 = vmatprep.subr.bf16.mxu0 %v2461_v28 }
  0x61   : > { %1679 = vmatpush2.bf16.msra.mxu1 %v2487_v34 }
  0x62   : > { %1680 = vmatprep.subr.bf16.mxu1 %v2495_v2 }
  0x63   : > { %1740 = vmatpush1.bf16.msra.mxu0 %v2459_v31 }
  0x64   : > { %1741 = vmatprep.subr.bf16.mxu0 %v2468_v33 }
  0x65   : > { %1681 = vmatpush2.bf16.msra.mxu1 %v2493_v39 }
  0x66   : > { %1150 = vmatmul.mubr.bf16.gmra.mxu0 %v2465_v32  ;;  %1682 = vmatprep.subr.bf16.mxu1 %v2501_v40 }
  0x67   : > { %1742 = vmatpush1.bf16.msra.mxu0 %v2466_v36  ;;  %1761 = vmatprep.mubr.bf16.mxu0 %v2525_v38 }
  0x68   : > { %1743 = vmatprep.subr.bf16.mxu0 %v2474_v37 }
  0x69   : > { %1683 = vmatpush2.bf16.msra.mxu1 %v2499_v43 }
  0x6a   : > { %1684 = vmatprep.subr.bf16.mxu1 %v2507_v44 }
  0x6b   : > { %1744 = vmatpush1.bf16.msra.mxu0 %v2472_v41 }
  0x6c   : > { %1745 = vmatprep.subr.bf16.mxu0 %v2480_v42 }
  0x6d   : > { %1685 = vmatpush2.bf16.msra.mxu1 %v2505_v47 }
  0x6e   : > { %1686 = vmatprep.subr.bf16.mxu1 %v2513_v48 }
  0x6f   : > { %1746 = vmatpush2.bf16.msra.mxu0 %v2478_v45 }
  0x70   : > { %1747 = vmatprep.subr.bf16.mxu0 %v2486_v46 }
  0x71   : > { %1687 = vmatpush2.bf16.msra.mxu1 %v2511_v51 }
  0x73   : > { %1748 = vmatpush2.bf16.msra.mxu0 %v2484_v49 }
  0x74   : > { %1749 = vmatprep.subr.bf16.mxu0 %v2492_v50  ;;  %1689 = vmatmul.mubr.bf16.vlgmr.msra.gmra.mxu1 %v2517_v54 }
  0x75   : > { %1698 = vmatprep.mubr.bf16.mxu1 %v2526_v55 }
  0x77   : > { %1750 = vmatpush2.bf16.msra.mxu0 %v2490_v52 }
  0x78   : > { %1751 = vmatprep.subr.bf16.mxu0 %v2498_v53 }
  0x7b   : > { %1752 = vmatpush2.bf16.msra.mxu0 %v2496_v56 }
  0x7c   : > { %1753 = vmatprep.subr.bf16.mxu0 %v2504_v57  ;;  %1699 = vmatmul.mubr.bf16.gmra.mxu1 %v2528_v60 }
  0x7d   : > { %1708 = vmatprep.mubr.bf16.mxu1 %v2532_v61 }
  0x7f   : > { %1754 = vmatpush2.bf16.msra.mxu0 %v2502_v58 }
  0x80   : > { %1755 = vmatprep.subr.bf16.mxu0 %v2510_v59 }
  0x83   : > { %1756 = vmatpush2.bf16.msra.mxu0 %v2508_v62 }
  0x84   : > { %1757 = vmatprep.subr.bf16.mxu0 %v2516_v63  ;;  %1709 = vmatmul.mubr.bf16.gmra.mxu1 %v2534_v3  ;;  %v1820_v63 = vlaneseq }
  0x85   : > { %1718 = vmatprep.mubr.bf16.mxu1 %v2538_v4 }
  0x86   : > { %v1821_v3 = vshrl.u32 %v1820_v63, 7 }
  0x87   : > { %1758 = vmatpush2.bf16.msra.mxu0 %v2514_v0 }
  0x88   : > { %1759 = vmatprep.subr.bf16.mxu0 %v2522_v1 }
  0x8b   : > { %1760 = vmatpush2.bf16.msra.mxu0 %v2520_v5 }
  0x8c   : > { %1719 = vmatmul.mubr.bf16.gmra.mxu1 %v2540_v8  ;;  %v1818_v8 = vld [vmem:[%s503_s28] sm:$0x3] }
  0x8e   : > { %1762 = vmatmul.mubr.bf16.vlgmr.msra.gmra.mxu0 %v2523_v6  ;;  %v1822_v6 = vsub.s32 0, %v1821_v3 }
  0x8f   : > { %1771 = vmatprep.mubr.bf16.mxu0 %v2529_v7 }
  0x96   : > { %1772 = vmatmul.mubr.bf16.gmra.mxu0 %v2531_v9  ;;  %v1826_v9 = vsub.s32 1, %v1821_v3 }
  0x97   : > { %1781 = vmatprep.mubr.bf16.mxu0 %v2535_v10 }
  0x9e   : > { %1782 = vmatmul.mubr.bf16.gmra.mxu0 %v2537_v11  ;;  %v1846_v11 = vld [vmem:[%s3290_s9] sm:$0x3] }
  0x9f   : > { %1791 = vmatprep.mubr.bf16.mxu0 %v2541_v12 }
  0xa6   : > { %1792 = vmatmul.mubr.bf16.gmra.mxu0 %v2543_v13 }
  0xee   : > { %v743_v14 = vpop.f32.mrf.mxu0  ;;  %v920_v20 = vpop.f32.mrf.mxu1 }
  0xef   : > { %v921_v10 = vadd.f32 %v920_v20, %v743_v14  ;;  %v3157_v20 = vrot.slane %v1818_v8, %v1826_v9 }
  0xf0   : > { %v3056_v15 = vpop.f32.mrf.mxu0  ;;  %v922_v23 = vpop.f32.mrf.mxu1 }
  0xf1   : > { %v923_v63 = vadd.f32 %v922_v23, %v3056_v15 }
  0xf2   : > { %v3058_v16 = vpop.f32.mrf.mxu0  ;;  %v924_v26 = vpop.f32.mrf.mxu1 }
  0xf3   : > { %v925_v3 = vadd.f32 %v924_v26, %v3058_v16 }
  0xf4   : > { %v3060_v17 = vpop.f32.mrf.mxu0  ;;  %v3078_v29 = vpop.f32.mrf.mxu1 }
  0xf5   : > { %v927_v15 = vadd.f32 %v3078_v29, %v3060_v17 }
  0xf6   : > { %v3062_v18 = vpop.f32.mrf.mxu0  ;;  %v3084_v32 = vpop.f32.mrf.mxu1 }
  0xf7   : > { %v931_v16 = vadd.f32 %v3084_v32, %v3062_v18 }
  0xf8   : > { %v3064_v19 = vpop.f32.mrf.mxu0  ;;  %v3090_v35 = vpop.f32.mrf.mxu1 }
  0xfa   : > { %v3066_v21 = vpop.f32.mrf.mxu0  ;;  %v3092_v2 = vpop.f32.mrf.mxu1 }
  0xfc   : > { %v3068_v22 = vpop.f32.mrf.mxu0  ;;  %v3094_v38 = vpop.f32.mrf.mxu1 }
  0xfd   : > { %v937_v18 = vadd.f32 %v3094_v38, %v3068_v22 }
  0xfe   : > { %v3070_v24 = vpop.f32.mrf.mxu0  ;;  %v3096_v40 = vpop.f32.mrf.mxu1 }
  0xff   : > { %v941_v32 = vadd.f32 %v3096_v40, %v3070_v24 }
 0x100   : > { %v3072_v25 = vpop.f32.mrf.mxu0  ;;  %v3098_v42 = vpop.f32.mrf.mxu1 }
 0x102   : > { %v3074_v27 = vpop.f32.mrf.mxu0  ;;  %v3102_v44 = vpop.f32.mrf.mxu1 }
 0x104   : > { %v3076_v28 = vpop.f32.mrf.mxu0  ;;  %v3106_v46 = vpop.f32.mrf.mxu1 }
 0x106   : > { %v3080_v30 = vpop.f32.mrf.mxu0  ;;  %v3110_v48 = vpop.f32.mrf.mxu1 }
 0x108   : > { %v3082_v31 = vpop.f32.mrf.mxu0  ;;  %v3114_v50 = vpop.f32.mrf.mxu1 }
 0x10a   : > { %v3086_v33 = vpop.f32.mrf.mxu0  ;;  %v3118_v52 = vpop.f32.mrf.mxu1 }
 0x10b   : > { %3293 = vst [vmem:[#allocation2_spill] sm:$0xff] %v3086_v33  ;;  %3295 = vst [vmem:[#allocation4_spill] sm:$0xff] %v3118_v52 }
 0x10c   : > { %v3088_v34 = vpop.f32.mrf.mxu0  ;;  %v3122_v54 = vpop.f32.mrf.mxu1 }
 0x10d   : > { %3294 = vst [vmem:[#allocation3_spill] sm:$0xff] %v3088_v34  ;;  %3296 = vst [vmem:[#allocation5_spill] sm:$0xff] %v3122_v54 }
 0x10e   : > { %v1121_v36 = vpop.f32.mrf.mxu0 }
 0x10f   : > { %v1160_v54 = vadd.f32 %v1121_v36, %v921_v10  ;;  %v3166_v36 = vrot.slane %v1846_v11, %v1826_v9 }
 0x110   : > { %v1123_v37 = vpop.f32.mrf.mxu0 }
 0x112   : > { %v1125_v39 = vpop.f32.mrf.mxu0 }
 0x113   : > { %v1162_v10 = vadd.f32 %v1125_v39, %v925_v3  ;;  %v933_v39 = vadd.f32 %v3090_v35, %v3064_v19  ;;  %v943_v19 = vadd.f32 %v3098_v42, %v3072_v25 }
 0x114   : > { %v1127_v41 = vpop.f32.mrf.mxu0 }
 0x115   : > { %v1163_v26 = vadd.f32 %v1127_v41, %v927_v15 }
 0x116   : > { %v3100_v43 = vpop.f32.mrf.mxu0 }
 0x117   : > { %v1164_v35 = vadd.f32 %v3100_v43, %v931_v16 }
 0x118   : > { %v3104_v45 = vpop.f32.mrf.mxu0 }
 0x119   : > { %v1165_v24 = vadd.f32 %v3104_v45, %v933_v39 }
 0x11a   : > { %v3108_v47 = vpop.f32.mrf.mxu0 }
 0x11c   : > { %v3112_v49 = vpop.f32.mrf.mxu0 }
 0x11d   : > { %v1167_v15 = vadd.f32 %v3112_v49, %v937_v18 }
 0x11e   : > { %v3116_v51 = vpop.f32.mrf.mxu0 }
 0x120   : > { %v3120_v53 = vpop.f32.mrf.mxu0 }
 0x122   : > { %v3124_v55 = vpop.f32.mrf.mxu0 }
 0x123   : > { %3297 = vst [vmem:[#allocation6_spill] sm:$0xff] %v3124_v55 }
 0x124   : > { %v3126_v58 = vpop.f32.mrf.mxu0 }
 0x125   : > { %3298 = vst [vmem:[#allocation7_spill] sm:$0xff] %v3126_v58 }
 0x126   : > { %v3128_v61 = vpop.f32.mrf.mxu0 }
 0x127   : > { %3299 = vst [vmem:[#allocation8_spill] sm:$0xff] %v3128_v61  ;;  %v1161_v61 = vadd.f32 %v1123_v37, %v923_v63  ;;  %v947_v63 = vadd.f32 %v3106_v46, %v3076_v28  ;;  %v1168_v46 = vadd.f32 %v3116_v51, %v941_v32 }
 0x128   : > { %v3130_v0 = vpop.f32.mrf.mxu0 }
 0x129   : > { %3300 = vst [vmem:[#allocation9_spill] sm:$0xff] %v3130_v0  ;;  %v3155_v0 = vrot.slane %v1846_v11, %v1822_v6 }
 0x12a   : > { %v3135_v4 = vpop.f32.mrf.mxu0 }
 0x12b   : > { %3301 = vst [vmem:[#allocation10_spill] sm:$0xff] %v3135_v4  ;;  %v3150_v4 = vrot.slane %v1818_v8, %v1822_v6 }
 0x12c   : > { %v3142_v7 = vpop.f32.mrf.mxu0 }
 0x12d   : > { %3302 = vst [vmem:[#allocation11_spill] sm:$0xff] %v3142_v7  ;;  %v1874_v7 = vld [vmem:[%s3291_s10] sm:$0x3] }
 0x12e   : > { %v3164_v23 = vrot.slane %v1874_v7, %v1822_v6 }
 0x134   : > { %v1690_v56 = vpop.f32.mrf.mxu1 }
 0x136   : > { %v1692_v57 = vpop.f32.mrf.mxu1 }
 0x138   : > { %v1694_v59 = vpop.f32.mrf.mxu1 }
 0x13a   : > { %v1696_v60 = vpop.f32.mrf.mxu1 }
 0x13c   : > { %v1700_v62 = vpop.f32.mrf.mxu1 }
 0x13e   : > { %v3132_v1 = vpop.f32.mrf.mxu1 }
 0x140   : > { %v3140_v5 = vpop.f32.mrf.mxu1 }
 0x142   : > { %v3147_v12 = vpop.f32.mrf.mxu1 }
 0x144   : > { %v3160_v52 = vpop.f32.mrf.mxu1 }
 0x146   : > { %v1712_v6 = vpop.f32.mrf.mxu1 }
 0x14e   : > { %v1763_v13 = vpop.f32.mrf.mxu0 }
 0x14f   : > { %v1764_v34 = vadd.f32 %v1763_v13, %v1690_v56 }
 0x150   : > { %v1765_v14 = vpop.f32.mrf.mxu0 }
 0x151   : > { %v1802_v58 = vadd.f32 %v1764_v34, %v1160_v54  ;;  %v1766_v55 = vadd.f32 %v1765_v14, %v1692_v57  ;;  %v3171_v34 = vrot.slane %v1874_v7, %v1826_v9  ;;  %v1714_v7 = vpop.f32.mrf.mxu1  ;;  %v951_v14 = vadd.f32 %v3110_v48, %v3080_v30 }
 0x152   : > { %v1767_v56 = vpop.f32.mrf.mxu0 }
 0x153   : > { %v1830_v13 = vadd.f32 %v3150_v4, %v1802_v58  ;;  %v1803_v8 = vadd.f32 %v1766_v55, %v1161_v61  ;;  %v1768_v33 = vadd.f32 %v1767_v56, %v1694_v59  ;;  %v935_v55 = vadd.f32 %v3092_v2, %v3066_v21  ;;  %v1716_v28 = vpop.f32.mrf.mxu1 }
 0x154   : > { %v1769_v37 = vpop.f32.mrf.mxu0  ;;  %v945_v21 = vadd.f32 %v3102_v44, %v3074_v27 }
 0x155   : > { %v1858_v54 = vmul.f32 %v3155_v0, %v1830_v13  ;;  %v1831_v17 = vadd.f32 %v3157_v20, %v1803_v8  ;;  %v1804_v29 = vadd.f32 %v1768_v33, %v1162_v10  ;;  %v1770_v57 = vadd.f32 %v1769_v37, %v1696_v60  ;;  %v1720_v18 = vpop.f32.mrf.mxu1 }
 0x156   : > { %v1773_v41 = vpop.f32.mrf.mxu0  ;;  %v1166_v9 = vadd.f32 %v3108_v47, %v935_v55 }
 0x157   : > { %v1886_v58 = vadd.f32 %v3164_v23, %v1858_v54  ;;  %v1859_v33 = vmul.f32 %v3166_v36, %v1831_v17  ;;  %v1832_v59 = vadd.f32 %v3150_v4, %v1804_v29  ;;  %v1805_v60 = vadd.f32 %v1770_v57, %v1163_v26 }
 0x158   : > { %v1774_v22 = vadd.f32 %v1773_v41, %v1700_v62  ;;  %v1775_v2 = vpop.f32.mrf.mxu0  ;;  %v1169_v54 = vadd.f32 %v3120_v53, %v943_v19  ;;  %v953_v41 = vadd.f32 %v3114_v50, %v3082_v31  ;;  %v3305_v19 = vld [vmem:[#allocation6_spill] sm:$0xff] }
 0x159   : > { %v1887_v38 = vadd.f32 %v3171_v34, %v1859_v33  ;;  %v1860_v40 = vmul.f32 %v3155_v0, %v1832_v59  ;;  %v1833_v61 = vadd.f32 %v3157_v20, %v1805_v60  ;;  %v1902_v25 = vmax.f32 %v1886_v58, 0.0  ;;  %v3303_v58 = vld [vmem:[#allocation2_spill] sm:$0xff] }
 0x15a   : > { %v1806_v42 = vadd.f32 %v1774_v22, %v1164_v35  ;;  %v1776_v27 = vadd.f32 %v1775_v2, %v3132_v1  ;;  %v1777_v44 = vpop.f32.mrf.mxu0  ;;  %v1170_v35 = vadd.f32 %v3305_v19, %v945_v21  ;;  %v1722_v21 = vpop.f32.mrf.mxu1 }
 0x15b   : > { %v1903_v43 = vmax.f32 %v1887_v38, 0.0  ;;  %v1888_v62 = vadd.f32 %v3164_v23, %v1860_v40  ;;  %v1861_v45 = vmul.f32 %v3166_v36, %v1833_v61  ;;  %v1778_v11 = vadd.f32 %v1777_v44, %v3140_v5  ;;  %v3306_v61 = vld [vmem:[#allocation7_spill] sm:$0xff]  ;;  %v3307_v44 = vld [vmem:[#allocation8_spill] sm:$0xff] }
 0x15c   : > { %v1834_v47 = vadd.f32 %v3150_v4, %v1806_v42  ;;  %v1807_v1 = vadd.f32 %v1776_v27, %v1165_v24  ;;  %v1779_v3 = vpop.f32.mrf.mxu0 }
 0x15d   : > { %v2307_v56 = vpack.c.bf16 %v1903_v43, %v1902_v25  ;;  %v1889_v5 = vadd.f32 %v3171_v34, %v1861_v45  ;;  %v1808_v10 = vadd.f32 %v1778_v11, %v1166_v9  ;;  %v1780_v13 = vadd.f32 %v1779_v3, %v3147_v12 }
 0x15e   : > { %v1862_v30 = vmul.f32 %v3155_v0, %v1834_v47  ;;  %v1835_v48 = vadd.f32 %v3157_v20, %v1807_v1  ;;  %v1783_v8 = vpop.f32.mrf.mxu0  ;;  %v1904_v16 = vmax.f32 %v1888_v62, 0.0  ;;  %v1171_v9 = vadd.f32 %v3306_v61, %v947_v63 }
 0x15f   : > { %1966 = vst [vmem:[%s3208_s16] sm:$0xff] %v2307_v56  ;;  %v1905_v26 = vmax.f32 %v1889_v5, 0.0  ;;  %v1836_v37 = vadd.f32 %v3150_v4, %v1808_v10  ;;  %v1784_v49 = vadd.f32 %v1783_v8, %v3160_v52  ;;  %v1809_v29 = vadd.f32 %v1780_v13, %v1167_v15  ;;  %v3304_v52 = vld [vmem:[#allocation4_spill] sm:$0xff]  ;;  %v3308_v15 = vld [vmem:[#allocation9_spill] sm:$0xff]  ;;  %v1724_v8 = vpop.f32.mrf.mxu1 }
 0x160   : > { %v1890_v17 = vadd.f32 %v3164_v23, %v1862_v30  ;;  %v1863_v51 = vmul.f32 %v3166_v36, %v1835_v48  ;;  %v1785_v57 = vpop.f32.mrf.mxu0  ;;  %v955_v33 = vadd.f32 %v3304_v52, %v3303_v58  ;;  %v1172_v43 = vadd.f32 %v3307_v44, %v951_v14  ;;  %v3309_v14 = vld [vmem:[#allocation10_spill] sm:$0xff] }
 0x161   : > { %v2308_v39 = vpack.c.bf16 %v1905_v26, %v1904_v16  ;;  %v1864_v12 = vmul.f32 %v3155_v0, %v1836_v37  ;;  %v1810_v55 = vadd.f32 %v1784_v49, %v1168_v46  ;;  %v1786_v32 = vadd.f32 %v1785_v57, %v1712_v6 }
 0x162   : > { %v1891_v53 = vadd.f32 %v3171_v34, %v1863_v51  ;;  %v1837_v59 = vadd.f32 %v3157_v20, %v1809_v29  ;;  %v1787_v60 = vpop.f32.mrf.mxu0  ;;  %v1906_v38 = vmax.f32 %v1890_v17, 0.0  ;;  %v1173_v56 = vadd.f32 %v3308_v15, %v953_v41 }
 0x163   : > { %1967 = vst [vmem:[%s3208_s16 + $0x8] sm:$0xff] %v2308_v39  ;;  %v1838_v22 = vadd.f32 %v3150_v4, %v1810_v55  ;;  %v1811_v2 = vadd.f32 %v1786_v32, %v1169_v54  ;;  %v1788_v24 = vadd.f32 %v1787_v60, %v1714_v7  ;;  %v1892_v40 = vadd.f32 %v3164_v23, %v1864_v12  ;;  %v3310_v12 = vld [vmem:[#allocation3_spill] sm:$0xff]  ;;  %v3311_v55 = vld [vmem:[#allocation5_spill] sm:$0xff] }
 0x164   : > { %v1907_v6 = vmax.f32 %v1891_v53, 0.0  ;;  %v1865_v31 = vmul.f32 %v3166_v36, %v1837_v59  ;;  %v1789_v50 = vpop.f32.mrf.mxu0  ;;  %v1174_v48 = vadd.f32 %v3309_v14, %v955_v33  ;;  %v1726_v33 = vpop.f32.mrf.mxu1  ;;  %v3312_v60 = vld [vmem:[#allocation11_spill] sm:$0xff] }
 0x165   : > { %v1866_v25 = vmul.f32 %v3155_v0, %v1838_v22  ;;  %v1839_v42 = vadd.f32 %v3157_v20, %v1811_v2  ;;  %v1812_v27 = vadd.f32 %v1788_v24, %v1170_v35  ;;  %v1790_v45 = vadd.f32 %v1789_v50, %v1716_v28 }
 0x166   : > { %v2309_v62 = vpack.c.bf16 %v1907_v6, %v1906_v38  ;;  %v1893_v7 = vadd.f32 %v3171_v34, %v1865_v31  ;;  %v1793_v11 = vpop.f32.mrf.mxu0  ;;  %v1908_v5 = vmax.f32 %v1892_v40, 0.0 }
 0x167   : > { %v1894_v47 = vadd.f32 %v3164_v23, %v1866_v25  ;;  %v1867_v1 = vmul.f32 %v3166_v36, %v1839_v42  ;;  %v1840_v3 = vadd.f32 %v3150_v4, %v1812_v27  ;;  %v1794_v63 = vadd.f32 %v1793_v11, %v1720_v18 }
 0x168   : > { %1968 = vst [vmem:[%s3208_s16 + $0x10] sm:$0xff] %v2309_v62  ;;  %v1909_v10 = vmax.f32 %v1893_v7, 0.0  ;;  %v1813_v46 = vadd.f32 %v1790_v45, %v1171_v9  ;;  %v1795_v30 = vpop.f32.mrf.mxu0  ;;  %v957_v18 = vadd.f32 %v3311_v55, %v3310_v12 }
 0x169   : > { %v1895_v28 = vadd.f32 %v3171_v34, %v1867_v1  ;;  %v1868_v13 = vmul.f32 %v3155_v0, %v1840_v3  ;;  %v1814_v16 = vadd.f32 %v1794_v63, %v1172_v43  ;;  %v1910_v37 = vmax.f32 %v1894_v47, 0.0 }
 0x16a   : > { %v2310_v26 = vpack.c.bf16 %v1909_v10, %v1908_v5  ;;  %v1841_v49 = vadd.f32 %v3157_v20, %v1813_v46  ;;  %v1796_v54 = vadd.f32 %v1795_v30, %v1722_v21  ;;  %v1797_v17 = vpop.f32.mrf.mxu0  ;;  %v1175_v19 = vadd.f32 %v3312_v60, %v957_v18 }
 0x16b   : > { %v1911_v51 = vmax.f32 %v1895_v28, 0.0  ;;  %v1896_v29 = vadd.f32 %v3164_v23, %v1868_v13  ;;  %v1842_v57 = vadd.f32 %v3150_v4, %v1814_v16  ;;  %v1798_v39 = vadd.f32 %v1797_v17, %v1724_v8 }
 0x16c   : > { %1969 = vst [vmem:[%s3208_s16 + $0x18] sm:$0xff] %v2310_v26  ;;  %v1869_v32 = vmul.f32 %v3166_v36, %v1841_v49  ;;  %v1815_v41 = vadd.f32 %v1796_v54, %v1173_v56  ;;  %v1799_v58 = vpop.f32.mrf.mxu0 }
 0x16d   : > { %v2311_v52 = vpack.c.bf16 %v1911_v51, %v1910_v37  ;;  %v1870_v53 = vmul.f32 %v3155_v0, %v1842_v57  ;;  %v1816_v59 = vadd.f32 %v1798_v39, %v1174_v48  ;;  %v1800_v2 = vadd.f32 %v1799_v58, %v1726_v33 }
 0x16e   : > { %v1897_v35 = vadd.f32 %v3171_v34, %v1869_v32  ;;  %v1843_v22 = vadd.f32 %v3157_v20, %v1815_v41  ;;  %v1912_v24 = vmax.f32 %v1896_v29, 0.0 }
 0x16f   : > { %1970 = vst [vmem:[%s3208_s16 + $0x20] sm:$0xff] %v2311_v52  ;;  %v1844_v38 = vadd.f32 %v3150_v4, %v1816_v59  ;;  %v1898_v40 = vadd.f32 %v3164_v23, %v1870_v53  ;;  %v1817_v50 = vadd.f32 %v1800_v2, %v1175_v19 }
 0x170   : > { %v1913_v6 = vmax.f32 %v1897_v35, 0.0  ;;  %v1871_v31 = vmul.f32 %v3166_v36, %v1843_v22 }
 0x171   : > { %v1872_v61 = vmul.f32 %v3155_v0, %v1844_v38  ;;  %v1845_v42 = vadd.f32 %v3157_v20, %v1817_v50  ;;  %v1914_v21 = vmax.f32 %v1898_v40, 0.0 }
 0x172   : > { %v2312_v9 = vpack.c.bf16 %v1913_v6, %v1912_v24  ;;  %v1899_v25 = vadd.f32 %v3171_v34, %v1871_v31 }
 0x173   : > { %v1900_v4 = vadd.f32 %v3164_v23, %v1872_v61  ;;  %v1873_v44 = vmul.f32 %v3166_v36, %v1845_v42 }
 0x174   : > { %1971 = vst [vmem:[%s3208_s16 + $0x28] sm:$0xff] %v2312_v9  ;;  %v1915_v27 = vmax.f32 %v1899_v25, 0.0 }
 0x175   : > { %v1901_v62 = vadd.f32 %v3171_v34, %v1873_v44  ;;  %v1916_v7 = vmax.f32 %v1900_v4, 0.0 }
 0x176   : > { %v2313_v43 = vpack.c.bf16 %v1915_v27, %v1914_v21 }
 0x177   : > { %v1917_v45 = vmax.f32 %v1901_v62, 0.0 }
 0x178   : > { %1972 = vst [vmem:[%s3208_s16 + $0x30] sm:$0xff] %v2313_v43 }
 0x179   : > { %v2314_v11 = vpack.c.bf16 %v1917_v45, %v1916_v7 }
 0x17b   : > { %1973 = vst [vmem:[%s3208_s16 + $0x38] sm:$0xff] %v2314_v11 }
 0x17c PF: > { %s21_s19 = sadd.s32 1, %s2566_s19   ;;  %s3313_s17 = smov %s2562_s18 }
 0x17d   : > { %p18_p5 = scmp.ge.s32.totalorder %s21_s19, 4   ;;  %s3314_s18 = smov %s3316_s20 }
 0x17f   :  { %20 = sbr.rel (!%p18_p5) target bundleno = 2 (0x2), region = 106 }

// kernel: pointnet_partseg_forward.11
= control target key start
LH: loop header
LB: loop body
LE: loop exit
PB: predicated region body
PF: predicated region fallthrough
CT: control target
= control target key end

     0   :  { %s1773_s1 = inlined_call_operand.vmem [shape: bf16[256,256], index: 1, kind: input, shape index: {}]   ;;  %s1774_s0 = inlined_call_operand.vmem [shape: bf16[128,256], index: 0, kind: input, shape index: {}]   ;;  %s1775_s4 = inlined_call_operand.vmem [shape: bf16[256,128], index: 4, kind: input, shape index: {}]   ;;  %s1776_s7 = inlined_call_operand.vmem [shape: bf16[128,128], index: 7, kind: input, shape index: {}]   ;;  %s1777_s2 = inlined_call_operand.vmem [shape: f32[1,256], index: 2, kind: input, shape index: {}]   ;;  %s1778_s3 = inlined_call_operand.vmem [shape: f32[1,256], index: 3, kind: input, shape index: {}]   ;;  %s1779_s5 = inlined_call_operand.vmem [shape: f32[1,128], index: 5, kind: input, shape index: {}]   ;;  %s1780_s6 = inlined_call_operand.vmem [shape: f32[1,128], index: 6, kind: input, shape index: {}]   ;;  %s1781_s8 = inlined_call_operand.vmem [shape: f32[1,128], index: 8, kind: input, shape index: {}]   ;;  %s1782_s9 = inlined_call_operand.vmem [shape: f32[128,128], index: 9, kind: output, shape index: {}]  }
   0x1   :  { %v1240_v0 = vld [vmem:[%s1773_s1 + $0x74] ss:$8 sps:$4 sm:$0xff]   ;;  %v1242_v1 = vld [vmem:[%s1773_s1 + $0x70] ss:$8 sps:$4 sm:$0xff]   ;;  %v1243_v2 = vld [vmem:[%s1773_s1 + $0x64] ss:$8 sps:$4 sm:$0xff]  }
   0x2   :  { %321 = vmatprep.subr.bf16.mxu0 %v1240_v0  ;;  %v1245_v3 = vld [vmem:[%s1773_s1 + $0x60] ss:$8 sps:$4 sm:$0xff]   ;;  %v1246_v4 = vld [vmem:[%s1773_s1 + $0x54] ss:$8 sps:$4 sm:$0xff]   ;;  %v1248_v5 = vld [vmem:[%s1773_s1 + $0x50] ss:$8 sps:$4 sm:$0xff]  }
   0x3   :  { %322 = vmatpush1.bf16.msra.mxu0 %v1242_v1  ;;  %v1249_v6 = vld [vmem:[%s1773_s1 + $0x44] ss:$8 sps:$4 sm:$0xff]   ;;  %v1251_v7 = vld [vmem:[%s1773_s1 + $0x40] ss:$8 sps:$4 sm:$0xff]   ;;  %v1252_v8 = vld [vmem:[%s1773_s1 + $0x34] ss:$8 sps:$4 sm:$0xff]   ;;  %v436_v1 = vlaneseq }
   0x4   :  { %323 = vmatprep.subr.bf16.mxu0 %v1243_v2  ;;  %v1254_v9 = vld [vmem:[%s1773_s1 + $0x30] ss:$8 sps:$4 sm:$0xff]   ;;  %v1255_v10 = vld [vmem:[%s1773_s1 + $0x24] ss:$8 sps:$4 sm:$0xff]   ;;  %v1257_v11 = vld [vmem:[%s1773_s1 + $0x20] ss:$8 sps:$4 sm:$0xff]  }
   0x5   :  { %v1258_v12 = vld [vmem:[%s1773_s1 + $0x14] ss:$8 sps:$4 sm:$0xff]   ;;  %v1290_v13 = vld [vmem:[%s1774_s0 + $0x4] ss:$8 sps:$4 sm:$0xff]   ;;  %v1260_v14 = vld [vmem:[%s1773_s1 + $0x10] ss:$8 sps:$4 sm:$0xff]  }
   0x6   :  { %v1261_v15 = vld [vmem:[%s1773_s1 + $0x4] ss:$8 sps:$4 sm:$0xff]   ;;  %353 = vmatprep.mubr.bf16.mxu0 %v1290_v13  ;;  %v1263_v16 = vld [vmem:[%s1773_s1] ss:$8 sps:$4 sm:$0xff]   ;;  %v1264_v17 = vld [vmem:[%s1773_s1 + $0xf4] ss:$8 sps:$4 sm:$0xff]  }
   0x7   :  { %324 = vmatpush1.bf16.msra.mxu0 %v1245_v3  ;;  %v1266_v18 = vld [vmem:[%s1773_s1 + $0xf0] ss:$8 sps:$4 sm:$0xff]   ;;  %v1267_v19 = vld [vmem:[%s1773_s1 + $0xe4] ss:$8 sps:$4 sm:$0xff]   ;;  %v1269_v21 = vld [vmem:[%s1773_s1 + $0xe0] ss:$8 sps:$4 sm:$0xff]  }
   0x8   :  { %325 = vmatprep.subr.bf16.mxu0 %v1246_v4  ;;  %v1312_v20 = vld [vmem:[%s1775_s4 + $0x78] sm:$0xff]   ;;  %v1314_v24 = vld [vmem:[%s1775_s4 + $0x70] sm:$0xff]   ;;  %v1316_v26 = vld [vmem:[%s1775_s4 + $0x68] sm:$0xff]   ;;  %v437_v2 = vshrl.u32 %v436_v1, 7 }
   0x9   :  { %v1313_v22 = vld [vmem:[%s1775_s4 + $0x38] sm:$0xff]   ;;  %1128 = vmatprep.subr.bf16.mxu1 %v1312_v20  ;;  %v1315_v25 = vld [vmem:[%s1775_s4 + $0x30] sm:$0xff]   ;;  %v1273_v28 = vld [vmem:[%s1773_s1 + $0xc4] ss:$8 sps:$4 sm:$0xff]  }
   0xa   :  { %v1270_v23 = vld [vmem:[%s1773_s1 + $0xd4] ss:$8 sps:$4 sm:$0xff]   ;;  %1129 = vmatpush3.bf16.msra.mxu1 %v1313_v22  ;;  %v1272_v27 = vld [vmem:[%s1773_s1 + $0xd0] ss:$8 sps:$4 sm:$0xff]   ;;  %v1317_v29 = vld [vmem:[%s1775_s4 + $0x28] sm:$0xff]   ;;  %v442_v3 = vsub.s32 1, %v437_v2 }
   0xb   :  { %326 = vmatpush1.bf16.msra.mxu0 %v1248_v5  ;;  %1130 = vmatprep.subr.bf16.mxu1 %v1314_v24  ;;  %v1318_v30 = vld [vmem:[%s1775_s4 + $0x60] sm:$0xff]   ;;  %v1276_v33 = vld [vmem:[%s1773_s1 + $0xb4] ss:$8 sps:$4 sm:$0xff]   ;;  %v1278_v34 = vld [vmem:[%s1773_s1 + $0xb0] ss:$8 sps:$4 sm:$0xff]   ;;  %v438_v4 = vsub.s32 0, %v437_v2 }
   0xc   :  { %327 = vmatprep.subr.bf16.mxu0 %v1249_v6  ;;  %v1275_v31 = vld [vmem:[%s1773_s1 + $0xc0] ss:$8 sps:$4 sm:$0xff]   ;;  %v1279_v35 = vld [vmem:[%s1773_s1 + $0xa4] ss:$8 sps:$4 sm:$0xff]   ;;  %v1282_v37 = vld [vmem:[%s1773_s1 + $0x94] ss:$8 sps:$4 sm:$0xff]  }
   0xd   :  { %v1319_v32 = vld [vmem:[%s1775_s4 + $0x20] sm:$0xff]   ;;  %v1284_v38 = vld [vmem:[%s1773_s1 + $0x90] ss:$8 sps:$4 sm:$0xff]   ;;  %v1291_v42 = vld [vmem:[%s1774_s0 + $0x14] ss:$8 sps:$4 sm:$0xff]  }
   0xe   :  { %1131 = vmatpush3.bf16.msra.mxu1 %v1315_v25  ;;  %v1281_v36 = vld [vmem:[%s1773_s1 + $0xa0] ss:$8 sps:$4 sm:$0xff]   ;;  %v1285_v39 = vld [vmem:[%s1773_s1 + $0x84] ss:$8 sps:$4 sm:$0xff]   ;;  %v1293_v43 = vld [vmem:[%s1774_s0 + $0x10] ss:$8 sps:$4 sm:$0xff]  }
   0xf   :  { %328 = vmatpush1.bf16.msra.mxu0 %v1251_v7  ;;  %1132 = vmatprep.subr.bf16.mxu1 %v1316_v26  ;;  %v1287_v40 = vld [vmem:[%s1773_s1 + $0x80] ss:$8 sps:$4 sm:$0xff]   ;;  %v1294_v44 = vld [vmem:[%s1774_s0 + $0x24] ss:$8 sps:$4 sm:$0xff]   ;;  %v1297_v46 = vld [vmem:[%s1774_s0 + $0x34] ss:$8 sps:$4 sm:$0xff]  }
  0x10   :  { %329 = vmatprep.subr.bf16.mxu0 %v1252_v8  ;;  %v1288_v41 = vld [vmem:[%s1774_s0] ss:$8 sps:$4 sm:$0xff]   ;;  %v1299_v47 = vld [vmem:[%s1774_s0 + $0x30] ss:$8 sps:$4 sm:$0xff]   ;;  %v1300_v48 = vld [vmem:[%s1774_s0 + $0x44] ss:$8 sps:$4 sm:$0xff]  }
  0x11   :  { %v1296_v45 = vld [vmem:[%s1774_s0 + $0x20] ss:$8 sps:$4 sm:$0xff]   ;;  %v1303_v50 = vld [vmem:[%s1774_s0 + $0x54] ss:$8 sps:$4 sm:$0xff]   ;;  %v1305_v51 = vld [vmem:[%s1774_s0 + $0x50] ss:$8 sps:$4 sm:$0xff]  }
  0x12   :  { %1133 = vmatpush3.bf16.msra.mxu1 %v1317_v29  ;;  %v1302_v49 = vld [vmem:[%s1774_s0 + $0x40] ss:$8 sps:$4 sm:$0xff]   ;;  %v1306_v52 = vld [vmem:[%s1774_s0 + $0x64] ss:$8 sps:$4 sm:$0xff]   ;;  %v1309_v54 = vld [vmem:[%s1774_s0 + $0x74] ss:$8 sps:$4 sm:$0xff]  }
  0x13   :  { %330 = vmatpush1.bf16.msra.mxu0 %v1254_v9  ;;  %1134 = vmatprep.subr.bf16.mxu1 %v1318_v30  ;;  %v1308_v53 = vld [vmem:[%s1774_s0 + $0x60] ss:$8 sps:$4 sm:$0xff]   ;;  %v1311_v55 = vld [vmem:[%s1774_s0 + $0x70] ss:$8 sps:$4 sm:$0xff]  }
  0x14   :  { %331 = vmatprep.subr.bf16.mxu0 %v1255_v10  ;;  %v1320_v56 = vld [vmem:[%s1775_s4 + $0x58] sm:$0xff]   ;;  %v1322_v58 = vld [vmem:[%s1775_s4 + $0x50] sm:$0xff]   ;;  %v1324_v60 = vld [vmem:[%s1775_s4 + $0x48] sm:$0xff]  }
  0x15   :  { %v1321_v57 = vld [vmem:[%s1775_s4 + $0x18] sm:$0xff]   ;;  %v1323_v59 = vld [vmem:[%s1775_s4 + $0x10] sm:$0xff]   ;;  %v1325_v61 = vld [vmem:[%s1775_s4 + $0x8] sm:$0xff]  }
  0x16   :  { %1135 = vmatpush3.bf16.msra.mxu1 %v1319_v32  ;;  %v1326_v62 = vld [vmem:[%s1775_s4 + $0x40] sm:$0xff]   ;;  %v1328_v0 = vld [vmem:[%s1776_s7 + $0x38] sm:$0xff]  }
  0x17   :  { %332 = vmatpush1.bf16.msra.mxu0 %v1257_v11  ;;  %1136 = vmatprep.subr.bf16.mxu1 %v1320_v56  ;;  %v1327_v63 = vld [vmem:[%s1775_s4] sm:$0xff]  }
  0x18   :  { %333 = vmatprep.subr.bf16.mxu0 %v1258_v12  ;;  %v434_v5 = vld [vmem:[%s1777_s2] sm:$0x3] }
  0x19   :  { %v1584_v6 = vrot.slane %v434_v5, %v442_v3  ;;  %v1586_v8 = vrot.slane %v434_v5, %v438_v4  ;;  %v478_v9 = vld [vmem:[%s1778_s3] sm:$0x3] }
  0x1a   :  { %1137 = vmatpush3.bf16.msra.mxu1 %v1321_v57  ;;  %v1592_v12 = vrot.slane %v478_v9, %v442_v3 }
  0x1b   :  { %334 = vmatpush1.bf16.msra.mxu0 %v1260_v14  ;;  %1138 = vmatprep.subr.bf16.mxu1 %v1322_v58  ;;  %v1595_v14 = vrot.slane %v478_v9, %v438_v4 }
  0x1c   :  { %335 = vmatprep.subr.bf16.mxu0 %v1261_v15 }
  0x1e   :  { %1139 = vmatpush3.bf16.msra.mxu1 %v1323_v59 }
  0x1f   :  { %336 = vmatpush1.bf16.msra.mxu0 %v1263_v16  ;;  %1140 = vmatprep.subr.bf16.mxu1 %v1324_v60 }
  0x20   :  { %337 = vmatprep.subr.bf16.mxu0 %v1264_v17 }
  0x22   :  { %1141 = vmatpush3.bf16.msra.mxu1 %v1325_v61 }
  0x23   :  { %338 = vmatpush2.bf16.msra.mxu0 %v1266_v18  ;;  %1142 = vmatprep.subr.bf16.mxu1 %v1326_v62 }
  0x24   :  { %339 = vmatprep.subr.bf16.mxu0 %v1267_v19 }
  0x26   :  { %1143 = vmatpush3.bf16.msra.mxu1 %v1327_v63 }
  0x27   :  { %340 = vmatpush2.bf16.msra.mxu0 %v1269_v21  ;;  %1208 = vmatprep.subr.bf16.mxu1 %v1328_v0 }
  0x28   :  { %341 = vmatprep.subr.bf16.mxu0 %v1270_v23 }
  0x2b   :  { %342 = vmatpush2.bf16.msra.mxu0 %v1272_v27 }
  0x2c   :  { %343 = vmatprep.subr.bf16.mxu0 %v1273_v28 }
  0x2f   :  { %344 = vmatpush2.bf16.msra.mxu0 %v1275_v31 }
  0x30   :  { %345 = vmatprep.subr.bf16.mxu0 %v1276_v33 }
  0x33   :  { %346 = vmatpush2.bf16.msra.mxu0 %v1278_v34 }
  0x34   :  { %347 = vmatprep.subr.bf16.mxu0 %v1279_v35 }
  0x37   :  { %348 = vmatpush2.bf16.msra.mxu0 %v1281_v36  ;;  %v1329_v36 = vld [vmem:[%s1776_s7 + $0x30] sm:$0xff]  }
  0x38   :  { %349 = vmatprep.subr.bf16.mxu0 %v1282_v37 }
  0x3b   :  { %350 = vmatpush2.bf16.msra.mxu0 %v1284_v38 }
  0x3c   :  { %351 = vmatprep.subr.bf16.mxu0 %v1285_v39 }
  0x3f   :  { %352 = vmatpush2.bf16.msra.mxu0 %v1287_v40 }
  0x42   :  { %354 = vmatmul.mubr.bf16.vlgmr.msra.gmra.mxu0 %v1288_v41 }
  0x43   :  { %363 = vmatprep.mubr.bf16.mxu0 %v1291_v42 }
  0x4a   :  { %364 = vmatmul.mubr.bf16.gmra.mxu0 %v1293_v43 }
  0x4b   :  { %373 = vmatprep.mubr.bf16.mxu0 %v1294_v44 }
  0x52   :  { %374 = vmatmul.mubr.bf16.gmra.mxu0 %v1296_v45 }
  0x53   :  { %383 = vmatprep.mubr.bf16.mxu0 %v1297_v46 }
  0x5a   :  { %384 = vmatmul.mubr.bf16.gmra.mxu0 %v1299_v47 }
  0x5b   :  { %393 = vmatprep.mubr.bf16.mxu0 %v1300_v48 }
  0x62   :  { %394 = vmatmul.mubr.bf16.gmra.mxu0 %v1302_v49 }
  0x63   :  { %403 = vmatprep.mubr.bf16.mxu0 %v1303_v50 }
  0x6a   :  { %404 = vmatmul.mubr.bf16.gmra.mxu0 %v1305_v51 }
  0x6b   :  { %413 = vmatprep.mubr.bf16.mxu0 %v1306_v52 }
  0x72   :  { %414 = vmatmul.mubr.bf16.gmra.mxu0 %v1308_v53 }
  0x73   :  { %423 = vmatprep.mubr.bf16.mxu0 %v1309_v54 }
  0x7a   :  { %424 = vmatmul.mubr.bf16.gmra.mxu0 %v1311_v55 }
 0x102   :  { %v355_v7 = vpop.f32.mrf.mxu0 }
 0x103   :  { %v446_v13 = vmul.f32 %v1586_v8, %v355_v7 }
 0x104   :  { %v357_v10 = vpop.f32.mrf.mxu0 }
 0x105   :  { %v447_v11 = vmul.f32 %v1584_v6, %v357_v10  ;;  %v490_v21 = vadd.f32 %v1595_v14, %v446_v13 }
 0x106   :  { %v359_v15 = vpop.f32.mrf.mxu0 }
 0x107   :  { %v448_v16 = vmul.f32 %v1586_v8, %v359_v15  ;;  %v491_v20 = vadd.f32 %v1592_v12, %v447_v11  ;;  %v522_v29 = vmax.f32 %v490_v21, 0.0 }
 0x108   :  { %v361_v17 = vpop.f32.mrf.mxu0 }
 0x109   :  { %v492_v18 = vadd.f32 %v1595_v14, %v448_v16  ;;  %v449_v19 = vmul.f32 %v1584_v6, %v361_v17  ;;  %v523_v27 = vmax.f32 %v491_v20, 0.0 }
 0x10a   :  { %v365_v22 = vpop.f32.mrf.mxu0 }
 0x10b   :  { %v493_v23 = vadd.f32 %v1592_v12, %v449_v19  ;;  %v524_v24 = vmax.f32 %v492_v18, 0.0  ;;  %v450_v30 = vmul.f32 %v1586_v8, %v365_v22 }
 0x10c   :  { %v367_v25 = vpop.f32.mrf.mxu0 }
 0x10d   :  { %v451_v26 = vmul.f32 %v1584_v6, %v367_v25  ;;  %v525_v28 = vmax.f32 %v493_v23, 0.0  ;;  %v554_v35 = vpack.c.bf16 %v524_v24, %v522_v29  ;;  %v494_v40 = vadd.f32 %v1595_v14, %v450_v30 }
 0x10e   :  { %v369_v31 = vpop.f32.mrf.mxu0 }
 0x10f   :  { %v452_v32 = vmul.f32 %v1586_v8, %v369_v31  ;;  %v555_v33 = vpack.c.bf16 %v525_v28, %v523_v27  ;;  %v495_v37 = vadd.f32 %v1592_v12, %v451_v26  ;;  %v526_v48 = vmax.f32 %v494_v40, 0.0 }
 0x110   :  { %v371_v34 = vpop.f32.mrf.mxu0 }
 0x111   :  { %v496_v38 = vadd.f32 %v1595_v14, %v452_v32  ;;  %v453_v39 = vmul.f32 %v1584_v6, %v371_v34  ;;  %730 = vmatprep.mubr.bf16.mxu1 %v555_v33  ;;  %v527_v45 = vmax.f32 %v495_v37, 0.0 }
 0x112   :  { %v375_v41 = vpop.f32.mrf.mxu0  ;;  %731 = vmatmul.mubr.bf16.vlgmr.msra.gmra.mxu1 %v554_v35 }
 0x113   :  { %v497_v42 = vadd.f32 %v1592_v12, %v453_v39  ;;  %1209 = vmatpush3.bf16.msra.mxu1 %v1328_v0  ;;  %v528_v43 = vmax.f32 %v496_v38, 0.0  ;;  %v454_v49 = vmul.f32 %v1586_v8, %v375_v41 }
 0x114   :  { %v377_v44 = vpop.f32.mrf.mxu0  ;;  %1210 = vmatprep.subr.bf16.mxu1 %v1329_v36 }
 0x115   :  { %v529_v46 = vmax.f32 %v497_v42, 0.0  ;;  %v455_v47 = vmul.f32 %v1584_v6, %v377_v44  ;;  %v556_v54 = vpack.c.bf16 %v528_v43, %v526_v48  ;;  %v498_v58 = vadd.f32 %v1595_v14, %v454_v49 }
 0x116   :  { %v379_v50 = vpop.f32.mrf.mxu0 }
 0x117   :  { %v456_v51 = vmul.f32 %v1586_v8, %v379_v50  ;;  %v557_v52 = vpack.c.bf16 %v529_v46, %v527_v45  ;;  %1211 = vmatpush3.bf16.msra.mxu1 %v1329_v36  ;;  %v499_v55 = vadd.f32 %v1592_v12, %v455_v47  ;;  %v530_v2 = vmax.f32 %v498_v58, 0.0 }
 0x118   :  { %v381_v53 = vpop.f32.mrf.mxu0 }
 0x119   :  { %v500_v56 = vadd.f32 %v1595_v14, %v456_v51  ;;  %v457_v57 = vmul.f32 %v1584_v6, %v381_v53  ;;  %738 = vmatprep.mubr.bf16.mxu1 %v557_v52  ;;  %v531_v63 = vmax.f32 %v499_v55, 0.0 }
 0x11a   :  { %v385_v59 = vpop.f32.mrf.mxu0  ;;  %739 = vmatmul.mubr.bf16.gmra.mxu1 %v556_v54 }
 0x11b   :  { %v501_v60 = vadd.f32 %v1592_v12, %v457_v57  ;;  %v532_v61 = vmax.f32 %v500_v56, 0.0  ;;  %v458_v3 = vmul.f32 %v1586_v8, %v385_v59 }
 0x11c   :  { %v387_v62 = vpop.f32.mrf.mxu0 }
 0x11d   :  { %v533_v0 = vmax.f32 %v501_v60, 0.0  ;;  %v459_v1 = vmul.f32 %v1584_v6, %v387_v62  ;;  %v558_v10 = vpack.c.bf16 %v532_v61, %v530_v2  ;;  %v502_v16 = vadd.f32 %v1595_v14, %v458_v3 }
 0x11e   :  { %v389_v4 = vpop.f32.mrf.mxu0 }
 0x11f   :  { %v460_v5 = vmul.f32 %v1586_v8, %v389_v4  ;;  %v559_v7 = vpack.c.bf16 %v533_v0, %v531_v63  ;;  %v503_v11 = vadd.f32 %v1592_v12, %v459_v1  ;;  %v534_v24 = vmax.f32 %v502_v16, 0.0 }
 0x120   :  { %v391_v9 = vpop.f32.mrf.mxu0 }
 0x121   :  { %v504_v13 = vadd.f32 %v1595_v14, %v460_v5  ;;  %v461_v15 = vmul.f32 %v1584_v6, %v391_v9  ;;  %746 = vmatprep.mubr.bf16.mxu1 %v559_v7  ;;  %v535_v21 = vmax.f32 %v503_v11, 0.0 }
 0x122   :  { %v395_v17 = vpop.f32.mrf.mxu0  ;;  %747 = vmatmul.mubr.bf16.gmra.mxu1 %v558_v10 }
 0x123   :  { %v505_v18 = vadd.f32 %v1592_v12, %v461_v15  ;;  %v536_v19 = vmax.f32 %v504_v13, 0.0  ;;  %v462_v25 = vmul.f32 %v1586_v8, %v395_v17 }
 0x124   :  { %v397_v20 = vpop.f32.mrf.mxu0 }
 0x125   :  { %v537_v22 = vmax.f32 %v505_v18, 0.0  ;;  %v463_v23 = vmul.f32 %v1584_v6, %v397_v20  ;;  %v560_v30 = vpack.c.bf16 %v536_v19, %v534_v24  ;;  %v506_v34 = vadd.f32 %v1595_v14, %v462_v25 }
 0x126   :  { %v399_v26 = vpop.f32.mrf.mxu0 }
 0x127   :  { %v464_v27 = vmul.f32 %v1586_v8, %v399_v26  ;;  %v561_v28 = vpack.c.bf16 %v537_v22, %v535_v21  ;;  %v507_v31 = vadd.f32 %v1592_v12, %v463_v23  ;;  %v538_v42 = vmax.f32 %v506_v34, 0.0 }
 0x128   :  { %v401_v29 = vpop.f32.mrf.mxu0 }
 0x129   :  { %v508_v32 = vadd.f32 %v1595_v14, %v464_v27  ;;  %v465_v33 = vmul.f32 %v1584_v6, %v401_v29  ;;  %754 = vmatprep.mubr.bf16.mxu1 %v561_v28  ;;  %v539_v39 = vmax.f32 %v507_v31, 0.0 }
 0x12a   :  { %v405_v35 = vpop.f32.mrf.mxu0  ;;  %755 = vmatmul.mubr.bf16.gmra.mxu1 %v560_v30 }
 0x12b   :  { %v509_v36 = vadd.f32 %v1592_v12, %v465_v33  ;;  %v540_v37 = vmax.f32 %v508_v32, 0.0  ;;  %v466_v43 = vmul.f32 %v1586_v8, %v405_v35  ;;  %v1330_v35 = vld [vmem:[%s1776_s7 + $0x28] sm:$0xff]  }
 0x12c   :  { %v407_v38 = vpop.f32.mrf.mxu0  ;;  %1212 = vmatprep.subr.bf16.mxu1 %v1330_v35 }
 0x12d   :  { %v541_v40 = vmax.f32 %v509_v36, 0.0  ;;  %v467_v41 = vmul.f32 %v1584_v6, %v407_v38  ;;  %v562_v48 = vpack.c.bf16 %v540_v37, %v538_v42  ;;  %v510_v52 = vadd.f32 %v1595_v14, %v466_v43  ;;  %1213 = vmatpush3.bf16.msra.mxu1 %v1330_v35  ;;  %v1334_v36 = vld [vmem:[%s1776_s7 + $0x8] sm:$0xff]   ;;  %v1335_v37 = vld [vmem:[%s1776_s7] sm:$0xff]  }
 0x12e   :  { %v409_v44 = vpop.f32.mrf.mxu0 }
 0x12f   :  { %v468_v45 = vmul.f32 %v1586_v8, %v409_v44  ;;  %v563_v46 = vpack.c.bf16 %v541_v40, %v539_v39  ;;  %v511_v49 = vadd.f32 %v1592_v12, %v467_v41  ;;  %v542_v60 = vmax.f32 %v510_v52, 0.0  ;;  %v1683_v40 = vld [vmem:[%s1779_s5] ss:$0 sm:$0xff] }
 0x130   :  { %v411_v47 = vpop.f32.mrf.mxu0  ;;  %v1689_v44 = vld [vmem:[%s1780_s6] ss:$0 sm:$0xff] }
 0x131   :  { %v512_v50 = vadd.f32 %v1595_v14, %v468_v45  ;;  %v469_v51 = vmul.f32 %v1584_v6, %v411_v47  ;;  %762 = vmatprep.mubr.bf16.mxu1 %v563_v46  ;;  %v543_v57 = vmax.f32 %v511_v49, 0.0 }
 0x132   :  { %v415_v53 = vpop.f32.mrf.mxu0  ;;  %763 = vmatmul.mubr.bf16.gmra.mxu1 %v562_v48 }
 0x133   :  { %v513_v54 = vadd.f32 %v1592_v12, %v469_v51  ;;  %v544_v55 = vmax.f32 %v512_v50, 0.0  ;;  %v470_v61 = vmul.f32 %v1586_v8, %v415_v53 }
 0x134   :  { %v417_v56 = vpop.f32.mrf.mxu0 }
 0x135   :  { %v545_v58 = vmax.f32 %v513_v54, 0.0  ;;  %v471_v59 = vmul.f32 %v1584_v6, %v417_v56  ;;  %v564_v2 = vpack.c.bf16 %v544_v55, %v542_v60  ;;  %v514_v7 = vadd.f32 %v1595_v14, %v470_v61 }
 0x136   :  { %v419_v62 = vpop.f32.mrf.mxu0 }
 0x137   :  { %v472_v63 = vmul.f32 %v1586_v8, %v419_v62  ;;  %v565_v0 = vpack.c.bf16 %v545_v58, %v543_v57  ;;  %v515_v3 = vadd.f32 %v1592_v12, %v471_v59  ;;  %v546_v18 = vmax.f32 %v514_v7, 0.0 }
 0x138   :  { %v421_v1 = vpop.f32.mrf.mxu0 }
 0x139   :  { %v516_v4 = vadd.f32 %v1595_v14, %v472_v63  ;;  %v473_v5 = vmul.f32 %v1584_v6, %v421_v1  ;;  %770 = vmatprep.mubr.bf16.mxu1 %v565_v0  ;;  %v547_v15 = vmax.f32 %v515_v3, 0.0 }
 0x13a   :  { %v425_v9 = vpop.f32.mrf.mxu0  ;;  %771 = vmatmul.mubr.bf16.gmra.mxu1 %v564_v2 }
 0x13b   :  { %v517_v10 = vadd.f32 %v1592_v12, %v473_v5  ;;  %v548_v11 = vmax.f32 %v516_v4, 0.0  ;;  %v474_v19 = vmul.f32 %v1586_v8, %v425_v9 }
 0x13c   :  { %v427_v13 = vpop.f32.mrf.mxu0 }
 0x13d   :  { %v549_v16 = vmax.f32 %v517_v10, 0.0  ;;  %v475_v17 = vmul.f32 %v1584_v6, %v427_v13  ;;  %v566_v24 = vpack.c.bf16 %v548_v11, %v546_v18  ;;  %v518_v28 = vadd.f32 %v1595_v14, %v474_v19 }
 0x13e   :  { %v429_v20 = vpop.f32.mrf.mxu0 }
 0x13f   :  { %v476_v21 = vmul.f32 %v1586_v8, %v429_v20  ;;  %v567_v22 = vpack.c.bf16 %v549_v16, %v547_v15  ;;  %v519_v25 = vadd.f32 %v1592_v12, %v475_v17  ;;  %v550_v33 = vmax.f32 %v518_v28, 0.0 }
 0x140   :  { %v431_v23 = vpop.f32.mrf.mxu0 }
 0x141   :  { %v520_v26 = vadd.f32 %v1595_v14, %v476_v21  ;;  %v477_v27 = vmul.f32 %v1584_v6, %v431_v23  ;;  %778 = vmatprep.mubr.bf16.mxu1 %v567_v22  ;;  %v551_v31 = vmax.f32 %v519_v25, 0.0  ;;  %v1331_v6 = vld [vmem:[%s1776_s7 + $0x20] sm:$0xff]   ;;  %v1333_v14 = vld [vmem:[%s1776_s7 + $0x10] sm:$0xff]  }
 0x142   :  { %779 = vmatmul.mubr.bf16.gmra.mxu1 %v566_v24  ;;  %1214 = vmatprep.subr.bf16.mxu1 %v1331_v6 }
 0x143   :  { %v521_v29 = vadd.f32 %v1592_v12, %v477_v27  ;;  %v552_v30 = vmax.f32 %v520_v26, 0.0  ;;  %1215 = vmatpush3.bf16.msra.mxu1 %v1331_v6  ;;  %v1332_v12 = vld [vmem:[%s1776_s7 + $0x18] sm:$0xff]  }
 0x144   :  { %1216 = vmatprep.subr.bf16.mxu1 %v1332_v12 }
 0x145   :  { %v553_v32 = vmax.f32 %v521_v29, 0.0  ;;  %v568_v34 = vpack.c.bf16 %v552_v30, %v550_v33 }
 0x147   :  { %v569_v8 = vpack.c.bf16 %v553_v32, %v551_v31  ;;  %1217 = vmatpush3.bf16.msra.mxu1 %v1332_v12 }
 0x148   :  { %1218 = vmatprep.subr.bf16.mxu1 %v1333_v14 }
 0x149   :  { %786 = vmatprep.mubr.bf16.mxu1 %v569_v8 }
 0x14a   :  { %787 = vmatmul.mubr.bf16.gmra.mxu1 %v568_v34 }
 0x14b   :  { %1219 = vmatpush3.bf16.msra.mxu1 %v1333_v14 }
 0x14c   :  { %1220 = vmatprep.subr.bf16.mxu1 %v1334_v36 }
 0x14f   :  { %1221 = vmatpush3.bf16.msra.mxu1 %v1334_v36 }
 0x150   :  { %1222 = vmatprep.subr.bf16.mxu1 %v1335_v37 }
 0x153   :  { %1223 = vmatpush3.bf16.msra.mxu1 %v1335_v37 }
 0x1d2   :  { %v1144_v38 = vpop.f32.mrf.mxu1 }
 0x1d4   :  { %v1145_v39 = vpop.f32.mrf.mxu1 }
 0x1d5   :  { %v1146_v41 = vadd.f32 %v1145_v39, %v1144_v38 }
 0x1d6   :  { %v1147_v42 = vpop.f32.mrf.mxu1 }
 0x1d7   :  { %v802_v43 = vmul.f32 %v1146_v41, %v1683_v40 }
 0x1d8   :  { %v1148_v45 = vpop.f32.mrf.mxu1 }
 0x1d9   :  { %v1149_v46 = vadd.f32 %v1148_v45, %v1147_v42  ;;  %v825_v48 = vadd.f32 %v1689_v44, %v802_v43 }
 0x1da   :  { %v1150_v47 = vpop.f32.mrf.mxu1 }
 0x1db   :  { %v803_v49 = vmul.f32 %v1149_v46, %v1683_v40  ;;  %v841_v54 = vmax.f32 %v825_v48, 0.0 }
 0x1dc   :  { %v1151_v50 = vpop.f32.mrf.mxu1 }
 0x1dd   :  { %v826_v51 = vadd.f32 %v1689_v44, %v803_v49  ;;  %v1152_v52 = vadd.f32 %v1151_v50, %v1150_v47 }
 0x1de   :  { %v1153_v53 = vpop.f32.mrf.mxu1 }
 0x1df   :  { %v842_v55 = vmax.f32 %v826_v51, 0.0  ;;  %v804_v56 = vmul.f32 %v1152_v52, %v1683_v40 }
 0x1e0   :  { %v1154_v57 = vpop.f32.mrf.mxu1 }
 0x1e1   :  { %v1155_v58 = vadd.f32 %v1154_v57, %v1153_v53  ;;  %v857_v59 = vpack.c.bf16 %v842_v55, %v841_v54  ;;  %v827_v61 = vadd.f32 %v1689_v44, %v804_v56 }
 0x1e2   :  { %v1156_v60 = vpop.f32.mrf.mxu1 }
 0x1e3   :  { %v805_v62 = vmul.f32 %v1155_v58, %v1683_v40  ;;  %1224 = vmatprep.mubr.bf16.mxu1 %v857_v59  ;;  %v843_v3 = vmax.f32 %v827_v61, 0.0 }
 0x1e4   :  { %v1157_v63 = vpop.f32.mrf.mxu1 }
 0x1e5   :  { %v828_v0 = vadd.f32 %v1689_v44, %v805_v62  ;;  %v1158_v1 = vadd.f32 %v1157_v63, %v1156_v60 }
 0x1e6   :  { %v1159_v2 = vpop.f32.mrf.mxu1 }
 0x1e7   :  { %v844_v4 = vmax.f32 %v828_v0, 0.0  ;;  %v806_v5 = vmul.f32 %v1158_v1, %v1683_v40 }
 0x1e8   :  { %v1160_v7 = vpop.f32.mrf.mxu1 }
 0x1e9   :  { %v858_v9 = vpack.c.bf16 %v844_v4, %v843_v3  ;;  %v1161_v10 = vadd.f32 %v1160_v7, %v1159_v2  ;;  %v829_v13 = vadd.f32 %v1689_v44, %v806_v5 }
 0x1ea   :  { %v1162_v11 = vpop.f32.mrf.mxu1 }
 0x1eb   :  { %v807_v15 = vmul.f32 %v1161_v10, %v1683_v40  ;;  %1225 = vmatmul.mubr.bf16.vlgmr.msra.gmra.mxu1 %v858_v9  ;;  %v845_v20 = vmax.f32 %v829_v13, 0.0 }
 0x1ec   :  { %v1163_v16 = vpop.f32.mrf.mxu1 }
 0x1ed   :  { %v830_v17 = vadd.f32 %v1689_v44, %v807_v15  ;;  %v1164_v18 = vadd.f32 %v1163_v16, %v1162_v11 }
 0x1ee   :  { %v1165_v19 = vpop.f32.mrf.mxu1 }
 0x1ef   :  { %v846_v21 = vmax.f32 %v830_v17, 0.0  ;;  %v808_v22 = vmul.f32 %v1164_v18, %v1683_v40 }
 0x1f0   :  { %v1166_v23 = vpop.f32.mrf.mxu1 }
 0x1f1   :  { %v1167_v24 = vadd.f32 %v1166_v23, %v1165_v19  ;;  %v859_v25 = vpack.c.bf16 %v846_v21, %v845_v20  ;;  %v831_v27 = vadd.f32 %v1689_v44, %v808_v22  ;;  %v1119_v22 = vld [vmem:[%s1781_s8] ss:$0 sm:$0xff] }
 0x1f2   :  { %v1168_v26 = vpop.f32.mrf.mxu1 }
 0x1f3   :  { %v809_v28 = vmul.f32 %v1167_v24, %v1683_v40  ;;  %1228 = vmatprep.mubr.bf16.mxu1 %v859_v25  ;;  %v847_v33 = vmax.f32 %v831_v27, 0.0 }
 0x1f4   :  { %v1169_v29 = vpop.f32.mrf.mxu1 }
 0x1f5   :  { %v832_v30 = vadd.f32 %v1689_v44, %v809_v28  ;;  %v1170_v31 = vadd.f32 %v1169_v29, %v1168_v26 }
 0x1f6   :  { %v1171_v32 = vpop.f32.mrf.mxu1 }
 0x1f7   :  { %v848_v8 = vmax.f32 %v832_v30, 0.0  ;;  %v810_v34 = vmul.f32 %v1170_v31, %v1683_v40 }
 0x1f8   :  { %v1172_v35 = vpop.f32.mrf.mxu1 }
 0x1f9   :  { %v1173_v6 = vadd.f32 %v1172_v35, %v1171_v32  ;;  %v860_v12 = vpack.c.bf16 %v848_v8, %v847_v33  ;;  %v833_v36 = vadd.f32 %v1689_v44, %v810_v34 }
 0x1fa   :  { %v1174_v14 = vpop.f32.mrf.mxu1 }
 0x1fb   :  { %v811_v37 = vmul.f32 %v1173_v6, %v1683_v40  ;;  %1229 = vmatmul.mubr.bf16.gmra.mxu1 %v860_v12  ;;  %v849_v43 = vmax.f32 %v833_v36, 0.0 }
 0x1fc   :  { %v1175_v38 = vpop.f32.mrf.mxu1 }
 0x1fd   :  { %v834_v39 = vadd.f32 %v1689_v44, %v811_v37  ;;  %v1176_v41 = vadd.f32 %v1175_v38, %v1174_v14 }
 0x1fe   :  { %v1177_v42 = vpop.f32.mrf.mxu1 }
 0x1ff   :  { %v850_v45 = vmax.f32 %v834_v39, 0.0  ;;  %v812_v46 = vmul.f32 %v1176_v41, %v1683_v40 }
 0x200   :  { %v1178_v47 = vpop.f32.mrf.mxu1 }
 0x201   :  { %v1179_v48 = vadd.f32 %v1178_v47, %v1177_v42  ;;  %v861_v49 = vpack.c.bf16 %v850_v45, %v849_v43  ;;  %v835_v51 = vadd.f32 %v1689_v44, %v812_v46 }
 0x202   :  { %v1180_v50 = vpop.f32.mrf.mxu1 }
 0x203   :  { %v813_v52 = vmul.f32 %v1179_v48, %v1683_v40  ;;  %1232 = vmatprep.mubr.bf16.mxu1 %v861_v49  ;;  %v851_v57 = vmax.f32 %v835_v51, 0.0 }
 0x204   :  { %v1181_v53 = vpop.f32.mrf.mxu1 }
 0x205   :  { %v836_v54 = vadd.f32 %v1689_v44, %v813_v52  ;;  %v1182_v55 = vadd.f32 %v1181_v53, %v1180_v50 }
 0x206   :  { %v1183_v56 = vpop.f32.mrf.mxu1 }
 0x207   :  { %v852_v58 = vmax.f32 %v836_v54, 0.0  ;;  %v814_v59 = vmul.f32 %v1182_v55, %v1683_v40 }
 0x208   :  { %v1184_v60 = vpop.f32.mrf.mxu1 }
 0x209   :  { %v1185_v61 = vadd.f32 %v1184_v60, %v1183_v56  ;;  %v862_v62 = vpack.c.bf16 %v852_v58, %v851_v57  ;;  %v837_v0 = vadd.f32 %v1689_v44, %v814_v59 }
 0x20a   :  { %v1186_v63 = vpop.f32.mrf.mxu1 }
 0x20b   :  { %v815_v1 = vmul.f32 %v1185_v61, %v1683_v40  ;;  %1233 = vmatmul.mubr.bf16.gmra.mxu1 %v862_v62  ;;  %v853_v7 = vmax.f32 %v837_v0, 0.0 }
 0x20c   :  { %v1187_v2 = vpop.f32.mrf.mxu1 }
 0x20d   :  { %v838_v3 = vadd.f32 %v1689_v44, %v815_v1  ;;  %v1188_v4 = vadd.f32 %v1187_v2, %v1186_v63 }
 0x20e   :  { %v1189_v5 = vpop.f32.mrf.mxu1 }
 0x20f   :  { %v854_v9 = vmax.f32 %v838_v3, 0.0  ;;  %v816_v10 = vmul.f32 %v1188_v4, %v1683_v40 }
 0x210   :  { %v1190_v11 = vpop.f32.mrf.mxu1 }
 0x211   :  { %v1191_v13 = vadd.f32 %v1190_v11, %v1189_v5  ;;  %v863_v15 = vpack.c.bf16 %v854_v9, %v853_v7  ;;  %v839_v16 = vadd.f32 %v1689_v44, %v816_v10 }
 0x213   :  { %v817_v17 = vmul.f32 %v1191_v13, %v1683_v40  ;;  %1236 = vmatprep.mubr.bf16.mxu1 %v863_v15  ;;  %v855_v19 = vmax.f32 %v839_v16, 0.0 }
 0x215   :  { %v840_v18 = vadd.f32 %v1689_v44, %v817_v17 }
 0x217   :  { %v856_v20 = vmax.f32 %v840_v18, 0.0 }
 0x219   :  { %v864_v21 = vpack.c.bf16 %v856_v20, %v855_v19 }
 0x21b   :  { %1237 = vmatmul.mubr.bf16.gmra.mxu1 %v864_v21 }
 0x2ab   :  { %v1226_v23 = vpop.f32.mrf.mxu1 }
 0x2ac   :  { %v979_v24 = vadd.f32 %v1226_v23, %v1119_v22 }
 0x2ad   :  { %v970_v25 = vpop.f32.mrf.mxu1 }
 0x2ae   :  { %1035 = vst [vmem:[%s1782_s9 + $0x10] sm:$0xff] %v979_v24  ;;  %v971_v26 = vadd.f32 %v1119_v22, %v970_v25 }
 0x2af   :  { %v1227_v40 = vpop.f32.mrf.mxu1 }
 0x2b0   :  { %1033 = vst [vmem:[%s1782_s9] sm:$0xff] %v971_v26  ;;  %v982_v44 = vadd.f32 %v1227_v40, %v1119_v22 }
 0x2b1   :  { %v973_v27 = vpop.f32.mrf.mxu1 }
 0x2b2   :  { %1036 = vst [vmem:[%s1782_s9 + $0x18] sm:$0xff] %v982_v44  ;;  %v974_v28 = vadd.f32 %v1119_v22, %v973_v27 }
 0x2b4   :  { %1034 = vst [vmem:[%s1782_s9 + $0x8] sm:$0xff] %v974_v28 }
 0x2bb   :  { %v1230_v29 = vpop.f32.mrf.mxu1 }
 0x2bc   :  { %v995_v30 = vadd.f32 %v1230_v29, %v1119_v22 }
 0x2bd   :  { %v986_v31 = vpop.f32.mrf.mxu1 }
 0x2be   :  { %1039 = vst [vmem:[%s1782_s9 + $0x30] sm:$0xff] %v995_v30  ;;  %v987_v32 = vadd.f32 %v1119_v22, %v986_v31 }
 0x2bf   :  { %v1231_v33 = vpop.f32.mrf.mxu1 }
 0x2c0   :  { %1037 = vst [vmem:[%s1782_s9 + $0x20] sm:$0xff] %v987_v32  ;;  %v998_v8 = vadd.f32 %v1231_v33, %v1119_v22 }
 0x2c1   :  { %v989_v34 = vpop.f32.mrf.mxu1 }
 0x2c2   :  { %1040 = vst [vmem:[%s1782_s9 + $0x38] sm:$0xff] %v998_v8  ;;  %v990_v35 = vadd.f32 %v1119_v22, %v989_v34 }
 0x2c4   :  { %1038 = vst [vmem:[%s1782_s9 + $0x28] sm:$0xff] %v990_v35 }
 0x2cb   :  { %v1234_v6 = vpop.f32.mrf.mxu1 }
 0x2cc   :  { %v1011_v12 = vadd.f32 %v1234_v6, %v1119_v22 }
 0x2cd   :  { %v1002_v14 = vpop.f32.mrf.mxu1 }
 0x2ce   :  { %1043 = vst [vmem:[%s1782_s9 + $0x50] sm:$0xff] %v1011_v12  ;;  %v1003_v36 = vadd.f32 %v1119_v22, %v1002_v14 }
 0x2cf   :  { %v1235_v37 = vpop.f32.mrf.mxu1 }
 0x2d0   :  { %1041 = vst [vmem:[%s1782_s9 + $0x40] sm:$0xff] %v1003_v36  ;;  %v1014_v38 = vadd.f32 %v1235_v37, %v1119_v22 }
 0x2d1   :  { %v1005_v39 = vpop.f32.mrf.mxu1 }
 0x2d2   :  { %1044 = vst [vmem:[%s1782_s9 + $0x58] sm:$0xff] %v1014_v38  ;;  %v1006_v41 = vadd.f32 %v1119_v22, %v1005_v39 }
 0x2d4   :  { %1042 = vst [vmem:[%s1782_s9 + $0x48] sm:$0xff] %v1006_v41 }
 0x2db   :  { %v1238_v42 = vpop.f32.mrf.mxu1 }
 0x2dc   :  { %v1027_v43 = vadd.f32 %v1238_v42, %v1119_v22 }
 0x2dd   :  { %v1018_v45 = vpop.f32.mrf.mxu1 }
 0x2de   :  { %1047 = vst [vmem:[%s1782_s9 + $0x70] sm:$0xff] %v1027_v43  ;;  %v1019_v46 = vadd.f32 %v1119_v22, %v1018_v45 }
 0x2df   :  { %v1239_v47 = vpop.f32.mrf.mxu1 }
 0x2e0   :  { %1045 = vst [vmem:[%s1782_s9 + $0x60] sm:$0xff] %v1019_v46  ;;  %v1030_v48 = vadd.f32 %v1239_v47, %v1119_v22 }
 0x2e1   :  { %v1021_v49 = vpop.f32.mrf.mxu1 }
 0x2e2   :  { %1048 = vst [vmem:[%s1782_s9 + $0x78] sm:$0xff] %v1030_v48  ;;  %v1022_v50 = vadd.f32 %v1119_v22, %v1021_v49 }
 0x2e4   :  { %1046 = vst [vmem:[%s1782_s9 + $0x68] sm:$0xff] %v1022_v50 }

// kernel: pointnet_partseg_forward.9
= control target key start
LH: loop header
LB: loop body
LE: loop exit
PB: predicated region body
PF: predicated region fallthrough
CT: control target
= control target key end

     0   :  { %s6886_s27 = smov 0   ;;  %s6888_s28 = smov 0   ;;  %s9913_s0 = inlined_call_operand.vmem [shape: bf16[2,64,128], index: 0, kind: input, shape index: {}]   ;;  %s9914_s1 = inlined_call_operand.vmem [shape: bf16[2,128,512], index: 1, kind: input, shape index: {}]   ;;  %s9915_s2 = inlined_call_operand.vmem [shape: f32[1,512], index: 2, kind: input, shape index: {}]   ;;  %s9916_s3 = inlined_call_operand.vmem [shape: f32[1,512], index: 3, kind: input, shape index: {}]   ;;  %s9917_s4 = inlined_call_operand.vmem [shape: bf16[512,2048], index: 4, kind: input, shape index: {}]   ;;  %s9918_s5 = inlined_call_operand.vmem [shape: f32[1,2048], index: 5, kind: input, shape index: {}]   ;;  %s9919_s6 = inlined_call_operand.vmem [shape: f32[1,2048], index: 6, kind: input, shape index: {}]   ;;  %s9920_s7 = inlined_call_operand.vmem [shape: bf16[2,64,512], index: 7, kind: output, shape index: {0}]   ;;  %s9921_s8 = inlined_call_operand.vmem [shape: f32[2,1,2048], index: 8, kind: output, shape index: {1}]  }
   0x1   :  { %s6890_s29 = smov 0  }
   0x2 LB: > { %s31_s30 = sadd.s32 1, %s6833_s28  ;;  %p6141_p0 = scmp.ge.s32.totalorder %s6837_s29, 1  ;;  %s6837_s29 = sphi %s6890_s29, %s19_s29   ;;  %s6833_s28 = sphi %s6888_s28, %s10100_s28   ;;  %s6829_s27 = sphi %s6886_s27, %s10099_s27  }
   0x3   : > { %p33_p1 = scmp.ge.s32.totalorder %s31_s30, 2  ;;  %p296_p2 = scmp.lt.s32.totalorder %s6837_s29, 3 }
   0x5   : > { %s10102_s30 = smov (%p33_p1, %s31_s30), 0  ;;  %p297_p3 = pnand %p6141_p0, %p296_p2 }
   0x7   : > { %300 = sbr.rel (%p297_p3) target bundleno = 980 (0x3d4), region = 48 }
   0xc   : > { %p349_p4 = scmp.lt.s32.totalorder %s6829_s27, 1  ;;  %v6839_v0 = vmov 0   ;;  %v1113_v31 = vld [vmem:[%s9917_s4 + $0x380] sm:$0xff] }
   0xd   : > { %635 = vmatprep.mubr.bf16.mxu0 %v6839_v0  ;;  %708 = vmatprep.mubr.bf16.mxu1 %v6839_v0  ;;  %v1121_v32 = vld [vmem:[%s9917_s4 + $0x3c0] sm:$0xff] }
   0xe   : > { %s10104_s27 = smov (!%p349_p4, %s6829_s27), 1  ;;  %v1369_v33 = vld [vmem:[%s9917_s4 + $0xb80] sm:$0xff]  ;;  %v6314_v37 = vcombine.high %v1113_v31, %v1121_v32  ;;  %v6313_v44 = vcombine.low %v1113_v31, %v1121_v32 }
   0xf   : > { %s6716_s9 = sshll.u32 %s10104_s27, 8  ;;  %s6715_s13 = sshll.u32 %s10104_s27, 5  ;;  %v1377_v34 = vld [vmem:[%s9917_s4 + $0xbc0] sm:$0xff] }
  0x10   : > { %s6912_s12 = scalar_lea.vmem %s9914_s1, %s6716_s9  ;;  %s6943_s16 = scalar_lea.vmem %s9913_s0, %s6715_s13  ;;  %v6570_v38 = vcombine.high %v1369_v33, %v1377_v34  ;;  %v1097_v39 = vld [vmem:[%s9917_s4 + $0x300] sm:$0xff]  ;;  %v6569_v45 = vcombine.low %v1369_v33, %v1377_v34 }
  0x11   : > { %v6761_v1 = vld [vmem:[%s6912_s12 + $0xe4] ss:$16 sps:$4 sm:$0xff]   ;;  %v6763_v2 = vld [vmem:[%s6912_s12 + $0xec] ss:$16 sps:$4 sm:$0xff]   ;;  %v6765_v3 = vld [vmem:[%s6912_s12 + $0xe0] ss:$16 sps:$4 sm:$0xff]  }
  0x12   : > { %603 = vmatprep.subr.bf16.mxu0 %v6761_v1  ;;  %v6766_v4 = vld [vmem:[%s6912_s12 + $0xe8] ss:$16 sps:$4 sm:$0xff]   ;;  %676 = vmatprep.subr.bf16.mxu1 %v6763_v2  ;;  %v6767_v5 = vld [vmem:[%s6912_s12 + $0xc4] ss:$16 sps:$4 sm:$0xff]   ;;  %v6769_v6 = vld [vmem:[%s6912_s12 + $0xcc] ss:$16 sps:$4 sm:$0xff]  }
  0x13   : > { %604 = vmatpush1.bf16.msra.mxu0 %v6765_v3  ;;  %677 = vmatpush1.bf16.msra.mxu1 %v6766_v4  ;;  %v6771_v7 = vld [vmem:[%s6912_s12 + $0xc0] ss:$16 sps:$4 sm:$0xff]   ;;  %v6772_v8 = vld [vmem:[%s6912_s12 + $0xc8] ss:$16 sps:$4 sm:$0xff]   ;;  %v6773_v9 = vld [vmem:[%s6912_s12 + $0xa4] ss:$16 sps:$4 sm:$0xff]  }
  0x14   : > { %605 = vmatprep.subr.bf16.mxu0 %v6767_v5  ;;  %678 = vmatprep.subr.bf16.mxu1 %v6769_v6  ;;  %v6775_v10 = vld [vmem:[%s6912_s12 + $0xac] ss:$16 sps:$4 sm:$0xff]   ;;  %v6777_v11 = vld [vmem:[%s6912_s12 + $0xa0] ss:$16 sps:$4 sm:$0xff]   ;;  %v6778_v12 = vld [vmem:[%s6912_s12 + $0xa8] ss:$16 sps:$4 sm:$0xff]  }
  0x15   : > { %v6779_v13 = vld [vmem:[%s6912_s12 + $0x84] ss:$16 sps:$4 sm:$0xff]   ;;  %v6781_v14 = vld [vmem:[%s6912_s12 + $0x8c] ss:$16 sps:$4 sm:$0xff]   ;;  %v6783_v15 = vld [vmem:[%s6912_s12 + $0x80] ss:$16 sps:$4 sm:$0xff]  }
  0x16   : > { %v6784_v16 = vld [vmem:[%s6912_s12 + $0x88] ss:$16 sps:$4 sm:$0xff]   ;;  %v6785_v17 = vld [vmem:[%s6912_s12 + $0x64] ss:$16 sps:$4 sm:$0xff]   ;;  %v6787_v18 = vld [vmem:[%s6912_s12 + $0x6c] ss:$16 sps:$4 sm:$0xff]  }
  0x17   : > { %606 = vmatpush1.bf16.msra.mxu0 %v6771_v7  ;;  %679 = vmatpush1.bf16.msra.mxu1 %v6772_v8  ;;  %v6789_v19 = vld [vmem:[%s6912_s12 + $0x60] ss:$16 sps:$4 sm:$0xff]   ;;  %v6790_v20 = vld [vmem:[%s6912_s12 + $0x68] ss:$16 sps:$4 sm:$0xff]   ;;  %v6791_v21 = vld [vmem:[%s6912_s12 + $0x44] ss:$16 sps:$4 sm:$0xff]  }
  0x18   : > { %607 = vmatprep.subr.bf16.mxu0 %v6773_v9  ;;  %680 = vmatprep.subr.bf16.mxu1 %v6775_v10  ;;  %v6793_v22 = vld [vmem:[%s6912_s12 + $0x4c] ss:$16 sps:$4 sm:$0xff]   ;;  %v6795_v23 = vld [vmem:[%s6912_s12 + $0x40] ss:$16 sps:$4 sm:$0xff]   ;;  %v6796_v24 = vld [vmem:[%s6912_s12 + $0x48] ss:$16 sps:$4 sm:$0xff]  }
  0x19   : > { %v6797_v25 = vld [vmem:[%s6912_s12 + $0x24] ss:$16 sps:$4 sm:$0xff]   ;;  %v6799_v26 = vld [vmem:[%s6912_s12 + $0x2c] ss:$16 sps:$4 sm:$0xff]   ;;  %v6801_v27 = vld [vmem:[%s6912_s12 + $0x20] ss:$16 sps:$4 sm:$0xff]  }
  0x1a   : > { %v6802_v28 = vld [vmem:[%s6912_s12 + $0x28] ss:$16 sps:$4 sm:$0xff]   ;;  %v6803_v29 = vld [vmem:[%s6912_s12 + $0x4] ss:$16 sps:$4 sm:$0xff]   ;;  %v6805_v30 = vld [vmem:[%s6912_s12 + $0xc] ss:$16 sps:$4 sm:$0xff]  }
  0x1b   : > { %608 = vmatpush1.bf16.msra.mxu0 %v6777_v11  ;;  %681 = vmatpush1.bf16.msra.mxu1 %v6778_v12  ;;  %v6807_v35 = vld [vmem:[%s6912_s12] ss:$16 sps:$4 sm:$0xff]   ;;  %v6808_v36 = vld [vmem:[%s6912_s12 + $0x8] ss:$16 sps:$4 sm:$0xff]   ;;  %s6717_s18 = sshll.u32 %s10104_s27, 7  ;;  %s6148_s17 = sshll.u32 %s10104_s27, 4 }
  0x1c   : > { %609 = vmatprep.subr.bf16.mxu0 %v6779_v13  ;;  %682 = vmatprep.subr.bf16.mxu1 %v6781_v14  ;;  %v1105_v40 = vld [vmem:[%s9917_s4 + $0x340] sm:$0xff]  ;;  %v6810_v58 = vld [vmem:[%s6943_s16 + $0x8] sm:$0xff]   ;;  %v6811_v8 = vld [vmem:[%s6943_s16 + $0x10] sm:$0xff]   ;;  %s7328_s25 = scalar_lea.vmem %s9920_s7, %s6717_s18  ;;  %s9660_s20 = scalar_lea.vmem %s9921_s8, %s6148_s17 }
  0x1d   : > { %v6809_v41 = vld [vmem:[%s6943_s16] sm:$0xff]   ;;  %v6298_v46 = vcombine.high %v1097_v39, %v1105_v40  ;;  %v6297_v52 = vcombine.low %v1097_v39, %v1105_v40 }
  0x1e   : > { %v1353_v42 = vld [vmem:[%s9917_s4 + $0xb00] sm:$0xff] }
  0x1f   : > { %610 = vmatpush1.bf16.msra.mxu0 %v6783_v15  ;;  %683 = vmatpush1.bf16.msra.mxu1 %v6784_v16  ;;  %v1361_v43 = vld [vmem:[%s9917_s4 + $0xb40] sm:$0xff] }
  0x20   : > { %611 = vmatprep.subr.bf16.mxu0 %v6785_v17  ;;  %684 = vmatprep.subr.bf16.mxu1 %v6787_v18  ;;  %v6554_v47 = vcombine.high %v1353_v42, %v1361_v43  ;;  %v1081_v48 = vld [vmem:[%s9917_s4 + $0x280] sm:$0xff]  ;;  %v6553_v53 = vcombine.low %v1353_v42, %v1361_v43 }
  0x21   : > { %v1089_v49 = vld [vmem:[%s9917_s4 + $0x2c0] sm:$0xff] }
  0x22   : > { %v1337_v50 = vld [vmem:[%s9917_s4 + $0xa80] sm:$0xff]  ;;  %v6282_v54 = vcombine.high %v1081_v48, %v1089_v49  ;;  %v6281_v61 = vcombine.low %v1081_v48, %v1089_v49 }
  0x23   : > { %612 = vmatpush1.bf16.msra.mxu0 %v6789_v19  ;;  %685 = vmatpush1.bf16.msra.mxu1 %v6790_v20  ;;  %v1345_v51 = vld [vmem:[%s9917_s4 + $0xac0] sm:$0xff] }
  0x24   : > { %613 = vmatprep.subr.bf16.mxu0 %v6791_v21  ;;  %686 = vmatprep.subr.bf16.mxu1 %v6793_v22  ;;  %v6538_v55 = vcombine.high %v1337_v50, %v1345_v51  ;;  %v1065_v56 = vld [vmem:[%s9917_s4 + $0x200] sm:$0xff]  ;;  %v6537_v62 = vcombine.low %v1337_v50, %v1345_v51 }
  0x25   : > { %v1073_v57 = vld [vmem:[%s9917_s4 + $0x240] sm:$0xff] }
  0x26   : > { %v1321_v59 = vld [vmem:[%s9917_s4 + $0xa00] sm:$0xff]  ;;  %v6266_v63 = vcombine.high %v1065_v56, %v1073_v57  ;;  %v6265_v6 = vcombine.low %v1065_v56, %v1073_v57 }
  0x27   : > { %614 = vmatpush1.bf16.msra.mxu0 %v6795_v23  ;;  %687 = vmatpush1.bf16.msra.mxu1 %v6796_v24  ;;  %v1329_v60 = vld [vmem:[%s9917_s4 + $0xa40] sm:$0xff] }
  0x28   : > { %615 = vmatprep.subr.bf16.mxu0 %v6797_v25  ;;  %688 = vmatprep.subr.bf16.mxu1 %v6799_v26  ;;  %v6522_v1 = vcombine.high %v1321_v59, %v1329_v60  ;;  %v1049_v2 = vld [vmem:[%s9917_s4 + $0x180] sm:$0xff]  ;;  %v6521_v7 = vcombine.low %v1321_v59, %v1329_v60  ;;  %v6812_v25 = vld [vmem:[%s6943_s16 + $0x18] sm:$0xff]  }
  0x29   : > { %v1057_v3 = vld [vmem:[%s9917_s4 + $0x1c0] sm:$0xff] }
  0x2a   : > { %v1305_v4 = vld [vmem:[%s9917_s4 + $0x980] sm:$0xff]  ;;  %v6250_v9 = vcombine.high %v1049_v2, %v1057_v3  ;;  %v6249_v15 = vcombine.low %v1049_v2, %v1057_v3 }
  0x2b   : > { %616 = vmatpush1.bf16.msra.mxu0 %v6801_v27  ;;  %689 = vmatpush1.bf16.msra.mxu1 %v6802_v28  ;;  %v1313_v5 = vld [vmem:[%s9917_s4 + $0x9c0] sm:$0xff] }
  0x2c   : > { %617 = vmatprep.subr.bf16.mxu0 %v6803_v29  ;;  %690 = vmatprep.subr.bf16.mxu1 %v6805_v30  ;;  %v6506_v10 = vcombine.high %v1305_v4, %v1313_v5  ;;  %v1033_v11 = vld [vmem:[%s9917_s4 + $0x100] sm:$0xff]  ;;  %v6505_v16 = vcombine.low %v1305_v4, %v1313_v5 }
  0x2d   : > { %v1041_v12 = vld [vmem:[%s9917_s4 + $0x140] sm:$0xff] }
  0x2e   : > { %v1289_v13 = vld [vmem:[%s9917_s4 + $0x900] sm:$0xff]  ;;  %v6234_v17 = vcombine.high %v1033_v11, %v1041_v12  ;;  %v6233_v23 = vcombine.low %v1033_v11, %v1041_v12 }
  0x2f   : > { %618 = vmatpush1.bf16.msra.mxu0 %v6807_v35  ;;  %691 = vmatpush1.bf16.msra.mxu1 %v6808_v36  ;;  %v1297_v14 = vld [vmem:[%s9917_s4 + $0x940] sm:$0xff] }
  0x30   : > { %4073 = vmatprep.subr.bf16.mxu0 %v6314_v37  ;;  %4146 = vmatprep.subr.bf16.mxu1 %v6570_v38  ;;  %v6490_v18 = vcombine.high %v1289_v13, %v1297_v14  ;;  %v1017_v19 = vld [vmem:[%s9917_s4 + $0x80] sm:$0xff]  ;;  %v6489_v24 = vcombine.low %v1289_v13, %v1297_v14 }
  0x31   : > { %v1025_v20 = vld [vmem:[%s9917_s4 + $0xc0] sm:$0xff] }
  0x32   : > { %636 = vmatmul.mubr.bf16.vlgmr.msra.gmra.mxu0 %v6809_v41  ;;  %709 = vmatmul.mubr.bf16.vlgmr.msra.gmra.mxu1 %v6809_v41  ;;  %v1273_v21 = vld [vmem:[%s9917_s4 + $0x880] sm:$0xff]  ;;  %v6218_v26 = vcombine.high %v1017_v19, %v1025_v20  ;;  %v6217_v31 = vcombine.low %v1017_v19, %v1025_v20 }
  0x33   : > { %645 = vmatprep.mubr.bf16.mxu0 %v6839_v0  ;;  %718 = vmatprep.mubr.bf16.mxu1 %v6839_v0  ;;  %v1281_v22 = vld [vmem:[%s9917_s4 + $0x8c0] sm:$0xff] }
  0x34   : > { %4074 = vmatpush1.bf16.msra.mxu0 %v6313_v44  ;;  %4147 = vmatpush1.bf16.msra.mxu1 %v6569_v45  ;;  %v6474_v27 = vcombine.high %v1273_v21, %v1281_v22  ;;  %v1001_v28 = vld [vmem:[%s9917_s4] sm:$0xff]  ;;  %v6473_v32 = vcombine.low %v1273_v21, %v1281_v22 }
  0x35   : > { %4075 = vmatprep.subr.bf16.mxu0 %v6298_v46  ;;  %4148 = vmatprep.subr.bf16.mxu1 %v6554_v47  ;;  %v1009_v29 = vld [vmem:[%s9917_s4 + $0x40] sm:$0xff] }
  0x36   : > { %v1265_v30 = vld [vmem:[%s9917_s4 + $0x840] sm:$0xff]  ;;  %v6202_v33 = vcombine.high %v1001_v28, %v1009_v29  ;;  %v6201_v39 = vcombine.low %v1001_v28, %v1009_v29 }
  0x37   : > { %v1241_v35 = vld [vmem:[%s9917_s4 + $0x780] sm:$0xff] }
  0x38   : > { %4076 = vmatpush1.bf16.msra.mxu0 %v6297_v52  ;;  %4149 = vmatpush1.bf16.msra.mxu1 %v6553_v53  ;;  %v1249_v36 = vld [vmem:[%s9917_s4 + $0x7c0] sm:$0xff] }
  0x39   : > { %4077 = vmatprep.subr.bf16.mxu0 %v6282_v54  ;;  %4150 = vmatprep.subr.bf16.mxu1 %v6538_v55  ;;  %v1497_v37 = vld [vmem:[%s9917_s4 + $0xf80] sm:$0xff]  ;;  %v6442_v41 = vcombine.high %v1241_v35, %v1249_v36  ;;  %v6441_v47 = vcombine.low %v1241_v35, %v1249_v36 }
  0x3a   : > { %646 = vmatmul.mubr.bf16.gmra.mxu0 %v6810_v58  ;;  %719 = vmatmul.mubr.bf16.gmra.mxu1 %v6810_v58  ;;  %v1505_v38 = vld [vmem:[%s9917_s4 + $0xfc0] sm:$0xff] }
  0x3b   : > { %655 = vmatprep.mubr.bf16.mxu0 %v6839_v0  ;;  %728 = vmatprep.mubr.bf16.mxu1 %v6839_v0  ;;  %v6698_v42 = vcombine.high %v1497_v37, %v1505_v38  ;;  %v1225_v43 = vld [vmem:[%s9917_s4 + $0x700] sm:$0xff]  ;;  %v6697_v48 = vcombine.low %v1497_v37, %v1505_v38  ;;  %v7157_v37 = vld [vmem:[%s9917_s4 + $0x388] sm:$0xff] }
  0x3c   : > { %4078 = vmatpush1.bf16.msra.mxu0 %v6281_v61  ;;  %4151 = vmatpush1.bf16.msra.mxu1 %v6537_v62  ;;  %v1233_v44 = vld [vmem:[%s9917_s4 + $0x740] sm:$0xff]  ;;  %v7162_v38 = vld [vmem:[%s9917_s4 + $0x3c8] sm:$0xff] }
  0x3d   : > { %4079 = vmatprep.subr.bf16.mxu0 %v6266_v63  ;;  %4152 = vmatprep.subr.bf16.mxu1 %v6522_v1  ;;  %v1481_v45 = vld [vmem:[%s9917_s4 + $0xf00] sm:$0xff]  ;;  %v6426_v49 = vcombine.high %v1225_v43, %v1233_v44  ;;  %v6425_v55 = vcombine.low %v1225_v43, %v1233_v44 }
  0x3e   : > { %v1489_v46 = vld [vmem:[%s9917_s4 + $0xf40] sm:$0xff] }
  0x3f   : > { %v6682_v50 = vcombine.high %v1481_v45, %v1489_v46  ;;  %v1209_v51 = vld [vmem:[%s9917_s4 + $0x680] sm:$0xff]  ;;  %v6681_v56 = vcombine.low %v1481_v45, %v1489_v46  ;;  %v751_v45 = vlaneseq }
  0x40   : > { %4080 = vmatpush1.bf16.msra.mxu0 %v6265_v6  ;;  %4153 = vmatpush1.bf16.msra.mxu1 %v6521_v7  ;;  %v1217_v52 = vld [vmem:[%s9917_s4 + $0x6c0] sm:$0xff] }
  0x41   : > { %4081 = vmatprep.subr.bf16.mxu0 %v6250_v9  ;;  %4154 = vmatprep.subr.bf16.mxu1 %v6506_v10  ;;  %v1465_v53 = vld [vmem:[%s9917_s4 + $0xe80] sm:$0xff]  ;;  %v6410_v57 = vcombine.high %v1209_v51, %v1217_v52  ;;  %v6409_v63 = vcombine.low %v1209_v51, %v1217_v52  ;;  %v7182_v46 = vshrl.u32 %v751_v45, 7 }
  0x42   : > { %656 = vmatmul.mubr.bf16.gmra.mxu0 %v6811_v8  ;;  %729 = vmatmul.mubr.bf16.gmra.mxu1 %v6811_v8  ;;  %v1473_v54 = vld [vmem:[%s9917_s4 + $0xec0] sm:$0xff] }
  0x43   : > { %665 = vmatprep.mubr.bf16.mxu0 %v6839_v0  ;;  %738 = vmatprep.mubr.bf16.mxu1 %v6839_v0  ;;  %v1257_v0 = vld [vmem:[%s9917_s4 + $0x800] sm:$0xff]  ;;  %v6666_v58 = vcombine.high %v1465_v53, %v1473_v54  ;;  %v6665_v1 = vcombine.low %v1465_v53, %v1473_v54  ;;  %v7197_v51 = vsub.s32 3, %v7182_v46 }
  0x44   : > { %4082 = vmatpush1.bf16.msra.mxu0 %v6249_v15  ;;  %4155 = vmatpush1.bf16.msra.mxu1 %v6505_v16  ;;  %v6458_v34 = vcombine.high %v1257_v0, %v1265_v30  ;;  %v6457_v40 = vcombine.low %v1257_v0, %v1265_v30  ;;  %v1193_v59 = vld [vmem:[%s9917_s4 + $0x600] sm:$0xff] }
  0x45   : > { %4083 = vmatprep.subr.bf16.mxu0 %v6234_v17  ;;  %4156 = vmatprep.subr.bf16.mxu1 %v6490_v18  ;;  %v1201_v60 = vld [vmem:[%s9917_s4 + $0x640] sm:$0xff]  ;;  %9981 = vst [vmem:[#allocation5_spill] sm:$0xff] %v7197_v51 }
  0x46   : > { %v1449_v61 = vld [vmem:[%s9917_s4 + $0xe00] sm:$0xff]  ;;  %v6394_v2 = vcombine.high %v1193_v59, %v1201_v60  ;;  %v6393_v8 = vcombine.low %v1193_v59, %v1201_v60  ;;  %v7228_v60 = vld [vmem:[%s9917_s4 + $0x348] sm:$0xff] }
  0x47   : > { %v1457_v62 = vld [vmem:[%s9917_s4 + $0xe40] sm:$0xff] }
  0x48   : > { %4084 = vmatpush1.bf16.msra.mxu0 %v6233_v23  ;;  %4157 = vmatpush1.bf16.msra.mxu1 %v6489_v24  ;;  %v6650_v3 = vcombine.high %v1449_v61, %v1457_v62  ;;  %v1177_v4 = vld [vmem:[%s9917_s4 + $0x580] sm:$0xff]  ;;  %v6649_v9 = vcombine.low %v1449_v61, %v1457_v62  ;;  %v7233_v61 = vld [vmem:[%s9917_s4 + $0xb08] sm:$0xff] }
  0x49   : > { %4085 = vmatprep.subr.bf16.mxu0 %v6218_v26  ;;  %4158 = vmatprep.subr.bf16.mxu1 %v6474_v27  ;;  %v1185_v5 = vld [vmem:[%s9917_s4 + $0x5c0] sm:$0xff]  ;;  %v7238_v62 = vld [vmem:[%s9917_s4 + $0xb48] sm:$0xff] }
  0x4a   : > { %666 = vmatmul.mubr.bf16.gmra.mxu0 %v6812_v25  ;;  %739 = vmatmul.mubr.bf16.gmra.mxu1 %v6812_v25  ;;  %v1433_v6 = vld [vmem:[%s9917_s4 + $0xd80] sm:$0xff]  ;;  %v6378_v10 = vcombine.high %v1177_v4, %v1185_v5  ;;  %v6377_v12 = vcombine.low %v1177_v4, %v1185_v5 }
  0x4b   : > { %v1441_v7 = vld [vmem:[%s9917_s4 + $0xdc0] sm:$0xff] }
  0x4c   : > { %4086 = vmatpush1.bf16.msra.mxu0 %v6217_v31  ;;  %4159 = vmatpush1.bf16.msra.mxu1 %v6473_v32  ;;  %v6634_v11 = vcombine.high %v1433_v6, %v1441_v7  ;;  %v6633_v13 = vcombine.low %v1433_v6, %v1441_v7  ;;  %v1161_v14 = vld [vmem:[%s9917_s4 + $0x500] sm:$0xff]  ;;  %v7256_v7 = vld [vmem:[%s9917_s4 + $0x2c8] sm:$0xff] }
  0x4d   : > { %4087 = vmatprep.subr.bf16.mxu0 %v6202_v33  ;;  %4160 = vmatprep.subr.bf16.mxu1 %v6458_v34  ;;  %v1169_v15 = vld [vmem:[%s9917_s4 + $0x540] sm:$0xff] }
  0x4e   : > { %v1417_v16 = vld [vmem:[%s9917_s4 + $0xd00] sm:$0xff]  ;;  %v6361_v18 = vcombine.low %v1161_v14, %v1169_v15  ;;  %v6362_v19 = vcombine.high %v1161_v14, %v1169_v15  ;;  %v6555_v14 = vcombine.low %v7233_v61, %v7238_v62  ;;  %v6556_v15 = vcombine.high %v7233_v61, %v7238_v62  ;;  %v7457_v61 = vld [vmem:[%s9917_s4 + $0x108] sm:$0xff] }
  0x4f   : > { %v1425_v17 = vld [vmem:[%s9917_s4 + $0xd40] sm:$0xff] }
  0x50   : > { %4088 = vmatpush1.bf16.msra.mxu0 %v6201_v39  ;;  %4161 = vmatpush1.bf16.msra.mxu1 %v6457_v40  ;;  %v6617_v20 = vcombine.low %v1417_v16, %v1425_v17  ;;  %v6618_v21 = vcombine.high %v1417_v16, %v1425_v17  ;;  %v1145_v22 = vld [vmem:[%s9917_s4 + $0x480] sm:$0xff]  ;;  %v7167_v39 = vld [vmem:[%s9917_s4 + $0xb88] sm:$0xff]  ;;  %v6316_v40 = vcombine.high %v7157_v37, %v7162_v38 }
  0x51   : > { %4089 = vmatprep.subr.bf16.mxu0 %v6442_v41  ;;  %4162 = vmatprep.subr.bf16.mxu1 %v6698_v42  ;;  %v1153_v23 = vld [vmem:[%s9917_s4 + $0x4c0] sm:$0xff]  ;;  %v7174_v41 = vld [vmem:[%s9917_s4 + $0xbc8] sm:$0xff]  ;;  %v6315_v42 = vcombine.low %v7157_v37, %v7162_v38 }
  0x52   : > { %v1401_v24 = vld [vmem:[%s9917_s4 + $0xc80] sm:$0xff]  ;;  %v6346_v25 = vcombine.high %v1145_v22, %v1153_v23  ;;  %v6345_v27 = vcombine.low %v1145_v22, %v1153_v23  ;;  %v6571_v43 = vcombine.low %v7167_v39, %v7174_v41  ;;  %v6572_v44 = vcombine.high %v7167_v39, %v7174_v41  ;;  %v7279_v16 = vld [vmem:[%s9917_s4 + $0x208] sm:$0xff] }
  0x53   : > { %v1409_v26 = vld [vmem:[%s9917_s4 + $0xcc0] sm:$0xff]  ;;  %v7284_v17 = vld [vmem:[%s9917_s4 + $0x248] sm:$0xff] }
  0x54   : > { %4090 = vmatpush2.bf16.msra.mxu0 %v6441_v47  ;;  %4163 = vmatpush2.bf16.msra.mxu1 %v6697_v48  ;;  %v6601_v28 = vcombine.low %v1401_v24, %v1409_v26  ;;  %v6602_v29 = vcombine.high %v1401_v24, %v1409_v26  ;;  %v1129_v0 = vld [vmem:[%s9917_s4 + $0x400] sm:$0xff]  ;;  %v7185_v47 = vsub.s32 0, %v7182_v46  ;;  %v7188_v48 = vsub.s32 2, %v7182_v46 }
  0x55   : > { %4091 = vmatprep.subr.bf16.mxu0 %v6426_v49  ;;  %4164 = vmatprep.subr.bf16.mxu1 %v6682_v50  ;;  %v1137_v30 = vld [vmem:[%s9917_s4 + $0x440] sm:$0xff]  ;;  %v7194_v50 = vsub.s32 1, %v7182_v46 }
  0x56   : > { %v1385_v31 = vld [vmem:[%s9917_s4 + $0xc00] sm:$0xff]  ;;  %v6330_v32 = vcombine.high %v1129_v0, %v1137_v30  ;;  %v6329_v34 = vcombine.low %v1129_v0, %v1137_v30  ;;  %9978 = vst [vmem:[#allocation2_spill] sm:$0xff] %v7185_v47  ;;  %9979 = vst [vmem:[#allocation3_spill] sm:$0xff] %v7188_v48 }
  0x57   : > { %v1393_v33 = vld [vmem:[%s9917_s4 + $0xc40] sm:$0xff]  ;;  %9980 = vst [vmem:[#allocation4_spill] sm:$0xff] %v7194_v50 }
  0x58   : > { %4092 = vmatpush2.bf16.msra.mxu0 %v6425_v55  ;;  %4165 = vmatpush2.bf16.msra.mxu1 %v6681_v56  ;;  %v6585_v35 = vcombine.low %v1385_v31, %v1393_v33  ;;  %v6586_v36 = vcombine.high %v1385_v31, %v1393_v33  ;;  %v749_v49 = vld [vmem:[%s9915_s2] sm:$0xf]  ;;  %v7211_v55 = vld [vmem:[%s9917_s4 + $0x308] sm:$0xff] }
  0x59   : > { %4093 = vmatprep.subr.bf16.mxu0 %v6410_v57  ;;  %4166 = vmatprep.subr.bf16.mxu1 %v6666_v58  ;;  %v803_v52 = vld [vmem:[%s9916_s3] sm:$0xf]  ;;  %v7203_v53 = vrot.slane %v749_v49, %v7185_v47  ;;  %v7206_v54 = vrot.slane %v749_v49, %v7188_v48  ;;  %v7220_v58 = vrot.slane %v749_v49, %v7194_v50  ;;  %v7312_v31 = vld [vmem:[%s9917_s4 + $0xa08] sm:$0xff] }
  0x5a   : > { %v7214_v56 = vrot.slane %v803_v52, %v7185_v47  ;;  %v7217_v57 = vrot.slane %v803_v52, %v7188_v48  ;;  %v7223_v59 = vrot.slane %v749_v49, %v7197_v51  ;;  %v7248_v5 = vrot.slane %v803_v52, %v7194_v50 }
  0x5b   : > { %v7251_v6 = vrot.slane %v803_v52, %v7197_v51 }
  0x5c   : > { %4094 = vmatpush2.bf16.msra.mxu0 %v6409_v63  ;;  %4167 = vmatpush2.bf16.msra.mxu1 %v6665_v1 }
  0x5d   : > { %4095 = vmatprep.subr.bf16.mxu0 %v6394_v2  ;;  %4168 = vmatprep.subr.bf16.mxu1 %v6650_v3  ;;  %v7243_v2 = vld [vmem:[%s9917_s4 + $0x288] sm:$0xff] }
  0x60   : > { %4096 = vmatpush2.bf16.msra.mxu0 %v6393_v8  ;;  %4169 = vmatpush2.bf16.msra.mxu1 %v6649_v9  ;;  %v7261_v8 = vld [vmem:[%s9917_s4 + $0xa88] sm:$0xff] }
  0x61   : > { %4097 = vmatprep.subr.bf16.mxu0 %v6378_v10  ;;  %4170 = vmatprep.subr.bf16.mxu1 %v6634_v11  ;;  %v7266_v9 = vld [vmem:[%s9917_s4 + $0xac8] sm:$0xff] }
  0x64   : > { %4098 = vmatpush2.bf16.msra.mxu0 %v6377_v12  ;;  %4171 = vmatpush2.bf16.msra.mxu1 %v6633_v13  ;;  %v6299_v12 = vcombine.low %v7211_v55, %v7228_v60  ;;  %v6300_v13 = vcombine.high %v7211_v55, %v7228_v60 }
  0x65   : > { %4099 = vmatprep.subr.bf16.mxu0 %v6362_v19  ;;  %4172 = vmatprep.subr.bf16.mxu1 %v6618_v21 }
  0x68   : > { %4100 = vmatpush2.bf16.msra.mxu0 %v6361_v18  ;;  %4173 = vmatpush2.bf16.msra.mxu1 %v6617_v20 }
  0x69   : > { %4101 = vmatprep.subr.bf16.mxu0 %v6346_v25  ;;  %4174 = vmatprep.subr.bf16.mxu1 %v6602_v29  ;;  %v6284_v25 = vcombine.high %v7243_v2, %v7256_v7 }
  0x6c   : > { %4102 = vmatpush2.bf16.msra.mxu0 %v6345_v27  ;;  %4175 = vmatpush2.bf16.msra.mxu1 %v6601_v28 }
  0x6d   : > { %4103 = vmatprep.subr.bf16.mxu0 %v6330_v32  ;;  %4176 = vmatprep.subr.bf16.mxu1 %v6586_v36  ;;  %v7317_v32 = vld [vmem:[%s9917_s4 + $0xa48] sm:$0xff] }
  0x70   : > { %4104 = vmatpush2.bf16.msra.mxu0 %v6329_v34  ;;  %4177 = vmatpush2.bf16.msra.mxu1 %v6585_v35 }
  0x71   : > { %4219 = vmatprep.subr.bf16.mxu0 %v6316_v40  ;;  %4292 = vmatprep.subr.bf16.mxu1 %v6572_v44 }
  0xf2   : > { %v637_v63 = vpop.f32.mrf.mxu0  ;;  %v710_v1 = vpop.f32.mrf.mxu1 }
  0xf3   : > { %v771_v3 = vmul.f32 %v7203_v53, %v637_v63  ;;  %v773_v4 = vmul.f32 %v7206_v54, %v710_v1 }
  0xf4   : > { %v639_v10 = vpop.f32.mrf.mxu0  ;;  %v712_v11 = vpop.f32.mrf.mxu1 }
  0xf5   : > { %v7287_v18 = vadd.f32 %v7214_v56, %v771_v3  ;;  %v7290_v19 = vadd.f32 %v7217_v57, %v773_v4  ;;  %v772_v20 = vmul.f32 %v7220_v58, %v639_v10  ;;  %v774_v21 = vmul.f32 %v7223_v59, %v712_v11 }
  0xf6   : > { %v641_v22 = vpop.f32.mrf.mxu0  ;;  %v714_v23 = vpop.f32.mrf.mxu1 }
  0xf7   : > { %v826_v28 = vadd.f32 %v7248_v5, %v772_v20  ;;  %v828_v29 = vadd.f32 %v7251_v6, %v774_v21  ;;  %v857_v33 = vmax.f32 %v7287_v18, 0.0  ;;  %v859_v34 = vmax.f32 %v7290_v19, 0.0 }
  0xf8   : > { %v775_v35 = vmul.f32 %v7203_v53, %v641_v22  ;;  %v777_v36 = vmul.f32 %v7206_v54, %v714_v23  ;;  %v643_v40 = vpop.f32.mrf.mxu0  ;;  %v716_v44 = vpop.f32.mrf.mxu1  ;;  %v7341_v23 = vld [vmem:[%s9917_s4 + $0x188] sm:$0xff] }
  0xf9   : > { %v858_v45 = vmax.f32 %v826_v28, 0.0  ;;  %v860_v49 = vmax.f32 %v828_v29, 0.0  ;;  %v776_v52 = vmul.f32 %v7220_v58, %v643_v40  ;;  %v778_v63 = vmul.f32 %v7223_v59, %v716_v44  ;;  %v7346_v28 = vld [vmem:[%s9917_s4 + $0x1c8] sm:$0xff] }
  0xfa   : > { %v829_v1 = vadd.f32 %v7214_v56, %v775_v35  ;;  %v831_v3 = vadd.f32 %v7217_v57, %v777_v36  ;;  %v647_v4 = vpop.f32.mrf.mxu0  ;;  %v720_v10 = vpop.f32.mrf.mxu1 }
  0xfb   : > { %v6718_v19 = vpack.c.bf16 %v858_v45, %v857_v33  ;;  %v6719_v20 = vpack.c.bf16 %v860_v49, %v859_v34  ;;  %v830_v21 = vadd.f32 %v7248_v5, %v776_v52  ;;  %v832_v22 = vadd.f32 %v7251_v6, %v778_v63 }
  0xfc   : > { %v861_v29 = vmax.f32 %v829_v1, 0.0  ;;  %v863_v35 = vmax.f32 %v831_v3, 0.0  ;;  %v779_v36 = vmul.f32 %v7203_v53, %v647_v4  ;;  %v781_v40 = vmul.f32 %v7206_v54, %v720_v10  ;;  %v649_v44 = vpop.f32.mrf.mxu0  ;;  %v722_v52 = vpop.f32.mrf.mxu1 }
  0xfd   : > { %985 = vst [vmem:[%s7328_s25] sm:$0xff] %v6718_v19  ;;  %986 = vst [vmem:[%s7328_s25 + $0x8] sm:$0xff] %v6719_v20  ;;  %v862_v63 = vmax.f32 %v830_v21, 0.0  ;;  %v864_v11 = vmax.f32 %v832_v22, 0.0  ;;  %v780_v0 = vmul.f32 %v7220_v58, %v649_v44  ;;  %v782_v18 = vmul.f32 %v7223_v59, %v722_v52 }
  0xfe   : > { %v7355_v30 = vadd.f32 %v7214_v56, %v779_v36  ;;  %v7358_v1 = vadd.f32 %v7217_v57, %v781_v40  ;;  %v651_v3 = vpop.f32.mrf.mxu0  ;;  %v724_v4 = vpop.f32.mrf.mxu1  ;;  %v6252_v19 = vcombine.high %v7341_v23, %v7346_v28  ;;  %v7368_v44 = vpack.c.bf16 %v861_v29, %v857_v33 }
  0xff   : > { %v7364_v20 = vpack.c.bf16 %v862_v63, %v858_v45  ;;  %v6720_v21 = vpack.c.bf16 %v862_v63, %v861_v29  ;;  %v7366_v22 = vpack.c.bf16 %v864_v11, %v860_v49  ;;  %v6721_v36 = vpack.c.bf16 %v864_v11, %v863_v35 }
 0x100   : > { %9984 = vst [vmem:[#allocation8_spill] sm:$0xff] %v7368_v44  ;;  %v7370_v52 = vpack.c.bf16 %v863_v35, %v859_v34  ;;  %v834_v40 = vadd.f32 %v7248_v5, %v780_v0  ;;  %v836_v26 = vadd.f32 %v7251_v6, %v782_v18  ;;  %v653_v24 = vpop.f32.mrf.mxu0  ;;  %v726_v27 = vpop.f32.mrf.mxu1  ;;  %v783_v10 = vmul.f32 %v7203_v53, %v651_v3 }
 0x101   : > { %9982 = vst [vmem:[#allocation6_spill] sm:$0xff] %v7364_v20  ;;  %9983 = vst [vmem:[#allocation7_spill] sm:$0xff] %v7366_v22  ;;  %v785_v45 = vmul.f32 %v7206_v54, %v724_v4  ;;  %v784_v49 = vmul.f32 %v7220_v58, %v653_v24  ;;  %v786_v11 = vmul.f32 %v7223_v59, %v726_v27  ;;  %4105 = vmatprep.mubr.bf16.mxu0 %v7364_v20 }
 0x102   : > { %987 = vst [vmem:[%s7328_s25 + $0x10] sm:$0xff] %v6720_v21  ;;  %988 = vst [vmem:[%s7328_s25 + $0x18] sm:$0xff] %v6721_v36  ;;  %v865_v33 = vmax.f32 %v7355_v30, 0.0  ;;  %v867_v0 = vmax.f32 %v7358_v1, 0.0  ;;  %v866_v34 = vmax.f32 %v834_v40, 0.0  ;;  %v868_v18 = vmax.f32 %v836_v26, 0.0  ;;  %4178 = vmatprep.mubr.bf16.mxu1 %v7366_v22  ;;  %v657_v29 = vpop.f32.mrf.mxu0  ;;  %v730_v35 = vpop.f32.mrf.mxu1  ;;  %4106 = vmatmul.mubr.bf16.vlgmr.msra.gmra.mxu0 %v7368_v44 }
 0x103   : > { %v837_v63 = vadd.f32 %v7214_v56, %v783_v10  ;;  %v839_v24 = vadd.f32 %v7217_v57, %v785_v45  ;;  %v838_v27 = vadd.f32 %v7248_v5, %v784_v49  ;;  %v840_v3 = vadd.f32 %v7251_v6, %v786_v11  ;;  %4179 = vmatmul.mubr.bf16.vlgmr.msra.gmra.mxu1 %v7370_v52  ;;  %v7398_v36 = vld [vmem:[%s9917_s4 + $0x988] sm:$0xff] }
 0x104   : > { %v6722_v30 = vpack.c.bf16 %v866_v34, %v865_v33  ;;  %v6723_v26 = vpack.c.bf16 %v868_v18, %v867_v0  ;;  %v787_v1 = vmul.f32 %v7203_v53, %v657_v29  ;;  %v789_v4 = vmul.f32 %v7206_v54, %v730_v35  ;;  %4220 = vmatpush1.bf16.msra.mxu0 %v6315_v42  ;;  %v659_v10 = vpop.f32.mrf.mxu0  ;;  %v732_v21 = vpop.f32.mrf.mxu1  ;;  %v7403_v40 = vld [vmem:[%s9917_s4 + $0x9c8] sm:$0xff] }
 0x105   : > { %v869_v45 = vmax.f32 %v837_v63, 0.0  ;;  %v871_v49 = vmax.f32 %v839_v24, 0.0  ;;  %v870_v11 = vmax.f32 %v838_v27, 0.0  ;;  %v872_v29 = vmax.f32 %v840_v3, 0.0  ;;  %4293 = vmatpush1.bf16.msra.mxu1 %v6571_v43  ;;  %4221 = vmatprep.subr.bf16.mxu0 %v6300_v13 }
 0x106   : > { %989 = vst [vmem:[%s7328_s25 + $0x20] sm:$0xff] %v6722_v30  ;;  %990 = vst [vmem:[%s7328_s25 + $0x28] sm:$0xff] %v6723_v26  ;;  %v7414_v37 = vadd.f32 %v7214_v56, %v787_v1  ;;  %v7417_v38 = vadd.f32 %v7217_v57, %v789_v4  ;;  %v788_v42 = vmul.f32 %v7220_v58, %v659_v10  ;;  %4294 = vmatprep.subr.bf16.mxu1 %v6556_v15  ;;  %v661_v39 = vpop.f32.mrf.mxu0  ;;  %v734_v41 = vpop.f32.mrf.mxu1 }
 0x107   : > { %v790_v35 = vmul.f32 %v7223_v59, %v732_v21  ;;  %v7424_v43 = vpack.c.bf16 %v870_v11, %v866_v34  ;;  %v6724_v13 = vpack.c.bf16 %v870_v11, %v869_v45  ;;  %v6507_v63 = vcombine.low %v7398_v36, %v7403_v40 }
 0x108   : > { %v6508_v24 = vcombine.high %v7398_v36, %v7403_v40  ;;  %v7430_v27 = vpack.c.bf16 %v869_v45, %v865_v33  ;;  %v7432_v3 = vpack.c.bf16 %v871_v49, %v867_v0  ;;  %v7434_v30 = vpack.c.bf16 %v872_v29, %v868_v18  ;;  %4222 = vmatpush1.bf16.msra.mxu0 %v6299_v12  ;;  %v663_v15 = vpop.f32.mrf.mxu0  ;;  %v736_v34 = vpop.f32.mrf.mxu1  ;;  %v1002_v36 = vld [vmem:[%s9917_s4 + $0x8] sm:$0xff] }
 0x109   : > { %9985 = vst [vmem:[#allocation9_spill] sm:$0xff] %v7424_v43  ;;  %v6725_v26 = vpack.c.bf16 %v872_v29, %v871_v49  ;;  %991 = vst [vmem:[%s7328_s25 + $0x30] sm:$0xff] %v6724_v13  ;;  %v842_v1 = vadd.f32 %v7248_v5, %v788_v42  ;;  %v844_v4 = vadd.f32 %v7251_v6, %v790_v35  ;;  %4295 = vmatpush1.bf16.msra.mxu1 %v6555_v14  ;;  %v7470_v29 = vld [vmem:[%s9917_s4 + $0x148] sm:$0xff] }
 0x10a   : > { %9986 = vst [vmem:[#allocation10_spill] sm:$0xff] %v7430_v27  ;;  %9987 = vst [vmem:[#allocation11_spill] sm:$0xff] %v7432_v3  ;;  %v791_v10 = vmul.f32 %v7203_v53, %v661_v39  ;;  %v793_v33 = vmul.f32 %v7206_v54, %v734_v41  ;;  %v873_v0 = vmax.f32 %v7414_v37, 0.0  ;;  %v875_v55 = vmax.f32 %v7417_v38, 0.0  ;;  %4115 = vmatprep.mubr.bf16.mxu0 %v7424_v43  ;;  %v667_v18 = vpop.f32.mrf.mxu0  ;;  %v740_v21 = vpop.f32.mrf.mxu1  ;;  %v7475_v37 = vld [vmem:[%s9917_s4 + $0x908] sm:$0xff] }
 0x10b   : > { %9988 = vst [vmem:[#allocation12_spill] sm:$0xff] %v7434_v30  ;;  %992 = vst [vmem:[%s7328_s25 + $0x38] sm:$0xff] %v6725_v26  ;;  %v792_v60 = vmul.f32 %v7220_v58, %v663_v15  ;;  %v794_v12 = vmul.f32 %v7223_v59, %v736_v34  ;;  %4188 = vmatprep.mubr.bf16.mxu1 %v7434_v30  ;;  %v874_v62 = vmax.f32 %v842_v1, 0.0  ;;  %v876_v14 = vmax.f32 %v844_v4, 0.0  ;;  %v7480_v38 = vld [vmem:[%s9917_s4 + $0x948] sm:$0xff] }
 0x10c   : > { %v845_v45 = vadd.f32 %v7214_v56, %v791_v10  ;;  %v847_v49 = vadd.f32 %v7217_v57, %v793_v33  ;;  %4223 = vmatprep.subr.bf16.mxu0 %v6284_v25  ;;  %v9989_v11 = vcombine.high %v7261_v8, %v7266_v9  ;;  %v795_v35 = vmul.f32 %v7203_v53, %v667_v18  ;;  %v669_v41 = vpop.f32.mrf.mxu0  ;;  %v742_v13 = vpop.f32.mrf.mxu1  ;;  %v1010_v40 = vld [vmem:[%s9917_s4 + $0x48] sm:$0xff] }
 0x10d   : > { %v846_v25 = vadd.f32 %v7248_v5, %v792_v60  ;;  %v848_v42 = vadd.f32 %v7251_v6, %v794_v12  ;;  %v797_v39 = vmul.f32 %v7206_v54, %v740_v21  ;;  %4116 = vmatmul.mubr.bf16.gmra.mxu0 %v7430_v27  ;;  %v6726_v26 = vpack.c.bf16 %v874_v62, %v873_v0 }
 0x10e   : > { %4296 = vmatprep.subr.bf16.mxu1 %v9989_v11  ;;  %v6727_v15 = vpack.c.bf16 %v876_v14, %v875_v55  ;;  %v877_v34 = vmax.f32 %v845_v45, 0.0  ;;  %v879_v1 = vmax.f32 %v847_v49, 0.0  ;;  %4189 = vmatmul.mubr.bf16.gmra.mxu1 %v7432_v3  ;;  %v9990_v4 = vcombine.low %v7243_v2, %v7256_v7  ;;  %v671_v18 = vpop.f32.mrf.mxu0  ;;  %v744_v21 = vpop.f32.mrf.mxu1 }
 0x10f   : > { %v878_v10 = vmax.f32 %v846_v25, 0.0  ;;  %v880_v33 = vmax.f32 %v848_v42, 0.0  ;;  %v9991_v60 = vcombine.low %v7261_v8, %v7266_v9  ;;  %v9992_v12 = vcombine.high %v7279_v16, %v7284_v17  ;;  %993 = vst [vmem:[%s7328_s25 + $0x40] sm:$0xff] %v6726_v26 }
 0x110   : > { %4224 = vmatpush1.bf16.msra.mxu0 %v9990_v4  ;;  %v6236_v45 = vcombine.high %v7457_v61, %v7470_v29  ;;  %v6492_v49 = vcombine.high %v7475_v37, %v7480_v38  ;;  %994 = vst [vmem:[%s7328_s25 + $0x48] sm:$0xff] %v6727_v15  ;;  %v849_v2 = vadd.f32 %v7214_v56, %v795_v35  ;;  %v673_v35 = vpop.f32.mrf.mxu0  ;;  %v746_v4 = vpop.f32.mrf.mxu1 }
 0x111   : > { %4297 = vmatpush1.bf16.msra.mxu1 %v9991_v60  ;;  %4225 = vmatprep.subr.bf16.mxu0 %v9992_v12  ;;  %v7505_v7 = vadd.f32 %v7217_v57, %v797_v39  ;;  %v796_v8 = vmul.f32 %v7220_v58, %v669_v41  ;;  %v798_v9 = vmul.f32 %v7223_v59, %v742_v13 }
 0x112   : > { %v9993_v11 = vcombine.high %v7312_v31, %v7317_v32  ;;  %v7512_v25 = vpack.c.bf16 %v878_v10, %v874_v62  ;;  %v6728_v42 = vpack.c.bf16 %v878_v10, %v877_v34  ;;  %v7514_v26 = vpack.c.bf16 %v880_v33, %v876_v14 }
 0x113   : > { %v6729_v15 = vpack.c.bf16 %v880_v33, %v879_v1  ;;  %v7516_v60 = vpack.c.bf16 %v877_v34, %v873_v0  ;;  %v7518_v39 = vpack.c.bf16 %v879_v1, %v875_v55  ;;  %v850_v41 = vadd.f32 %v7248_v5, %v796_v8 }
 0x114   : > { %4298 = vmatprep.subr.bf16.mxu1 %v9993_v11  ;;  %9994 = vst [vmem:[#allocation13_spill] sm:$0xff] %v7512_v25  ;;  %9995 = vst [vmem:[#allocation14_spill] sm:$0xff] %v7514_v26  ;;  %v852_v13 = vadd.f32 %v7251_v6, %v798_v9  ;;  %v9998_v12 = vcombine.low %v7279_v16, %v7284_v17  ;;  %v799_v62 = vmul.f32 %v7203_v53, %v671_v18 }
 0x115   : > { %9996 = vst [vmem:[#allocation15_spill] sm:$0xff] %v7516_v60  ;;  %9997 = vst [vmem:[#allocation16_spill] sm:$0xff] %v7518_v39  ;;  %v801_v14 = vmul.f32 %v7206_v54, %v744_v21  ;;  %v9999_v0 = vcombine.low %v7312_v31, %v7317_v32  ;;  %v800_v55 = vmul.f32 %v7220_v58, %v673_v35  ;;  %v881_v1 = vmax.f32 %v849_v2, 0.0  ;;  %v1018_v58 = vld [vmem:[%s9917_s4 + $0x88] sm:$0xff] }
 0x116   : > { %4226 = vmatpush1.bf16.msra.mxu0 %v9998_v12  ;;  %995 = vst [vmem:[%s7328_s25 + $0x50] sm:$0xff] %v6728_v42  ;;  %996 = vst [vmem:[%s7328_s25 + $0x58] sm:$0xff] %v6729_v15  ;;  %v802_v34 = vmul.f32 %v7223_v59, %v746_v4  ;;  %v883_v10 = vmax.f32 %v7505_v7, 0.0  ;;  %v882_v33 = vmax.f32 %v850_v41, 0.0  ;;  %v884_v16 = vmax.f32 %v852_v13, 0.0  ;;  %4125 = vmatprep.mubr.bf16.mxu0 %v7512_v25  ;;  %v1242_v15 = vld [vmem:[%s9917_s4 + $0x788] sm:$0xff] }
 0x117   : > { %4299 = vmatpush1.bf16.msra.mxu1 %v9999_v0  ;;  %4198 = vmatprep.mubr.bf16.mxu1 %v7514_v26  ;;  %v853_v53 = vadd.f32 %v7214_v56, %v799_v62  ;;  %v855_v54 = vadd.f32 %v7217_v57, %v801_v14  ;;  %v854_v17 = vadd.f32 %v7248_v5, %v800_v55  ;;  %v1026_v57 = vld [vmem:[%s9917_s4 + $0xc8] sm:$0xff] }
 0x118   : > { %v856_v31 = vadd.f32 %v7251_v6, %v802_v34  ;;  %4227 = vmatprep.subr.bf16.mxu0 %v6252_v19  ;;  %v6730_v59 = vpack.c.bf16 %v882_v33, %v881_v1  ;;  %v6731_v32 = vpack.c.bf16 %v884_v16, %v883_v10  ;;  %4300 = vmatprep.subr.bf16.mxu1 %v6508_v24  ;;  %v1274_v5 = vld [vmem:[%s9917_s4 + $0x888] sm:$0xff] }
 0x119   : > { %4126 = vmatmul.mubr.bf16.gmra.mxu0 %v7516_v60  ;;  %v6235_v56 = vcombine.low %v7457_v61, %v7470_v29  ;;  %v1282_v6 = vld [vmem:[%s9917_s4 + $0x8c8] sm:$0xff]  ;;  %v885_v19 = vmax.f32 %v853_v53, 0.0  ;;  %v887_v18 = vmax.f32 %v855_v54, 0.0  ;;  %v886_v24 = vmax.f32 %v854_v17, 0.0  ;;  %4199 = vmatmul.mubr.bf16.gmra.mxu1 %v7518_v39 }
 0x11a   : > { %v888_v21 = vmax.f32 %v856_v31, 0.0  ;;  %v10000_v61 = vcombine.low %v7341_v23, %v7346_v28  ;;  %997 = vst [vmem:[%s7328_s25 + $0x60] sm:$0xff] %v6730_v59  ;;  %998 = vst [vmem:[%s7328_s25 + $0x68] sm:$0xff] %v6731_v32  ;;  %v6491_v29 = vcombine.low %v7475_v37, %v7480_v38  ;;  %v6220_v8 = vcombine.high %v1018_v58, %v1026_v57  ;;  %v1258_v38 = vld [vmem:[%s9917_s4 + $0x808] sm:$0xff] }
 0x11b   : > { %4301 = vmatpush1.bf16.msra.mxu1 %v6507_v63  ;;  %v7573_v2 = vpack.c.bf16 %v886_v24, %v882_v33  ;;  %v6732_v7 = vpack.c.bf16 %v886_v24, %v885_v19  ;;  %v6476_v9 = vcombine.high %v1274_v5, %v1282_v6  ;;  %v7575_v23 = vpack.c.bf16 %v885_v19, %v881_v1  ;;  %v1250_v35 = vld [vmem:[%s9917_s4 + $0x7c8] sm:$0xff] }
 0x11c   : > { %4228 = vmatpush1.bf16.msra.mxu0 %v10000_v61  ;;  %4302 = vmatprep.subr.bf16.mxu1 %v6492_v49  ;;  %v7577_v28 = vpack.c.bf16 %v888_v21, %v884_v16  ;;  %v6733_v11 = vpack.c.bf16 %v888_v21, %v887_v18  ;;  %v7585_v63 = vpack.c.bf16 %v887_v18, %v883_v10  ;;  %v1498_v41 = vld [vmem:[%s9917_s4 + $0xf88] sm:$0xff] }
 0x11d   : > { %4229 = vmatprep.subr.bf16.mxu0 %v6236_v45  ;;  %10001 = vst [vmem:[#allocation17_spill] sm:$0xff] %v7573_v2  ;;  %10002 = vst [vmem:[#allocation18_spill] sm:$0xff] %v7575_v23  ;;  %4135 = vmatprep.mubr.bf16.mxu0 %v7573_v2  ;;  %v6219_v37 = vcombine.low %v1018_v58, %v1026_v57  ;;  %v1266_v45 = vld [vmem:[%s9917_s4 + $0x848] sm:$0xff]  ;;  %v6475_v49 = vcombine.low %v1274_v5, %v1282_v6 }
 0x11e   : > { %10003 = vst [vmem:[#allocation19_spill] sm:$0xff] %v7577_v28  ;;  %10004 = vst [vmem:[#allocation20_spill] sm:$0xff] %v7585_v63  ;;  %4208 = vmatprep.mubr.bf16.mxu1 %v7577_v28  ;;  %v6204_v42 = vcombine.high %v1002_v36, %v1010_v40  ;;  %v6460_v4 = vcombine.high %v1258_v38, %v1266_v45  ;;  %v1506_v13 = vld [vmem:[%s9917_s4 + $0xfc8] sm:$0xff]  ;;  %v6203_v12 = vcombine.low %v1002_v36, %v1010_v40 }
 0x11f   : > { %999 = vst [vmem:[%s7328_s25 + $0x70] sm:$0xff] %v6732_v7  ;;  %1000 = vst [vmem:[%s7328_s25 + $0x78] sm:$0xff] %v6733_v11  ;;  %4303 = vmatpush1.bf16.msra.mxu1 %v6491_v29  ;;  %v6459_v62 = vcombine.low %v1258_v38, %v1266_v45  ;;  %v6444_v14 = vcombine.high %v1242_v15, %v1250_v35  ;;  %v6700_v0 = vcombine.high %v1498_v41, %v1506_v13  ;;  %v1226_v55 = vld [vmem:[%s9917_s4 + $0x708] sm:$0xff] }
 0x120   : > { %4230 = vmatpush1.bf16.msra.mxu0 %v6235_v56  ;;  %4304 = vmatprep.subr.bf16.mxu1 %v6476_v9  ;;  %v1234_v34 = vld [vmem:[%s9917_s4 + $0x748] sm:$0xff]  ;;  %v6443_v33 = vcombine.low %v1242_v15, %v1250_v35  ;;  %v6699_v16 = vcombine.low %v1498_v41, %v1506_v13 }
 0x121   : > { %4231 = vmatprep.subr.bf16.mxu0 %v6220_v8  ;;  %4136 = vmatmul.mubr.bf16.gmra.mxu0 %v7575_v23  ;;  %v1482_v1 = vld [vmem:[%s9917_s4 + $0xf08] sm:$0xff]  ;;  %v6428_v53 = vcombine.high %v1226_v55, %v1234_v34  ;;  %v6427_v32 = vcombine.low %v1226_v55, %v1234_v34 }
 0x122   : > { %4209 = vmatmul.mubr.bf16.gmra.mxu1 %v7585_v63  ;;  %4251 = vmatprep.mubr.bf16.mxu0 %v7364_v20  ;;  %v1490_v10 = vld [vmem:[%s9917_s4 + $0xf48] sm:$0xff] }
 0x123   : > { %4305 = vmatpush1.bf16.msra.mxu1 %v6475_v49  ;;  %4324 = vmatprep.mubr.bf16.mxu1 %v7366_v22  ;;  %v6684_v54 = vcombine.high %v1482_v1, %v1490_v10  ;;  %v1210_v17 = vld [vmem:[%s9917_s4 + $0x688] sm:$0xff]  ;;  %v6683_v56 = vcombine.low %v1482_v1, %v1490_v10 }
 0x124   : > { %4232 = vmatpush1.bf16.msra.mxu0 %v6219_v37  ;;  %4306 = vmatprep.subr.bf16.mxu1 %v6460_v4  ;;  %v1218_v31 = vld [vmem:[%s9917_s4 + $0x6c8] sm:$0xff] }
 0x125   : > { %4233 = vmatprep.subr.bf16.mxu0 %v6204_v42  ;;  %v1466_v58 = vld [vmem:[%s9917_s4 + $0xe88] sm:$0xff]  ;;  %v6412_v57 = vcombine.high %v1210_v17, %v1218_v31  ;;  %v6411_v21 = vcombine.low %v1210_v17, %v1218_v31 }
 0x126   : > { %v1474_v59 = vld [vmem:[%s9917_s4 + $0xec8] sm:$0xff] }
 0x127   : > { %4307 = vmatpush1.bf16.msra.mxu1 %v6459_v62  ;;  %v6668_v5 = vcombine.high %v1466_v58, %v1474_v59  ;;  %v1194_v6 = vld [vmem:[%s9917_s4 + $0x608] sm:$0xff]  ;;  %v6667_v61 = vcombine.low %v1466_v58, %v1474_v59 }
 0x128   : > { %4234 = vmatpush1.bf16.msra.mxu0 %v6203_v12  ;;  %4308 = vmatprep.subr.bf16.mxu1 %v6700_v0  ;;  %v1202_v19 = vld [vmem:[%s9917_s4 + $0x648] sm:$0xff] }
 0x129   : > { %4235 = vmatprep.subr.bf16.mxu0 %v6444_v14  ;;  %v1450_v18 = vld [vmem:[%s9917_s4 + $0xe08] sm:$0xff]  ;;  %v6396_v29 = vcombine.high %v1194_v6, %v1202_v19  ;;  %v6395_v40 = vcombine.low %v1194_v6, %v1202_v19  ;;  %v1379_v6 = vld [vmem:[%s9917_s4 + $0xbd0] sm:$0xff] }
 0x12a   : > { %v1458_v24 = vld [vmem:[%s9917_s4 + $0xe48] sm:$0xff] }
 0x12b   : > { %4309 = vmatpush2.bf16.msra.mxu1 %v6699_v16  ;;  %v6652_v7 = vcombine.high %v1450_v18, %v1458_v24  ;;  %v1178_v8 = vld [vmem:[%s9917_s4 + $0x588] sm:$0xff]  ;;  %v6651_v37 = vcombine.low %v1450_v18, %v1458_v24 }
 0x12c   : > { %4236 = vmatpush2.bf16.msra.mxu0 %v6443_v33  ;;  %4310 = vmatprep.subr.bf16.mxu1 %v6684_v54  ;;  %v1186_v9 = vld [vmem:[%s9917_s4 + $0x5c8] sm:$0xff] }
 0x12d   : > { %4237 = vmatprep.subr.bf16.mxu0 %v6428_v53  ;;  %v1434_v11 = vld [vmem:[%s9917_s4 + $0xd88] sm:$0xff]  ;;  %v6380_v38 = vcombine.high %v1178_v8, %v1186_v9  ;;  %v6379_v4 = vcombine.low %v1178_v8, %v1186_v9  ;;  %v1363_v8 = vld [vmem:[%s9917_s4 + $0xb50] sm:$0xff] }
 0x12e   : > { %v1442_v36 = vld [vmem:[%s9917_s4 + $0xdc8] sm:$0xff] }
 0x12f   : > { %4311 = vmatpush2.bf16.msra.mxu1 %v6683_v56  ;;  %v6636_v45 = vcombine.high %v1434_v11, %v1442_v36  ;;  %v1162_v49 = vld [vmem:[%s9917_s4 + $0x508] sm:$0xff]  ;;  %v6635_v41 = vcombine.low %v1434_v11, %v1442_v36  ;;  %v1115_v56 = vld [vmem:[%s9917_s4 + $0x390] sm:$0xff] }
 0x130   : > { %4238 = vmatpush2.bf16.msra.mxu0 %v6427_v32  ;;  %4312 = vmatprep.subr.bf16.mxu1 %v6668_v5  ;;  %v1170_v42 = vld [vmem:[%s9917_s4 + $0x548] sm:$0xff]  ;;  %v1371_v5 = vld [vmem:[%s9917_s4 + $0xb90] sm:$0xff] }
 0x131   : > { %4239 = vmatprep.subr.bf16.mxu0 %v6412_v57  ;;  %v1418_v15 = vld [vmem:[%s9917_s4 + $0xd08] sm:$0xff]  ;;  %v6364_v13 = vcombine.high %v1162_v49, %v1170_v42  ;;  %v6363_v34 = vcombine.low %v1162_v49, %v1170_v42  ;;  %v1123_v57 = vld [vmem:[%s9917_s4 + $0x3d0] sm:$0xff]  ;;  %v6573_v11 = vcombine.low %v1371_v5, %v1379_v6 }
 0x132   : > { %v1426_v35 = vld [vmem:[%s9917_s4 + $0xd48] sm:$0xff]  ;;  %v6318_v24 = vcombine.high %v1115_v56, %v1123_v57  ;;  %v6317_v9 = vcombine.low %v1115_v56, %v1123_v57  ;;  %v1347_v49 = vld [vmem:[%s9917_s4 + $0xad0] sm:$0xff] }
 0x133   : > { %4313 = vmatpush2.bf16.msra.mxu1 %v6667_v61  ;;  %v6620_v12 = vcombine.high %v1418_v15, %v1426_v35  ;;  %v1146_v62 = vld [vmem:[%s9917_s4 + $0x488] sm:$0xff]  ;;  %v6619_v1 = vcombine.low %v1418_v15, %v1426_v35  ;;  %v1099_v61 = vld [vmem:[%s9917_s4 + $0x310] sm:$0xff] }
 0x134   : > { %4240 = vmatpush2.bf16.msra.mxu0 %v6411_v21  ;;  %4314 = vmatprep.subr.bf16.mxu1 %v6652_v7  ;;  %v1154_v14 = vld [vmem:[%s9917_s4 + $0x4c8] sm:$0xff]  ;;  %v6574_v21 = vcombine.high %v1371_v5, %v1379_v6  ;;  %v1355_v7 = vld [vmem:[%s9917_s4 + $0xb10] sm:$0xff] }
 0x135   : > { %4241 = vmatprep.subr.bf16.mxu0 %v6396_v29  ;;  %v1402_v0 = vld [vmem:[%s9917_s4 + $0xc88] sm:$0xff]  ;;  %v6348_v10 = vcombine.high %v1146_v62, %v1154_v14  ;;  %v6347_v31 = vcombine.low %v1146_v62, %v1154_v14  ;;  %v1107_v29 = vld [vmem:[%s9917_s4 + $0x350] sm:$0xff]  ;;  %v6557_v15 = vcombine.low %v1355_v7, %v1363_v8 }
 0x136   : > { %v1410_v55 = vld [vmem:[%s9917_s4 + $0xcc8] sm:$0xff]  ;;  %v6302_v36 = vcombine.high %v1099_v61, %v1107_v29  ;;  %v6301_v42 = vcombine.low %v1099_v61, %v1107_v29  ;;  %v1331_v62 = vld [vmem:[%s9917_s4 + $0xa50] sm:$0xff] }
 0x137   : > { %4315 = vmatpush2.bf16.msra.mxu1 %v6651_v37  ;;  %v6604_v33 = vcombine.high %v1402_v0, %v1410_v55  ;;  %v1130_v16 = vld [vmem:[%s9917_s4 + $0x408] sm:$0xff]  ;;  %v6603_v58 = vcombine.low %v1402_v0, %v1410_v55  ;;  %v1083_v37 = vld [vmem:[%s9917_s4 + $0x290] sm:$0xff] }
 0x138   : > { %4242 = vmatpush2.bf16.msra.mxu0 %v6395_v40  ;;  %4316 = vmatprep.subr.bf16.mxu1 %v6636_v45  ;;  %v1138_v53 = vld [vmem:[%s9917_s4 + $0x448] sm:$0xff]  ;;  %v6558_v40 = vcombine.high %v1355_v7, %v1363_v8  ;;  %v1339_v45 = vld [vmem:[%s9917_s4 + $0xa90] sm:$0xff] }
 0x139   : > { %4243 = vmatprep.subr.bf16.mxu0 %v6380_v38  ;;  %v1386_v54 = vld [vmem:[%s9917_s4 + $0xc08] sm:$0xff]  ;;  %v6332_v59 = vcombine.high %v1130_v16, %v1138_v53  ;;  %v6331_v19 = vcombine.low %v1130_v16, %v1138_v53  ;;  %v1091_v38 = vld [vmem:[%s9917_s4 + $0x2d0] sm:$0xff]  ;;  %v6541_v0 = vcombine.low %v1339_v45, %v1347_v49 }
 0x13a   : > { %v1394_v17 = vld [vmem:[%s9917_s4 + $0xc48] sm:$0xff]  ;;  %v6286_v35 = vcombine.high %v1083_v37, %v1091_v38  ;;  %v6285_v14 = vcombine.low %v1083_v37, %v1091_v38  ;;  %v1315_v16 = vld [vmem:[%s9917_s4 + $0x9d0] sm:$0xff] }
 0x13b   : > { %4317 = vmatpush2.bf16.msra.mxu1 %v6635_v41  ;;  %v6588_v32 = vcombine.high %v1386_v54, %v1394_v17  ;;  %v6587_v18 = vcombine.low %v1386_v54, %v1394_v17  ;;  %v1067_v41 = vld [vmem:[%s9917_s4 + $0x210] sm:$0xff] }
 0x13c   : > { %4244 = vmatpush2.bf16.msra.mxu0 %v6379_v4  ;;  %4318 = vmatprep.subr.bf16.mxu1 %v6620_v12  ;;  %v6542_v4 = vcombine.high %v1339_v45, %v1347_v49  ;;  %v1323_v12 = vld [vmem:[%s9917_s4 + $0xa10] sm:$0xff] }
 0x13d   : > { %4245 = vmatprep.subr.bf16.mxu0 %v6364_v13  ;;  %v1075_v13 = vld [vmem:[%s9917_s4 + $0x250] sm:$0xff]  ;;  %v6525_v54 = vcombine.low %v1323_v12, %v1331_v62 }
 0x13e   : > { %v6270_v55 = vcombine.high %v1067_v41, %v1075_v13  ;;  %v6269_v53 = vcombine.low %v1067_v41, %v1075_v13  ;;  %v1299_v56 = vld [vmem:[%s9917_s4 + $0x950] sm:$0xff] }
 0x13f   : > { %4319 = vmatpush2.bf16.msra.mxu1 %v6619_v1  ;;  %v1051_v1 = vld [vmem:[%s9917_s4 + $0x190] sm:$0xff] }
 0x140   : > { %4246 = vmatpush2.bf16.msra.mxu0 %v6363_v34  ;;  %4320 = vmatprep.subr.bf16.mxu1 %v6604_v33  ;;  %v6526_v34 = vcombine.high %v1323_v12, %v1331_v62  ;;  %v1307_v33 = vld [vmem:[%s9917_s4 + $0x990] sm:$0xff] }
 0x141   : > { %4247 = vmatprep.subr.bf16.mxu0 %v6348_v10  ;;  %v1059_v10 = vld [vmem:[%s9917_s4 + $0x1d0] sm:$0xff]  ;;  %v6509_v5 = vcombine.low %v1307_v33, %v1315_v16 }
 0x142   : > { %v6254_v17 = vcombine.high %v1051_v1, %v1059_v10  ;;  %v6253_v57 = vcombine.low %v1051_v1, %v1059_v10  ;;  %v1283_v61 = vld [vmem:[%s9917_s4 + $0x8d0] sm:$0xff] }
 0x143   : > { %4321 = vmatpush2.bf16.msra.mxu1 %v6603_v58  ;;  %v1035_v58 = vld [vmem:[%s9917_s4 + $0x110] sm:$0xff] }
 0x144   : > { %4248 = vmatpush2.bf16.msra.mxu0 %v6347_v31  ;;  %4322 = vmatprep.subr.bf16.mxu1 %v6588_v32  ;;  %v6510_v31 = vcombine.high %v1307_v33, %v1315_v16  ;;  %v1291_v32 = vld [vmem:[%s9917_s4 + $0x910] sm:$0xff] }
 0x145   : > { %4249 = vmatprep.subr.bf16.mxu0 %v6332_v59  ;;  %v1043_v59 = vld [vmem:[%s9917_s4 + $0x150] sm:$0xff]  ;;  %v6493_v7 = vcombine.low %v1291_v32, %v1299_v56 }
 0x146   : > { %v6238_v6 = vcombine.high %v1035_v58, %v1043_v59  ;;  %v6237_v29 = vcombine.low %v1035_v58, %v1043_v59  ;;  %v1267_v37 = vld [vmem:[%s9917_s4 + $0x850] sm:$0xff] }
 0x147   : > { %4323 = vmatpush2.bf16.msra.mxu1 %v6587_v18  ;;  %v1019_v18 = vld [vmem:[%s9917_s4 + $0x90] sm:$0xff] }
 0x148   : > { %4250 = vmatpush2.bf16.msra.mxu0 %v6331_v19  ;;  %4438 = vmatprep.subr.bf16.mxu1 %v6574_v21  ;;  %v6494_v19 = vcombine.high %v1291_v32, %v1299_v56  ;;  %v1275_v21 = vld [vmem:[%s9917_s4 + $0x890] sm:$0xff] }
 0x149   : > { %4365 = vmatprep.subr.bf16.mxu0 %v6318_v24  ;;  %v1027_v24 = vld [vmem:[%s9917_s4 + $0xd0] sm:$0xff]  ;;  %v6477_v45 = vcombine.low %v1275_v21, %v1283_v61 }
 0x14a   : > { %4325 = vmatmul.mubr.bf16.vlgmr.msra.gmra.mxu1 %v7370_v52  ;;  %v6222_v8 = vcombine.high %v1019_v18, %v1027_v24  ;;  %v6221_v38 = vcombine.low %v1019_v18, %v1027_v24  ;;  %v1507_v41 = vld [vmem:[%s9917_s4 + $0xfd0] sm:$0xff] }
 0x14b   : > { %4252 = vmatmul.mubr.bf16.vlgmr.msra.gmra.mxu0 %v7368_v44  ;;  %4334 = vmatprep.mubr.bf16.mxu1 %v7434_v30  ;;  %v1491_v1 = vld [vmem:[%s9917_s4 + $0xf50] sm:$0xff] }
 0x14c   : > { %4261 = vmatprep.mubr.bf16.mxu0 %v7424_v43  ;;  %4366 = vmatpush1.bf16.msra.mxu0 %v6317_v9  ;;  %v6478_v9 = vcombine.high %v1275_v21, %v1283_v61  ;;  %v1475_v58 = vld [vmem:[%s9917_s4 + $0xed0] sm:$0xff] }
 0x14d   : > { %4439 = vmatpush1.bf16.msra.mxu1 %v6573_v11  ;;  %4367 = vmatprep.subr.bf16.mxu0 %v6302_v36  ;;  %v1003_v11 = vld [vmem:[%s9917_s4 + $0x10] sm:$0xff] }
 0x14e   : > { %4440 = vmatprep.subr.bf16.mxu1 %v6558_v40  ;;  %v1011_v36 = vld [vmem:[%s9917_s4 + $0x50] sm:$0xff] }
 0x14f   : > { %v1259_v40 = vld [vmem:[%s9917_s4 + $0x810] sm:$0xff]  ;;  %v6206_v49 = vcombine.high %v1003_v11, %v1011_v36  ;;  %v6205_v13 = vcombine.low %v1003_v11, %v1011_v36 }
 0x150   : > { %4368 = vmatpush1.bf16.msra.mxu0 %v6301_v42  ;;  %v6462_v42 = vcombine.high %v1259_v40, %v1267_v37  ;;  %v6461_v12 = vcombine.low %v1259_v40, %v1267_v37  ;;  %v1459_v18 = vld [vmem:[%s9917_s4 + $0xe50] sm:$0xff] }
 0x151   : > { %4441 = vmatpush1.bf16.msra.mxu1 %v6557_v15  ;;  %4369 = vmatprep.subr.bf16.mxu0 %v6286_v35  ;;  %v1243_v15 = vld [vmem:[%s9917_s4 + $0x790] sm:$0xff] }
 0x152   : > { %4442 = vmatprep.subr.bf16.mxu1 %v6542_v4  ;;  %4335 = vmatmul.mubr.bf16.gmra.mxu1 %v7432_v3  ;;  %v1251_v35 = vld [vmem:[%s9917_s4 + $0x7d0] sm:$0xff] }
 0x153   : > { %4262 = vmatmul.mubr.bf16.gmra.mxu0 %v7430_v27  ;;  %4344 = vmatprep.mubr.bf16.mxu1 %v7514_v26  ;;  %v1499_v4 = vld [vmem:[%s9917_s4 + $0xf90] sm:$0xff]  ;;  %v6446_v62 = vcombine.high %v1243_v15, %v1251_v35  ;;  %v6445_v10 = vcombine.low %v1243_v15, %v1251_v35 }
 0x154   : > { %4271 = vmatprep.mubr.bf16.mxu0 %v7512_v25  ;;  %4370 = vmatpush1.bf16.msra.mxu0 %v6285_v14  ;;  %v6702_v14 = vcombine.high %v1499_v4, %v1507_v41  ;;  %v6701_v33 = vcombine.low %v1499_v4, %v1507_v41  ;;  %v1443_v11 = vld [vmem:[%s9917_s4 + $0xdd0] sm:$0xff] }
 0x155   : > { %4443 = vmatpush1.bf16.msra.mxu1 %v6541_v0  ;;  %4371 = vmatprep.subr.bf16.mxu0 %v6270_v55  ;;  %v1227_v0 = vld [vmem:[%s9917_s4 + $0x710] sm:$0xff] }
 0x156   : > { %4444 = vmatprep.subr.bf16.mxu1 %v6526_v34  ;;  %v1235_v55 = vld [vmem:[%s9917_s4 + $0x750] sm:$0xff] }
 0x157   : > { %v1483_v34 = vld [vmem:[%s9917_s4 + $0xf10] sm:$0xff]  ;;  %v6430_v16 = vcombine.high %v1227_v0, %v1235_v55  ;;  %v6429_v59 = vcombine.low %v1227_v0, %v1235_v55 }
 0x158   : > { %4372 = vmatpush1.bf16.msra.mxu0 %v6269_v53  ;;  %v6686_v53 = vcombine.high %v1483_v34, %v1491_v1  ;;  %v6685_v32 = vcombine.low %v1483_v34, %v1491_v1  ;;  %v1427_v15 = vld [vmem:[%s9917_s4 + $0xd50] sm:$0xff] }
 0x159   : > { %4445 = vmatpush1.bf16.msra.mxu1 %v6525_v54  ;;  %4373 = vmatprep.subr.bf16.mxu0 %v6254_v17  ;;  %v1211_v54 = vld [vmem:[%s9917_s4 + $0x690] sm:$0xff] }
 0x15a   : > { %4446 = vmatprep.subr.bf16.mxu1 %v6510_v31  ;;  %4345 = vmatmul.mubr.bf16.gmra.mxu1 %v7518_v39  ;;  %v1219_v17 = vld [vmem:[%s9917_s4 + $0x6d0] sm:$0xff] }
 0x15b   : > { %4272 = vmatmul.mubr.bf16.gmra.mxu0 %v7516_v60  ;;  %4354 = vmatprep.mubr.bf16.mxu1 %v7577_v28  ;;  %v1467_v31 = vld [vmem:[%s9917_s4 + $0xe90] sm:$0xff]  ;;  %v6414_v56 = vcombine.high %v1211_v54, %v1219_v17  ;;  %v6413_v24 = vcombine.low %v1211_v54, %v1219_v17 }
 0x15c   : > { %4281 = vmatprep.mubr.bf16.mxu0 %v7573_v2  ;;  %4374 = vmatpush1.bf16.msra.mxu0 %v6253_v57  ;;  %v6670_v57 = vcombine.high %v1467_v31, %v1475_v58  ;;  %v6669_v21 = vcombine.low %v1467_v31, %v1475_v58  ;;  %v1411_v0 = vld [vmem:[%s9917_s4 + $0xcd0] sm:$0xff] }
 0x15d   : > { %4447 = vmatpush1.bf16.msra.mxu1 %v6509_v5  ;;  %4375 = vmatprep.subr.bf16.mxu0 %v6238_v6  ;;  %v1195_v5 = vld [vmem:[%s9917_s4 + $0x610] sm:$0xff] }
 0x15e   : > { %4448 = vmatprep.subr.bf16.mxu1 %v6494_v19  ;;  %v1203_v6 = vld [vmem:[%s9917_s4 + $0x650] sm:$0xff] }
 0x15f   : > { %v1451_v19 = vld [vmem:[%s9917_s4 + $0xe10] sm:$0xff]  ;;  %v6398_v61 = vcombine.high %v1195_v5, %v1203_v6  ;;  %v6397_v36 = vcombine.low %v1195_v5, %v1203_v6  ;;  %v1380_v5 = vld [vmem:[%s9917_s4 + $0xbd8] sm:$0xff] }
 0x160   : > { %4376 = vmatpush1.bf16.msra.mxu0 %v6237_v29  ;;  %v6654_v29 = vcombine.high %v1451_v19, %v1459_v18  ;;  %v6653_v40 = vcombine.low %v1451_v19, %v1459_v18  ;;  %v1395_v54 = vld [vmem:[%s9917_s4 + $0xc50] sm:$0xff] }
 0x161   : > { %4449 = vmatpush1.bf16.msra.mxu1 %v6493_v7  ;;  %4377 = vmatprep.subr.bf16.mxu0 %v6222_v8  ;;  %v1179_v7 = vld [vmem:[%s9917_s4 + $0x590] sm:$0xff] }
 0x162   : > { %4450 = vmatprep.subr.bf16.mxu1 %v6478_v9  ;;  %4355 = vmatmul.mubr.bf16.gmra.mxu1 %v7585_v63  ;;  %v1187_v8 = vld [vmem:[%s9917_s4 + $0x5d0] sm:$0xff] }
 0x163   : > { %4282 = vmatmul.mubr.bf16.gmra.mxu0 %v7575_v23  ;;  %4470 = vmatprep.mubr.bf16.mxu1 %v7366_v22  ;;  %v1435_v9 = vld [vmem:[%s9917_s4 + $0xd90] sm:$0xff]  ;;  %v6382_v37 = vcombine.high %v1179_v7, %v1187_v8  ;;  %v6381_v35 = vcombine.low %v1179_v7, %v1187_v8  ;;  %v1364_v7 = vld [vmem:[%s9917_s4 + $0xb58] sm:$0xff] }
 0x164   : > { %4397 = vmatprep.mubr.bf16.mxu0 %v7364_v20  ;;  %4378 = vmatpush1.bf16.msra.mxu0 %v6221_v38  ;;  %v6638_v38 = vcombine.high %v1435_v9, %v1443_v11  ;;  %v6637_v4 = vcombine.low %v1435_v9, %v1443_v11 }
 0x165   : > { %4451 = vmatpush1.bf16.msra.mxu1 %v6477_v45  ;;  %4379 = vmatprep.subr.bf16.mxu0 %v6206_v49  ;;  %v1163_v45 = vld [vmem:[%s9917_s4 + $0x510] sm:$0xff] }
 0x166   : > { %4452 = vmatprep.subr.bf16.mxu1 %v6462_v42  ;;  %v1171_v49 = vld [vmem:[%s9917_s4 + $0x550] sm:$0xff] }
 0x167   : > { %v1419_v42 = vld [vmem:[%s9917_s4 + $0xd10] sm:$0xff]  ;;  %v6366_v41 = vcombine.high %v1163_v45, %v1171_v49  ;;  %v6365_v55 = vcombine.low %v1163_v45, %v1171_v49  ;;  %v1348_v45 = vld [vmem:[%s9917_s4 + $0xad8] sm:$0xff] }
 0x168   : > { %4380 = vmatpush1.bf16.msra.mxu0 %v6205_v13  ;;  %v6622_v13 = vcombine.high %v1419_v42, %v1427_v15  ;;  %v6621_v34 = vcombine.low %v1419_v42, %v1427_v15 }
 0x169   : > { %4453 = vmatpush1.bf16.msra.mxu1 %v6461_v12  ;;  %4381 = vmatprep.subr.bf16.mxu0 %v6446_v62  ;;  %v1147_v12 = vld [vmem:[%s9917_s4 + $0x490] sm:$0xff] }
 0x16a   : > { %4454 = vmatprep.subr.bf16.mxu1 %v6702_v14  ;;  %v1155_v62 = vld [vmem:[%s9917_s4 + $0x4d0] sm:$0xff] }
 0x16b   : > { %v1403_v14 = vld [vmem:[%s9917_s4 + $0xc90] sm:$0xff]  ;;  %v6350_v1 = vcombine.high %v1147_v12, %v1155_v62  ;;  %v6349_v17 = vcombine.low %v1147_v12, %v1155_v62  ;;  %v1332_v12 = vld [vmem:[%s9917_s4 + $0xa58] sm:$0xff] }
 0x16c   : > { %4382 = vmatpush2.bf16.msra.mxu0 %v6445_v10  ;;  %v6606_v10 = vcombine.high %v1403_v14, %v1411_v0  ;;  %v6605_v31 = vcombine.low %v1403_v14, %v1411_v0 }
 0x16d   : > { %4455 = vmatpush2.bf16.msra.mxu1 %v6701_v33  ;;  %4383 = vmatprep.subr.bf16.mxu0 %v6430_v16  ;;  %v1131_v33 = vld [vmem:[%s9917_s4 + $0x410] sm:$0xff] }
 0x16e   : > { %4456 = vmatprep.subr.bf16.mxu1 %v6686_v53  ;;  %v1139_v16 = vld [vmem:[%s9917_s4 + $0x450] sm:$0xff] }
 0x16f   : > { %v1387_v53 = vld [vmem:[%s9917_s4 + $0xc10] sm:$0xff]  ;;  %v6334_v58 = vcombine.high %v1131_v33, %v1139_v16  ;;  %v6333_v6 = vcombine.low %v1131_v33, %v1139_v16  ;;  %v1316_v33 = vld [vmem:[%s9917_s4 + $0x9d8] sm:$0xff] }
 0x170   : > { %4384 = vmatpush2.bf16.msra.mxu0 %v6429_v59  ;;  %v6590_v59 = vcombine.high %v1387_v53, %v1395_v54  ;;  %v6589_v19 = vcombine.low %v1387_v53, %v1395_v54 }
 0x171   : > { %4457 = vmatpush2.bf16.msra.mxu1 %v6685_v32  ;;  %4385 = vmatprep.subr.bf16.mxu0 %v6414_v56  ;;  %v1116_v32 = vld [vmem:[%s9917_s4 + $0x398] sm:$0xff] }
 0x172   : > { %4458 = vmatprep.subr.bf16.mxu1 %v6670_v57  ;;  %v1124_v56 = vld [vmem:[%s9917_s4 + $0x3d8] sm:$0xff] }
 0x173   : > { %v1372_v57 = vld [vmem:[%s9917_s4 + $0xb98] sm:$0xff]  ;;  %v6320_v18 = vcombine.high %v1116_v32, %v1124_v56  ;;  %v6319_v8 = vcombine.low %v1116_v32, %v1124_v56 }
 0x174   : > { %4386 = vmatpush2.bf16.msra.mxu0 %v6413_v24  ;;  %v6576_v24 = vcombine.high %v1372_v57, %v1380_v5  ;;  %v6575_v9 = vcombine.low %v1372_v57, %v1380_v5  ;;  %v1300_v32 = vld [vmem:[%s9917_s4 + $0x958] sm:$0xff] }
 0x175   : > { %4459 = vmatpush2.bf16.msra.mxu1 %v6669_v21  ;;  %4387 = vmatprep.subr.bf16.mxu0 %v6398_v61  ;;  %v1100_v21 = vld [vmem:[%s9917_s4 + $0x318] sm:$0xff] }
 0x176   : > { %4460 = vmatprep.subr.bf16.mxu1 %v6654_v29  ;;  %v1108_v61 = vld [vmem:[%s9917_s4 + $0x358] sm:$0xff] }
 0x177   : > { %v1356_v29 = vld [vmem:[%s9917_s4 + $0xb18] sm:$0xff]  ;;  %v6304_v11 = vcombine.high %v1100_v21, %v1108_v61  ;;  %v6303_v49 = vcombine.low %v1100_v21, %v1108_v61 }
 0x178   : > { %4388 = vmatpush2.bf16.msra.mxu0 %v6397_v36  ;;  %v6560_v36 = vcombine.high %v1356_v29, %v1364_v7  ;;  %v6559_v42 = vcombine.low %v1356_v29, %v1364_v7  ;;  %v1284_v21 = vld [vmem:[%s9917_s4 + $0x8d8] sm:$0xff] }
 0x179   : > { %4461 = vmatpush2.bf16.msra.mxu1 %v6653_v40  ;;  %4389 = vmatprep.subr.bf16.mxu0 %v6382_v37  ;;  %v1084_v40 = vld [vmem:[%s9917_s4 + $0x298] sm:$0xff] }
 0x17a   : > { %4462 = vmatprep.subr.bf16.mxu1 %v6638_v38  ;;  %v1092_v37 = vld [vmem:[%s9917_s4 + $0x2d8] sm:$0xff] }
 0x17b   : > { %v1340_v38 = vld [vmem:[%s9917_s4 + $0xa98] sm:$0xff]  ;;  %v6288_v15 = vcombine.high %v1084_v40, %v1092_v37  ;;  %v6287_v62 = vcombine.low %v1084_v40, %v1092_v37 }
 0x17c   : > { %4390 = vmatpush2.bf16.msra.mxu0 %v6381_v35  ;;  %v6544_v35 = vcombine.high %v1340_v38, %v1348_v45  ;;  %v6543_v14 = vcombine.low %v1340_v38, %v1348_v45  ;;  %v1268_v40 = vld [vmem:[%s9917_s4 + $0x858] sm:$0xff] }
 0x17d   : > { %4463 = vmatpush2.bf16.msra.mxu1 %v6637_v4  ;;  %4391 = vmatprep.subr.bf16.mxu0 %v6366_v41  ;;  %v1068_v4 = vld [vmem:[%s9917_s4 + $0x218] sm:$0xff] }
 0x17e   : > { %4464 = vmatprep.subr.bf16.mxu1 %v6622_v13  ;;  %v1076_v41 = vld [vmem:[%s9917_s4 + $0x258] sm:$0xff] }
 0x17f   : > { %v1324_v13 = vld [vmem:[%s9917_s4 + $0xa18] sm:$0xff]  ;;  %v6272_v0 = vcombine.high %v1068_v4, %v1076_v41  ;;  %v6271_v16 = vcombine.low %v1068_v4, %v1076_v41 }
 0x180   : > { %4392 = vmatpush2.bf16.msra.mxu0 %v6365_v55  ;;  %v6528_v55 = vcombine.high %v1324_v13, %v1332_v12  ;;  %v6527_v53 = vcombine.low %v1324_v13, %v1332_v12  ;;  %v1508_v4 = vld [vmem:[%s9917_s4 + $0xfd8] sm:$0xff] }
 0x181   : > { %4465 = vmatpush2.bf16.msra.mxu1 %v6621_v34  ;;  %4393 = vmatprep.subr.bf16.mxu0 %v6350_v1  ;;  %v1052_v34 = vld [vmem:[%s9917_s4 + $0x198] sm:$0xff] }
 0x182   : > { %4466 = vmatprep.subr.bf16.mxu1 %v6606_v10  ;;  %v1060_v1 = vld [vmem:[%s9917_s4 + $0x1d8] sm:$0xff] }
 0x183   : > { %v1308_v10 = vld [vmem:[%s9917_s4 + $0x998] sm:$0xff]  ;;  %v6256_v54 = vcombine.high %v1052_v34, %v1060_v1  ;;  %v6255_v56 = vcombine.low %v1052_v34, %v1060_v1 }
 0x184   : > { %4394 = vmatpush2.bf16.msra.mxu0 %v6349_v17  ;;  %v6512_v17 = vcombine.high %v1308_v10, %v1316_v33  ;;  %v6511_v57 = vcombine.low %v1308_v10, %v1316_v33  ;;  %v1492_v34 = vld [vmem:[%s9917_s4 + $0xf58] sm:$0xff] }
 0x185   : > { %4467 = vmatpush2.bf16.msra.mxu1 %v6605_v31  ;;  %4395 = vmatprep.subr.bf16.mxu0 %v6334_v58  ;;  %v1036_v31 = vld [vmem:[%s9917_s4 + $0x118] sm:$0xff] }
 0x186   : > { %4468 = vmatprep.subr.bf16.mxu1 %v6590_v59  ;;  %v1044_v58 = vld [vmem:[%s9917_s4 + $0x158] sm:$0xff] }
 0x187   : > { %v1292_v59 = vld [vmem:[%s9917_s4 + $0x918] sm:$0xff]  ;;  %v6240_v5 = vcombine.high %v1036_v31, %v1044_v58  ;;  %v6239_v61 = vcombine.low %v1036_v31, %v1044_v58 }
 0x188   : > { %4396 = vmatpush2.bf16.msra.mxu0 %v6333_v6  ;;  %v6496_v6 = vcombine.high %v1292_v59, %v1300_v32  ;;  %v6495_v29 = vcombine.low %v1292_v59, %v1300_v32  ;;  %v1476_v31 = vld [vmem:[%s9917_s4 + $0xed8] sm:$0xff] }
 0x189   : > { %4469 = vmatpush2.bf16.msra.mxu1 %v6589_v19  ;;  %4511 = vmatprep.subr.bf16.mxu0 %v6320_v18  ;;  %v1020_v19 = vld [vmem:[%s9917_s4 + $0x98] sm:$0xff] }
 0x18a   : > { %4584 = vmatprep.subr.bf16.mxu1 %v6576_v24  ;;  %v1028_v18 = vld [vmem:[%s9917_s4 + $0xd8] sm:$0xff] }
 0x18b   : > { %4398 = vmatmul.mubr.bf16.vlgmr.msra.gmra.mxu0 %v7368_v44  ;;  %v1276_v24 = vld [vmem:[%s9917_s4 + $0x898] sm:$0xff]  ;;  %v6224_v7 = vcombine.high %v1020_v19, %v1028_v18  ;;  %v6223_v37 = vcombine.low %v1020_v19, %v1028_v18 }
 0x18c   : > { %4471 = vmatmul.mubr.bf16.vlgmr.msra.gmra.mxu1 %v7370_v52  ;;  %4407 = vmatprep.mubr.bf16.mxu0 %v7424_v43  ;;  %v6479_v38 = vcombine.low %v1276_v24, %v1284_v21  ;;  %v1460_v19 = vld [vmem:[%s9917_s4 + $0xe58] sm:$0xff] }
 0x18d   : > { %4480 = vmatprep.mubr.bf16.mxu1 %v7434_v30  ;;  %4512 = vmatpush1.bf16.msra.mxu0 %v6319_v8  ;;  %v6480_v8 = vcombine.high %v1276_v24, %v1284_v21 }
 0x18e   : > { %4585 = vmatpush1.bf16.msra.mxu1 %v6575_v9  ;;  %4513 = vmatprep.subr.bf16.mxu0 %v6304_v11  ;;  %v1004_v9 = vld [vmem:[%s9917_s4 + $0x18] sm:$0xff] }
 0x18f   : > { %4586 = vmatprep.subr.bf16.mxu1 %v6560_v36  ;;  %v1012_v11 = vld [vmem:[%s9917_s4 + $0x58] sm:$0xff] }
 0x190   : > { %v1260_v36 = vld [vmem:[%s9917_s4 + $0x818] sm:$0xff]  ;;  %v6208_v45 = vcombine.high %v1004_v9, %v1012_v11  ;;  %v6207_v41 = vcombine.low %v1004_v9, %v1012_v11 }
 0x191   : > { %4514 = vmatpush1.bf16.msra.mxu0 %v6303_v49  ;;  %v6464_v49 = vcombine.high %v1260_v36, %v1268_v40  ;;  %v6463_v13 = vcombine.low %v1260_v36, %v1268_v40  ;;  %v1444_v9 = vld [vmem:[%s9917_s4 + $0xdd8] sm:$0xff] }
 0x192   : > { %4587 = vmatpush1.bf16.msra.mxu1 %v6559_v42  ;;  %4515 = vmatprep.subr.bf16.mxu0 %v6288_v15  ;;  %v1244_v42 = vld [vmem:[%s9917_s4 + $0x798] sm:$0xff] }
 0x193   : > { %4408 = vmatmul.mubr.bf16.gmra.mxu0 %v7430_v27  ;;  %4588 = vmatprep.subr.bf16.mxu1 %v6544_v35  ;;  %v1252_v15 = vld [vmem:[%s9917_s4 + $0x7d8] sm:$0xff] }
 0x194   : > { %4481 = vmatmul.mubr.bf16.gmra.mxu1 %v7432_v3  ;;  %4417 = vmatprep.mubr.bf16.mxu0 %v7512_v25  ;;  %v1500_v35 = vld [vmem:[%s9917_s4 + $0xf98] sm:$0xff]  ;;  %v6448_v12 = vcombine.high %v1244_v42, %v1252_v15  ;;  %v6447_v1 = vcombine.low %v1244_v42, %v1252_v15 }
 0x195   : > { %4490 = vmatprep.mubr.bf16.mxu1 %v7514_v26  ;;  %4516 = vmatpush1.bf16.msra.mxu0 %v6287_v62  ;;  %v6704_v62 = vcombine.high %v1500_v35, %v1508_v4  ;;  %v6703_v10 = vcombine.low %v1500_v35, %v1508_v4  ;;  %v1428_v42 = vld [vmem:[%s9917_s4 + $0xd58] sm:$0xff] }
 0x196   : > { %4589 = vmatpush1.bf16.msra.mxu1 %v6543_v14  ;;  %4517 = vmatprep.subr.bf16.mxu0 %v6272_v0  ;;  %v1228_v14 = vld [vmem:[%s9917_s4 + $0x718] sm:$0xff] }
 0x197   : > { %4590 = vmatprep.subr.bf16.mxu1 %v6528_v55  ;;  %v1236_v0 = vld [vmem:[%s9917_s4 + $0x758] sm:$0xff] }
 0x198   : > { %v1484_v55 = vld [vmem:[%s9917_s4 + $0xf18] sm:$0xff]  ;;  %v6432_v33 = vcombine.high %v1228_v14, %v1236_v0  ;;  %v6431_v58 = vcombine.low %v1228_v14, %v1236_v0 }
 0x199   : > { %4518 = vmatpush1.bf16.msra.mxu0 %v6271_v16  ;;  %v6688_v16 = vcombine.high %v1484_v55, %v1492_v34  ;;  %v6687_v59 = vcombine.low %v1484_v55, %v1492_v34  ;;  %v1412_v14 = vld [vmem:[%s9917_s4 + $0xcd8] sm:$0xff] }
 0x19a   : > { %4591 = vmatpush1.bf16.msra.mxu1 %v6527_v53  ;;  %4519 = vmatprep.subr.bf16.mxu0 %v6256_v54  ;;  %v1212_v53 = vld [vmem:[%s9917_s4 + $0x698] sm:$0xff] }
 0x19b   : > { %4418 = vmatmul.mubr.bf16.gmra.mxu0 %v7516_v60  ;;  %4592 = vmatprep.subr.bf16.mxu1 %v6512_v17  ;;  %v1220_v54 = vld [vmem:[%s9917_s4 + $0x6d8] sm:$0xff] }
 0x19c   : > { %4491 = vmatmul.mubr.bf16.gmra.mxu1 %v7518_v39  ;;  %4427 = vmatprep.mubr.bf16.mxu0 %v7573_v2  ;;  %v1468_v17 = vld [vmem:[%s9917_s4 + $0xe98] sm:$0xff]  ;;  %v6416_v32 = vcombine.high %v1212_v53, %v1220_v54  ;;  %v6415_v18 = vcombine.low %v1212_v53, %v1220_v54 }
 0x19d   : > { %4500 = vmatprep.mubr.bf16.mxu1 %v7577_v28  ;;  %4520 = vmatpush1.bf16.msra.mxu0 %v6255_v56  ;;  %v6672_v56 = vcombine.high %v1468_v17, %v1476_v31  ;;  %v6671_v24 = vcombine.low %v1468_v17, %v1476_v31  ;;  %v1396_v53 = vld [vmem:[%s9917_s4 + $0xc58] sm:$0xff] }
 0x19e   : > { %4593 = vmatpush1.bf16.msra.mxu1 %v6511_v57  ;;  %4521 = vmatprep.subr.bf16.mxu0 %v6240_v5  ;;  %v1196_v57 = vld [vmem:[%s9917_s4 + $0x618] sm:$0xff] }
 0x19f   : > { %4594 = vmatprep.subr.bf16.mxu1 %v6496_v6  ;;  %v1204_v5 = vld [vmem:[%s9917_s4 + $0x658] sm:$0xff] }
 0x1a0   : > { %v1452_v6 = vld [vmem:[%s9917_s4 + $0xe18] sm:$0xff]  ;;  %v6400_v21 = vcombine.high %v1196_v57, %v1204_v5  ;;  %v6399_v11 = vcombine.low %v1196_v57, %v1204_v5  ;;  %v1381_v57 = vld [vmem:[%s9917_s4 + $0xbe0] sm:$0xff] }
 0x1a1   : > { %4522 = vmatpush1.bf16.msra.mxu0 %v6239_v61  ;;  %v6656_v61 = vcombine.high %v1452_v6, %v1460_v19  ;;  %v6655_v36 = vcombine.low %v1452_v6, %v1460_v19 }
 0x1a2   : > { %4595 = vmatpush1.bf16.msra.mxu1 %v6495_v29  ;;  %4523 = vmatprep.subr.bf16.mxu0 %v6224_v7  ;;  %v1180_v29 = vld [vmem:[%s9917_s4 + $0x598] sm:$0xff] }
 0x1a3   : > { %4428 = vmatmul.mubr.bf16.gmra.mxu0 %v7575_v23  ;;  %4596 = vmatprep.subr.bf16.mxu1 %v6480_v8  ;;  %v1188_v7 = vld [vmem:[%s9917_s4 + $0x5d8] sm:$0xff] }
 0x1a4   : > { %4501 = vmatmul.mubr.bf16.gmra.mxu1 %v7585_v63  ;;  %4543 = vmatprep.mubr.bf16.mxu0 %v7364_v20  ;;  %v1436_v8 = vld [vmem:[%s9917_s4 + $0xd98] sm:$0xff]  ;;  %v6384_v40 = vcombine.high %v1180_v29, %v1188_v7  ;;  %v6383_v15 = vcombine.low %v1180_v29, %v1188_v7  ;;  %v1101_v29 = vld [vmem:[%s9917_s4 + $0x320] sm:$0xff] }
 0x1a5   : > { %4524 = vmatpush1.bf16.msra.mxu0 %v6223_v37  ;;  %4616 = vmatprep.mubr.bf16.mxu1 %v7366_v22  ;;  %v6640_v37 = vcombine.high %v1436_v8, %v1444_v9  ;;  %v6639_v35 = vcombine.low %v1436_v8, %v1444_v9  ;;  %v1109_v7 = vld [vmem:[%s9917_s4 + $0x360] sm:$0xff] }
 0x1a6   : > { %4597 = vmatpush1.bf16.msra.mxu1 %v6479_v38  ;;  %4525 = vmatprep.subr.bf16.mxu0 %v6208_v45  ;;  %v1164_v38 = vld [vmem:[%s9917_s4 + $0x518] sm:$0xff] }
 0x1a7   : > { %4598 = vmatprep.subr.bf16.mxu1 %v6464_v49  ;;  %v1172_v45 = vld [vmem:[%s9917_s4 + $0x558] sm:$0xff] }
 0x1a8   : > { %v1420_v49 = vld [vmem:[%s9917_s4 + $0xd18] sm:$0xff]  ;;  %v6368_v4 = vcombine.high %v1164_v38, %v1172_v45  ;;  %v6367_v0 = vcombine.low %v1164_v38, %v1172_v45  ;;  %v8149_v38 = vld [vmem:[%s9919_s6] sm:$0xff] }
 0x1a9   : > { %4526 = vmatpush1.bf16.msra.mxu0 %v6207_v41  ;;  %v6624_v41 = vcombine.high %v1420_v49, %v1428_v42  ;;  %v6623_v55 = vcombine.low %v1420_v49, %v1428_v42 }
 0x1aa   : > { %4599 = vmatpush1.bf16.msra.mxu1 %v6463_v13  ;;  %4527 = vmatprep.subr.bf16.mxu0 %v6448_v12  ;;  %v1148_v13 = vld [vmem:[%s9917_s4 + $0x498] sm:$0xff] }
 0x1ab   : > { %4600 = vmatprep.subr.bf16.mxu1 %v6704_v62  ;;  %v1156_v12 = vld [vmem:[%s9917_s4 + $0x4d8] sm:$0xff] }
 0x1ac   : > { %v1404_v62 = vld [vmem:[%s9917_s4 + $0xc98] sm:$0xff]  ;;  %v6352_v34 = vcombine.high %v1148_v13, %v1156_v12  ;;  %v6351_v54 = vcombine.low %v1148_v13, %v1156_v12  ;;  %v1085_v13 = vld [vmem:[%s9917_s4 + $0x2a0] sm:$0xff] }
 0x1ad   : > { %4528 = vmatpush2.bf16.msra.mxu0 %v6447_v1  ;;  %v6608_v1 = vcombine.high %v1404_v62, %v1412_v14  ;;  %v6607_v17 = vcombine.low %v1404_v62, %v1412_v14  ;;  %v1093_v12 = vld [vmem:[%s9917_s4 + $0x2e0] sm:$0xff]  ;;  %v8162_v14 = vrot.slane %v8149_v38, %v7185_v47 }
 0x1ae   : > { %4601 = vmatpush2.bf16.msra.mxu1 %v6703_v10  ;;  %4529 = vmatprep.subr.bf16.mxu0 %v6432_v33  ;;  %v1132_v10 = vld [vmem:[%s9917_s4 + $0x418] sm:$0xff] }
 0x1af   : > { %4602 = vmatprep.subr.bf16.mxu1 %v6688_v16  ;;  %v1140_v33 = vld [vmem:[%s9917_s4 + $0x458] sm:$0xff] }
 0x1b0   : > { %v1388_v16 = vld [vmem:[%s9917_s4 + $0xc18] sm:$0xff]  ;;  %v6336_v31 = vcombine.high %v1132_v10, %v1140_v33  ;;  %v6335_v5 = vcombine.low %v1132_v10, %v1140_v33  ;;  %v6305_v33 = vcombine.low %v1101_v29, %v1109_v7 }
 0x1b1   : > { %4530 = vmatpush2.bf16.msra.mxu0 %v6431_v58  ;;  %v6592_v58 = vcombine.high %v1388_v16, %v1396_v53  ;;  %v6591_v6 = vcombine.low %v1388_v16, %v1396_v53 }
 0x1b2   : > { %4603 = vmatpush2.bf16.msra.mxu1 %v6687_v59  ;;  %4531 = vmatprep.subr.bf16.mxu0 %v6416_v32  ;;  %v1117_v59 = vld [vmem:[%s9917_s4 + $0x3a0] sm:$0xff] }
 0x1b3   : > { %4604 = vmatprep.subr.bf16.mxu1 %v6672_v56  ;;  %v1125_v32 = vld [vmem:[%s9917_s4 + $0x3e0] sm:$0xff] }
 0x1b4   : > { %v1373_v56 = vld [vmem:[%s9917_s4 + $0xba0] sm:$0xff]  ;;  %v6322_v19 = vcombine.high %v1117_v59, %v1125_v32 }
 0x1b5   : > { %4532 = vmatpush2.bf16.msra.mxu0 %v6415_v18  ;;  %v8128_v18 = vld [vmem:[%s9918_s5] sm:$0xff]  ;;  %v6577_v49 = vcombine.low %v1373_v56, %v1381_v57 }
 0x1b6   : > { %4605 = vmatpush2.bf16.msra.mxu1 %v6671_v24  ;;  %4533 = vmatprep.subr.bf16.mxu0 %v6400_v21  ;;  %v6578_v24 = vcombine.high %v1373_v56, %v1381_v57  ;;  %v8138_v9 = vrot.slane %v8128_v18, %v7185_v47  ;;  %v8174_v10 = vrot.slane %v8128_v18, %v7194_v50  ;;  %v8987_v47 = vld [vmem:[%s9917_s4 + $0x4f0] sm:$0xff] }
 0x1b7   : > { %4606 = vmatprep.subr.bf16.mxu1 %v6656_v61 }
 0x1b9   : > { %4534 = vmatpush2.bf16.msra.mxu0 %v6399_v11 }
 0x1ba   : > { %4607 = vmatpush2.bf16.msra.mxu1 %v6655_v36  ;;  %4535 = vmatprep.subr.bf16.mxu0 %v6384_v40  ;;  %v1357_v36 = vld [vmem:[%s9917_s4 + $0xb20] sm:$0xff] }
 0x1bb   : > { %4608 = vmatprep.subr.bf16.mxu1 %v6640_v37  ;;  %v1365_v40 = vld [vmem:[%s9917_s4 + $0xb60] sm:$0xff]  ;;  %v6321_v37 = vcombine.low %v1117_v59, %v1125_v32 }
 0x1bc   : > { %v6561_v16 = vcombine.low %v1357_v36, %v1365_v40  ;;  %v1069_v59 = vld [vmem:[%s9917_s4 + $0x220] sm:$0xff] }
 0x1bd   : > { %4536 = vmatpush2.bf16.msra.mxu0 %v6383_v15  ;;  %v6306_v15 = vcombine.high %v1101_v29, %v1109_v7  ;;  %v1077_v32 = vld [vmem:[%s9917_s4 + $0x260] sm:$0xff]  ;;  %v6289_v29 = vcombine.low %v1085_v13, %v1093_v12 }
 0x1be   : > { %4609 = vmatpush2.bf16.msra.mxu1 %v6639_v35  ;;  %4537 = vmatprep.subr.bf16.mxu0 %v6368_v4  ;;  %v6562_v4 = vcombine.high %v1357_v36, %v1365_v40 }
 0x1bf   : > { %4610 = vmatprep.subr.bf16.mxu1 %v6624_v41 }
 0x1c1   : > { %4538 = vmatpush2.bf16.msra.mxu0 %v6367_v0 }
 0x1c2   : > { %4611 = vmatpush2.bf16.msra.mxu1 %v6623_v55  ;;  %4539 = vmatprep.subr.bf16.mxu0 %v6352_v34  ;;  %v4107_v21 = vpop.f32.mrf.mxu0  ;;  %v1341_v34 = vld [vmem:[%s9917_s4 + $0xaa0] sm:$0xff] }
 0x1c3   : > { %4612 = vmatprep.subr.bf16.mxu1 %v6608_v1  ;;  %v4180_v61 = vpop.f32.mrf.mxu1  ;;  %v1349_v1 = vld [vmem:[%s9917_s4 + $0xae0] sm:$0xff] }
 0x1c4   : > { %v4181_v8 = vadd.f32 %v4180_v61, %v4107_v21  ;;  %v4109_v11 = vpop.f32.mrf.mxu0  ;;  %v8195_v61 = vrot.slane %v8149_v38, %v7194_v50  ;;  %v6545_v7 = vcombine.low %v1341_v34, %v1349_v1 }
 0x1c5   : > { %4540 = vmatpush2.bf16.msra.mxu0 %v6351_v54  ;;  %v4182_v45 = vpop.f32.mrf.mxu1 }
 0x1c6   : > { %4613 = vmatpush2.bf16.msra.mxu1 %v6607_v17  ;;  %4541 = vmatprep.subr.bf16.mxu0 %v6336_v31  ;;  %v4183_v42 = vadd.f32 %v4182_v45, %v4109_v11  ;;  %v4111_v35 = vpop.f32.mrf.mxu0  ;;  %v5325_v62 = vmul.f32 %v8138_v9, %v4181_v8  ;;  %v6290_v31 = vcombine.high %v1085_v13, %v1093_v12  ;;  %v8200_v45 = vld [vmem:[%s9917_s4 + $0x1a0] sm:$0xff] }
 0x1c7   : > { %4614 = vmatprep.subr.bf16.mxu1 %v6592_v58  ;;  %v4184_v41 = vpop.f32.mrf.mxu1  ;;  %v6546_v58 = vcombine.high %v1341_v34, %v1349_v1  ;;  %v6273_v13 = vcombine.low %v1069_v59, %v1077_v32 }
 0x1c8   : > { %v4185_v0 = vadd.f32 %v4184_v41, %v4111_v35  ;;  %v4113_v55 = vpop.f32.mrf.mxu0  ;;  %v5537_v56 = vadd.f32 %v8162_v14, %v5325_v62  ;;  %v5326_v21 = vmul.f32 %v8174_v10, %v4183_v42  ;;  %v1309_v62 = vld [vmem:[%s9917_s4 + $0x9a0] sm:$0xff] }
 0x1c9   : > { %4542 = vmatpush2.bf16.msra.mxu0 %v6335_v5  ;;  %v4186_v53 = vpop.f32.mrf.mxu1 }
 0x1ca   : > { %4615 = vmatpush2.bf16.msra.mxu1 %v6591_v6  ;;  %4657 = vmatprep.subr.bf16.mxu0 %v6322_v19  ;;  %v5341_v54 = vmul.f32 %v8138_v9, %v4185_v0  ;;  %v4187_v17 = vadd.f32 %v4186_v53, %v4113_v55  ;;  %v1325_v19 = vld [vmem:[%s9917_s4 + $0xa20] sm:$0xff]  ;;  %v5538_v55 = vadd.f32 %v8195_v61, %v5326_v21 }
 0x1cb   : > { %4730 = vmatprep.subr.bf16.mxu1 %v6578_v24  ;;  %v1333_v24 = vld [vmem:[%s9917_s4 + $0xa60] sm:$0xff] }
 0x1cc   : > { %4544 = vmatmul.mubr.bf16.vlgmr.msra.gmra.mxu0 %v7368_v44  ;;  %v5553_v57 = vadd.f32 %v8162_v14, %v5341_v54  ;;  %v5342_v5 = vmul.f32 %v8174_v10, %v4187_v17  ;;  %v6530_v35 = vcombine.high %v1325_v19, %v1333_v24  ;;  %v1317_v0 = vld [vmem:[%s9917_s4 + $0x9e0] sm:$0xff]  ;;  %v6529_v34 = vcombine.low %v1325_v19, %v1333_v24 }
 0x1cd   : > { %4617 = vmatmul.mubr.bf16.vlgmr.msra.gmra.mxu1 %v7370_v52  ;;  %4553 = vmatprep.mubr.bf16.mxu0 %v7424_v43  ;;  %v4117_v6 = vpop.f32.mrf.mxu0  ;;  %v1293_v24 = vld [vmem:[%s9917_s4 + $0x920] sm:$0xff] }
 0x1ce   : > { %4626 = vmatprep.mubr.bf16.mxu1 %v7434_v30  ;;  %4658 = vmatpush1.bf16.msra.mxu0 %v6321_v37  ;;  %v4190_v8 = vpop.f32.mrf.mxu1  ;;  %v5673_v11 = vmax.f32 %v5537_v56, %v5553_v57  ;;  %v6274_v37 = vcombine.high %v1069_v59, %v1077_v32  ;;  %v5554_v42 = vadd.f32 %v8195_v61, %v5342_v5  ;;  %v1301_v21 = vld [vmem:[%s9917_s4 + $0x960] sm:$0xff] }
 0x1cf   : > { %4731 = vmatpush1.bf16.msra.mxu1 %v6577_v49  ;;  %4659 = vmatprep.subr.bf16.mxu0 %v6306_v15  ;;  %v4191_v36 = vadd.f32 %v4190_v8, %v4117_v6  ;;  %v4119_v40 = vpop.f32.mrf.mxu0  ;;  %v8205_v49 = vld [vmem:[%s9917_s4 + $0x1e0] sm:$0xff]  ;;  %v6514_v56 = vcombine.high %v1309_v62, %v1317_v0 }
 0x1d0   : > { %4732 = vmatprep.subr.bf16.mxu1 %v6562_v4  ;;  %v4192_v15 = vpop.f32.mrf.mxu1  ;;  %v5686_v59 = vmax.f32 %v5538_v55, %v5554_v42 }
 0x1d1   : > { %v5357_v4 = vmul.f32 %v8138_v9, %v4191_v36  ;;  %v4193_v41 = vadd.f32 %v4192_v15, %v4119_v40  ;;  %v4121_v12 = vpop.f32.mrf.mxu0 }
 0x1d2   : > { %4660 = vmatpush1.bf16.msra.mxu0 %v6305_v33  ;;  %v4194_v1 = vpop.f32.mrf.mxu1  ;;  %v6258_v33 = vcombine.high %v8200_v45, %v8205_v49 }
 0x1d3   : > { %4733 = vmatpush1.bf16.msra.mxu1 %v6561_v16  ;;  %4661 = vmatprep.subr.bf16.mxu0 %v6290_v31  ;;  %v5569_v16 = vadd.f32 %v8162_v14, %v5357_v4  ;;  %v5358_v53 = vmul.f32 %v8174_v10, %v4193_v41  ;;  %v4195_v54 = vadd.f32 %v4194_v1, %v4121_v12  ;;  %v4123_v17 = vpop.f32.mrf.mxu0  ;;  %v8227_v31 = vld [vmem:[%s9917_s4 + $0x120] sm:$0xff] }
 0x1d4   : > { %4554 = vmatmul.mubr.bf16.gmra.mxu0 %v7430_v27  ;;  %4734 = vmatprep.subr.bf16.mxu1 %v6546_v58  ;;  %v8232_v58 = vld [vmem:[%s9917_s4 + $0x160] sm:$0xff]  ;;  %v4196_v32 = vpop.f32.mrf.mxu1  ;;  %v6498_v4 = vcombine.high %v1293_v24, %v1301_v21 }
 0x1d5   : > { %4627 = vmatmul.mubr.bf16.gmra.mxu1 %v7432_v3  ;;  %4563 = vmatprep.mubr.bf16.mxu0 %v7512_v25  ;;  %v5674_v57 = vmax.f32 %v5673_v11, %v5569_v16  ;;  %v5570_v5 = vadd.f32 %v8195_v61, %v5358_v53  ;;  %v5373_v6 = vmul.f32 %v8138_v9, %v4195_v54 }
 0x1d6   : > { %4636 = vmatprep.mubr.bf16.mxu1 %v7514_v26  ;;  %4662 = vmatpush1.bf16.msra.mxu0 %v6289_v29  ;;  %v4197_v19 = vadd.f32 %v4196_v32, %v4123_v17  ;;  %v6257_v29 = vcombine.low %v8200_v45, %v8205_v49  ;;  %v6242_v11 = vcombine.high %v8227_v31, %v8232_v58  ;;  %v1021_v45 = vld [vmem:[%s9917_s4 + $0xa0] sm:$0xff] }
 0x1d7   : > { %4735 = vmatpush1.bf16.msra.mxu1 %v6545_v7  ;;  %4663 = vmatprep.subr.bf16.mxu0 %v6274_v37  ;;  %v6513_v7 = vcombine.low %v1309_v62, %v1317_v0  ;;  %v5687_v36 = vmax.f32 %v5686_v59, %v5570_v5  ;;  %v5585_v40 = vadd.f32 %v8162_v14, %v5373_v6  ;;  %v1029_v49 = vld [vmem:[%s9917_s4 + $0xe0] sm:$0xff] }
 0x1d8   : > { %4736 = vmatprep.subr.bf16.mxu1 %v6530_v35  ;;  %v5374_v37 = vmul.f32 %v8174_v10, %v4197_v19  ;;  %v1277_v62 = vld [vmem:[%s9917_s4 + $0x8a0] sm:$0xff]  ;;  %v6241_v1 = vcombine.low %v8227_v31, %v8232_v58  ;;  %v6497_v16 = vcombine.low %v1293_v24, %v1301_v21  ;;  %v6226_v54 = vcombine.high %v1021_v45, %v1029_v49 }
 0x1d9   : > { %v4127_v8 = vpop.f32.mrf.mxu0  ;;  %v4200_v42 = vpop.f32.mrf.mxu1  ;;  %v5675_v41 = vmax.f32 %v5674_v57, %v5585_v40  ;;  %v1285_v0 = vld [vmem:[%s9917_s4 + $0x8e0] sm:$0xff]  ;;  %v6225_v21 = vcombine.low %v1021_v45, %v1029_v49 }
 0x1da   : > { %4664 = vmatpush1.bf16.msra.mxu0 %v6273_v13  ;;  %v4201_v15 = vadd.f32 %v4200_v42, %v4127_v8  ;;  %v5586_v13 = vadd.f32 %v8195_v61, %v5374_v37  ;;  %v8271_v17 = vld [vmem:[%s9917_s4 + $0x20] sm:$0xff]  ;;  %v6482_v5 = vcombine.high %v1277_v62, %v1285_v0  ;;  %v6481_v37 = vcombine.low %v1277_v62, %v1285_v0 }
 0x1db   : > { %4737 = vmatpush1.bf16.msra.mxu1 %v6529_v34  ;;  %4665 = vmatprep.subr.bf16.mxu0 %v6258_v33  ;;  %v4129_v35 = vpop.f32.mrf.mxu0  ;;  %v4202_v12 = vpop.f32.mrf.mxu1  ;;  %v1013_v31 = vld [vmem:[%s9917_s4 + $0x60] sm:$0xff] }
 0x1dc   : > { %4564 = vmatmul.mubr.bf16.gmra.mxu0 %v7516_v60  ;;  %4738 = vmatprep.subr.bf16.mxu1 %v6514_v56  ;;  %v5389_v55 = vmul.f32 %v8138_v9, %v4201_v15  ;;  %v4203_v34 = vadd.f32 %v4202_v12, %v4129_v35  ;;  %v1261_v58 = vld [vmem:[%s9917_s4 + $0x820] sm:$0xff]  ;;  %v5688_v19 = vmax.f32 %v5687_v36, %v5586_v13 }
 0x1dd   : > { %4637 = vmatmul.mubr.bf16.gmra.mxu1 %v7518_v39  ;;  %4573 = vmatprep.mubr.bf16.mxu0 %v7573_v2  ;;  %v4131_v33 = vpop.f32.mrf.mxu0  ;;  %v4204_v53 = vpop.f32.mrf.mxu1  ;;  %v1269_v6 = vld [vmem:[%s9917_s4 + $0x860] sm:$0xff]  ;;  %v6210_v15 = vcombine.high %v8271_v17, %v1013_v31  ;;  %v6209_v0 = vcombine.low %v8271_v17, %v1013_v31 }
 0x1de   : > { %4646 = vmatprep.mubr.bf16.mxu1 %v7577_v28  ;;  %4666 = vmatpush1.bf16.msra.mxu0 %v6257_v29  ;;  %v5601_v59 = vadd.f32 %v8162_v14, %v5389_v55  ;;  %v5390_v32 = vmul.f32 %v8174_v10, %v4203_v34  ;;  %v4205_v56 = vadd.f32 %v4204_v53, %v4131_v33  ;;  %v1253_v13 = vld [vmem:[%s9917_s4 + $0x7e0] sm:$0xff] }
 0x1df   : > { %4739 = vmatpush1.bf16.msra.mxu1 %v6513_v7  ;;  %4667 = vmatprep.subr.bf16.mxu0 %v6242_v11  ;;  %v4133_v57 = vpop.f32.mrf.mxu0  ;;  %v4206_v24 = vpop.f32.mrf.mxu1  ;;  %v6466_v35 = vcombine.high %v1261_v58, %v1269_v6  ;;  %v1501_v55 = vld [vmem:[%s9917_s4 + $0xfa0] sm:$0xff]  ;;  %v6465_v17 = vcombine.low %v1261_v58, %v1269_v6 }
 0x1e0   : > { %4740 = vmatprep.subr.bf16.mxu1 %v6498_v4  ;;  %v5676_v29 = vmax.f32 %v5675_v41, %v5601_v59  ;;  %v5602_v7 = vadd.f32 %v8195_v61, %v5390_v32  ;;  %v5405_v8 = vmul.f32 %v8138_v9, %v4205_v56  ;;  %v4207_v11 = vadd.f32 %v4206_v24, %v4133_v57  ;;  %v1245_v41 = vld [vmem:[%s9917_s4 + $0x7a0] sm:$0xff] }
 0x1e1   : > { %v4137_v40 = vpop.f32.mrf.mxu0  ;;  %v1509_v34 = vld [vmem:[%s9917_s4 + $0xfe0] sm:$0xff]  ;;  %v6450_v32 = vcombine.high %v1245_v41, %v1253_v13  ;;  %v6449_v58 = vcombine.low %v1245_v41, %v1253_v13 }
 0x1e2   : > { %4668 = vmatpush1.bf16.msra.mxu0 %v6241_v1  ;;  %v4210_v42 = vpop.f32.mrf.mxu1  ;;  %v5689_v4 = vmax.f32 %v5688_v19, %v5602_v7  ;;  %v5617_v36 = vadd.f32 %v8162_v14, %v5405_v8  ;;  %v5406_v45 = vmul.f32 %v8174_v10, %v4207_v11  ;;  %v6706_v31 = vcombine.high %v1501_v55, %v1509_v34  ;;  %v1229_v19 = vld [vmem:[%s9917_s4 + $0x720] sm:$0xff] }
 0x1e3   : > { %4741 = vmatpush1.bf16.msra.mxu1 %v6497_v16  ;;  %4669 = vmatprep.subr.bf16.mxu0 %v6226_v54  ;;  %v4139_v49 = vpop.f32.mrf.mxu0  ;;  %v4211_v12 = vadd.f32 %v4210_v42, %v4137_v40  ;;  %v1237_v24 = vld [vmem:[%s9917_s4 + $0x760] sm:$0xff] }
 0x1e4   : > { %4574 = vmatmul.mubr.bf16.gmra.mxu0 %v7575_v23  ;;  %4742 = vmatprep.subr.bf16.mxu1 %v6482_v5  ;;  %v4212_v62 = vpop.f32.mrf.mxu1  ;;  %v5677_v1 = vmax.f32 %v5676_v29, %v5617_v36  ;;  %v5618_v33 = vadd.f32 %v8195_v61, %v5406_v45  ;;  %v1485_v6 = vld [vmem:[%s9917_s4 + $0xf20] sm:$0xff] }
 0x1e5   : > { %4647 = vmatmul.mubr.bf16.gmra.mxu1 %v7585_v63  ;;  %4689 = vmatprep.mubr.bf16.mxu0 %v7364_v20  ;;  %v4213_v16 = vadd.f32 %v4212_v62, %v4139_v49  ;;  %v4141_v53 = vpop.f32.mrf.mxu0  ;;  %v5421_v54 = vmul.f32 %v8138_v9, %v4211_v12  ;;  %v1493_v7 = vld [vmem:[%s9917_s4 + $0xf60] sm:$0xff]  ;;  %v6433_v62 = vcombine.low %v1229_v19, %v1237_v24 }
 0x1e6   : > { %4670 = vmatpush1.bf16.msra.mxu0 %v6225_v21  ;;  %4762 = vmatprep.mubr.bf16.mxu1 %v7366_v22  ;;  %v4214_v59 = vpop.f32.mrf.mxu1  ;;  %v5690_v8 = vmax.f32 %v5689_v4, %v5618_v33  ;;  %v6690_v41 = vcombine.high %v1485_v6, %v1493_v7  ;;  %v1213_v4 = vld [vmem:[%s9917_s4 + $0x6a0] sm:$0xff] }
 0x1e7   : > { %4743 = vmatpush1.bf16.msra.mxu1 %v6481_v37  ;;  %4671 = vmatprep.subr.bf16.mxu0 %v6210_v15  ;;  %v5422_v56 = vmul.f32 %v8174_v10, %v4213_v16  ;;  %v4215_v57 = vadd.f32 %v4214_v59, %v4141_v53  ;;  %v4143_v5 = vpop.f32.mrf.mxu0  ;;  %v5633_v21 = vadd.f32 %v8162_v14, %v5421_v54  ;;  %v1469_v13 = vld [vmem:[%s9917_s4 + $0xea0] sm:$0xff] }
 0x1e8   : > { %4744 = vmatprep.subr.bf16.mxu1 %v6466_v35  ;;  %v4216_v29 = vpop.f32.mrf.mxu1  ;;  %v6705_v15 = vcombine.low %v1501_v55, %v1509_v34  ;;  %v6434_v35 = vcombine.high %v1229_v19, %v1237_v24  ;;  %v1197_v16 = vld [vmem:[%s9917_s4 + $0x620] sm:$0xff] }
 0x1e9   : > { %v5634_v11 = vadd.f32 %v8195_v61, %v5422_v56  ;;  %v5437_v40 = vmul.f32 %v8138_v9, %v4215_v57  ;;  %v4217_v37 = vadd.f32 %v4216_v29, %v4143_v5  ;;  %v5678_v42 = vmax.f32 %v5677_v1, %v5633_v21  ;;  %v1221_v9 = vld [vmem:[%s9917_s4 + $0x6e0] sm:$0xff] }
 0x1ea   : > { %4672 = vmatpush1.bf16.msra.mxu0 %v6209_v0  ;;  %v6689_v0 = vcombine.low %v1485_v6, %v1493_v7  ;;  %v6418_v55 = vcombine.high %v1213_v4, %v1221_v9  ;;  %v1205_v53 = vld [vmem:[%s9917_s4 + $0x660] sm:$0xff] }
 0x1eb   : > { %4745 = vmatpush1.bf16.msra.mxu1 %v6465_v17  ;;  %4673 = vmatprep.subr.bf16.mxu0 %v6450_v32  ;;  %v5691_v36 = vmax.f32 %v5690_v8, %v5634_v11  ;;  %v5649_v45 = vadd.f32 %v8162_v14, %v5437_v40  ;;  %v5438_v49 = vmul.f32 %v8174_v10, %v4217_v37  ;;  %v1477_v14 = vld [vmem:[%s9917_s4 + $0xee0] sm:$0xff] }
 0x1ec   : > { %4746 = vmatprep.subr.bf16.mxu1 %v6706_v31  ;;  %v6674_v33 = vcombine.high %v1469_v13, %v1477_v14  ;;  %v1461_v54 = vld [vmem:[%s9917_s4 + $0xe60] sm:$0xff]  ;;  %v6417_v32 = vcombine.low %v1213_v4, %v1221_v9  ;;  %v6673_v56 = vcombine.low %v1469_v13, %v1477_v14  ;;  %v6402_v57 = vcombine.high %v1197_v16, %v1205_v53 }
 0x1ed   : > { %v5679_v12 = vmax.f32 %v5678_v42, %v5649_v45  ;;  %v5650_v10 = vadd.f32 %v8195_v61, %v5438_v49  ;;  %v1453_v61 = vld [vmem:[%s9917_s4 + $0xe20] sm:$0xff]  ;;  %v6401_v8 = vcombine.low %v1197_v16, %v1205_v53 }
 0x1ee   : > { %4674 = vmatpush2.bf16.msra.mxu0 %v6449_v58  ;;  %v6658_v19 = vcombine.high %v1453_v61, %v1461_v54  ;;  %v1181_v24 = vld [vmem:[%s9917_s4 + $0x5a0] sm:$0xff]  ;;  %v6657_v11 = vcombine.low %v1453_v61, %v1461_v54 }
 0x1ef   : > { %4747 = vmatpush2.bf16.msra.mxu1 %v6705_v15  ;;  %4675 = vmatprep.subr.bf16.mxu0 %v6434_v35  ;;  %v5680_v34 = vrot.slane %v5679_v12, 4  ;;  %v5692_v1 = vmax.f32 %v5691_v36, %v5650_v10  ;;  %v1189_v21 = vld [vmem:[%s9917_s4 + $0x5e0] sm:$0xff] }
 0x1f0   : > { %4748 = vmatprep.subr.bf16.mxu1 %v6690_v41  ;;  %v1437_v29 = vld [vmem:[%s9917_s4 + $0xda0] sm:$0xff]  ;;  %v6386_v40 = vcombine.high %v1181_v24, %v1189_v21  ;;  %v6385_v4 = vcombine.low %v1181_v24, %v1189_v21  ;;  %v1126_v24 = vld [vmem:[%s9917_s4 + $0x3e8] sm:$0xff] }
 0x1f1   : > { %v5681_v17 = vmax.f32 %v5679_v12, %v5680_v34  ;;  %v5693_v59 = vrot.slane %v5692_v1, 4  ;;  %v1445_v58 = vld [vmem:[%s9917_s4 + $0xde0] sm:$0xff]  ;;  %v1374_v21 = vld [vmem:[%s9917_s4 + $0xba8] sm:$0xff] }
 0x1f2   : > { %4676 = vmatpush2.bf16.msra.mxu0 %v6433_v62  ;;  %v6642_v15 = vcombine.high %v1437_v29, %v1445_v58  ;;  %v1165_v35 = vld [vmem:[%s9917_s4 + $0x520] sm:$0xff]  ;;  %v6641_v9 = vcombine.low %v1437_v29, %v1445_v58  ;;  %v1382_v29 = vld [vmem:[%s9917_s4 + $0xbe8] sm:$0xff] }
 0x1f3   : > { %4749 = vmatpush2.bf16.msra.mxu1 %v6689_v0  ;;  %4677 = vmatprep.subr.bf16.mxu0 %v6418_v55  ;;  %v5682_v5 = vrot.slane %v5681_v17, 2  ;;  %v5694_v31 = vmax.f32 %v5692_v1, %v5693_v59  ;;  %v1173_v36 = vld [vmem:[%s9917_s4 + $0x560] sm:$0xff] }
 0x1f4   : > { %4750 = vmatprep.subr.bf16.mxu1 %v6674_v33  ;;  %v1421_v45 = vld [vmem:[%s9917_s4 + $0xd20] sm:$0xff]  ;;  %v6370_v13 = vcombine.high %v1165_v35, %v1173_v36  ;;  %v6369_v33 = vcombine.low %v1165_v35, %v1173_v36  ;;  %v8431_v36 = vrot.slane %v8128_v18, %v7188_v48 }
 0x1f5   : > { %v5683_v6 = vmax.f32 %v5681_v17, %v5682_v5  ;;  %v5695_v7 = vrot.slane %v5694_v31, 2  ;;  %v1429_v49 = vld [vmem:[%s9917_s4 + $0xd60] sm:$0xff] }
 0x1f6   : > { %4678 = vmatpush2.bf16.msra.mxu0 %v6417_v32  ;;  %v6626_v10 = vcombine.high %v1421_v45, %v1429_v49  ;;  %v1149_v62 = vld [vmem:[%s9917_s4 + $0x4a0] sm:$0xff]  ;;  %v6625_v16 = vcombine.low %v1421_v45, %v1429_v49 }
 0x1f7   : > { %4751 = vmatpush2.bf16.msra.mxu1 %v6673_v56  ;;  %4679 = vmatprep.subr.bf16.mxu0 %v6402_v57  ;;  %v5684_v37 = vrot.slane %v5683_v6, 1  ;;  %v5696_v42 = vmax.f32 %v5694_v31, %v5695_v7  ;;  %v1157_v0 = vld [vmem:[%s9917_s4 + $0x4e0] sm:$0xff] }
 0x1f8   : > { %4752 = vmatprep.subr.bf16.mxu1 %v6658_v19  ;;  %v1405_v55 = vld [vmem:[%s9917_s4 + $0xca0] sm:$0xff]  ;;  %v6354_v53 = vcombine.high %v1149_v62, %v1157_v0  ;;  %v6353_v56 = vcombine.low %v1149_v62, %v1157_v0  ;;  %v1118_v19 = vld [vmem:[%s9917_s4 + $0x3a8] sm:$0xff] }
 0x1f9   : > { %v5697_v41 = vrot.slane %v5696_v42, 1  ;;  %v8375_v14 = vmax.f32 %v5683_v6, %v5684_v37  ;;  %v1413_v34 = vld [vmem:[%s9917_s4 + $0xce0] sm:$0xff]  ;;  %v6324_v7 = vcombine.high %v1118_v19, %v1126_v24  ;;  %v6323_v45 = vcombine.low %v1118_v19, %v1126_v24  ;;  %v1086_v0 = vld [vmem:[%s9917_s4 + $0x2a8] sm:$0xff] }
 0x1fa   : > { %4680 = vmatpush2.bf16.msra.mxu0 %v6401_v8  ;;  %v6610_v61 = vcombine.high %v1405_v55, %v1413_v34  ;;  %v1133_v54 = vld [vmem:[%s9917_s4 + $0x420] sm:$0xff]  ;;  %v6609_v57 = vcombine.low %v1405_v55, %v1413_v34  ;;  %v6580_v8 = vcombine.high %v1374_v21, %v1382_v29  ;;  %v1094_v55 = vld [vmem:[%s9917_s4 + $0x2e8] sm:$0xff]  ;;  %v8471_v24 = vrot.slane %v8149_v38, %v7197_v51 }
 0x1fb   : > { %4753 = vmatpush2.bf16.msra.mxu1 %v6657_v11  ;;  %4681 = vmatprep.subr.bf16.mxu0 %v6386_v40  ;;  %v8377_v12 = vmax.f32 %v5696_v42, %v5697_v41  ;;  %v1141_v17 = vld [vmem:[%s9917_s4 + $0x460] sm:$0xff]  ;;  %v1102_v11 = vld [vmem:[%s9917_s4 + $0x328] sm:$0xff]  ;;  %v6579_v41 = vcombine.low %v1374_v21, %v1382_v29 }
 0x1fc   : > { %4754 = vmatprep.subr.bf16.mxu1 %v6642_v15  ;;  %v1389_v59 = vld [vmem:[%s9917_s4 + $0xc20] sm:$0xff]  ;;  %v6338_v5 = vcombine.high %v1133_v54, %v1141_v17  ;;  %v6337_v58 = vcombine.low %v1133_v54, %v1141_v17  ;;  %v1110_v40 = vld [vmem:[%s9917_s4 + $0x368] sm:$0xff] }
 0x1fd   : > { %v5897_v1 = vcombine.low %v8375_v14, %v8377_v12  ;;  %v1397_v32 = vld [vmem:[%s9917_s4 + $0xc60] sm:$0xff]  ;;  %v1358_v42 = vld [vmem:[%s9917_s4 + $0xb28] sm:$0xff]  ;;  %v6307_v17 = vcombine.low %v1102_v11, %v1110_v40  ;;  %v8924_v14 = vsub.s32 4, %v7182_v46 }
 0x1fe   : > { %4682 = vmatpush2.bf16.msra.mxu0 %v6385_v4  ;;  %v6594_v31 = vcombine.high %v1389_v59, %v1397_v32  ;;  %v6593_v6 = vcombine.low %v1389_v59, %v1397_v32  ;;  %v1366_v15 = vld [vmem:[%s9917_s4 + $0xb68] sm:$0xff] }
 0x1ff   : > { %4755 = vmatpush2.bf16.msra.mxu1 %v6641_v9  ;;  %4683 = vmatprep.subr.bf16.mxu0 %v6370_v13  ;;  %v6308_v9 = vcombine.high %v1102_v11, %v1110_v40  ;;  %v6564_v62 = vcombine.high %v1358_v42, %v1366_v15  ;;  %v6563_v32 = vcombine.low %v1358_v42, %v1366_v15  ;;  %v1334_v11 = vld [vmem:[%s9917_s4 + $0xa68] sm:$0xff] }
 0x200   : > { %4756 = vmatprep.subr.bf16.mxu1 %v6626_v10  ;;  %v8436_v10 = vrot.slane %v8128_v18, %v7197_v51  ;;  %v1342_v18 = vld [vmem:[%s9917_s4 + $0xaa8] sm:$0xff]  ;;  %10009 = vst [vmem:[#allocation25_spill] sm:$0xff] %v8924_v14  ;;  %v8949_v51 = vld [vmem:[%s9917_s4 + $0x570] sm:$0xff] }
 0x201   : > { %v1390_v12 = vld [vmem:[%s9917_s4 + $0xc28] sm:$0xff] }
 0x202   : > { %4684 = vmatpush2.bf16.msra.mxu0 %v6369_v33 }
 0x203   : > { %4757 = vmatpush2.bf16.msra.mxu1 %v6625_v16  ;;  %4685 = vmatprep.subr.bf16.mxu0 %v6354_v53  ;;  %v1350_v16 = vld [vmem:[%s9917_s4 + $0xae8] sm:$0xff] }
 0x204   : > { %4758 = vmatprep.subr.bf16.mxu1 %v6610_v61  ;;  %v8455_v61 = vrot.slane %v8149_v38, %v7188_v48  ;;  %v6548_v29 = vcombine.high %v1342_v18, %v1350_v16  ;;  %v6547_v42 = vcombine.low %v1342_v18, %v1350_v16 }
 0x206   : > { %4686 = vmatpush2.bf16.msra.mxu0 %v6353_v56 }
 0x207   : > { %4759 = vmatpush2.bf16.msra.mxu1 %v6609_v57  ;;  %4687 = vmatprep.subr.bf16.mxu0 %v6338_v5  ;;  %v6292_v57 = vcombine.high %v1086_v0, %v1094_v55  ;;  %v8461_v5 = vld [vmem:[%s9917_s4 + $0x228] sm:$0xff] }
 0x208   : > { %4760 = vmatprep.subr.bf16.mxu1 %v6594_v31  ;;  %v8466_v31 = vld [vmem:[%s9917_s4 + $0x268] sm:$0xff] }
 0x209   : > { %v6276_v15 = vcombine.high %v8461_v5, %v8466_v31 }
 0x20a   : > { %4688 = vmatpush2.bf16.msra.mxu0 %v6337_v58  ;;  %v4326_v35 = vpop.f32.mrf.mxu1 }
 0x20b   : > { %v4253_v37 = vpop.f32.mrf.mxu0  ;;  %4761 = vmatpush2.bf16.msra.mxu1 %v6593_v6  ;;  %4803 = vmatprep.subr.bf16.mxu0 %v6324_v7 }
 0x20c   : > { %v4327_v49 = vadd.f32 %v4326_v35, %v4253_v37  ;;  %4876 = vmatprep.subr.bf16.mxu1 %v6580_v8  ;;  %v4328_v13 = vpop.f32.mrf.mxu1  ;;  %v1326_v8 = vld [vmem:[%s9917_s4 + $0xa28] sm:$0xff]  ;;  %v6291_v37 = vcombine.low %v1086_v0, %v1094_v55  ;;  %v6275_v0 = vcombine.low %v8461_v5, %v8466_v31 }
 0x20d   : > { %v4255_v4 = vpop.f32.mrf.mxu0  ;;  %4690 = vmatmul.mubr.bf16.vlgmr.msra.gmra.mxu0 %v7368_v44  ;;  %v6532_v55 = vcombine.high %v1326_v8, %v1334_v11 }
 0x20e   : > { %4763 = vmatmul.mubr.bf16.vlgmr.msra.gmra.mxu1 %v7370_v52  ;;  %4699 = vmatprep.mubr.bf16.mxu0 %v7424_v43  ;;  %v4329_v34 = vadd.f32 %v4328_v13, %v4255_v4  ;;  %v5327_v53 = vmul.f32 %v8431_v36, %v4327_v49  ;;  %v4330_v54 = vpop.f32.mrf.mxu1  ;;  %v8488_v4 = vld [vmem:[%s9917_s4 + $0x1a8] sm:$0xff] }
 0x20f   : > { %v4257_v33 = vpop.f32.mrf.mxu0  ;;  %4772 = vmatprep.mubr.bf16.mxu1 %v7434_v30  ;;  %4804 = vmatpush1.bf16.msra.mxu0 %v6323_v45 }
 0x210   : > { %4877 = vmatpush1.bf16.msra.mxu1 %v6579_v41  ;;  %v4331_v59 = vadd.f32 %v4330_v54, %v4257_v33  ;;  %4805 = vmatprep.subr.bf16.mxu0 %v6308_v9  ;;  %v5328_v19 = vmul.f32 %v8436_v10, %v4329_v34  ;;  %v4332_v21 = vpop.f32.mrf.mxu1  ;;  %v5539_v40 = vadd.f32 %v8455_v61, %v5327_v53  ;;  %v8493_v9 = vld [vmem:[%s9917_s4 + $0x1e8] sm:$0xff] }
 0x211   : > { %v4259_v56 = vpop.f32.mrf.mxu0  ;;  %4878 = vmatprep.subr.bf16.mxu1 %v6564_v62  ;;  %v1310_v53 = vld [vmem:[%s9917_s4 + $0x9a8] sm:$0xff] }
 0x212   : > { %v5343_v58 = vmul.f32 %v8431_v36, %v4331_v59  ;;  %v4333_v6 = vadd.f32 %v4332_v21, %v4259_v56  ;;  %v4336_v38 = vpop.f32.mrf.mxu1  ;;  %v5540_v13 = vadd.f32 %v8471_v24, %v5328_v19  ;;  %v1318_v54 = vld [vmem:[%s9917_s4 + $0x9e8] sm:$0xff]  ;;  %v6260_v56 = vcombine.high %v8488_v4, %v8493_v9 }
 0x213   : > { %v4263_v7 = vpop.f32.mrf.mxu0  ;;  %4806 = vmatpush1.bf16.msra.mxu0 %v6307_v17  ;;  %v8516_v21 = vld [vmem:[%s9917_s4 + $0x128] sm:$0xff] }
 0x214   : > { %v5555_v35 = vadd.f32 %v8455_v61, %v5343_v58  ;;  %4879 = vmatpush1.bf16.msra.mxu1 %v6563_v32  ;;  %v5344_v45 = vmul.f32 %v8436_v10, %v4333_v6  ;;  %v4337_v49 = vadd.f32 %v4336_v38, %v4263_v7  ;;  %4807 = vmatprep.subr.bf16.mxu0 %v6292_v57  ;;  %v4338_v62 = vpop.f32.mrf.mxu1 }
 0x215   : > { %v4265_v41 = vpop.f32.mrf.mxu0  ;;  %4700 = vmatmul.mubr.bf16.gmra.mxu0 %v7430_v27  ;;  %4880 = vmatprep.subr.bf16.mxu1 %v6548_v29  ;;  %v6531_v32 = vcombine.low %v1326_v8, %v1334_v11  ;;  %v8521_v29 = vld [vmem:[%s9917_s4 + $0x168] sm:$0xff]  ;;  %v6516_v7 = vcombine.high %v1310_v53, %v1318_v54 }
 0x216   : > { %v5699_v34 = vmax.f32 %v5539_v40, %v5555_v35  ;;  %v5556_v33 = vadd.f32 %v8471_v24, %v5344_v45  ;;  %v5359_v18 = vmul.f32 %v8431_v36, %v4337_v49  ;;  %4773 = vmatmul.mubr.bf16.gmra.mxu1 %v7432_v3  ;;  %4709 = vmatprep.mubr.bf16.mxu0 %v7512_v25  ;;  %v4340_v59 = vpop.f32.mrf.mxu1 }
 0x217   : > { %v4267_v16 = vpop.f32.mrf.mxu0  ;;  %4782 = vmatprep.mubr.bf16.mxu1 %v7514_v26  ;;  %4808 = vmatpush1.bf16.msra.mxu0 %v6291_v37  ;;  %v4339_v17 = vadd.f32 %v4338_v62, %v4265_v41  ;;  %v1294_v37 = vld [vmem:[%s9917_s4 + $0x928] sm:$0xff]  ;;  %v6259_v45 = vcombine.low %v8488_v4, %v8493_v9  ;;  %v6515_v49 = vcombine.low %v1310_v53, %v1318_v54 }
 0x218   : > { %v5712_v57 = vmax.f32 %v5540_v13, %v5556_v33  ;;  %v5571_v5 = vadd.f32 %v8455_v61, %v5359_v18  ;;  %4881 = vmatpush1.bf16.msra.mxu1 %v6547_v42  ;;  %v4341_v31 = vadd.f32 %v4340_v59, %v4267_v16  ;;  %4809 = vmatprep.subr.bf16.mxu0 %v6276_v15  ;;  %v4342_v6 = vpop.f32.mrf.mxu1  ;;  %v1302_v42 = vld [vmem:[%s9917_s4 + $0x968] sm:$0xff] }
 0x219   : > { %v4269_v19 = vpop.f32.mrf.mxu0  ;;  %v5360_v58 = vmul.f32 %v8436_v10, %v4339_v17  ;;  %4882 = vmatprep.subr.bf16.mxu1 %v6532_v55  ;;  %v6244_v41 = vcombine.high %v8516_v21, %v8521_v29  ;;  %v8546_v4 = vld [vmem:[%s9917_s4 + $0xe8] sm:$0xff]  ;;  %v6243_v18 = vcombine.low %v8516_v21, %v8521_v29  ;;  %v6500_v16 = vcombine.high %v1294_v37, %v1302_v42 }
 0x21a   : > { %v5700_v8 = vmax.f32 %v5699_v34, %v5571_v5  ;;  %v5375_v11 = vmul.f32 %v8431_v36, %v4341_v31  ;;  %v4343_v40 = vadd.f32 %v4342_v6, %v4269_v19  ;;  %v4346_v35 = vpop.f32.mrf.mxu1  ;;  %v6499_v31 = vcombine.low %v1294_v37, %v1302_v42 }
 0x21b   : > { %v4273_v38 = vpop.f32.mrf.mxu0  ;;  %v5572_v15 = vadd.f32 %v8471_v24, %v5360_v58  ;;  %4810 = vmatpush1.bf16.msra.mxu0 %v6275_v0  ;;  %v8541_v0 = vld [vmem:[%s9917_s4 + $0xa8] sm:$0xff] }
 0x21c   : > { %v5587_v13 = vadd.f32 %v8455_v61, %v5375_v11  ;;  %4883 = vmatpush1.bf16.msra.mxu1 %v6531_v32  ;;  %v5376_v62 = vmul.f32 %v8436_v10, %v4343_v40  ;;  %v4347_v55 = vadd.f32 %v4346_v35, %v4273_v38  ;;  %4811 = vmatprep.subr.bf16.mxu0 %v6260_v56  ;;  %v4348_v33 = vpop.f32.mrf.mxu1  ;;  %v1278_v32 = vld [vmem:[%s9917_s4 + $0x8a8] sm:$0xff] }
 0x21d   : > { %v4275_v34 = vpop.f32.mrf.mxu0  ;;  %v5713_v9 = vmax.f32 %v5712_v57, %v5572_v15  ;;  %4710 = vmatmul.mubr.bf16.gmra.mxu0 %v7516_v60  ;;  %4884 = vmatprep.subr.bf16.mxu1 %v6516_v7  ;;  %v1286_v56 = vld [vmem:[%s9917_s4 + $0x8e8] sm:$0xff]  ;;  %v6228_v19 = vcombine.high %v8541_v0, %v8546_v4 }
 0x21e   : > { %v5701_v53 = vmax.f32 %v5700_v8, %v5587_v13  ;;  %v5588_v54 = vadd.f32 %v8471_v24, %v5376_v62  ;;  %v5391_v17 = vmul.f32 %v8431_v36, %v4347_v55  ;;  %4783 = vmatmul.mubr.bf16.gmra.mxu1 %v7518_v39  ;;  %4719 = vmatprep.mubr.bf16.mxu0 %v7573_v2  ;;  %v4350_v5 = vpop.f32.mrf.mxu1  ;;  %v8568_v7 = vld [vmem:[%s9917_s4 + $0x28] sm:$0xff] }
 0x21f   : > { %v4277_v59 = vpop.f32.mrf.mxu0  ;;  %4792 = vmatprep.mubr.bf16.mxu1 %v7577_v28  ;;  %4812 = vmatpush1.bf16.msra.mxu0 %v6259_v45  ;;  %v4349_v57 = vadd.f32 %v4348_v33, %v4275_v34  ;;  %v8573_v8 = vld [vmem:[%s9917_s4 + $0x68] sm:$0xff]  ;;  %v6484_v38 = vcombine.high %v1278_v32, %v1286_v56  ;;  %v6227_v62 = vcombine.low %v8541_v0, %v8546_v4 }
 0x220   : > { %v5714_v21 = vmax.f32 %v5713_v9, %v5588_v54  ;;  %v5603_v29 = vadd.f32 %v8455_v61, %v5391_v17  ;;  %4885 = vmatpush1.bf16.msra.mxu1 %v6515_v49  ;;  %v4351_v58 = vadd.f32 %v4350_v5, %v4277_v59  ;;  %4813 = vmatprep.subr.bf16.mxu0 %v6244_v41  ;;  %v4352_v40 = vpop.f32.mrf.mxu1  ;;  %v1262_v45 = vld [vmem:[%s9917_s4 + $0x828] sm:$0xff] }
 0x221   : > { %v4279_v6 = vpop.f32.mrf.mxu0  ;;  %v5392_v11 = vmul.f32 %v8436_v10, %v4349_v57  ;;  %4886 = vmatprep.subr.bf16.mxu1 %v6500_v16  ;;  %v1270_v49 = vld [vmem:[%s9917_s4 + $0x868] sm:$0xff]  ;;  %v6483_v55 = vcombine.low %v1278_v32, %v1286_v56  ;;  %v6212_v34 = vcombine.high %v8568_v7, %v8573_v8  ;;  %v6211_v17 = vcombine.low %v8568_v7, %v8573_v8 }
 0x222   : > { %v5702_v37 = vmax.f32 %v5701_v53, %v5603_v29  ;;  %v5407_v42 = vmul.f32 %v8431_v36, %v4351_v58  ;;  %v4353_v15 = vadd.f32 %v4352_v40, %v4279_v6  ;;  %v4356_v13 = vpop.f32.mrf.mxu1  ;;  %v1254_v0 = vld [vmem:[%s9917_s4 + $0x7e8] sm:$0xff]  ;;  %v6468_v59 = vcombine.high %v1262_v45, %v1270_v49 }
 0x223   : > { %v4283_v35 = vpop.f32.mrf.mxu0  ;;  %v5604_v41 = vadd.f32 %v8471_v24, %v5392_v11  ;;  %4814 = vmatpush1.bf16.msra.mxu0 %v6243_v18  ;;  %v1246_v18 = vld [vmem:[%s9917_s4 + $0x7a8] sm:$0xff]  ;;  %v6467_v58 = vcombine.low %v1262_v45, %v1270_v49 }
 0x224   : > { %v5619_v9 = vadd.f32 %v8455_v61, %v5407_v42  ;;  %4887 = vmatpush1.bf16.msra.mxu1 %v6499_v31  ;;  %v5408_v33 = vmul.f32 %v8436_v10, %v4353_v15  ;;  %v4357_v16 = vadd.f32 %v4356_v13, %v4283_v35  ;;  %4815 = vmatprep.subr.bf16.mxu0 %v6228_v19  ;;  %v4358_v54 = vpop.f32.mrf.mxu1  ;;  %v1502_v31 = vld [vmem:[%s9917_s4 + $0xfa8] sm:$0xff] }
 0x225   : > { %v4285_v53 = vpop.f32.mrf.mxu0  ;;  %v5715_v4 = vmax.f32 %v5714_v21, %v5604_v41  ;;  %4720 = vmatmul.mubr.bf16.gmra.mxu0 %v7575_v23  ;;  %4888 = vmatprep.subr.bf16.mxu1 %v6484_v38  ;;  %v1510_v19 = vld [vmem:[%s9917_s4 + $0xfe8] sm:$0xff]  ;;  %v6452_v6 = vcombine.high %v1246_v18, %v1254_v0 }
 0x226   : > { %v5703_v32 = vmax.f32 %v5702_v37, %v5619_v9  ;;  %v5620_v56 = vadd.f32 %v8471_v24, %v5408_v33  ;;  %v5423_v57 = vmul.f32 %v8431_v36, %v4357_v16  ;;  %4793 = vmatmul.mubr.bf16.gmra.mxu1 %v7585_v63  ;;  %4835 = vmatprep.mubr.bf16.mxu0 %v7364_v20  ;;  %v4360_v29 = vpop.f32.mrf.mxu1  ;;  %v1230_v15 = vld [vmem:[%s9917_s4 + $0x728] sm:$0xff] }
 0x227   : > { %v4287_v5 = vpop.f32.mrf.mxu0  ;;  %4816 = vmatpush1.bf16.msra.mxu0 %v6227_v62  ;;  %4908 = vmatprep.mubr.bf16.mxu1 %v7366_v22  ;;  %v4359_v21 = vadd.f32 %v4358_v54, %v4285_v53  ;;  %v6708_v42 = vcombine.high %v1502_v31, %v1510_v19  ;;  %v1238_v35 = vld [vmem:[%s9917_s4 + $0x768] sm:$0xff]  ;;  %v6707_v9 = vcombine.low %v1502_v31, %v1510_v19 }
 0x228   : > { %v5716_v7 = vmax.f32 %v5715_v4, %v5620_v56  ;;  %v5635_v8 = vadd.f32 %v8455_v61, %v5423_v57  ;;  %4889 = vmatpush1.bf16.msra.mxu1 %v6483_v55  ;;  %v4361_v11 = vadd.f32 %v4360_v29, %v4287_v5  ;;  %4817 = vmatprep.subr.bf16.mxu0 %v6212_v34  ;;  %v4362_v37 = vpop.f32.mrf.mxu1  ;;  %v1486_v13 = vld [vmem:[%s9917_s4 + $0xf28] sm:$0xff] }
 0x229   : > { %v4289_v40 = vpop.f32.mrf.mxu0  ;;  %v5424_v38 = vmul.f32 %v8436_v10, %v4359_v21  ;;  %4890 = vmatprep.subr.bf16.mxu1 %v6468_v59  ;;  %v1494_v62 = vld [vmem:[%s9917_s4 + $0xf68] sm:$0xff]  ;;  %v6451_v34 = vcombine.low %v1246_v18, %v1254_v0  ;;  %v6435_v59 = vcombine.low %v1230_v15, %v1238_v35 }
 0x22a   : > { %v5704_v45 = vmax.f32 %v5703_v32, %v5635_v8  ;;  %v5439_v49 = vmul.f32 %v8431_v36, %v4361_v11  ;;  %v4363_v41 = vadd.f32 %v4362_v37, %v4289_v40  ;;  %v6436_v36 = vcombine.high %v1230_v15, %v1238_v35  ;;  %v1214_v54 = vld [vmem:[%s9917_s4 + $0x6a8] sm:$0xff] }
 0x22b   : > { %v5636_v55 = vadd.f32 %v8471_v24, %v5424_v38  ;;  %4818 = vmatpush1.bf16.msra.mxu0 %v6211_v17  ;;  %v6692_v4 = vcombine.high %v1486_v13, %v1494_v62  ;;  %v1222_v17 = vld [vmem:[%s9917_s4 + $0x6e8] sm:$0xff]  ;;  %v6691_v57 = vcombine.low %v1486_v13, %v1494_v62 }
 0x22c   : > { %v5651_v33 = vadd.f32 %v8455_v61, %v5439_v49  ;;  %4891 = vmatpush1.bf16.msra.mxu1 %v6467_v58  ;;  %v5440_v16 = vmul.f32 %v8436_v10, %v4363_v41  ;;  %4819 = vmatprep.subr.bf16.mxu0 %v6452_v6  ;;  %v1470_v10 = vld [vmem:[%s9917_s4 + $0xea8] sm:$0xff]  ;;  %v6420_v5 = vcombine.high %v1214_v54, %v1222_v17 }
 0x22d   : > { %v5717_v53 = vmax.f32 %v5716_v7, %v5636_v55  ;;  %4892 = vmatprep.subr.bf16.mxu1 %v6708_v42  ;;  %v1478_v61 = vld [vmem:[%s9917_s4 + $0xee8] sm:$0xff]  ;;  %v6840_v7 = vmov 1966171168   ;;  %v6419_v11 = vcombine.low %v1214_v54, %v1222_v17 }
 0x22e   : > { %v5705_v18 = vmax.f32 %v5704_v45, %v5651_v33  ;;  %v5652_v0 = vadd.f32 %v8471_v24, %v5440_v16  ;;  %v6676_v31 = vcombine.high %v1470_v10, %v1478_v61  ;;  %v1198_v24 = vld [vmem:[%s9917_s4 + $0x628] sm:$0xff]  ;;  %v5902_v8 = vunpack.c.l.s4 %v6840_v7 }
 0x22f   : > { %4820 = vmatpush2.bf16.msra.mxu0 %v6451_v34  ;;  %v1206_v19 = vld [vmem:[%s9917_s4 + $0x668] sm:$0xff]  ;;  %v6675_v37 = vcombine.low %v1470_v10, %v1478_v61 }
 0x230   : > { %v5706_v32 = vrot.slane %v5705_v18, 4  ;;  %v5718_v56 = vmax.f32 %v5717_v53, %v5652_v0  ;;  %4893 = vmatpush2.bf16.msra.mxu1 %v6707_v9  ;;  %4821 = vmatprep.subr.bf16.mxu0 %v6436_v36  ;;  %v1454_v58 = vld [vmem:[%s9917_s4 + $0xe28] sm:$0xff]  ;;  %v6404_v42 = vcombine.high %v1198_v24, %v1206_v19  ;;  %v5903_v55 = vunpack.c.0.s8 %v5902_v8 }
 0x231   : > { %4894 = vmatprep.subr.bf16.mxu1 %v6692_v4  ;;  %v1462_v6 = vld [vmem:[%s9917_s4 + $0xe68] sm:$0xff]  ;;  %v6403_v34 = vcombine.low %v1198_v24, %v1206_v19 }
 0x232   : > { %v5707_v21 = vmax.f32 %v5705_v18, %v5706_v32  ;;  %v5719_v29 = vrot.slane %v5718_v56, 4  ;;  %v6660_v15 = vcombine.high %v1454_v58, %v1462_v6  ;;  %v1182_v35 = vld [vmem:[%s9917_s4 + $0x5a8] sm:$0xff]  ;;  %v6659_v16 = vcombine.low %v1454_v58, %v1462_v6 }
 0x233   : > { %4822 = vmatpush2.bf16.msra.mxu0 %v6435_v59  ;;  %v1190_v45 = vld [vmem:[%s9917_s4 + $0x5e8] sm:$0xff]  ;;  %v8678_v10 = vsub.s32 %v5903_v55, %v7182_v46 }
 0x234   : > { %v5708_v40 = vrot.slane %v5707_v21, 2  ;;  %v5720_v38 = vmax.f32 %v5718_v56, %v5719_v29  ;;  %4895 = vmatpush2.bf16.msra.mxu1 %v6691_v57  ;;  %4823 = vmatprep.subr.bf16.mxu0 %v6420_v5  ;;  %v1438_v13 = vld [vmem:[%s9917_s4 + $0xda8] sm:$0xff]  ;;  %v6388_v36 = vcombine.high %v1182_v35, %v1190_v45  ;;  %v6387_v61 = vcombine.low %v1182_v35, %v1190_v45 }
 0x235   : > { %4896 = vmatprep.subr.bf16.mxu1 %v6676_v31  ;;  %v1446_v62 = vld [vmem:[%s9917_s4 + $0xde8] sm:$0xff]  ;;  %10005 = vst [vmem:[#allocation21_spill] sm:$0xff] %v8678_v10  ;;  %v8696_v7 = vrot.slane %v5897_v1, %v8678_v10 }
 0x236   : > { %v5709_v49 = vmax.f32 %v5707_v21, %v5708_v40  ;;  %v5721_v41 = vrot.slane %v5720_v38, 2  ;;  %v6644_v53 = vcombine.high %v1438_v13, %v1446_v62  ;;  %v1166_v4 = vld [vmem:[%s9917_s4 + $0x528] sm:$0xff]  ;;  %v6643_v59 = vcombine.low %v1438_v13, %v1446_v62  ;;  %v1375_v13 = vld [vmem:[%s9917_s4 + $0xbb0] sm:$0xff] }
 0x237   : > { %4824 = vmatpush2.bf16.msra.mxu0 %v6419_v11  ;;  %v1174_v54 = vld [vmem:[%s9917_s4 + $0x568] sm:$0xff]  ;;  %10006 = vst [vmem:[#allocation22_spill] sm:$0xff] %v8696_v7  ;;  %v1383_v62 = vld [vmem:[%s9917_s4 + $0xbf0] sm:$0xff] }
 0x238   : > { %v5710_v9 = vrot.slane %v5709_v49, 1  ;;  %v5722_v33 = vmax.f32 %v5720_v38, %v5721_v41  ;;  %4897 = vmatpush2.bf16.msra.mxu1 %v6675_v37  ;;  %4825 = vmatprep.subr.bf16.mxu0 %v6404_v42  ;;  %v1422_v18 = vld [vmem:[%s9917_s4 + $0xd28] sm:$0xff]  ;;  %v6372_v57 = vcombine.high %v1166_v4, %v1174_v54  ;;  %v6371_v58 = vcombine.low %v1166_v4, %v1174_v54  ;;  %v1127_v41 = vld [vmem:[%s9917_s4 + $0x3f0] sm:$0xff] }
 0x239   : > { %4898 = vmatprep.subr.bf16.mxu1 %v6660_v15  ;;  %v1430_v0 = vld [vmem:[%s9917_s4 + $0xd68] sm:$0xff]  ;;  %v1367_v4 = vld [vmem:[%s9917_s4 + $0xb70] sm:$0xff] }
 0x23a   : > { %v5723_v17 = vrot.slane %v5722_v33, 1  ;;  %v5711_v32 = vmax.f32 %v5709_v49, %v5710_v9  ;;  %v6628_v5 = vcombine.high %v1422_v18, %v1430_v0  ;;  %v1150_v31 = vld [vmem:[%s9917_s4 + $0x4a8] sm:$0xff]  ;;  %v6627_v6 = vcombine.low %v1422_v18, %v1430_v0  ;;  %v1119_v49 = vld [vmem:[%s9917_s4 + $0x3b0] sm:$0xff] }
 0x23b   : > { %4826 = vmatpush2.bf16.msra.mxu0 %v6403_v34  ;;  %v1158_v24 = vld [vmem:[%s9917_s4 + $0x4e8] sm:$0xff]  ;;  %v6326_v9 = vcombine.high %v1119_v49, %v1127_v41  ;;  %v6325_v54 = vcombine.low %v1119_v49, %v1127_v41  ;;  %v1311_v41 = vld [vmem:[%s9917_s4 + $0x9b0] sm:$0xff] }
 0x23c   : > { %v5724_v56 = vmax.f32 %v5722_v33, %v5723_v17  ;;  %4899 = vmatpush2.bf16.msra.mxu1 %v6659_v16  ;;  %4827 = vmatprep.subr.bf16.mxu0 %v6388_v36  ;;  %v1406_v21 = vld [vmem:[%s9917_s4 + $0xca8] sm:$0xff]  ;;  %v6356_v11 = vcombine.high %v1150_v31, %v1158_v24  ;;  %v6355_v42 = vcombine.low %v1150_v31, %v1158_v24  ;;  %v1103_v16 = vld [vmem:[%s9917_s4 + $0x330] sm:$0xff] }
 0x23d   : > { %4900 = vmatprep.subr.bf16.mxu1 %v6644_v53  ;;  %v1414_v29 = vld [vmem:[%s9917_s4 + $0xce8] sm:$0xff]  ;;  %v6582_v33 = vcombine.high %v1375_v13, %v1383_v62  ;;  %v1111_v36 = vld [vmem:[%s9917_s4 + $0x370] sm:$0xff]  ;;  %v6581_v17 = vcombine.low %v1375_v13, %v1383_v62 }
 0x23e   : > { %v5898_v19 = vcombine.low %v5711_v32, %v5724_v56  ;;  %v6612_v40 = vcombine.high %v1406_v21, %v1414_v29  ;;  %v1134_v38 = vld [vmem:[%s9917_s4 + $0x428] sm:$0xff]  ;;  %v6611_v15 = vcombine.low %v1406_v21, %v1414_v29  ;;  %v1359_v53 = vld [vmem:[%s9917_s4 + $0xb30] sm:$0xff]  ;;  %v6310_v18 = vcombine.high %v1103_v16, %v1111_v36 }
 0x23f   : > { %4828 = vmatpush2.bf16.msra.mxu0 %v6387_v61  ;;  %v1142_v37 = vld [vmem:[%s9917_s4 + $0x468] sm:$0xff]  ;;  %v6566_v61 = vcombine.high %v1359_v53, %v1367_v4  ;;  %v1095_v32 = vld [vmem:[%s9917_s4 + $0x2f0] sm:$0xff]  ;;  %v6309_v31 = vcombine.low %v1103_v16, %v1111_v36  ;;  %v6565_v24 = vcombine.low %v1359_v53, %v1367_v4 }
 0x240   : > { %v8699_v8 = vrot.slane %v5898_v19, %v8678_v10  ;;  %4901 = vmatpush2.bf16.msra.mxu1 %v6643_v59  ;;  %4829 = vmatprep.subr.bf16.mxu0 %v6372_v57  ;;  %v1398_v1 = vld [vmem:[%s9917_s4 + $0xc68] sm:$0xff]  ;;  %v6340_v35 = vcombine.high %v1134_v38, %v1142_v37  ;;  %v6339_v55 = vcombine.low %v1134_v38, %v1142_v37  ;;  %v1087_v59 = vld [vmem:[%s9917_s4 + $0x2b0] sm:$0xff] }
 0x241   : > { %4902 = vmatprep.subr.bf16.mxu1 %v6628_v5  ;;  %v6596_v45 = vcombine.high %v1390_v12, %v1398_v1  ;;  %v6595_v34 = vcombine.low %v1390_v12, %v1398_v1  ;;  %v1343_v57 = vld [vmem:[%s9917_s4 + $0xab0] sm:$0xff]  ;;  %v6294_v19 = vcombine.high %v1087_v59, %v1095_v32  ;;  %v6293_v37 = vcombine.low %v1087_v59, %v1095_v32 }
 0x242   : > { %10007 = vst [vmem:[#allocation23_spill] sm:$0xff] %v8699_v8  ;;  %v1351_v5 = vld [vmem:[%s9917_s4 + $0xaf0] sm:$0xff] }
 0x243   : > { %4830 = vmatpush2.bf16.msra.mxu0 %v6371_v58  ;;  %v6550_v29 = vcombine.high %v1343_v57, %v1351_v5  ;;  %v1071_v58 = vld [vmem:[%s9917_s4 + $0x230] sm:$0xff]  ;;  %v6549_v12 = vcombine.low %v1343_v57, %v1351_v5 }
 0x244   : > { %4903 = vmatpush2.bf16.msra.mxu1 %v6627_v6  ;;  %4831 = vmatprep.subr.bf16.mxu0 %v6356_v11  ;;  %v1079_v6 = vld [vmem:[%s9917_s4 + $0x270] sm:$0xff] }
 0x245   : > { %4904 = vmatprep.subr.bf16.mxu1 %v6612_v40  ;;  %v1327_v40 = vld [vmem:[%s9917_s4 + $0xa30] sm:$0xff]  ;;  %v6278_v1 = vcombine.high %v1071_v58, %v1079_v6  ;;  %v6277_v62 = vcombine.low %v1071_v58, %v1079_v6 }
 0x246   : > { %v1335_v38 = vld [vmem:[%s9917_s4 + $0xa70] sm:$0xff] }
 0x247   : > { %4832 = vmatpush2.bf16.msra.mxu0 %v6355_v42  ;;  %v1319_v13 = vld [vmem:[%s9917_s4 + $0x9f0] sm:$0xff] }
 0x248   : > { %4905 = vmatpush2.bf16.msra.mxu1 %v6611_v15  ;;  %4833 = vmatprep.subr.bf16.mxu0 %v6340_v35  ;;  %v6534_v15 = vcombine.high %v1327_v40, %v1335_v38  ;;  %v1055_v35 = vld [vmem:[%s9917_s4 + $0x1b0] sm:$0xff] }
 0x249   : > { %4906 = vmatprep.subr.bf16.mxu1 %v6596_v45  ;;  %v1063_v45 = vld [vmem:[%s9917_s4 + $0x1f0] sm:$0xff] }
 0x24a   : > { %v1039_v16 = vld [vmem:[%s9917_s4 + $0x130] sm:$0xff] }
 0x24b   : > { %4834 = vmatpush2.bf16.msra.mxu0 %v6339_v55  ;;  %v8739_v0 = vpop.f32.mrf.mxu0  ;;  %v6533_v55 = vcombine.low %v1327_v40, %v1335_v38  ;;  %v1047_v36 = vld [vmem:[%s9917_s4 + $0x170] sm:$0xff] }
 0x24c   : > { %4907 = vmatpush2.bf16.msra.mxu1 %v6595_v34  ;;  %4949 = vmatprep.subr.bf16.mxu0 %v6326_v9  ;;  %v8748_v56 = vpop.f32.mrf.mxu1  ;;  %v6262_v34 = vcombine.high %v1055_v35, %v1063_v45  ;;  %v1295_v4 = vld [vmem:[%s9917_s4 + $0x930] sm:$0xff] }
 0x24d   : > { %5022 = vmatprep.subr.bf16.mxu1 %v6582_v33  ;;  %v8759_v21 = vpop.f32.mrf.mxu0  ;;  %v6518_v33 = vcombine.high %v1311_v41, %v1319_v13  ;;  %v1023_v57 = vld [vmem:[%s9917_s4 + $0xb0] sm:$0xff] }
 0x24e   : > { %4836 = vmatmul.mubr.bf16.vlgmr.msra.gmra.mxu0 %v7368_v44  ;;  %v8767_v11 = vpop.f32.mrf.mxu1  ;;  %v1031_v5 = vld [vmem:[%s9917_s4 + $0xf0] sm:$0xff] }
 0x24f   : > { %4909 = vmatmul.mubr.bf16.vlgmr.msra.gmra.mxu1 %v7370_v52  ;;  %4845 = vmatprep.mubr.bf16.mxu0 %v7424_v43  ;;  %v8775_v42 = vpop.f32.mrf.mxu0  ;;  %v6230_v6 = vcombine.high %v1023_v57, %v1031_v5  ;;  %v8992_v8 = vld [vmem:[%s9917_s4 + $0xcb0] sm:$0xff] }
 0x250   : > { %4918 = vmatprep.mubr.bf16.mxu1 %v7434_v30  ;;  %4950 = vmatpush1.bf16.msra.mxu0 %v6325_v54  ;;  %v8784_v49 = vpop.f32.mrf.mxu1  ;;  %v1303_v54 = vld [vmem:[%s9917_s4 + $0x970] sm:$0xff]  ;;  %v9125_v30 = vld [vmem:[%s9917_s4 + $0xab8] sm:$0xff] }
 0x251   : > { %5023 = vmatpush1.bf16.msra.mxu1 %v6581_v17  ;;  %4951 = vmatprep.subr.bf16.mxu0 %v6310_v18  ;;  %v8795_v9 = vpop.f32.mrf.mxu0  ;;  %v6261_v17 = vcombine.low %v1055_v35, %v1063_v45  ;;  %v6517_v18 = vcombine.low %v1311_v41, %v1319_v13  ;;  %v6502_v32 = vcombine.high %v1295_v4, %v1303_v54  ;;  %v1271_v35 = vld [vmem:[%s9917_s4 + $0x870] sm:$0xff] }
 0x252   : > { %5024 = vmatprep.subr.bf16.mxu1 %v6566_v61  ;;  %v8803_v53 = vpop.f32.mrf.mxu1  ;;  %v6246_v61 = vcombine.high %v1039_v16, %v1047_v36  ;;  %v6501_v58 = vcombine.low %v1295_v4, %v1303_v54  ;;  %v6229_v45 = vcombine.low %v1023_v57, %v1031_v5  ;;  %v1511_v4 = vld [vmem:[%s9917_s4 + $0xff0] sm:$0xff] }
 0x253   : > { %v8811_v59 = vpop.f32.mrf.mxu0  ;;  %v1231_v57 = vld [vmem:[%s9917_s4 + $0x730] sm:$0xff] }
 0x254   : > { %4952 = vmatpush1.bf16.msra.mxu0 %v6309_v31  ;;  %v8820_v31 = vpop.f32.mrf.mxu1  ;;  %v1239_v5 = vld [vmem:[%s9917_s4 + $0x770] sm:$0xff] }
 0x255   : > { %5025 = vmatpush1.bf16.msra.mxu1 %v6565_v24  ;;  %4953 = vmatprep.subr.bf16.mxu0 %v6294_v19  ;;  %v1279_v24 = vld [vmem:[%s9917_s4 + $0x8b0] sm:$0xff]  ;;  %v8831_v40 = vpop.f32.mrf.mxu0 }
 0x256   : > { %4846 = vmatmul.mubr.bf16.gmra.mxu0 %v7430_v27  ;;  %5026 = vmatprep.subr.bf16.mxu1 %v6550_v29  ;;  %v1287_v19 = vld [vmem:[%s9917_s4 + $0x8f0] sm:$0xff]  ;;  %v6245_v29 = vcombine.low %v1039_v16, %v1047_v36 }
 0x257   : > { %4919 = vmatmul.mubr.bf16.gmra.mxu1 %v7432_v3  ;;  %4855 = vmatprep.mubr.bf16.mxu0 %v7512_v25  ;;  %v6486_v38 = vcombine.high %v1279_v24, %v1287_v19  ;;  %v6485_v41 = vcombine.low %v1279_v24, %v1287_v19  ;;  %v1503_v36 = vld [vmem:[%s9917_s4 + $0xfb0] sm:$0xff]  ;;  %v9080_v3 = vld [vmem:[%s9917_s4 + $0x338] sm:$0xff] }
 0x258   : > { %4928 = vmatprep.mubr.bf16.mxu1 %v7514_v26  ;;  %4954 = vmatpush1.bf16.msra.mxu0 %v6293_v37  ;;  %v1007_v37 = vld [vmem:[%s9917_s4 + $0x30] sm:$0xff]  ;;  %v9113_v26 = vld [vmem:[%s9917_s4 + $0x2f8] sm:$0xff] }
 0x259   : > { %5027 = vmatpush1.bf16.msra.mxu1 %v6549_v12  ;;  %4955 = vmatprep.subr.bf16.mxu0 %v6278_v1  ;;  %v1015_v12 = vld [vmem:[%s9917_s4 + $0x70] sm:$0xff]  ;;  %v8839_v1 = vpop.f32.mrf.mxu1 }
 0x25a   : > { %5028 = vmatprep.subr.bf16.mxu1 %v6534_v15  ;;  %v1263_v15 = vld [vmem:[%s9917_s4 + $0x830] sm:$0xff]  ;;  %v6214_v13 = vcombine.high %v1007_v37, %v1015_v12  ;;  %v6213_v54 = vcombine.low %v1007_v37, %v1015_v12 }
 0x25b   : > { %v8856_v16 = vpop.f32.mrf.mxu1  ;;  %v1487_v19 = vld [vmem:[%s9917_s4 + $0xf30] sm:$0xff] }
 0x25c   : > { %4956 = vmatpush1.bf16.msra.mxu0 %v6277_v62  ;;  %v8847_v62 = vpop.f32.mrf.mxu0  ;;  %v8997_v7 = vld [vmem:[%s9917_s4 + $0xcf0] sm:$0xff] }
 0x25d   : > { %5029 = vmatpush1.bf16.msra.mxu1 %v6533_v55  ;;  %4957 = vmatprep.subr.bf16.mxu0 %v6262_v34  ;;  %v6470_v55 = vcombine.high %v1263_v15, %v1271_v35  ;;  %v1247_v34 = vld [vmem:[%s9917_s4 + $0x7b0] sm:$0xff]  ;;  %v8875_v24 = vpop.f32.mrf.mxu1 }
 0x25e   : > { %4856 = vmatmul.mubr.bf16.gmra.mxu0 %v7516_v60  ;;  %5030 = vmatprep.subr.bf16.mxu1 %v6518_v33  ;;  %v1255_v33 = vld [vmem:[%s9917_s4 + $0x7f0] sm:$0xff]  ;;  %v9062_v60 = vld [vmem:[%s9917_s4 + $0xbf8] sm:$0xff] }
 0x25f   : > { %4929 = vmatmul.mubr.bf16.gmra.mxu1 %v7518_v39  ;;  %4865 = vmatprep.mubr.bf16.mxu0 %v7573_v2  ;;  %v9057_v39 = vld [vmem:[%s9917_s4 + $0xbb8] sm:$0xff] }
 0x260   : > { %4938 = vmatprep.mubr.bf16.mxu1 %v7577_v28  ;;  %4958 = vmatpush1.bf16.msra.mxu0 %v6261_v17  ;;  %v6469_v17 = vcombine.low %v1263_v15, %v1271_v35  ;;  %v1215_v15 = vld [vmem:[%s9917_s4 + $0x6b0] sm:$0xff]  ;;  %v6614_v28 = vcombine.high %v8992_v8, %v8997_v7 }
 0x261   : > { %5031 = vmatpush1.bf16.msra.mxu1 %v6517_v18  ;;  %4959 = vmatprep.subr.bf16.mxu0 %v6246_v61  ;;  %v6454_v18 = vcombine.high %v1247_v34, %v1255_v33  ;;  %v8867_v61 = vpop.f32.mrf.mxu0  ;;  %v1223_v35 = vld [vmem:[%s9917_s4 + $0x6f0] sm:$0xff] }
 0x262   : > { %5032 = vmatprep.subr.bf16.mxu1 %v6502_v32  ;;  %v6710_v32 = vcombine.high %v1503_v36, %v1511_v4 }
 0x263   : > { %v8883_v37 = vpop.f32.mrf.mxu0 }
 0x264   : > { %4960 = vmatpush1.bf16.msra.mxu0 %v6245_v29  ;;  %v1495_v29 = vld [vmem:[%s9917_s4 + $0xf70] sm:$0xff] }
 0x265   : > { %5033 = vmatpush1.bf16.msra.mxu1 %v6501_v58  ;;  %4961 = vmatprep.subr.bf16.mxu0 %v6230_v6  ;;  %v6453_v58 = vcombine.low %v1247_v34, %v1255_v33  ;;  %v6709_v6 = vcombine.low %v1503_v36, %v1511_v4  ;;  %v6694_v12 = vcombine.high %v1487_v19, %v1495_v29  ;;  %v8899_v36 = vpop.f32.mrf.mxu0 }
 0x266   : > { %4866 = vmatmul.mubr.bf16.gmra.mxu0 %v7575_v23  ;;  %5034 = vmatprep.subr.bf16.mxu1 %v6486_v38  ;;  %v6438_v38 = vcombine.high %v1231_v57, %v1239_v5  ;;  %v6693_v34 = vcombine.low %v1487_v19, %v1495_v29  ;;  %v6422_v33 = vcombine.high %v1215_v15, %v1223_v35  ;;  %v9015_v23 = vld [vmem:[%s9917_s4 + $0x470] sm:$0xff] }
 0x267   : > { %4939 = vmatmul.mubr.bf16.gmra.mxu1 %v7585_v63  ;;  %4981 = vmatprep.mubr.bf16.mxu0 %v7364_v20  ;;  %v9010_v63 = vld [vmem:[%s9917_s4 + $0x430] sm:$0xff] }
 0x268   : > { %4962 = vmatpush1.bf16.msra.mxu0 %v6229_v45  ;;  %5054 = vmatprep.mubr.bf16.mxu1 %v7366_v22  ;;  %v8891_v45 = vpop.f32.mrf.mxu1 }
 0x269   : > { %5035 = vmatpush1.bf16.msra.mxu1 %v6485_v41  ;;  %4963 = vmatprep.subr.bf16.mxu0 %v6214_v13  ;;  %v1471_v41 = vld [vmem:[%s9917_s4 + $0xeb0] sm:$0xff] }
 0x26a   : > { %5036 = vmatprep.subr.bf16.mxu1 %v6470_v55  ;;  %v1479_v13 = vld [vmem:[%s9917_s4 + $0xef0] sm:$0xff]  ;;  %v6437_v55 = vcombine.low %v1231_v57, %v1239_v5  ;;  %v6421_v5 = vcombine.low %v1215_v15, %v1223_v35 }
 0x26b   : > { %v6678_v4 = vcombine.high %v1471_v41, %v1479_v13  ;;  %v1463_v57 = vld [vmem:[%s9917_s4 + $0xe70] sm:$0xff]  ;;  %v6677_v19 = vcombine.low %v1471_v41, %v1479_v13  ;;  %v8939_v13 = vsub.s32 5, %v7182_v46 }
 0x26c   : > { %4964 = vmatpush1.bf16.msra.mxu0 %v6213_v54  ;;  %v1199_v54 = vld [vmem:[%s9917_s4 + $0x630] sm:$0xff] }
 0x26d   : > { %5037 = vmatpush1.bf16.msra.mxu1 %v6469_v17  ;;  %4965 = vmatprep.subr.bf16.mxu0 %v6454_v18  ;;  %v1207_v17 = vld [vmem:[%s9917_s4 + $0x670] sm:$0xff]  ;;  %v8907_v18 = vpop.f32.mrf.mxu1  ;;  %10011 = vst [vmem:[#allocation27_spill] sm:$0xff] %v8939_v13 }
 0x26e   : > { %5038 = vmatprep.subr.bf16.mxu1 %v6710_v32  ;;  %v1455_v32 = vld [vmem:[%s9917_s4 + $0xe30] sm:$0xff]  ;;  %v6406_v29 = vcombine.high %v1199_v54, %v1207_v17 }
 0x26f   : > { %v8926_v15 = vpop.f32.mrf.mxu1  ;;  %v8931_v35 = vld [vmem:[%s9917_s4 + $0xdb0] sm:$0xff] }
 0x270   : > { %4966 = vmatpush2.bf16.msra.mxu0 %v6453_v58  ;;  %v8915_v58 = vpop.f32.mrf.mxu0  ;;  %10010 = vst [vmem:[#allocation26_spill] sm:$0xff] %v8926_v15  ;;  %v8936_v41 = vld [vmem:[%s9917_s4 + $0xdf0] sm:$0xff]  ;;  %v9130_v15 = vld [vmem:[%s9917_s4 + $0xaf8] sm:$0xff] }
 0x271   : > { %5039 = vmatpush2.bf16.msra.mxu1 %v6709_v6  ;;  %4967 = vmatprep.subr.bf16.mxu0 %v6438_v38  ;;  %10008 = vst [vmem:[#allocation24_spill] sm:$0xff] %v8915_v58  ;;  %v6662_v6 = vcombine.high %v1455_v32, %v1463_v57  ;;  %v1183_v38 = vld [vmem:[%s9917_s4 + $0x5b0] sm:$0xff]  ;;  %v8982_v50 = vpop.f32.mrf.mxu1  ;;  %v6645_v20 = vcombine.low %v8931_v35, %v8936_v41  ;;  %v9148_v58 = vld [vmem:[%s9917_s4 + $0x238] sm:$0xff] }
 0x272   : > { %5040 = vmatprep.subr.bf16.mxu1 %v6694_v12  ;;  %v1191_v12 = vld [vmem:[%s9917_s4 + $0x5f0] sm:$0xff]  ;;  %v8951_v48 = vpop.f32.mrf.mxu0 }
 0x273   : > { %v6389_v22 = vcombine.low %v1183_v38, %v1191_v12 }
 0x274   : > { %4968 = vmatpush2.bf16.msra.mxu0 %v6437_v55  ;;  %v6405_v55 = vcombine.low %v1199_v54, %v1207_v17  ;;  %v6646_v54 = vcombine.high %v8931_v35, %v8936_v41  ;;  %v8958_v17 = vld [vmem:[%s9917_s4 + $0xd30] sm:$0xff] }
 0x275   : > { %5041 = vmatpush2.bf16.msra.mxu1 %v6693_v34  ;;  %4969 = vmatprep.subr.bf16.mxu0 %v6422_v33  ;;  %v6661_v34 = vcombine.low %v1455_v32, %v1463_v57  ;;  %v6390_v33 = vcombine.high %v1183_v38, %v1191_v12  ;;  %v8963_v32 = vld [vmem:[%s9917_s4 + $0xd70] sm:$0xff] }
 0x276   : > { %5042 = vmatprep.subr.bf16.mxu1 %v6678_v4  ;;  %v8944_v4 = vld [vmem:[%s9917_s4 + $0x530] sm:$0xff]  ;;  %v6629_v35 = vcombine.low %v8958_v17, %v8963_v32 }
 0x277   : > { %v8968_v57 = vld [vmem:[%s9917_s4 + $0x4b0] sm:$0xff]  ;;  %v6373_v38 = vcombine.low %v8944_v4, %v8949_v51  ;;  %v6374_v12 = vcombine.high %v8944_v4, %v8949_v51  ;;  %v9044_v51 = vld [vmem:[%s9917_s4 + $0x3f8] sm:$0xff]  ;;  %v6630_v4 = vcombine.high %v8958_v17, %v8963_v32  ;;  %v9067_v17 = vpop.f32.mrf.mxu1 }
 0x278   : > { %4970 = vmatpush2.bf16.msra.mxu0 %v6421_v5  ;;  %v6813_v5 = vld [vmem:[%s9918_s5] sm:$0xff]  ;;  %v9031_v41 = vld [vmem:[%s9917_s4 + $0xc70] sm:$0xff]  ;;  %v6358_v2 = vcombine.high %v8968_v57, %v8987_v47  ;;  %10015 = vst [vmem:[#allocation31_spill] sm:$0xff] %v9067_v17  ;;  %v9090_v32 = vld [vmem:[%s9917_s4 + $0xb38] sm:$0xff] }
 0x279   : > { %5043 = vmatpush2.bf16.msra.mxu1 %v6677_v19  ;;  %4971 = vmatprep.subr.bf16.mxu0 %v6406_v29  ;;  %v8974_v19 = vrot.slane %v6813_v5, %v8924_v14  ;;  %v6814_v29 = vld [vmem:[%s9919_s6] sm:$0xff] }
 0x27a   : > { %5044 = vmatprep.subr.bf16.mxu1 %v6662_v6  ;;  %v8980_v6 = vrot.slane %v6814_v29, %v8924_v14  ;;  %v9000_v14 = vrot.slane %v6813_v5, %v8939_v13  ;;  %v9003_v10 = vrot.slane %v6814_v29, %v8939_v13  ;;  %v9020_v13 = vld [vmem:[%s9917_s4 + $0xc30] sm:$0xff] }
 0x27c   : > { %4972 = vmatpush2.bf16.msra.mxu0 %v6405_v55  ;;  %v9034_v55 = vsub.s32 6, %v7182_v46 }
 0x27d   : > { %5045 = vmatpush2.bf16.msra.mxu1 %v6661_v34  ;;  %4973 = vmatprep.subr.bf16.mxu0 %v6390_v33  ;;  %v9039_v34 = vld [vmem:[%s9917_s4 + $0x3b8] sm:$0xff]  ;;  %v9046_v33 = vpop.f32.mrf.mxu0 }
 0x27e   : > { %10012 = vst [vmem:[#allocation28_spill] sm:$0xff] %v9034_v55  ;;  %10013 = vst [vmem:[#allocation29_spill] sm:$0xff] %v9046_v33  ;;  %5046 = vmatprep.subr.bf16.mxu1 %v6646_v54  ;;  %v9065_v54 = vsub.s32 7, %v7182_v46  ;;  %v9085_v46 = vld [vmem:[%s9917_s4 + $0x378] sm:$0xff]  ;;  %v9116_v27 = vrot.slane %v6813_v5, %v9034_v55 }
 0x27f   : > { %v9103_v33 = vld [vmem:[%s9917_s4 + $0xb78] sm:$0xff] }
 0x280   : > { %10014 = vst [vmem:[#allocation30_spill] sm:$0xff] %v9065_v54  ;;  %4974 = vmatpush2.bf16.msra.mxu0 %v6389_v22  ;;  %10016 = vst [vmem:[#allocation32_spill] sm:$0xff] %v9103_v33  ;;  %v9108_v22 = vld [vmem:[%s9917_s4 + $0x2b8] sm:$0xff]  ;;  %v9138_v17 = vrot.slane %v6813_v5, %v9065_v54  ;;  %v9141_v25 = vrot.slane %v6814_v29, %v9065_v54  ;;  %v4477_v5 = vadd.f32 %v8784_v49, %v8775_v42 }
 0x281   : > { %5047 = vmatpush2.bf16.msra.mxu1 %v6645_v20  ;;  %4975 = vmatprep.subr.bf16.mxu0 %v6374_v12  ;;  %10017 = vst [vmem:[#allocation33_spill] sm:$0xff] %v9116_v27  ;;  %v9132_v20 = vpop.f32.mrf.mxu0  ;;  %v9135_v12 = vrot.slane %v6814_v29, %v9034_v55  ;;  %v9155_v55 = vpop.f32.mrf.mxu1  ;;  %v4479_v29 = vadd.f32 %v8803_v53, %v8795_v9  ;;  %v9191_v33 = vld [vmem:[%s9917_s4 + $0x1f8] sm:$0xff] }
 0x282   : > { %5048 = vmatprep.subr.bf16.mxu1 %v6630_v4  ;;  %10019 = vst [vmem:[#allocation35_spill] sm:$0xff] %v9138_v17  ;;  %10020 = vst [vmem:[#allocation36_spill] sm:$0xff] %v9141_v25  ;;  %v9153_v4 = vld [vmem:[%s9917_s4 + $0x278] sm:$0xff]  ;;  %v4487_v54 = vadd.f32 %v8856_v16, %v8847_v62  ;;  %v10027_v9 = vcombine.low %v9010_v63, %v9015_v23 }
 0x283   : > { %10018 = vst [vmem:[#allocation34_spill] sm:$0xff] %v9135_v12  ;;  %v9168_v25 = vld [vmem:[%s9917_s4 + $0xa38] sm:$0xff]  ;;  %10021 = vst [vmem:[#allocation37_spill] sm:$0xff] %v9191_v33  ;;  %v9213_v49 = vpop.f32.mrf.mxu0  ;;  %v4489_v33 = vadd.f32 %v8875_v24, %v8867_v61  ;;  %v10026_v61 = vcombine.high %v9020_v13, %v9031_v41 }
 0x284   : > { %v9173_v12 = vld [vmem:[%s9917_s4 + $0xa78] sm:$0xff]  ;;  %4976 = vmatpush2.bf16.msra.mxu0 %v6373_v38 }
 0x285   : > { %v9186_v17 = vld [vmem:[%s9917_s4 + $0x1b8] sm:$0xff]  ;;  %5049 = vmatpush2.bf16.msra.mxu1 %v6629_v35  ;;  %4977 = vmatprep.subr.bf16.mxu0 %v6358_v2  ;;  %v4473_v2 = vadd.f32 %v8748_v56, %v8739_v0  ;;  %v4475_v35 = vadd.f32 %v8767_v11, %v8759_v21  ;;  %v4483_v56 = vadd.f32 %v8820_v31, %v8811_v59  ;;  %v9233_v21 = vpop.f32.mrf.mxu1  ;;  %v4435_v16 = vpop.f32.mrf.mxu0 }
 0x286   : > { %v9202_v53 = vld [vmem:[%s9917_s4 + $0x9b8] sm:$0xff]  ;;  %5050 = vmatprep.subr.bf16.mxu1 %v6614_v28  ;;  %v4485_v28 = vadd.f32 %v8839_v1, %v8831_v40  ;;  %v5345_v31 = vmul.f32 %v8974_v19, %v4477_v5  ;;  %v5346_v40 = vmul.f32 %v9000_v14, %v4479_v29  ;;  %v10023_v1 = vcombine.low %v8968_v57, %v8987_v47 }
 0x287   : > { %v9207_v38 = vld [vmem:[%s9917_s4 + $0x9f8] sm:$0xff]  ;;  %v10024_v5 = vcombine.low %v8992_v8, %v8997_v7  ;;  %v10025_v47 = vcombine.high %v9010_v63, %v9015_v23  ;;  %v5329_v7 = vmul.f32 %v8974_v19, %v4473_v2  ;;  %v5330_v8 = vmul.f32 %v9000_v14, %v4475_v35  ;;  %v4508_v24 = vpop.f32.mrf.mxu1 }
 0x288   : > { %v9222_v42 = vld [vmem:[%s9917_s4 + $0x138] sm:$0xff]  ;;  %4978 = vmatpush2.bf16.msra.mxu0 %v10023_v1  ;;  %v5361_v35 = vmul.f32 %v8974_v19, %v4483_v56  ;;  %v5557_v57 = vadd.f32 %v8980_v6, %v5345_v31  ;;  %v5558_v11 = vadd.f32 %v9003_v10, %v5346_v40  ;;  %v10028_v31 = vcombine.low %v9020_v13, %v9031_v41 }
 0x289   : > { %v9227_v0 = vld [vmem:[%s9917_s4 + $0x178] sm:$0xff]  ;;  %5051 = vmatpush2.bf16.msra.mxu1 %v10024_v5  ;;  %4979 = vmatprep.subr.bf16.mxu0 %v10025_v47  ;;  %v5362_v47 = vmul.f32 %v9000_v14, %v4485_v28  ;;  %v5378_v28 = vmul.f32 %v9000_v14, %v4489_v33  ;;  %v10029_v23 = vcombine.high %v9039_v34, %v9044_v51 }
 0x28a   : > { %10022 = vst [vmem:[#allocation38_spill] sm:$0xff] %v9227_v0  ;;  %v9242_v27 = vld [vmem:[%s9917_s4 + $0x938] sm:$0xff]  ;;  %5052 = vmatprep.subr.bf16.mxu1 %v10026_v61  ;;  %v4495_v61 = vadd.f32 %v8907_v18, %v8899_v36  ;;  %v5377_v18 = vmul.f32 %v8974_v19, %v4487_v54  ;;  %v5542_v56 = vadd.f32 %v9003_v10, %v5330_v8  ;;  %v10031_v54 = vld [vmem:[#allocation24_spill] sm:$0xff]  ;;  %v10032_v36 = vld [vmem:[#allocation26_spill] sm:$0xff] }
 0x28b   : > { %v9247_v59 = vld [vmem:[%s9917_s4 + $0x978] sm:$0xff]  ;;  %v4499_v33 = vadd.f32 %v8982_v50, %v8951_v48  ;;  %v10030_v13 = vcombine.high %v9057_v39, %v9062_v60  ;;  %v5590_v63 = vadd.f32 %v9003_v10, %v5378_v28  ;;  %v4497_v1 = vadd.f32 %v10032_v36, %v10031_v54 }
 0x28c   : > { %v9273_v29 = vld [vmem:[%s9917_s4 + $0xb8] sm:$0xff]  ;;  %4980 = vmatpush2.bf16.msra.mxu0 %v10027_v9  ;;  %v9310_v0 = vpop.f32.mrf.mxu0  ;;  %v5541_v9 = vadd.f32 %v8980_v6, %v5329_v7  ;;  %v4493_v7 = vadd.f32 %v8891_v45, %v8883_v37  ;;  %v5394_v8 = vmul.f32 %v9000_v14, %v4495_v61  ;;  %v4505_v37 = vadd.f32 %v9155_v55, %v9132_v20 }
 0x28d   : > { %v9278_v62 = vld [vmem:[%s9917_s4 + $0xf8] sm:$0xff]  ;;  %5053 = vmatpush2.bf16.msra.mxu1 %v10028_v31  ;;  %v9321_v40 = vpop.f32.mrf.mxu1  ;;  %5095 = vmatprep.subr.bf16.mxu0 %v10029_v23  ;;  %v5573_v31 = vadd.f32 %v8980_v6, %v5361_v35  ;;  %v5574_v23 = vadd.f32 %v9003_v10, %v5362_v47  ;;  %v5589_v61 = vadd.f32 %v8980_v6, %v5377_v18 }
 0x28e   : > { %v9292_v5 = vld [vmem:[%s9917_s4 + $0x8b8] sm:$0xff]  ;;  %5168 = vmatprep.subr.bf16.mxu1 %v10030_v13  ;;  %v9335_v41 = vpop.f32.mrf.mxu0  ;;  %v5725_v47 = vmax.f32 %v5541_v9, %v5557_v57  ;;  %v5738_v13 = vmax.f32 %v5542_v56, %v5558_v11  ;;  %v10034_v11 = vcombine.low %v9039_v34, %v9044_v51  ;;  %v5410_v56 = vmul.f32 %v9000_v14, %v4499_v33 }
 0x28f   : > { %v9297_v2 = vld [vmem:[%s9917_s4 + $0x8f8] sm:$0xff]  ;;  %4982 = vmatmul.mubr.bf16.vlgmr.msra.gmra.mxu0 %v7368_v44  ;;  %v9345_v48 = vpop.f32.mrf.mxu1  ;;  %v10033_v44 = vld [vmem:[#allocation12_spill] sm:$0xff]  ;;  %v4509_v36 = vadd.f32 %v4508_v24, %v4435_v16  ;;  %v10035_v18 = vcombine.low %v9057_v39, %v9062_v60  ;;  %v10036_v34 = vcombine.high %v9080_v3, %v9085_v46  ;;  %v5426_v39 = vmul.f32 %v9000_v14, %v4505_v37 }
 0x290   : > { %v9350_v50 = vld [vmem:[%s9917_s4 + $0x38] sm:$0xff]  ;;  %5055 = vmatmul.mubr.bf16.vlgmr.msra.gmra.mxu1 %v7370_v52  ;;  %4991 = vmatprep.mubr.bf16.mxu0 %v7424_v43  ;;  %v4549_v45 = vpop.f32.mrf.mxu0  ;;  %v5726_v9 = vmax.f32 %v5725_v47, %v5573_v31  ;;  %v5739_v54 = vmax.f32 %v5738_v13, %v5574_v23  ;;  %v10037_v16 = vld [vmem:[#allocation32_spill] sm:$0xff]  ;;  %v10040_v13 = vld [vmem:[#allocation31_spill] sm:$0xff]  ;;  %v10041_v37 = vcombine.low %v9080_v3, %v9085_v46 }
 0x291   : > { %v9355_v35 = vld [vmem:[%s9917_s4 + $0x78] sm:$0xff]  ;;  %5064 = vmatprep.mubr.bf16.mxu1 %v10033_v44  ;;  %5096 = vmatpush1.bf16.msra.mxu0 %v10034_v11  ;;  %v4622_v57 = vpop.f32.mrf.mxu1  ;;  %v5393_v11 = vmul.f32 %v8974_v19, %v4493_v7  ;;  %v5606_v44 = vadd.f32 %v9003_v10, %v5394_v8  ;;  %v10038_v24 = vcombine.high %v9090_v32, %v10037_v16 }
 0x292   : > { %v9372_v55 = vld [vmem:[%s9917_s4 + $0x838] sm:$0xff]  ;;  %5169 = vmatpush1.bf16.msra.mxu1 %v10035_v18  ;;  %5097 = vmatprep.subr.bf16.mxu0 %v10036_v34  ;;  %v4551_v51 = vpop.f32.mrf.mxu0  ;;  %v5727_v23 = vmax.f32 %v5726_v9, %v5589_v61  ;;  %v5740_v7 = vmax.f32 %v5739_v54, %v5590_v63  ;;  %v5409_v8 = vmul.f32 %v8974_v19, %v4497_v1  ;;  %v10044_v54 = vld [vmem:[#allocation10_spill] sm:$0xff] }
 0x293   : > { %v9377_v20 = vld [vmem:[%s9917_s4 + $0x878] sm:$0xff]  ;;  %5170 = vmatprep.subr.bf16.mxu1 %v10038_v24  ;;  %v4624_v60 = vpop.f32.mrf.mxu1  ;;  %v5622_v18 = vadd.f32 %v9003_v10, %v5410_v56  ;;  %v4507_v34 = vadd.f32 %v9233_v21, %v9213_v49  ;;  %v5442_v43 = vmul.f32 %v9000_v14, %v4509_v36  ;;  %v10042_v63 = vcombine.low %v9090_v32, %v10037_v16  ;;  %v10046_v36 = vld [vmem:[#allocation11_spill] sm:$0xff] }
 0x294   : > { %v4555_v33 = vpop.f32.mrf.mxu0  ;;  %v6472_v31 = vcombine.high %v9372_v55, %v9377_v20  ;;  %v10039_v47 = vld [vmem:[#allocation29_spill] sm:$0xff]  ;;  %v10043_v1 = vcombine.high %v9108_v22, %v9113_v26  ;;  %v5605_v3 = vadd.f32 %v8980_v6, %v5393_v11  ;;  %v5741_v46 = vmax.f32 %v5740_v7, %v5606_v44  ;;  %v10048_v7 = vld [vmem:[#allocation14_spill] sm:$0xff] }
 0x295   : > { %v4503_v24 = vadd.f32 %v10040_v13, %v10039_v47  ;;  %5098 = vmatpush1.bf16.msra.mxu0 %v10041_v37  ;;  %v4628_v28 = vpop.f32.mrf.mxu1  ;;  %v4623_v9 = vadd.f32 %v4622_v57, %v4549_v45  ;;  %v10045_v49 = vcombine.high %v9125_v30, %v9130_v15  ;;  %v5638_v21 = vadd.f32 %v9003_v10, %v5426_v39  ;;  %v10047_v16 = vld [vmem:[#allocation13_spill] sm:$0xff] }
 0x296   : > { %5171 = vmatpush1.bf16.msra.mxu1 %v10042_v63  ;;  %5099 = vmatprep.subr.bf16.mxu0 %v10043_v1  ;;  %v4557_v61 = vpop.f32.mrf.mxu0  ;;  %v4619_v32 = vadd.f32 %v9321_v40, %v9310_v0  ;;  %v4625_v56 = vadd.f32 %v4624_v60, %v4551_v51  ;;  %v5621_v44 = vadd.f32 %v8980_v6, %v5409_v8 }
 0x297   : > { %4992 = vmatmul.mubr.bf16.gmra.mxu0 %v10044_v54  ;;  %5172 = vmatprep.subr.bf16.mxu1 %v10045_v49  ;;  %v4630_v14 = vpop.f32.mrf.mxu1  ;;  %v5425_v45 = vmul.f32 %v8974_v19, %v4503_v24  ;;  %v4629_v57 = vadd.f32 %v4628_v28, %v4555_v33  ;;  %v10049_v47 = vcombine.low %v9108_v22, %v9113_v26  ;;  %v10052_v22 = vld [vmem:[#allocation33_spill] sm:$0xff] }
 0x298   : > { %5065 = vmatmul.mubr.bf16.gmra.mxu1 %v10046_v36  ;;  %5001 = vmatprep.mubr.bf16.mxu0 %v10047_v16  ;;  %v4559_v11 = vpop.f32.mrf.mxu0  ;;  %v5742_v13 = vmax.f32 %v5741_v46, %v5622_v18  ;;  %v5441_v0 = vmul.f32 %v8974_v19, %v4507_v34  ;;  %v5654_v40 = vadd.f32 %v9003_v10, %v5442_v43 }
 0x299   : > { %5074 = vmatprep.mubr.bf16.mxu1 %v10048_v7  ;;  %5100 = vmatpush1.bf16.msra.mxu0 %v10049_v47  ;;  %v4632_v39 = vpop.f32.mrf.mxu1  ;;  %v10050_v51 = vcombine.low %v9125_v30, %v9130_v15  ;;  %v10051_v60 = vcombine.high %v9148_v58, %v9153_v4  ;;  %v5728_v33 = vmax.f32 %v5727_v23, %v5605_v3  ;;  %v10054_v15 = vld [vmem:[#allocation35_spill] sm:$0xff] }
 0x29a   : > { %v4561_v28 = vpop.f32.mrf.mxu0  ;;  %v4621_v26 = vadd.f32 %v9345_v48, %v9335_v41  ;;  %v5347_v8 = vmul.f32 %v10052_v22, %v4623_v9  ;;  %v4631_v18 = vadd.f32 %v4630_v14, %v4557_v61  ;;  %v10053_v19 = vcombine.high %v9168_v25, %v9173_v12  ;;  %v10057_v14 = vld [vmem:[#allocation37_spill] sm:$0xff] }
 0x29b   : > { %5173 = vmatpush1.bf16.msra.mxu1 %v10050_v51  ;;  %5101 = vmatprep.subr.bf16.mxu0 %v10051_v60  ;;  %v4634_v43 = vpop.f32.mrf.mxu1  ;;  %v5743_v10 = vmax.f32 %v5742_v13, %v5638_v21  ;;  %v5331_v30 = vmul.f32 %v10052_v22, %v4619_v32  ;;  %v5348_v34 = vmul.f32 %v10054_v15, %v4625_v56  ;;  %v10064_v13 = vld [vmem:[#allocation17_spill] sm:$0xff]  ;;  %v10065_v60 = vld [vmem:[#allocation19_spill] sm:$0xff] }
 0x29c   : > { %5174 = vmatprep.subr.bf16.mxu1 %v10053_v19  ;;  %v4633_v24 = vadd.f32 %v4632_v39, %v4559_v11  ;;  %v4565_v37 = vpop.f32.mrf.mxu0  ;;  %v5729_v63 = vmax.f32 %v5728_v33, %v5621_v44  ;;  %v5637_v23 = vadd.f32 %v8980_v6, %v5425_v45  ;;  %v5363_v41 = vmul.f32 %v10052_v22, %v4629_v57  ;;  %v10059_v11 = vld [vmem:[#allocation34_spill] sm:$0xff]  ;;  %v10060_v44 = vld [vmem:[#allocation15_spill] sm:$0xff]  ;;  %v10062_v45 = vld [vmem:[#allocation36_spill] sm:$0xff] }
 0x29d   : > { %v10055_v48 = vcombine.low %v9148_v58, %v9153_v4  ;;  %v4635_v1 = vadd.f32 %v4634_v43, %v4561_v28  ;;  %v4638_v61 = vpop.f32.mrf.mxu1  ;;  %v5653_v3 = vadd.f32 %v8980_v6, %v5441_v0  ;;  %v5744_v46 = vmax.f32 %v5743_v10, %v5654_v40  ;;  %v10063_v39 = vld [vmem:[#allocation16_spill] sm:$0xff] }
 0x29e   : > { %v10056_v9 = vcombine.low %v9168_v25, %v9173_v12  ;;  %v4639_v49 = vadd.f32 %v4638_v61, %v4565_v37  ;;  %v10058_v21 = vcombine.high %v9186_v17, %v10057_v14  ;;  %v4567_v32 = vpop.f32.mrf.mxu0  ;;  %v5332_v56 = vmul.f32 %v10054_v15, %v4621_v26  ;;  %v9493_v37 = vld [vmem:[%s9917_s4 + $0x7f8] sm:$0xff] }
 0x29f   : > { %5102 = vmatpush1.bf16.msra.mxu0 %v10055_v48  ;;  %v5559_v58 = vadd.f32 %v10059_v11, %v5347_v8  ;;  %v5364_v4 = vmul.f32 %v10054_v15, %v4631_v18  ;;  %v10061_v6 = vcombine.high %v9202_v53, %v9207_v38  ;;  %v4640_v25 = vpop.f32.mrf.mxu1  ;;  %v5543_v12 = vadd.f32 %v10059_v11, %v5331_v30  ;;  %v10068_v30 = vld [vmem:[#allocation38_spill] sm:$0xff] }
 0x2a0   : > { %5175 = vmatpush1.bf16.msra.mxu1 %v10056_v9  ;;  %5103 = vmatprep.subr.bf16.mxu0 %v10058_v21  ;;  %v5560_v57 = vadd.f32 %v10062_v45, %v5348_v34  ;;  %v5379_v47 = vmul.f32 %v10052_v22, %v4633_v24  ;;  %v4569_v0 = vpop.f32.mrf.mxu0  ;;  %v5575_v40 = vadd.f32 %v10059_v11, %v5363_v41  ;;  %v5745_v18 = vrot.slane %v5744_v46, 4 }
 0x2a1   : > { %5002 = vmatmul.mubr.bf16.gmra.mxu0 %v10060_v44  ;;  %5176 = vmatprep.subr.bf16.mxu1 %v10061_v6  ;;  %v5380_v51 = vmul.f32 %v10054_v15, %v4635_v1  ;;  %v10066_v28 = vcombine.low %v9186_v17, %v10057_v14  ;;  %v4641_v33 = vadd.f32 %v4640_v25, %v4567_v32  ;;  %v4642_v26 = vpop.f32.mrf.mxu1  ;;  %v9488_v17 = vld [vmem:[%s9917_s4 + $0x7b8] sm:$0xff] }
 0x2a2   : > { %5075 = vmatmul.mubr.bf16.gmra.mxu1 %v10063_v39  ;;  %5011 = vmatprep.mubr.bf16.mxu0 %v10064_v13  ;;  %v5730_v8 = vmax.f32 %v5729_v63, %v5637_v23  ;;  %v5395_v19 = vmul.f32 %v10052_v22, %v4639_v49  ;;  %v10067_v43 = vcombine.low %v9202_v53, %v9207_v38  ;;  %v4571_v24 = vpop.f32.mrf.mxu0 }
 0x2a3   : > { %5084 = vmatprep.mubr.bf16.mxu1 %v10065_v60  ;;  %5104 = vmatpush1.bf16.msra.mxu0 %v10066_v28  ;;  %v4643_v10 = vadd.f32 %v4642_v26, %v4569_v0  ;;  %v10069_v34 = vcombine.high %v9222_v42, %v10068_v30  ;;  %v5544_v63 = vadd.f32 %v10062_v45, %v5332_v56  ;;  %v4644_v48 = vpop.f32.mrf.mxu1  ;;  %v10074_v28 = vld [vmem:[#allocation18_spill] sm:$0xff] }
 0x2a4   : > { %5177 = vmatpush1.bf16.msra.mxu1 %v10067_v43  ;;  %v5751_v53 = vmax.f32 %v5543_v12, %v5559_v58  ;;  %v5576_v38 = vadd.f32 %v10062_v45, %v5364_v4  ;;  %v5396_v23 = vmul.f32 %v10054_v15, %v4641_v33  ;;  %v10070_v41 = vcombine.high %v9242_v27, %v9247_v59  ;;  %v4575_v14 = vpop.f32.mrf.mxu0  ;;  %v10076_v43 = vld [vmem:[#allocation20_spill] sm:$0xff] }
 0x2a5   : > { %5105 = vmatprep.subr.bf16.mxu0 %v10069_v34  ;;  %v5731_v1 = vmax.f32 %v5730_v8, %v5653_v3  ;;  %v5591_v61 = vadd.f32 %v10059_v11, %v5379_v47  ;;  %v5411_v9 = vmul.f32 %v10052_v22, %v4643_v10  ;;  %v4645_v49 = vadd.f32 %v4644_v48, %v4571_v24  ;;  %v4648_v4 = vpop.f32.mrf.mxu1  ;;  %v1504_v10 = vld [vmem:[%s9917_s4 + $0xfb8] sm:$0xff] }
 0x2a6   : > { %5178 = vmatprep.subr.bf16.mxu1 %v10070_v41  ;;  %v5764_v21 = vmax.f32 %v5544_v63, %v5560_v57  ;;  %v5752_v32 = vmax.f32 %v5751_v53, %v5575_v40  ;;  %v5592_v56 = vadd.f32 %v10062_v45, %v5380_v51  ;;  %v10071_v58 = vcombine.low %v9222_v42, %v10068_v30  ;;  %v4577_v0 = vpop.f32.mrf.mxu0  ;;  %v1512_v30 = vld [vmem:[%s9917_s4 + $0xff8] sm:$0xff]  ;;  %v10079_v53 = vld [vmem:[#allocation7_spill] sm:$0xff] }
 0x2a7   : > { %v6456_v6 = vcombine.high %v9488_v17, %v9493_v37  ;;  %v5607_v3 = vadd.f32 %v10059_v11, %v5395_v19  ;;  %v10072_v25 = vcombine.low %v9242_v27, %v9247_v59  ;;  %v5412_v12 = vmul.f32 %v10054_v15, %v4645_v49  ;;  %v4650_v27 = vpop.f32.mrf.mxu1 }
 0x2a8   : > { %5106 = vmatpush1.bf16.msra.mxu0 %v10071_v58  ;;  %v4649_v57 = vadd.f32 %v4648_v4, %v4575_v14  ;;  %v10073_v47 = vcombine.high %v9273_v29, %v9278_v62  ;;  %v9517_v42 = vmax.f32 %v5744_v46, %v5745_v18  ;;  %v5765_v40 = vmax.f32 %v5764_v21, %v5576_v38  ;;  %v10077_v46 = vld [vmem:[#allocation6_spill] sm:$0xff]  ;;  %v4579_v18 = vpop.f32.mrf.mxu0 }
 0x2a9   : > { %5179 = vmatpush1.bf16.msra.mxu1 %v10072_v25  ;;  %v5608_v51 = vadd.f32 %v10062_v45, %v5396_v23  ;;  %5012 = vmatmul.mubr.bf16.gmra.mxu0 %v10074_v28  ;;  %v10075_v33 = vcombine.high %v9292_v5, %v9297_v2  ;;  %v5732_v59 = vrot.slane %v5731_v1, 4  ;;  %v5753_v26 = vmax.f32 %v5752_v32, %v5591_v61  ;;  %v4652_v23 = vpop.f32.mrf.mxu1 }
 0x2aa   : > { %5107 = vmatprep.subr.bf16.mxu0 %v10073_v47  ;;  %v5623_v8 = vadd.f32 %v10059_v11, %v5411_v9  ;;  %v5427_v19 = vmul.f32 %v10052_v22, %v4649_v57  ;;  %5085 = vmatmul.mubr.bf16.gmra.mxu1 %v10076_v43  ;;  %v5766_v34 = vmax.f32 %v5765_v40, %v5592_v56  ;;  %v4581_v14 = vpop.f32.mrf.mxu0  ;;  %v1496_v57 = vld [vmem:[%s9917_s4 + $0xf78] sm:$0xff] }
 0x2ab   : > { %5180 = vmatprep.subr.bf16.mxu1 %v10075_v33  ;;  %5127 = vmatprep.mubr.bf16.mxu0 %v10077_v46  ;;  %v5624_v24 = vadd.f32 %v10062_v45, %v5412_v12  ;;  %v10078_v63 = vcombine.low %v9273_v29, %v9278_v62  ;;  %v4651_v38 = vadd.f32 %v4650_v27, %v4577_v0  ;;  %v1232_v29 = vld [vmem:[%s9917_s4 + $0x738] sm:$0xff] }
 0x2ac   : > { %5200 = vmatprep.mubr.bf16.mxu1 %v10079_v53  ;;  %v5754_v41 = vmax.f32 %v5753_v26, %v5607_v3  ;;  %v5639_v48 = vadd.f32 %v10059_v11, %v5427_v19  ;;  %v10080_v61 = vcombine.low %v9292_v5, %v9297_v2  ;;  %v4653_v9 = vadd.f32 %v4652_v23, %v4579_v18  ;;  %v1240_v62 = vld [vmem:[%s9917_s4 + $0x778] sm:$0xff]  ;;  %v4654_v5 = vpop.f32.mrf.mxu1 }
 0x2ad   : > { %5108 = vmatpush1.bf16.msra.mxu0 %v10078_v63  ;;  %v10081_v49 = vcombine.high %v9350_v50, %v9355_v35  ;;  %v5767_v21 = vmax.f32 %v5766_v34, %v5608_v51  ;;  %v5428_v32 = vmul.f32 %v10054_v15, %v4651_v38  ;;  %v6455_v2 = vcombine.low %v9488_v17, %v9493_v37  ;;  %v1488_v12 = vld [vmem:[%s9917_s4 + $0xf38] sm:$0xff] }
 0x2ae   : > { %5181 = vmatpush1.bf16.msra.mxu1 %v10080_v61  ;;  %v6712_v56 = vcombine.high %v1504_v10, %v1512_v30  ;;  %v5733_v58 = vmax.f32 %v5731_v1, %v5732_v59  ;;  %v5755_v4 = vmax.f32 %v5754_v41, %v5623_v8  ;;  %v5443_v3 = vmul.f32 %v10052_v22, %v4653_v9  ;;  %v1208_v34 = vld [vmem:[%s9917_s4 + $0x678] sm:$0xff] }
 0x2af   : > { %5109 = vmatprep.subr.bf16.mxu0 %v10081_v49  ;;  %5182 = vmatprep.subr.bf16.mxu1 %v6472_v31  ;;  %v4655_v25 = vadd.f32 %v4654_v5, %v4581_v14  ;;  %v5768_v47 = vmax.f32 %v5767_v21, %v5624_v24  ;;  %v5640_v31 = vadd.f32 %v10062_v45, %v5428_v32  ;;  %v5747_v22 = vrot.slane %v9517_v42, 2  ;;  %v1464_v38 = vld [vmem:[%s9917_s4 + $0xe78] sm:$0xff] }
 0x2b0   : > { %v10082_v17 = vcombine.low %v9350_v50, %v9355_v35  ;;  %v6711_v37 = vcombine.low %v1504_v10, %v1512_v30  ;;  %v6440_v1 = vcombine.high %v1232_v29, %v1240_v62  ;;  %v5756_v0 = vmax.f32 %v5755_v4, %v5639_v48  ;;  %v1216_v50 = vld [vmem:[%s9917_s4 + $0x6b8] sm:$0xff] }
 0x2b1   : > { %v5655_v40 = vadd.f32 %v10059_v11, %v5443_v3  ;;  %v10083_v51 = vcombine.low %v9372_v55, %v9377_v20  ;;  %v5444_v33 = vmul.f32 %v10054_v15, %v4655_v25  ;;  %v6696_v27 = vcombine.high %v1488_v12, %v1496_v57  ;;  %v1224_v35 = vld [vmem:[%s9917_s4 + $0x6f8] sm:$0xff] }
 0x2b2   : > { %5110 = vmatpush1.bf16.msra.mxu0 %v10082_v17  ;;  %v5734_v59 = vrot.slane %v5733_v58, 2  ;;  %v5769_v26 = vmax.f32 %v5768_v47, %v5640_v31  ;;  %v1472_v55 = vld [vmem:[%s9917_s4 + $0xeb8] sm:$0xff]  ;;  %v6439_v15 = vcombine.low %v1232_v29, %v1240_v62  ;;  %v5748_v19 = vmax.f32 %v9517_v42, %v5747_v22 }
 0x2b3   : > { %5183 = vmatpush1.bf16.msra.mxu1 %v10083_v51  ;;  %5111 = vmatprep.subr.bf16.mxu0 %v6456_v6  ;;  %v5757_v11 = vmax.f32 %v5756_v0, %v5655_v40  ;;  %v5656_v8 = vadd.f32 %v10062_v45, %v5444_v33  ;;  %v1480_v20 = vld [vmem:[%s9917_s4 + $0xef8] sm:$0xff]  ;;  %v6695_v6 = vcombine.low %v1488_v12, %v1496_v57 }
 0x2b4   : > { %5184 = vmatprep.subr.bf16.mxu1 %v6712_v56  ;;  %v6424_v10 = vcombine.high %v1216_v50, %v1224_v35  ;;  %v6680_v45 = vcombine.high %v1472_v55, %v1480_v20  ;;  %v1200_v30 = vld [vmem:[%s9917_s4 + $0x638] sm:$0xff]  ;;  %v5735_v24 = vmax.f32 %v5733_v58, %v5734_v59  ;;  %v6423_v23 = vcombine.low %v1216_v50, %v1224_v35 }
 0x2b5   : > { %v5758_v46 = vrot.slane %v5757_v11, 4  ;;  %v5770_v18 = vmax.f32 %v5769_v26, %v5656_v8  ;;  %v1456_v42 = vld [vmem:[%s9917_s4 + $0xe38] sm:$0xff]  ;;  %v6679_v41 = vcombine.low %v1472_v55, %v1480_v20  ;;  %v5749_v48 = vrot.slane %v5748_v19, 1 }
 0x2b6   : > { %5112 = vmatpush2.bf16.msra.mxu0 %v6455_v2  ;;  %v6408_v49 = vcombine.high %v1200_v30, %v1208_v34  ;;  %v6664_v14 = vcombine.high %v1456_v42, %v1464_v38  ;;  %v1184_v29 = vld [vmem:[%s9917_s4 + $0x5b8] sm:$0xff]  ;;  %v5736_v21 = vrot.slane %v5735_v24, 1  ;;  %v6407_v58 = vcombine.low %v1200_v30, %v1208_v34 }
 0x2b7   : > { %5185 = vmatpush2.bf16.msra.mxu1 %v6711_v37  ;;  %5113 = vmatprep.subr.bf16.mxu0 %v6440_v1  ;;  %v5759_v63 = vmax.f32 %v5757_v11, %v5758_v46  ;;  %v5771_v53 = vrot.slane %v5770_v18, 4  ;;  %v1192_v62 = vld [vmem:[%s9917_s4 + $0x5f8] sm:$0xff]  ;;  %v6663_v4 = vcombine.low %v1456_v42, %v1464_v38  ;;  %v5750_v3 = vmax.f32 %v5748_v19, %v5749_v48  ;;  %v10085_v42 = vld [vmem:[#allocation22_spill] sm:$0xff]  ;;  %v10086_v38 = vld [vmem:[#allocation23_spill] sm:$0xff] }
 0x2b8   : > { %5186 = vmatprep.subr.bf16.mxu1 %v6696_v27  ;;  %v1440_v2 = vld [vmem:[%s9917_s4 + $0xdb8] sm:$0xff]  ;;  %v6392_v57 = vcombine.high %v1184_v29, %v1192_v62  ;;  %v5737_v37 = vmax.f32 %v5735_v24, %v5736_v21  ;;  %v6391_v40 = vcombine.low %v1184_v29, %v1192_v62 }
 0x2b9   : > { %v5760_v61 = vrot.slane %v5759_v63, 2  ;;  %v5772_v9 = vmax.f32 %v5770_v18, %v5771_v53  ;;  %v1448_v56 = vld [vmem:[%s9917_s4 + $0xdf8] sm:$0xff] }
 0x2ba   : > { %5114 = vmatpush2.bf16.msra.mxu0 %v6439_v15  ;;  %v1168_v47 = vld [vmem:[%s9917_s4 + $0x538] sm:$0xff]  ;;  %v6648_v17 = vcombine.high %v1440_v2, %v1448_v56  ;;  %v6647_v51 = vcombine.low %v1440_v2, %v1448_v56  ;;  %v5899_v27 = vcombine.low %v5737_v37, %v5750_v3 }
 0x2bb   : > { %5187 = vmatpush2.bf16.msra.mxu1 %v6695_v6  ;;  %5115 = vmatprep.subr.bf16.mxu0 %v6424_v10  ;;  %v5761_v32 = vmax.f32 %v5759_v63, %v5760_v61  ;;  %v5773_v5 = vrot.slane %v5772_v9, 2  ;;  %v1176_v31 = vld [vmem:[%s9917_s4 + $0x578] sm:$0xff] }
 0x2bc   : > { %5188 = vmatprep.subr.bf16.mxu1 %v6680_v45  ;;  %v1424_v22 = vld [vmem:[%s9917_s4 + $0xd38] sm:$0xff]  ;;  %v6376_v33 = vcombine.high %v1168_v47, %v1176_v31  ;;  %v6375_v15 = vcombine.low %v1168_v47, %v1176_v31  ;;  %v10090_v47 = vld [vmem:[#allocation4_spill] sm:$0xff] }
 0x2bd   : > { %v5762_v25 = vrot.slane %v5761_v32, 1  ;;  %v5774_v12 = vmax.f32 %v5772_v9, %v5773_v5  ;;  %v1432_v0 = vld [vmem:[%s9917_s4 + $0xd78] sm:$0xff] }
 0x2be   : > { %5116 = vmatpush2.bf16.msra.mxu0 %v6423_v23  ;;  %v6632_v59 = vcombine.high %v1424_v22, %v1432_v0  ;;  %v1152_v26 = vld [vmem:[%s9917_s4 + $0x4b8] sm:$0xff]  ;;  %v6631_v6 = vcombine.low %v1424_v22, %v1432_v0  ;;  %v10087_v23 = vcombine.low %v10085_v42, %v10086_v38  ;;  %v10092_v22 = vld [vmem:[#allocation12_spill] sm:$0xff] }
 0x2bf   : > { %5189 = vmatpush2.bf16.msra.mxu1 %v6679_v41  ;;  %5117 = vmatprep.subr.bf16.mxu0 %v6408_v49  ;;  %v5775_v1 = vrot.slane %v5774_v12, 1  ;;  %v5763_v50 = vmax.f32 %v5761_v32, %v5762_v25  ;;  %v1160_v11 = vld [vmem:[%s9917_s4 + $0x4f8] sm:$0xff]  ;;  %v9666_v32 = vld [vmem:[%s9918_s5 + $0x8] sm:$0xff] }
 0x2c0   : > { %5190 = vmatprep.subr.bf16.mxu1 %v6664_v14  ;;  %v1408_v55 = vld [vmem:[%s9917_s4 + $0xcb8] sm:$0xff]  ;;  %v6360_v10 = vcombine.high %v1152_v26, %v1160_v11  ;;  %v6359_v48 = vcombine.low %v1152_v26, %v1160_v11  ;;  %v9675_v25 = vld [vmem:[%s9919_s6 + $0x8] sm:$0xff]  ;;  %v9680_v31 = vrot.slane %v9666_v32, %v10090_v47 }
 0x2c1   : > { %v5776_v35 = vmax.f32 %v5774_v12, %v5775_v1  ;;  %v1416_v20 = vld [vmem:[%s9917_s4 + $0xcf8] sm:$0xff]  ;;  %v10089_v12 = vld [vmem:[#allocation8_spill] sm:$0xff] }
 0x2c2   : > { %5118 = vmatpush2.bf16.msra.mxu0 %v6407_v58  ;;  %v10084_v19 = vld [vmem:[#allocation21_spill] sm:$0xff]  ;;  %v6616_v45 = vcombine.high %v1408_v55, %v1416_v20  ;;  %v6615_v9 = vcombine.low %v1408_v55, %v1416_v20  ;;  %v10088_v58 = vld [vmem:[#allocation2_spill] sm:$0xff] }
 0x2c3   : > { %5191 = vmatpush2.bf16.msra.mxu1 %v6663_v4  ;;  %5119 = vmatprep.subr.bf16.mxu0 %v6392_v57  ;;  %v5900_v8 = vcombine.low %v5763_v50, %v5776_v35  ;;  %v5921_v46 = vrot.slane %v5899_v27, %v10084_v19  ;;  %v1136_v30 = vld [vmem:[%s9917_s4 + $0x438] sm:$0xff]  ;;  %v5937_v41 = vrot.slane %v10087_v23, %v10084_v19 }
 0x2c4   : > { %5192 = vmatprep.subr.bf16.mxu1 %v6648_v17  ;;  %v1144_v34 = vld [vmem:[%s9917_s4 + $0x478] sm:$0xff]  ;;  %v9670_v4 = vrot.slane %v9666_v32, %v10088_v58 }
 0x2c5   : > { %v5928_v18 = vrot.slane %v5900_v8, %v10084_v19  ;;  %v1392_v63 = vld [vmem:[%s9917_s4 + $0xc38] sm:$0xff]  ;;  %v6344_v49 = vcombine.high %v1136_v30, %v1144_v34  ;;  %v6343_v62 = vcombine.low %v1136_v30, %v1144_v34 }
 0x2c6   : > { %5120 = vmatpush2.bf16.msra.mxu0 %v6391_v40  ;;  %v1400_v53 = vld [vmem:[%s9917_s4 + $0xc78] sm:$0xff] }
 0x2c7   : > { %5193 = vmatpush2.bf16.msra.mxu1 %v6647_v51  ;;  %5121 = vmatprep.subr.bf16.mxu0 %v6376_v33  ;;  %v5930_v24 = vcombine.low %v5921_v46, %v5928_v18  ;;  %v6600_v14 = vcombine.high %v1392_v63, %v1400_v53  ;;  %v6599_v21 = vcombine.low %v1392_v63, %v1400_v53  ;;  %v10091_v17 = vld [vmem:[#allocation9_spill] sm:$0xff] }
 0x2c8   : > { %5194 = vmatprep.subr.bf16.mxu1 %v6632_v59  ;;  %v9688_v51 = vrot.slane %v9675_v25, %v10088_v58 }
 0x2c9   : > { %v5944_v61 = vrot.slane %v5930_v24, %v10084_v19 }
 0x2ca   : > { %5122 = vmatpush2.bf16.msra.mxu0 %v6375_v15 }
 0x2cb   : > { %5195 = vmatpush2.bf16.msra.mxu1 %v6631_v6  ;;  %5123 = vmatprep.subr.bf16.mxu0 %v6360_v10  ;;  %v5945_v29 = vcombine.low %v5937_v41, %v5944_v61 }
 0x2cc   : > { %5196 = vmatprep.subr.bf16.mxu1 %v6616_v45 }
 0x2cd   : > { %5999 = vst [vmem:[%s9660_s20] sm:$0xff] %v5945_v29  ;;  %v4691_v5 = vpop.f32.mrf.mxu0 }
 0x2ce   : > { %5124 = vmatpush2.bf16.msra.mxu0 %v6359_v48  ;;  %v4764_v2 = vpop.f32.mrf.mxu1 }
 0x2cf   : > { %5197 = vmatpush2.bf16.msra.mxu1 %v6615_v9  ;;  %5125 = vmatprep.subr.bf16.mxu0 %v6344_v49  ;;  %v4765_v56 = vadd.f32 %v4764_v2, %v4691_v5  ;;  %v4693_v3 = vpop.f32.mrf.mxu0 }
 0x2d0   : > { %5198 = vmatprep.subr.bf16.mxu1 %v6600_v14  ;;  %v4766_v57 = vpop.f32.mrf.mxu1 }
 0x2d1   : > { %v4767_v37 = vadd.f32 %v4766_v57, %v4693_v3  ;;  %v4695_v1 = vpop.f32.mrf.mxu0  ;;  %v5333_v40 = vmul.f32 %v9670_v4, %v4765_v56 }
 0x2d2   : > { %5126 = vmatpush2.bf16.msra.mxu0 %v6343_v62  ;;  %v4768_v0 = vpop.f32.mrf.mxu1 }
 0x2d3   : > { %5199 = vmatpush2.bf16.msra.mxu1 %v6599_v21  ;;  %v4769_v33 = vadd.f32 %v4768_v0, %v4695_v1  ;;  %v4697_v27 = vpop.f32.mrf.mxu0  ;;  %v5334_v50 = vmul.f32 %v9680_v31, %v4767_v37  ;;  %v5545_v55 = vadd.f32 %v9688_v51, %v5333_v40 }
 0x2d4   : > { %v4770_v35 = vpop.f32.mrf.mxu1 }
 0x2d5   : > { %5128 = vmatmul.mubr.bf16.vlgmr.msra.gmra.mxu0 %v10089_v12  ;;  %v5349_v59 = vmul.f32 %v9670_v4, %v4769_v33  ;;  %v4771_v26 = vadd.f32 %v4770_v35, %v4697_v27  ;;  %v4701_v11 = vpop.f32.mrf.mxu0 }
 0x2d6   : > { %5201 = vmatmul.mubr.bf16.vlgmr.msra.gmra.mxu1 %v7370_v52  ;;  %5137 = vmatprep.mubr.bf16.mxu0 %v10091_v17  ;;  %v9693_v52 = vrot.slane %v9675_v25, %v10090_v47  ;;  %v4774_v8 = vpop.f32.mrf.mxu1 }
 0x2d7   : > { %5210 = vmatprep.mubr.bf16.mxu1 %v10092_v22  ;;  %v5561_v20 = vadd.f32 %v9688_v51, %v5349_v59  ;;  %v5350_v15 = vmul.f32 %v9680_v31, %v4771_v26  ;;  %v4775_v6 = vadd.f32 %v4774_v8, %v4701_v11  ;;  %v4703_v46 = vpop.f32.mrf.mxu0 }
 0x2d8   : > { %v5546_v18 = vadd.f32 %v9693_v52, %v5334_v50  ;;  %v4776_v10 = vpop.f32.mrf.mxu1 }
 0x2d9   : > { %v5777_v45 = vmax.f32 %v5545_v55, %v5561_v20  ;;  %v5562_v30 = vadd.f32 %v9693_v52, %v5350_v15  ;;  %v5365_v34 = vmul.f32 %v9670_v4, %v4775_v6  ;;  %v4705_v24 = vpop.f32.mrf.mxu0  ;;  %v4777_v63 = vadd.f32 %v4776_v10, %v4703_v46 }
 0x2da   : > { %v4778_v53 = vpop.f32.mrf.mxu1 }
 0x2db   : > { %v5790_v42 = vmax.f32 %v5546_v18, %v5562_v30  ;;  %v5577_v38 = vadd.f32 %v9688_v51, %v5365_v34  ;;  %v4779_v23 = vadd.f32 %v4778_v53, %v4705_v24  ;;  %v5366_v41 = vmul.f32 %v9680_v31, %v4777_v63 }
 0x2dc   : > { %v4780_v48 = vpop.f32.mrf.mxu1 }
 0x2dd   : > { %5138 = vmatmul.mubr.bf16.gmra.mxu0 %v10044_v54  ;;  %v4707_v54 = vpop.f32.mrf.mxu0  ;;  %v5778_v61 = vmax.f32 %v5777_v45, %v5577_v38  ;;  %v5381_v9 = vmul.f32 %v9670_v4, %v4779_v23 }
 0x2de   : > { %5211 = vmatmul.mubr.bf16.gmra.mxu1 %v10046_v36  ;;  %5147 = vmatprep.mubr.bf16.mxu0 %v10047_v16  ;;  %v4781_v49 = vadd.f32 %v4780_v48, %v4707_v54  ;;  %v5578_v16 = vadd.f32 %v9693_v52, %v5366_v41  ;;  %v4784_v14 = vpop.f32.mrf.mxu1 }
 0x2df   : > { %5220 = vmatprep.mubr.bf16.mxu1 %v10048_v7  ;;  %v4711_v36 = vpop.f32.mrf.mxu0  ;;  %v5593_v7 = vadd.f32 %v9688_v51, %v5381_v9 }
 0x2e0   : > { %v5382_v29 = vmul.f32 %v9680_v31, %v4781_v49  ;;  %v4785_v62 = vadd.f32 %v4784_v14, %v4711_v36  ;;  %v5791_v5 = vmax.f32 %v5790_v42, %v5578_v16  ;;  %v4786_v2 = vpop.f32.mrf.mxu1 }
 0x2e1   : > { %v4713_v21 = vpop.f32.mrf.mxu0  ;;  %v5779_v56 = vmax.f32 %v5778_v61, %v5593_v7 }
 0x2e2   : > { %v5594_v58 = vadd.f32 %v9693_v52, %v5382_v29  ;;  %v5397_v3 = vmul.f32 %v9670_v4, %v4785_v62  ;;  %v4787_v57 = vadd.f32 %v4786_v2, %v4713_v21  ;;  %v4788_v47 = vpop.f32.mrf.mxu1 }
 0x2e3   : > { %v4715_v12 = vpop.f32.mrf.mxu0 }
 0x2e4   : > { %v5792_v17 = vmax.f32 %v5791_v5, %v5594_v58  ;;  %v5609_v37 = vadd.f32 %v9688_v51, %v5397_v3  ;;  %v4789_v1 = vadd.f32 %v4788_v47, %v4715_v12  ;;  %v5398_v22 = vmul.f32 %v9680_v31, %v4787_v57  ;;  %v4790_v0 = vpop.f32.mrf.mxu1  ;;  %v10093_v58 = vld [vmem:[#allocation3_spill] sm:$0xff]  ;;  %v10094_v47 = vld [vmem:[#allocation5_spill] sm:$0xff] }
 0x2e5   : > { %5148 = vmatmul.mubr.bf16.gmra.mxu0 %v10060_v44  ;;  %v4717_v44 = vpop.f32.mrf.mxu0  ;;  %v9743_v3 = vrot.slane %v9666_v32, %v10093_v58 }
 0x2e6   : > { %5221 = vmatmul.mubr.bf16.gmra.mxu1 %v10063_v39  ;;  %5157 = vmatprep.mubr.bf16.mxu0 %v10064_v13  ;;  %v5780_v40 = vmax.f32 %v5779_v56, %v5609_v37  ;;  %v5413_v33 = vmul.f32 %v9670_v4, %v4789_v1  ;;  %v4791_v27 = vadd.f32 %v4790_v0, %v4717_v44  ;;  %v4794_v50 = vpop.f32.mrf.mxu1 }
 0x2e7   : > { %5230 = vmatprep.mubr.bf16.mxu1 %v10065_v60  ;;  %v4721_v39 = vpop.f32.mrf.mxu0  ;;  %v5610_v13 = vadd.f32 %v9693_v52, %v5398_v22  ;;  %v9752_v0 = vrot.slane %v9675_v25, %v10093_v58 }
 0x2e8   : > { %v5625_v60 = vadd.f32 %v9688_v51, %v5413_v33  ;;  %v5414_v35 = vmul.f32 %v9680_v31, %v4791_v27  ;;  %v4795_v59 = vadd.f32 %v4794_v50, %v4721_v39  ;;  %v4796_v8 = vpop.f32.mrf.mxu1  ;;  %v9757_v39 = vrot.slane %v9675_v25, %v10094_v47 }
 0x2e9   : > { %v4723_v26 = vpop.f32.mrf.mxu0  ;;  %v5793_v11 = vmax.f32 %v5792_v17, %v5610_v13  ;;  %v9747_v17 = vrot.slane %v9666_v32, %v10094_v47 }
 0x2ea   : > { %v5781_v55 = vmax.f32 %v5780_v40, %v5625_v60  ;;  %v5626_v20 = vadd.f32 %v9693_v52, %v5414_v35  ;;  %v5429_v15 = vmul.f32 %v9670_v4, %v4795_v59  ;;  %v4797_v6 = vadd.f32 %v4796_v8, %v4723_v26  ;;  %v4798_v18 = vpop.f32.mrf.mxu1 }
 0x2eb   : > { %v4725_v46 = vpop.f32.mrf.mxu0 }
 0x2ec   : > { %v5794_v10 = vmax.f32 %v5793_v11, %v5626_v20  ;;  %v5641_v45 = vadd.f32 %v9688_v51, %v5429_v15  ;;  %v5430_v30 = vmul.f32 %v9680_v31, %v4797_v6  ;;  %v4799_v34 = vadd.f32 %v4798_v18, %v4725_v46  ;;  %v4800_v63 = vpop.f32.mrf.mxu1 }
 0x2ed   : > { %5158 = vmatmul.mubr.bf16.gmra.mxu0 %v10074_v28  ;;  %v4727_v24 = vpop.f32.mrf.mxu0 }
 0x2ee   : > { %5231 = vmatmul.mubr.bf16.gmra.mxu1 %v10076_v43  ;;  %v5782_v28 = vmax.f32 %v5781_v55, %v5641_v45  ;;  %v5642_v53 = vadd.f32 %v9693_v52, %v5430_v30  ;;  %v5445_v42 = vmul.f32 %v9670_v4, %v4799_v34  ;;  %v4801_v38 = vadd.f32 %v4800_v63, %v4727_v24 }
 0x2f0   : > { %v5795_v23 = vmax.f32 %v5794_v10, %v5642_v53  ;;  %v5657_v43 = vadd.f32 %v9688_v51, %v5445_v42  ;;  %v5446_v54 = vmul.f32 %v9680_v31, %v4801_v38 }
 0x2f2   : > { %v5783_v41 = vmax.f32 %v5782_v28, %v5657_v43  ;;  %v5658_v48 = vadd.f32 %v9693_v52, %v5446_v54 }
 0x2f4   : > { %v5784_v61 = vrot.slane %v5783_v41, 4  ;;  %v5796_v9 = vmax.f32 %v5795_v23, %v5658_v48 }
 0x2f6   : > { %v5785_v49 = vmax.f32 %v5783_v41, %v5784_v61  ;;  %v5797_v36 = vrot.slane %v5796_v9, 4 }
 0x2f8   : > { %v5786_v16 = vrot.slane %v5785_v49, 2  ;;  %v5798_v14 = vmax.f32 %v5796_v9, %v5797_v36 }
 0x2fa   : > { %v5787_v7 = vmax.f32 %v5785_v49, %v5786_v16  ;;  %v5799_v29 = vrot.slane %v5798_v14, 2 }
 0x2fc   : > { %v5788_v62 = vrot.slane %v5787_v7, 1  ;;  %v5800_v21 = vmax.f32 %v5798_v14, %v5799_v29 }
 0x2fe   : > { %v5801_v4 = vrot.slane %v5800_v21, 1  ;;  %v9735_v5 = vmax.f32 %v5787_v7, %v5788_v62 }
 0x300   : > { %v9737_v2 = vmax.f32 %v5800_v21, %v5801_v4 }
 0x302   : > { %v5946_v31 = vcombine.low %v9735_v5, %v9737_v2 }
 0x30e   : > { %v4837_v51 = vpop.f32.mrf.mxu0 }
 0x30f   : > { %v4910_v52 = vpop.f32.mrf.mxu1 }
 0x310   : > { %v4911_v56 = vadd.f32 %v4910_v52, %v4837_v51  ;;  %v4839_v12 = vpop.f32.mrf.mxu0 }
 0x311   : > { %v4912_v57 = vpop.f32.mrf.mxu1 }
 0x312   : > { %v4913_v37 = vadd.f32 %v4912_v57, %v4839_v12  ;;  %v4841_v1 = vpop.f32.mrf.mxu0  ;;  %v5335_v22 = vmul.f32 %v9743_v3, %v4911_v56 }
 0x313   : > { %v4914_v44 = vpop.f32.mrf.mxu1 }
 0x314   : > { %v4915_v40 = vadd.f32 %v4914_v44, %v4841_v1  ;;  %v4843_v33 = vpop.f32.mrf.mxu0  ;;  %v5336_v27 = vmul.f32 %v9747_v17, %v4913_v37  ;;  %v5547_v26 = vadd.f32 %v9752_v0, %v5335_v22 }
 0x315   : > { %v4916_v13 = vpop.f32.mrf.mxu1 }
 0x316   : > { %v5351_v50 = vmul.f32 %v9743_v3, %v4915_v40  ;;  %v4917_v60 = vadd.f32 %v4916_v13, %v4843_v33  ;;  %v4847_v35 = vpop.f32.mrf.mxu0  ;;  %v5548_v15 = vadd.f32 %v9757_v39, %v5336_v27 }
 0x317   : > { %v4920_v59 = vpop.f32.mrf.mxu1 }
 0x318   : > { %v5563_v11 = vadd.f32 %v9752_v0, %v5351_v50  ;;  %v5352_v8 = vmul.f32 %v9747_v17, %v4917_v60  ;;  %v4921_v55 = vadd.f32 %v4920_v59, %v4847_v35  ;;  %v4849_v20 = vpop.f32.mrf.mxu0 }
 0x319   : > { %v4922_v6 = vpop.f32.mrf.mxu1 }
 0x31a   : > { %v5803_v46 = vmax.f32 %v5547_v26, %v5563_v11  ;;  %v5564_v18 = vadd.f32 %v9757_v39, %v5352_v8  ;;  %v5367_v10 = vmul.f32 %v9743_v3, %v4921_v55  ;;  %v4923_v45 = vadd.f32 %v4922_v6, %v4849_v20  ;;  %v4851_v30 = vpop.f32.mrf.mxu0 }
 0x31b   : > { %v4924_v34 = vpop.f32.mrf.mxu1 }
 0x31c   : > { %v5816_v24 = vmax.f32 %v5548_v15, %v5564_v18  ;;  %v5579_v63 = vadd.f32 %v9752_v0, %v5367_v10  ;;  %v5368_v28 = vmul.f32 %v9747_v17, %v4923_v45  ;;  %v4925_v53 = vadd.f32 %v4924_v34, %v4851_v30  ;;  %v4853_v42 = vpop.f32.mrf.mxu0 }
 0x31d   : > { %v4926_v38 = vpop.f32.mrf.mxu1 }
 0x31e   : > { %v5804_v23 = vmax.f32 %v5803_v46, %v5579_v63  ;;  %v5580_v43 = vadd.f32 %v9757_v39, %v5368_v28  ;;  %v5383_v54 = vmul.f32 %v9743_v3, %v4925_v53  ;;  %v4927_v41 = vadd.f32 %v4926_v38, %v4853_v42  ;;  %v4857_v48 = vpop.f32.mrf.mxu0 }
 0x31f   : > { %v4930_v61 = vpop.f32.mrf.mxu1 }
 0x320   : > { %v5817_v9 = vmax.f32 %v5816_v24, %v5580_v43  ;;  %v5595_v49 = vadd.f32 %v9752_v0, %v5383_v54  ;;  %v5384_v36 = vmul.f32 %v9747_v17, %v4927_v41  ;;  %v4931_v16 = vadd.f32 %v4930_v61, %v4857_v48  ;;  %v4859_v14 = vpop.f32.mrf.mxu0 }
 0x321   : > { %v4932_v7 = vpop.f32.mrf.mxu1 }
 0x322   : > { %v5805_v29 = vmax.f32 %v5804_v23, %v5595_v49  ;;  %v5596_v62 = vadd.f32 %v9757_v39, %v5384_v36  ;;  %v5399_v21 = vmul.f32 %v9743_v3, %v4931_v16  ;;  %v4933_v4 = vadd.f32 %v4932_v7, %v4859_v14  ;;  %v4861_v51 = vpop.f32.mrf.mxu0 }
 0x323   : > { %v4934_v52 = vpop.f32.mrf.mxu1 }
 0x324   : > { %v5818_v56 = vmax.f32 %v5817_v9, %v5596_v62  ;;  %v5611_v58 = vadd.f32 %v9752_v0, %v5399_v21  ;;  %v5400_v12 = vmul.f32 %v9747_v17, %v4933_v4  ;;  %v4935_v57 = vadd.f32 %v4934_v52, %v4861_v51  ;;  %v4863_v47 = vpop.f32.mrf.mxu0 }
 0x325   : > { %v4936_v37 = vpop.f32.mrf.mxu1 }
 0x326   : > { %v5806_v1 = vmax.f32 %v5805_v29, %v5611_v58  ;;  %v5612_v44 = vadd.f32 %v9757_v39, %v5400_v12  ;;  %v5415_v22 = vmul.f32 %v9743_v3, %v4935_v57  ;;  %v4937_v40 = vadd.f32 %v4936_v37, %v4863_v47  ;;  %v4867_v33 = vpop.f32.mrf.mxu0 }
 0x327   : > { %v4940_v27 = vpop.f32.mrf.mxu1 }
 0x328   : > { %v5819_v13 = vmax.f32 %v5818_v56, %v5612_v44  ;;  %v5627_v50 = vadd.f32 %v9752_v0, %v5415_v22  ;;  %v5416_v60 = vmul.f32 %v9747_v17, %v4937_v40  ;;  %v4941_v35 = vadd.f32 %v4940_v27, %v4867_v33  ;;  %v4869_v59 = vpop.f32.mrf.mxu0 }
 0x329   : > { %v4942_v26 = vpop.f32.mrf.mxu1 }
 0x32a   : > { %v5807_v11 = vmax.f32 %v5806_v1, %v5627_v50  ;;  %v5628_v8 = vadd.f32 %v9757_v39, %v5416_v60  ;;  %v5431_v55 = vmul.f32 %v9743_v3, %v4941_v35  ;;  %v4943_v20 = vadd.f32 %v4942_v26, %v4869_v59  ;;  %v4871_v15 = vpop.f32.mrf.mxu0 }
 0x32b   : > { %v4944_v6 = vpop.f32.mrf.mxu1 }
 0x32c   : > { %v5820_v46 = vmax.f32 %v5819_v13, %v5628_v8  ;;  %v5643_v18 = vadd.f32 %v9752_v0, %v5431_v55  ;;  %v5432_v10 = vmul.f32 %v9747_v17, %v4943_v20  ;;  %v4945_v45 = vadd.f32 %v4944_v6, %v4871_v15  ;;  %v4873_v30 = vpop.f32.mrf.mxu0 }
 0x32d   : > { %v4946_v34 = vpop.f32.mrf.mxu1 }
 0x32e   : > { %v5808_v24 = vmax.f32 %v5807_v11, %v5643_v18  ;;  %v5644_v63 = vadd.f32 %v9757_v39, %v5432_v10  ;;  %v5447_v28 = vmul.f32 %v9743_v3, %v4945_v45  ;;  %v4947_v53 = vadd.f32 %v4946_v34, %v4873_v30  ;;  %v10095_v45 = vld [vmem:[#allocation27_spill] sm:$0xff] }
 0x32f   : > { %v9802_v30 = vrot.slane %v9666_v32, %v10095_v45 }
 0x330   : > { %v5821_v42 = vmax.f32 %v5820_v46, %v5644_v63  ;;  %v5659_v38 = vadd.f32 %v9752_v0, %v5447_v28  ;;  %v5448_v23 = vmul.f32 %v9747_v17, %v4947_v53  ;;  %v9793_v17 = vrot.slane %v5946_v31, %v10084_v19  ;;  %v10096_v28 = vld [vmem:[#allocation25_spill] sm:$0xff] }
 0x331   : > { %v9806_v53 = vrot.slane %v9666_v32, %v10096_v28 }
 0x332   : > { %v5809_v43 = vmax.f32 %v5808_v24, %v5659_v38  ;;  %v5660_v54 = vadd.f32 %v9757_v39, %v5448_v23 }
 0x334   : > { %v5810_v41 = vrot.slane %v5809_v43, 4  ;;  %v5822_v48 = vmax.f32 %v5821_v42, %v5660_v54 }
 0x336   : > { %v5811_v61 = vmax.f32 %v5809_v43, %v5810_v41  ;;  %v5823_v9 = vrot.slane %v5822_v48, 4 }
 0x338   : > { %v5812_v49 = vrot.slane %v5811_v61, 2  ;;  %v5824_v36 = vmax.f32 %v5822_v48, %v5823_v9  ;;  %v9812_v48 = vrot.slane %v9675_v25, %v10095_v45 }
 0x33a   : > { %v5813_v16 = vmax.f32 %v5811_v61, %v5812_v49  ;;  %v5825_v14 = vrot.slane %v5824_v36, 2 }
 0x33c   : > { %v5814_v7 = vrot.slane %v5813_v16, 1  ;;  %v5826_v29 = vmax.f32 %v5824_v36, %v5825_v14 }
 0x33e   : > { %v5827_v3 = vrot.slane %v5826_v29, 1  ;;  %v5815_v62 = vmax.f32 %v5813_v16, %v5814_v7  ;;  %v9819_v7 = vrot.slane %v9675_v25, %v10096_v28 }
 0x340   : > { %v5828_v21 = vmax.f32 %v5826_v29, %v5827_v3 }
 0x342   : > { %v5947_v4 = vcombine.low %v5815_v62, %v5828_v21 }
 0x344   : > { %v9796_v0 = vrot.slane %v5947_v4, %v10084_v19 }
 0x346   : > { %v5978_v39 = vcombine.low %v9793_v17, %v9796_v0 }
 0x34f   : > { %v4983_v51 = vpop.f32.mrf.mxu0 }
 0x350   : > { %v5056_v52 = vpop.f32.mrf.mxu1 }
 0x351   : > { %v4985_v56 = vpop.f32.mrf.mxu0  ;;  %v5057_v63 = vadd.f32 %v5056_v52, %v4983_v51 }
 0x352   : > { %v5058_v58 = vpop.f32.mrf.mxu1 }
 0x353   : > { %v4987_v12 = vpop.f32.mrf.mxu0  ;;  %v5059_v10 = vadd.f32 %v5058_v58, %v4985_v56  ;;  %v5337_v14 = vmul.f32 %v9806_v53, %v5057_v63 }
 0x354   : > { %v5060_v57 = vpop.f32.mrf.mxu1 }
 0x355   : > { %v4989_v47 = vpop.f32.mrf.mxu0  ;;  %v5061_v34 = vadd.f32 %v5060_v57, %v4987_v12  ;;  %v5338_v41 = vmul.f32 %v9802_v30, %v5059_v10  ;;  %v10097_v12 = vld [vmem:[#allocation28_spill] sm:$0xff]  ;;  %v10098_v10 = vld [vmem:[#allocation30_spill] sm:$0xff] }
 0x356   : > { %v5062_v37 = vpop.f32.mrf.mxu1  ;;  %v9827_v57 = vrot.slane %v9666_v32, %v10097_v12 }
 0x357   : > { %v4993_v1 = vpop.f32.mrf.mxu0  ;;  %v5063_v46 = vadd.f32 %v5062_v37, %v4989_v47  ;;  %v5353_v9 = vmul.f32 %v9806_v53, %v5061_v34  ;;  %v5550_v56 = vadd.f32 %v9812_v48, %v5338_v41 }
 0x358   : > { %v5066_v44 = vpop.f32.mrf.mxu1 }
 0x359   : > { %v4995_v22 = vpop.f32.mrf.mxu0  ;;  %v5354_v38 = vmul.f32 %v9802_v30, %v5063_v46  ;;  %v5067_v23 = vadd.f32 %v5066_v44, %v4993_v1  ;;  %v5565_v37 = vadd.f32 %v9819_v7, %v5353_v9 }
 0x35a   : > { %v5068_v5 = vpop.f32.mrf.mxu1 }
 0x35b   : > { %v4997_v2 = vpop.f32.mrf.mxu0  ;;  %v5069_v24 = vadd.f32 %v5068_v5, %v4995_v22  ;;  %v5566_v62 = vadd.f32 %v9812_v48, %v5354_v38  ;;  %v5369_v21 = vmul.f32 %v9806_v53, %v5067_v23 }
 0x35c   : > { %v5070_v31 = vpop.f32.mrf.mxu1 }
 0x35d   : > { %v4999_v40 = vpop.f32.mrf.mxu0  ;;  %v5370_v49 = vmul.f32 %v9802_v30, %v5069_v24  ;;  %v5071_v36 = vadd.f32 %v5070_v31, %v4997_v2  ;;  %v5549_v2 = vadd.f32 %v9819_v7, %v5337_v14 }
 0x35e   : > { %v5072_v33 = vpop.f32.mrf.mxu1 }
 0x35f   : > { %v5073_v43 = vadd.f32 %v5072_v33, %v4999_v40  ;;  %v5582_v1 = vadd.f32 %v9812_v48, %v5370_v49  ;;  %v5385_v44 = vmul.f32 %v9806_v53, %v5071_v36  ;;  %v9836_v33 = vrot.slane %v9675_v25, %v10097_v12 }
 0x360   : > { %v5829_v45 = vmax.f32 %v5549_v2, %v5565_v37 }
 0x361   : > { %v5003_v27 = vpop.f32.mrf.mxu0  ;;  %v5386_v4 = vmul.f32 %v9802_v30, %v5073_v43  ;;  %v5597_v24 = vadd.f32 %v9819_v7, %v5385_v44 }
 0x362   : > { %v5076_v13 = vpop.f32.mrf.mxu1 }
 0x363   : > { %v5005_v50 = vpop.f32.mrf.mxu0  ;;  %v5077_v51 = vadd.f32 %v5076_v13, %v5003_v27  ;;  %v5842_v13 = vmax.f32 %v5550_v56, %v5566_v62 }
 0x364   : > { %v5078_v60 = vpop.f32.mrf.mxu1 }
 0x365   : > { %v5007_v35 = vpop.f32.mrf.mxu0  ;;  %v5079_v29 = vadd.f32 %v5078_v60, %v5005_v50  ;;  %v5581_v50 = vadd.f32 %v9819_v7, %v5369_v21  ;;  %v5598_v60 = vadd.f32 %v9812_v48, %v5386_v4  ;;  %v5843_v34 = vmax.f32 %v5842_v13, %v5582_v1 }
 0x366   : > { %v5080_v59 = vpop.f32.mrf.mxu1 }
 0x367   : > { %v5009_v26 = vpop.f32.mrf.mxu0  ;;  %v5081_v22 = vadd.f32 %v5080_v59, %v5007_v35  ;;  %v5402_v31 = vmul.f32 %v9802_v30, %v5079_v29 }
 0x368   : > { %v5082_v11 = vpop.f32.mrf.mxu1 }
 0x369   : > { %v5013_v8 = vpop.f32.mrf.mxu0  ;;  %v5083_v58 = vadd.f32 %v5082_v11, %v5009_v26  ;;  %v5401_v26 = vmul.f32 %v9806_v53, %v5077_v51  ;;  %v5417_v63 = vmul.f32 %v9806_v53, %v5081_v22  ;;  %v5614_v38 = vadd.f32 %v9812_v48, %v5402_v31 }
 0x36a   : > { %v5086_v55 = vpop.f32.mrf.mxu1 }
 0x36b   : > { %v5015_v20 = vpop.f32.mrf.mxu0  ;;  %v5418_v35 = vmul.f32 %v9802_v30, %v5083_v58  ;;  %v5087_v59 = vadd.f32 %v5086_v55, %v5013_v8  ;;  %v9852_v8 = vrot.slane %v9675_v25, %v10098_v10 }
 0x36c   : > { %v5088_v15 = vpop.f32.mrf.mxu1 }
 0x36d   : > { %v5017_v6 = vpop.f32.mrf.mxu0  ;;  %v5089_v40 = vadd.f32 %v5088_v15, %v5015_v20  ;;  %v9844_v20 = vrot.slane %v9666_v32, %v10098_v10  ;;  %v5830_v32 = vmax.f32 %v5829_v45, %v5581_v50  ;;  %v5630_v49 = vadd.f32 %v9812_v48, %v5418_v35 }
 0x36e   : > { %v5090_v18 = vpop.f32.mrf.mxu1  ;;  %v5433_v36 = vmul.f32 %v9806_v53, %v5087_v59 }
 0x36f   : > { %v5019_v42 = vpop.f32.mrf.mxu0  ;;  %v5434_v23 = vmul.f32 %v9802_v30, %v5089_v40  ;;  %v5091_v43 = vadd.f32 %v5090_v18, %v5017_v6  ;;  %v5831_v6 = vmax.f32 %v5830_v32, %v5597_v24  ;;  %v5629_v18 = vadd.f32 %v9819_v7, %v5417_v63 }
 0x370   : > { %v5092_v54 = vpop.f32.mrf.mxu1  ;;  %v5645_v22 = vadd.f32 %v9819_v7, %v5433_v36 }
 0x371   : > { %v5093_v46 = vadd.f32 %v5092_v54, %v5019_v42  ;;  %v5844_v42 = vmax.f32 %v5843_v34, %v5598_v60  ;;  %v5613_v54 = vadd.f32 %v9819_v7, %v5401_v26  ;;  %v5646_v56 = vadd.f32 %v9812_v48, %v5434_v23 }
 0x372   : > { %v5449_v58 = vmul.f32 %v9806_v53, %v5091_v43 }
 0x373   : > { %v5450_v14 = vmul.f32 %v9802_v30, %v5093_v46  ;;  %v5845_v51 = vmax.f32 %v5844_v42, %v5614_v38  ;;  %v5832_v37 = vmax.f32 %v5831_v6, %v5613_v54 }
 0x374   : > { %v5661_v50 = vadd.f32 %v9819_v7, %v5449_v58 }
 0x375   : > { %v5833_v40 = vmax.f32 %v5832_v37, %v5629_v18 }
 0x377   : > { %v5834_v10 = vmax.f32 %v5833_v40, %v5645_v22 }
 0x379   : > { %v5835_v43 = vmax.f32 %v5834_v10, %v5661_v50 }
 0x395   : > { %v5129_v61 = vpop.f32.mrf.mxu0 }
 0x396   : > { %v5202_v16 = vpop.f32.mrf.mxu1 }
 0x397   : > { %v5131_v3 = vpop.f32.mrf.mxu0  ;;  %v5203_v29 = vadd.f32 %v5202_v16, %v5129_v61  ;;  %v5846_v16 = vmax.f32 %v5845_v51, %v5630_v49 }
 0x398   : > { %v5204_v52 = vpop.f32.mrf.mxu1 }
 0x399   : > { %v5133_v47 = vpop.f32.mrf.mxu0  ;;  %v5205_v12 = vadd.f32 %v5204_v52, %v5131_v3  ;;  %v5339_v2 = vmul.f32 %v9827_v57, %v5203_v29  ;;  %v5847_v13 = vmax.f32 %v5846_v16, %v5646_v56 }
 0x39a   : > { %v5206_v5 = vpop.f32.mrf.mxu1 }
 0x39b   : > { %v5135_v27 = vpop.f32.mrf.mxu0  ;;  %v5207_v41 = vadd.f32 %v5206_v5, %v5133_v47  ;;  %v5662_v5 = vadd.f32 %v9812_v48, %v5450_v14  ;;  %v5340_v60 = vmul.f32 %v9844_v20, %v5205_v12  ;;  %v5551_v45 = vadd.f32 %v9836_v33, %v5339_v2 }
 0x39c   : > { %v5208_v11 = vpop.f32.mrf.mxu1 }
 0x39d   : > { %v5139_v15 = vpop.f32.mrf.mxu0  ;;  %v5209_v25 = vadd.f32 %v5208_v11, %v5135_v27  ;;  %v5355_v1 = vmul.f32 %v9827_v57, %v5207_v41 }
 0x39e   : > { %v5212_v28 = vpop.f32.mrf.mxu1 }
 0x39f   : > { %v5141_v55 = vpop.f32.mrf.mxu0  ;;  %v5213_v21 = vadd.f32 %v5212_v28, %v5139_v15  ;;  %v5356_v27 = vmul.f32 %v9844_v20, %v5209_v25  ;;  %v5567_v35 = vadd.f32 %v9836_v33, %v5355_v1  ;;  %v5848_v15 = vmax.f32 %v5847_v13, %v5662_v5 }
 0x3a0   : > { %v5214_v9 = vpop.f32.mrf.mxu1 }
 0x3a1   : > { %v5143_v62 = vpop.f32.mrf.mxu0  ;;  %v5215_v44 = vadd.f32 %v5214_v9, %v5141_v55  ;;  %v5371_v53 = vmul.f32 %v9827_v57, %v5213_v21  ;;  %v5568_v63 = vadd.f32 %v9852_v8, %v5356_v27  ;;  %v5552_v55 = vadd.f32 %v9852_v8, %v5340_v60 }
 0x3a2   : > { %v5216_v4 = vpop.f32.mrf.mxu1  ;;  %v5855_v54 = vmax.f32 %v5551_v45, %v5567_v35  ;;  %v5849_v14 = vrot.slane %v5848_v15, 4 }
 0x3a3   : > { %v5145_v47 = vpop.f32.mrf.mxu0  ;;  %v5217_v30 = vadd.f32 %v5216_v4, %v5143_v62  ;;  %v5372_v48 = vmul.f32 %v9844_v20, %v5215_v44  ;;  %v5583_v7 = vadd.f32 %v9836_v33, %v5371_v53  ;;  %v5868_v18 = vmax.f32 %v5552_v55, %v5568_v63 }
 0x3a4   : > { %v5218_v61 = vpop.f32.mrf.mxu1  ;;  %v5850_v2 = vmax.f32 %v5848_v15, %v5849_v14 }
 0x3a5   : > { %v5149_v31 = vpop.f32.mrf.mxu0  ;;  %v5219_v3 = vadd.f32 %v5218_v61, %v5145_v47  ;;  %v5387_v59 = vmul.f32 %v9827_v57, %v5217_v30  ;;  %v5584_v41 = vadd.f32 %v9852_v8, %v5372_v48  ;;  %v5856_v25 = vmax.f32 %v5855_v54, %v5583_v7 }
 0x3a6   : > { %v5222_v52 = vpop.f32.mrf.mxu1  ;;  %v5836_v47 = vrot.slane %v5835_v43, 4  ;;  %v5851_v10 = vrot.slane %v5850_v2, 2 }
 0x3a7   : > { %v5223_v26 = vadd.f32 %v5222_v52, %v5149_v31  ;;  %v5151_v11 = vpop.f32.mrf.mxu0  ;;  %v5388_v28 = vmul.f32 %v9844_v20, %v5219_v3  ;;  %v5599_v9 = vadd.f32 %v9836_v33, %v5387_v59  ;;  %v5869_v37 = vmax.f32 %v5868_v18, %v5584_v41 }
 0x3a8   : > { %v5224_v46 = vpop.f32.mrf.mxu1  ;;  %v5837_v60 = vmax.f32 %v5835_v43, %v5836_v47 }
 0x3a9   : > { %v5225_v34 = vadd.f32 %v5224_v46, %v5151_v11  ;;  %v5153_v24 = vpop.f32.mrf.mxu0  ;;  %v5403_v38 = vmul.f32 %v9827_v57, %v5223_v26  ;;  %v5600_v21 = vadd.f32 %v9852_v8, %v5388_v28  ;;  %v5857_v1 = vmax.f32 %v5856_v25, %v5599_v9 }
 0x3aa   : > { %v5226_v23 = vpop.f32.mrf.mxu1  ;;  %v5838_v63 = vrot.slane %v5837_v60, 2 }
 0x3ab   : > { %v5227_v32 = vadd.f32 %v5226_v23, %v5153_v24  ;;  %v5155_v42 = vpop.f32.mrf.mxu0  ;;  %v5404_v49 = vmul.f32 %v9844_v20, %v5225_v34  ;;  %v5615_v4 = vadd.f32 %v9836_v33, %v5403_v38  ;;  %v5870_v31 = vmax.f32 %v5869_v37, %v5600_v21 }
 0x3ac   : > { %v5228_v36 = vpop.f32.mrf.mxu1  ;;  %v5852_v23 = vmax.f32 %v5850_v2, %v5851_v10 }
 0x3ad   : > { %v5419_v29 = vmul.f32 %v9827_v57, %v5227_v32  ;;  %v5229_v62 = vadd.f32 %v5228_v36, %v5155_v42  ;;  %v5159_v6 = vpop.f32.mrf.mxu0  ;;  %v5616_v44 = vadd.f32 %v9852_v8, %v5404_v49  ;;  %v5858_v40 = vmax.f32 %v5857_v1, %v5615_v4 }
 0x3ae   : > { %v5232_v51 = vpop.f32.mrf.mxu1  ;;  %v5839_v32 = vmax.f32 %v5837_v60, %v5838_v63 }
 0x3af   : > { %v5420_v56 = vmul.f32 %v9844_v20, %v5229_v62  ;;  %v5233_v58 = vadd.f32 %v5232_v51, %v5159_v6  ;;  %v5161_v12 = vpop.f32.mrf.mxu0  ;;  %v5631_v61 = vadd.f32 %v9836_v33, %v5419_v29  ;;  %v5871_v26 = vmax.f32 %v5870_v31, %v5616_v44 }
 0x3b0   : > { %v5234_v30 = vpop.f32.mrf.mxu1  ;;  %v5840_v49 = vrot.slane %v5839_v32, 1 }
 0x3b1   : > { %v5435_v16 = vmul.f32 %v9827_v57, %v5233_v58  ;;  %v5235_v22 = vadd.f32 %v5234_v30, %v5161_v12  ;;  %v5163_v5 = vpop.f32.mrf.mxu0  ;;  %v5632_v53 = vadd.f32 %v9852_v8, %v5420_v56  ;;  %v5859_v35 = vmax.f32 %v5858_v40, %v5631_v61 }
 0x3b2   : > { %v5236_v27 = vpop.f32.mrf.mxu1  ;;  %v5841_v62 = vmax.f32 %v5839_v32, %v5840_v49  ;;  %v5986_v58 = vrot.slane %v5978_v39, %v10084_v19 }
 0x3b3   : > { %v5647_v3 = vadd.f32 %v9836_v33, %v5435_v16  ;;  %v5436_v52 = vmul.f32 %v9844_v20, %v5235_v22  ;;  %v5237_v13 = vadd.f32 %v5236_v27, %v5163_v5  ;;  %v5165_v50 = vpop.f32.mrf.mxu0  ;;  %v5872_v15 = vmax.f32 %v5871_v26, %v5632_v53 }
 0x3b4   : > { %v5238_v11 = vpop.f32.mrf.mxu1 }
 0x3b5   : > { %v5648_v48 = vadd.f32 %v9852_v8, %v5436_v52  ;;  %v5451_v59 = vmul.f32 %v9827_v57, %v5237_v13  ;;  %v5239_v46 = vadd.f32 %v5238_v11, %v5165_v50  ;;  %v5860_v45 = vmax.f32 %v5859_v35, %v5647_v3 }
 0x3b6   : > { %v5853_v57 = vrot.slane %v5852_v23, 1 }
 0x3b7   : > { %v5663_v34 = vadd.f32 %v9836_v33, %v5451_v59  ;;  %v5452_v24 = vmul.f32 %v9844_v20, %v5239_v46  ;;  %v5873_v7 = vmax.f32 %v5872_v15, %v5648_v48 }
 0x3b8   : > { %v5854_v33 = vmax.f32 %v5852_v23, %v5853_v57 }
 0x3b9   : > { %v5861_v28 = vmax.f32 %v5860_v45, %v5663_v34  ;;  %v5664_v38 = vadd.f32 %v9852_v8, %v5452_v24 }
 0x3ba   : > { %v5948_v18 = vcombine.low %v5841_v62, %v5854_v33 }
 0x3bb   : > { %v5862_v43 = vrot.slane %v5861_v28, 4  ;;  %v5874_v55 = vmax.f32 %v5873_v7, %v5664_v38 }
 0x3bc   : > { %v5970_v4 = vrot.slane %v5948_v18, %v10084_v19 }
 0x3bd   : > { %v5863_v42 = vmax.f32 %v5861_v28, %v5862_v43  ;;  %v5875_v54 = vrot.slane %v5874_v55, 4 }
 0x3bf   : > { %v5864_v41 = vrot.slane %v5863_v42, 2  ;;  %v5876_v9 = vmax.f32 %v5874_v55, %v5875_v54 }
 0x3c1   : > { %v5865_v36 = vmax.f32 %v5863_v42, %v5864_v41  ;;  %v5877_v14 = vrot.slane %v5876_v9, 2 }
 0x3c3   : > { %v5866_v20 = vrot.slane %v5865_v36, 1  ;;  %v5878_v29 = vmax.f32 %v5876_v9, %v5877_v14 }
 0x3c5   : > { %v5879_v6 = vrot.slane %v5878_v29, 1  ;;  %v5867_v8 = vmax.f32 %v5865_v36, %v5866_v20 }
 0x3c7   : > { %v5880_v25 = vmax.f32 %v5878_v29, %v5879_v6 }
 0x3c9   : > { %v5949_v21 = vcombine.low %v5867_v8, %v5880_v25 }
 0x3cb   : > { %v5977_v51 = vrot.slane %v5949_v21, %v10084_v19 }
 0x3cd   : > { %v5979_v56 = vcombine.low %v5970_v4, %v5977_v51 }
 0x3cf   : > { %v5993_v12 = vrot.slane %v5979_v56, %v10084_v19 }
 0x3d1   : > { %v5994_v47 = vcombine.low %v5986_v58, %v5993_v12 }
 0x3d3   : > { %6000 = vst [vmem:[%s9660_s20 + $0x8] sm:$0xff] %v5994_v47 }
 0x3d4 PF: > { %s19_s29 = sadd.s32 1, %s6837_s29   ;;  %s10099_s27 = smov %s6833_s28 }
 0x3d5   : > { %p16_p5 = scmp.ge.s32.totalorder %s19_s29, 4   ;;  %s10100_s28 = smov %s10102_s30 }
 0x3d7   :  { %18 = sbr.rel (!%p16_p5) target bundleno = 2 (0x2), region = 97 }

</bundles_post_ra>
